<compile_context>
chip_gen: v5e
topology: v5e:2x2
jax: 0.10.0
libtpu: 0.0.40
codegen_flags: <defaults>
</compile_context>

<pallas_src>
import functools

import jax
import jax.numpy as jnp
from jax.experimental import pallas as pl
from jax.experimental.pallas import tpu as pltpu

_LANE = 128
_SUBLANE = 8


def _round_up(x, m):
    return ((x + m - 1) // m) * m


def _choose_tile(n, candidates):
    for t in candidates:
        if n % t == 0:
            return t
    return n


def _choose_time_chunk(t):
    """Time-chunk length and padded sequence length (padded steps are masked)."""
    for tc in (32, 16, 8):
        if t % tc == 0:
            return tc, t
    tc = 8
    return tc, _round_up(t, tc)


def _vmem_capacity_bytes():
    try:
        info = pltpu.get_tpu_info()
        cap = getattr(info, "vmem_capacity_bytes", None)
        if cap:
            return int(cap)
    except Exception:
        pass
    return 64 << 20  # conservative fallback: v7x per-TensorCore VMEM


def _vmem_limit_bytes(est_bytes, cap_bytes):
    hi = int(0.88 * cap_bytes)
    return int(min(max(int(est_bytes) + (8 << 20), 32 << 20), hi))


def _choose_batch_tile(bp, tc, din_max, hp, vmem_cap):
    """Largest batch tile whose double-buffered VMEM estimate fits; on v7x prefer
    exactly one tile per TensorCore so the 'parallel' batch axis uses both cores."""
    try:
        kind = jax.devices()[0].device_kind.lower()
    except Exception:
        kind = ""
    budget = int(0.45 * vmem_cap)

    def est(tb):
        return (2 * tb * tc * din_max * 2        # x chunk, double-buffered bf16
                + 2 * tb * tc * hp * 2           # out chunk, double-buffered bf16
                + (din_max + hp) * 4 * hp * 2    # wx + wh resident (single-buffered)
                + 4 * hp * 4                     # bias
                + 8 * tb * hp * 4                # h0/c0 + h/c carries (double-buffered)
                + tb * tc * 4 * hp * 4           # x_proj scratch (f32)
                + tb * tc * hp * 4)              # h-sequence scratch (f32)

    tiles = [tb for tb in range(bp, 0, -8) if bp % tb == 0]
    if "v7" in kind and (bp // 2) in tiles:
        tiles = [bp // 2] + [t for t in tiles if t < bp // 2]
    for tb in tiles:
        if est(tb) <= budget:
            return tb
    return tiles[-1] if tiles else bp


# ----------------------------------------------------------------------------
# LSTM layer kernel.
# grid = (batch tiles ["parallel"], time chunks ["arbitrary"]).
# NOTE: time MUST remain the innermost grid axis -- the h/c carry lives in the
# resident output refs (constant block index along time), so swapping the grid
# axes would break the recurrence.
# ----------------------------------------------------------------------------
def _lstm_layer_kernel(x_ref, wx_ref, wh_ref, b_ref, h0_ref, c0_ref,
                       out_ref, h_ref, c_ref, xproj_ref, hseq_ref, *, seq_len):
    tb, tc, din_p = x_ref.shape
    hp = h_ref.shape[-1]

    @pl.when(pl.program_id(1) == 0)          # first time-chunk of this batch tile
    def _():
        h_ref[...] = h0_ref[...]
        c_ref[...] = c0_ref[...]

    # Whole-chunk input projection: ONE large-M MXU matmul (M = tb*tc), bias
    # folded in here so the serial per-step path carries no broadcast/add for it.
    x2d = x_ref[...].reshape(tb * tc, din_p)                               # bf16
    xproj_ref[...] = (
        jnp.dot(x2d, wx_ref[...], preferred_element_type=jnp.float32)
        + b_ref[...]).reshape(tb, tc, 4 * hp)                              # f32

    wh = wh_ref[...]                          # (hp, 4hp) bf16, resident
    h = h_ref[...]                            # (tb, hp) f32 carry
    c = c_ref[...]                            # (tb, hp) f32 carry
    masked = (seq_len % tc) != 0              # static: only true if T was padded
    t_base = pl.program_id(1) * tc

    for tt in range(tc):                      # static unroll over the time chunk
        gates = xproj_ref[:, tt, :] + jnp.dot(
            h.astype(jnp.bfloat16), wh, preferred_element_type=jnp.float32)
        i_g = jax.nn.sigmoid(gates[:, 0 * hp:1 * hp])
        f_g = jax.nn.sigmoid(gates[:, 1 * hp:2 * hp])
        g_g = jnp.tanh(gates[:, 2 * hp:3 * hp])
        o_g = jax.nn.sigmoid(gates[:, 3 * hp:4 * hp])
        c_new = f_g * c + i_g * g_g
        h_new = o_g * jnp.tanh(c_new)
        if masked:
            valid = (t_base + tt) < seq_len   # padded steps do not update the carry
            c = jnp.where(valid, c_new, c)
            h = jnp.where(valid, h_new, h)
        else:
            c, h = c_new, h_new
        hseq_ref[:, tt, :] = h                # per-step f32 row store (no stack)

    out_ref[...] = hseq_ref[...].astype(out_ref.dtype)   # one lane-dense store
    h_ref[...] = h
    c_ref[...] = c


def lstm_layer(x, wx, wh, b, h0, c0, *, tb, tc, seq_len, vmem_cap):
    """x: (Bp, Tp, Din_p) bf16; wx: (Din_p, 4Hp) bf16; wh: (Hp, 4Hp) bf16;
    b: (1, 4Hp) f32; h0/c0: (Bp, Hp) f32.
    Returns (out (Bp, Tp, Hp) bf16, hT (Bp, Hp) f32, cT (Bp, Hp) f32)."""
    bp, t_pad, din_p = x.shape
    hp = h0.shape[-1]
    nb, nt = bp // tb, t_pad // tc

    est = (2 * tb * tc * din_p * 2            # x chunk (bf16, double-buffered)
           + din_p * 4 * hp * 2               # wx (bf16, single-buffered)
           + hp * 4 * hp * 2                  # wh (bf16, single-buffered)
           + 4 * hp * 4                       # bias (single-buffered)
           + 2 * 2 * tb * hp * 4              # h0, c0 (double-buffered)
           + 2 * tb * tc * hp * 2             # out chunk (bf16, double-buffered)
           + 2 * 2 * tb * hp * 4              # h, c carry outputs (double-buffered)
           + tb * tc * 4 * hp * 4             # x_proj scratch (f32)
           + tb * tc * hp * 4)                # h-sequence scratch (f32)
    # TODO(synk): for very large H (packed weights alone > ~0.45*VMEM, e.g. H>=2048
    # on v7x) tile the 4H gate dimension over an extra "arbitrary" grid axis.

    grid_spec = pltpu.PrefetchScalarGridSpec(
        num_scalar_prefetch=0,
        grid=(nb, nt),                        # time is the INNER axis (h/c carry)
        in_specs=[
            pl.BlockSpec((tb, tc, din_p), lambda bb, s: (bb, s, 0)),
            pl.BlockSpec((din_p, 4 * hp), lambda bb, s: (0, 0),
                         pipeline_mode=pl.Buffered(1)),
            pl.BlockSpec((hp, 4 * hp), lambda bb, s: (0, 0),
                         pipeline_mode=pl.Buffered(1)),
            pl.BlockSpec((1, 4 * hp), lambda bb, s: (0, 0),
                         pipeline_mode=pl.Buffered(1)),
            pl.BlockSpec((tb, hp), lambda bb, s: (bb, 0)),
            pl.BlockSpec((tb, hp), lambda bb, s: (bb, 0)),
        ],
        out_specs=(
            pl.BlockSpec((tb, tc, hp), lambda bb, s: (bb, s, 0)),
            pl.BlockSpec((tb, hp), lambda bb, s: (bb, 0)),   # h carry / final state
            pl.BlockSpec((tb, hp), lambda bb, s: (bb, 0)),   # c carry / final state
        ),
        scratch_shapes=[
            pltpu.VMEM((tb, tc, 4 * hp), jnp.float32),       # x_proj
            pltpu.VMEM((tb, tc, hp), jnp.float32),           # per-step h sequence
        ],
    )
    out_shapes = (
        jax.ShapeDtypeStruct((bp, t_pad, hp), jnp.bfloat16),
        jax.ShapeDtypeStruct((bp, hp), jnp.float32),
        jax.ShapeDtypeStruct((bp, hp), jnp.float32),
    )
    return pl.pallas_call(
        functools.partial(_lstm_layer_kernel, seq_len=seq_len),
        out_shape=out_shapes,
        grid_spec=grid_spec,
        compiler_params=pltpu.CompilerParams(
            dimension_semantics=("parallel", "arbitrary"),
            vmem_limit_bytes=_vmem_limit_bytes(est, vmem_cap)),
    )(x, wx, wh, b, h0, c0)


# ----------------------------------------------------------------------------
# Final projection: logits = x @ W + b with W pre-transposed to (Hp, Vp).
# Resident-activation path (weight streamed exactly once) when it fits VMEM,
# otherwise a 2-D grid with vocab as the outer axis so W is still streamed once.
# ----------------------------------------------------------------------------
def _fc_kernel(x_ref, w_ref, b_ref, o_ref):
    o_ref[...] = (
        jnp.dot(x_ref[...], w_ref[...], preferred_element_type=jnp.float32)
        + b_ref[...])


def fc(x2d, w_t, b2d, *, vmem_cap):
    n, hp = x2d.shape
    vp = w_t.shape[1]
    budget = int(0.45 * vmem_cap)
    tv = _choose_tile(vp, (512, 256, 128))

    resident_est = (n * hp * 2               # activations (bf16, single-buffered)
                    + 2 * hp * tv * 2        # weight tile (double-buffered)
                    + 2 * tv * 4             # bias tile
                    + 2 * n * tv * 4)        # output tile (double-buffered)
    if resident_est <= budget:
        est = resident_est
        grid_spec = pltpu.PrefetchScalarGridSpec(
            num_scalar_prefetch=0,
            grid=(vp // tv,),
            in_specs=[
                pl.BlockSpec((n, hp), lambda j: (0, 0),
                             pipeline_mode=pl.Buffered(1)),
                pl.BlockSpec((hp, tv), lambda j: (0, j)),
                pl.BlockSpec((1, tv), lambda j: (0, j)),
            ],
            out_specs=pl.BlockSpec((n, tv), lambda j: (0, j)),
        )
        sem = ("parallel",)
    else:
        tn = 8
        for cand in (4096, 2048, 1024, 512, 256, 128, 64, 32, 16, 8):
            if n % cand == 0:
                e = (2 * cand * hp * 2 + 2 * hp * tv * 2 + 2 * tv * 4
                     + 2 * cand * tv * 4)
                if e <= budget:
                    tn = cand
                    break
        est = 2 * tn * hp * 2 + 2 * hp * tv * 2 + 2 * tv * 4 + 2 * tn * tv * 4
        # vocab outer, rows inner: the big (Hp, Vp) weight is streamed once; the
        # smaller (tn, Hp) activation tiles are the ones re-streamed per vocab tile.
        grid_spec = pltpu.PrefetchScalarGridSpec(
            num_scalar_prefetch=0,
            grid=(vp // tv, n // tn),
            in_specs=[
                pl.BlockSpec((tn, hp), lambda j, i: (i, 0)),
                pl.BlockSpec((hp, tv), lambda j, i: (0, j)),
                pl.BlockSpec((1, tv), lambda j, i: (0, j)),
            ],
            out_specs=pl.BlockSpec((tn, tv), lambda j, i: (i, j)),
        )
        sem = ("parallel", "parallel")

    return pl.pallas_call(
        _fc_kernel,
        out_shape=jax.ShapeDtypeStruct((n, vp), jnp.float32),
        grid_spec=grid_spec,
        compiler_params=pltpu.CompilerParams(
            dimension_semantics=sem,
            vmem_limit_bytes=_vmem_limit_bytes(est, vmem_cap)),
    )(x2d, w_t, b2d)


# ----------------------------------------------------------------------------
# One-time parameter packing (runs OUTSIDE the jitted forward).
# ----------------------------------------------------------------------------
def _pack_lstm_weights(w_ih, w_hh, b_ih, b_hh, din_p, hp):
    """PyTorch-layout LSTM weights -> pre-transposed, lane-padded bf16 matrices
    wx: (din_p, 4*hp), wh: (hp, 4*hp) (gate order i,f,g,o preserved per padded
    gate block) plus a (1, 4*hp) f32 bias.  Padded rows/cols are zero, so padded
    hidden units stay exactly 0 and never influence real units."""
    four_h, din = w_ih.shape
    h = four_h // 4
    wi = jnp.pad(w_ih.reshape(4, h, din), ((0, 0), (0, hp - h), (0, din_p - din)))
    whh = jnp.pad(w_hh.reshape(4, h, h), ((0, 0), (0, hp - h), (0, hp - h)))
    wx_t = jnp.transpose(wi, (2, 0, 1)).reshape(din_p, 4 * hp).astype(jnp.bfloat16)
    wh_t = jnp.transpose(whh, (2, 0, 1)).reshape(hp, 4 * hp).astype(jnp.bfloat16)
    bias = jnp.pad((b_ih + b_hh).reshape(4, h), ((0, 0), (0, hp - h)))
    return wx_t, wh_t, bias.reshape(1, 4 * hp).astype(jnp.float32)


def prepare_params(params):
    """Pack / pad / pre-transpose all parameters once.  Returns (packed, dims)."""
    vocab, embed = params["embedding"].shape
    hidden = params["lstm"][0]["w_hh"].shape[1]
    num_layers = len(params["lstm"])
    ep = _round_up(embed, _LANE)
    hp = _round_up(hidden, _LANE)
    vp = _round_up(vocab, _LANE)

    packed = {
        # Pre-padded + pre-cast bf16 table so the gather lands directly in bf16.
        "embedding": jnp.pad(params["embedding"],
                             ((0, 0), (0, ep - embed))).astype(jnp.bfloat16),
        "fc_w": jnp.pad(params["fc_w"].T,
                        ((0, hp - hidden), (0, vp - vocab))).astype(jnp.bfloat16),
        "fc_b": jnp.pad(params["fc_b"], (0, vp - vocab)
                        ).reshape(1, vp).astype(jnp.float32),
        "lstm": [],
    }
    for layer in range(num_layers):
        p = params["lstm"][layer]
        din_p = ep if layer == 0 else hp
        wx, wh, b = _pack_lstm_weights(p["w_ih"], p["w_hh"],
                                       p["b_ih"], p["b_hh"], din_p, hp)
        packed["lstm"].append({"wx": wx, "wh": wh, "b": b})
    dims = (vocab, embed, hidden, num_layers)
    return packed, dims


# ----------------------------------------------------------------------------
# Model wrapper (mirrors RNNLanguageModel.forward)
# ----------------------------------------------------------------------------
def init_params(key, vocab_size, embed_size, hidden_size, num_layers):
    keys = jax.random.split(key, 3 + 4 * num_layers)
    params = {
        "embedding": jax.random.normal(keys[0], (vocab_size, embed_size),
                                       jnp.float32) * 0.1,
        "fc_w": jax.random.normal(keys[1], (vocab_size, hidden_size),
                                  jnp.float32) * 0.1,
        "fc_b": jax.random.normal(keys[2], (vocab_size,), jnp.float32) * 0.1,
        "lstm": [],
    }
    for layer in range(num_layers):
        in_dim = embed_size if layer == 0 else hidden_size
        k = keys[3 + 4 * layer: 3 + 4 * (layer + 1)]
        params["lstm"].append({
            "w_ih": jax.random.normal(k[0], (4 * hidden_size, in_dim), jnp.float32) * 0.1,
            "w_hh": jax.random.normal(k[1], (4 * hidden_size, hidden_size), jnp.float32) * 0.1,
            "b_ih": jax.random.normal(k[2], (4 * hidden_size,), jnp.float32) * 0.1,
            "b_hh": jax.random.normal(k[3], (4 * hidden_size,), jnp.float32) * 0.1,
        })
    return params


def init_state(num_layers, batch_size, hidden_size):
    z = jnp.zeros((num_layers, batch_size, hidden_size), jnp.float32)
    return (z, z)


@functools.partial(jax.jit, static_argnames=("dims",))
def rnn_language_model_forward(packed, x, prev_state, *, dims):
    """packed: output of prepare_params; x: (B, T) int32; prev_state: (h0, c0)
    each (L, B, H).  Returns (logits (B, T, V) f32, (h_n, c_n) each (L, B, H))."""
    vocab, embed, hidden, num_layers = dims
    h0_all, c0_all = prev_state
    batch, seq_len = x.shape
    ep = packed["embedding"].shape[1]
    hp, vp = packed["fc_w"].shape

    bp = _round_up(batch, _SUBLANE)
    tc, t_pad = _choose_time_chunk(seq_len)
    cap = _vmem_capacity_bytes()
    tb = _choose_batch_tile(bp, tc, max(ep, hp), hp, cap)

    # Embedding gather (plain JAX) straight into bf16; single pad afterwards.
    # TODO(synk): fuse the gather into the first LSTM layer via scalar-prefetched
    # token ids + pl.Element row gather to avoid materializing (B, T, E) in HBM.
    seq = jnp.take(packed["embedding"], x, axis=0)                 # (B, T, Ep) bf16
    seq = jnp.pad(seq, ((0, bp - batch), (0, t_pad - seq_len), (0, 0)))

    h0p = jnp.pad(h0_all.astype(jnp.float32),
                  ((0, 0), (0, bp - batch), (0, hp - hidden)))
    c0p = jnp.pad(c0_all.astype(jnp.float32),
                  ((0, 0), (0, bp - batch), (0, hp - hidden)))

    h_fin, c_fin = [], []
    for layer in range(num_layers):
        lp = packed["lstm"][layer]
        seq, h_t, c_t = lstm_layer(seq, lp["wx"], lp["wh"], lp["b"],
                                   h0p[layer], c0p[layer],
                                   tb=tb, tc=tc, seq_len=seq_len, vmem_cap=cap)
        h_fin.append(h_t[:batch, :hidden])
        c_fin.append(c_t[:batch, :hidden])

    n = bp * t_pad
    logits = fc(seq.reshape(n, hp), packed["fc_w"], packed["fc_b"], vmem_cap=cap)
    logits = logits.reshape(bp, t_pad, vp)[:batch, :seq_len, :vocab]

    state = (jnp.stack(h_fin, axis=0), jnp.stack(c_fin, axis=0))
    return logits, state


# Pure-JAX f32 reference (loose sanity check vs. bf16 kernels).
def _reference_forward(params, x, prev_state):
    h_all, c_all = prev_state
    num_layers = len(params["lstm"])
    hidden = params["lstm"][0]["w_hh"].shape[1]
    seq = params["embedding"][x]
    h_fin, c_fin = [], []
    for layer in range(num_layers):
        p = params["lstm"][layer]
        bias = p["b_ih"] + p["b_hh"]
        h, c = h_all[layer], c_all[layer]
        outs = []
        for t in range(seq.shape[1]):
            gates = seq[:, t, :] @ p["w_ih"].T + h @ p["w_hh"].T + bias
            i = jax.nn.sigmoid(gates[:, :hidden])
            f = jax.nn.sigmoid(gates[:, hidden:2 * hidden])
            g = jnp.tanh(gates[:, 2 * hidden:3 * hidden])
            o = jax.nn.sigmoid(gates[:, 3 * hidden:])
            c = f * c + i * g
            h = o * jnp.tanh(c)
            outs.append(h)
        seq = jnp.stack(outs, axis=1)
        h_fin.append(h)
        c_fin.append(c)
    logits = seq @ params["fc_w"].T + params["fc_b"]
    return logits, (jnp.stack(h_fin), jnp.stack(c_fin))


if __name__ == "__main__":
    vocab_size, embed_size, hidden_size, num_layers = 32, 16, 32, 2
    batch, seq_len = 2, 8

    key = jax.random.PRNGKey(0)
    pkey, xkey = jax.random.split(key)
    params = init_params(pkey, vocab_size, embed_size, hidden_size, num_layers)
    packed, dims = prepare_params(params)   # one-time packing, outside the jit

    x = jax.random.randint(xkey, (batch, seq_len), 0, vocab_size, jnp.int32)
    prev_state = init_state(num_layers, batch, hidden_size)

    logits, (h_n, c_n) = rnn_language_model_forward(packed, x, prev_state, dims=dims)
    jax.block_until_ready((logits, h_n, c_n))

    assert logits.shape == (batch, seq_len, vocab_size)
    assert h_n.shape == (num_layers, batch, hidden_size)
    assert c_n.shape == (num_layers, batch, hidden_size)

    # Sanity check vs pure-JAX f32 reference (loose tolerance covers bf16 matmuls).
    ref_logits, (ref_h, ref_c) = _reference_forward(params, x, prev_state)
    assert float(jnp.max(jnp.abs(logits - ref_logits))) < 1e-1
    assert float(jnp.max(jnp.abs(h_n - ref_h))) < 1e-1
    assert float(jnp.max(jnp.abs(c_n - ref_c))) < 1e-1

    print("KERNEL_OK")
</pallas_src>

<mosaic_0001>
module attributes {stable_mosaic.version = 11 : i64} {
  func.func @_fc_kernel(%arg0: i32, %arg1: memref<64x128xbf16, #tpu.memory_space<vmem>>, %arg2: memref<128x128xbf16, #tpu.memory_space<vmem>>, %arg3: memref<1x128xf32, #tpu.memory_space<vmem>>, %arg4: memref<64x128xf32, #tpu.memory_space<vmem>>) attributes {dimension_semantics = [#tpu.dimension_semantics<parallel>], iteration_bounds = array<i64: 1>, scalar_prefetch = 0 : i64, scratch_operands = 0 : i64, tpu.core_type = #tpu.core_type<tc>, window_params = [{pipeline_mode = #tpu.pipeline_mode<synchronous>, transform_indices = @transform_0, window_bounds = array<i64: 64, 128>}, {transform_indices = @transform_1, window_bounds = array<i64: 128, 128>}, {transform_indices = @transform_2, window_bounds = array<i64: 1, 128>}, {transform_indices = @transform_3, window_bounds = array<i64: 64, 128>}]} {
    %c0 = arith.constant 0 : index
    %c0_0 = arith.constant 0 : index
    %0 = vector.load %arg1[%c0, %c0_0] : memref<64x128xbf16, #tpu.memory_space<vmem>>, vector<64x128xbf16>
    %c0_1 = arith.constant 0 : index
    %c0_2 = arith.constant 0 : index
    %1 = vector.load %arg2[%c0_1, %c0_2] : memref<128x128xbf16, #tpu.memory_space<vmem>>, vector<128x128xbf16>
    %cst = arith.constant dense<0.000000e+00> : vector<64x128xf32>
    %2 = tpu.matmul %0, %1, %cst {dimension_numbers = #tpu.dot_dimension_numbers<[1], [0], [0], [1], [0, 0, 1, 1], [], []>} : vector<64x128xbf16>, vector<128x128xbf16>, vector<64x128xf32> -> vector<64x128xf32>
    %c0_3 = arith.constant 0 : index
    %c0_4 = arith.constant 0 : index
    %3 = vector.load %arg3[%c0_3, %c0_4] : memref<1x128xf32, #tpu.memory_space<vmem>>, vector<1x128xf32>
    %4 = vector.broadcast %3 : vector<1x128xf32> to vector<64x128xf32>
    %5 = arith.addf %2, %4 : vector<64x128xf32>
    %c0_5 = arith.constant 0 : index
    %c0_6 = arith.constant 0 : index
    %6 = vector.load %arg4[%c0_5, %c0_6] : memref<64x128xf32, #tpu.memory_space<vmem>>, vector<64x128xf32>
    tpu.vector_store %arg4[%c0_5, %c0_6], %5 {strides = array<i32>} : memref<64x128xf32, #tpu.memory_space<vmem>>, vector<64x128xf32>,
    return
  }
  func.func @transform_0(%arg0: i32) -> (i32, i32) {
    %c0_i32 = arith.constant 0 : i32
    %c0_i32_0 = arith.constant 0 : i32
    %c0_i32_1 = arith.constant 0 : i32
    return %c0_i32, %c0_i32_0 : i32, i32
  }
  func.func @transform_1(%arg0: i32) -> (i32, i32) {
    %c0_i32 = arith.constant 0 : i32
    %c0_i32_0 = arith.constant 0 : i32
    return %c0_i32, %arg0 : i32, i32
  }
  func.func @transform_2(%arg0: i32) -> (i32, i32) {
    %c0_i32 = arith.constant 0 : i32
    %c0_i32_0 = arith.constant 0 : i32
    return %c0_i32, %arg0 : i32, i32
  }
  func.func @transform_3(%arg0: i32) -> (i32, i32) {
    %c0_i32 = arith.constant 0 : i32
    %c0_i32_0 = arith.constant 0 : i32
    return %c0_i32, %arg0 : i32, i32
  }
}

module attributes {stable_mosaic.version = 11 : i64} {
  func.func @_lstm_layer_kernel(%arg0: i32, %arg1: i32, %arg2: memref<8x8x128xbf16, #tpu.memory_space<vmem>>, %arg3: memref<128x512xbf16, #tpu.memory_space<vmem>>, %arg4: memref<128x512xbf16, #tpu.memory_space<vmem>>, %arg5: memref<1x512xf32, #tpu.memory_space<vmem>>, %arg6: memref<8x128xf32, #tpu.memory_space<vmem>>, %arg7: memref<8x128xf32, #tpu.memory_space<vmem>>, %arg8: memref<8x8x128xbf16, #tpu.memory_space<vmem>>, %arg9: memref<8x128xf32, #tpu.memory_space<vmem>>, %arg10: memref<8x128xf32, #tpu.memory_space<vmem>>, %arg11: memref<8x8x512xf32, #tpu.memory_space<vmem>>, %arg12: memref<8x8x128xf32, #tpu.memory_space<vmem>>) attributes {dimension_semantics = [#tpu.dimension_semantics<parallel>, #tpu.dimension_semantics<arbitrary>], iteration_bounds = array<i64: 1, 1>, scalar_prefetch = 0 : i64, scratch_operands = 2 : i64, tpu.core_type = #tpu.core_type<tc>, window_params = [{transform_indices = @transform_0, window_bounds = array<i64: 8, 8, 128>}, {pipeline_mode = #tpu.pipeline_mode<synchronous>, transform_indices = @transform_1, window_bounds = array<i64: 128, 512>}, {pipeline_mode = #tpu.pipeline_mode<synchronous>, transform_indices = @transform_2, window_bounds = array<i64: 128, 512>}, {pipeline_mode = #tpu.pipeline_mode<synchronous>, transform_indices = @transform_3, window_bounds = array<i64: 1, 512>}, {transform_indices = @transform_4, window_bounds = array<i64: 8, 128>}, {transform_indices = @transform_5, window_bounds = array<i64: 8, 128>}, {transform_indices = @transform_6, window_bounds = array<i64: 8, 8, 128>}, {transform_indices = @transform_7, window_bounds = array<i64: 8, 128>}, {transform_indices = @transform_8, window_bounds = array<i64: 8, 128>}]} {
    %c0_i32 = arith.constant 0 : i32
    %0 = arith.cmpi eq, %arg1, %c0_i32 : i32
    %1 = arith.extui %0 : i1 to i32
    %c0_i32_0 = arith.constant 0 : i32
    %2 = arith.cmpi ne, %1, %c0_i32_0 : i32
    scf.if %2 {
      %c0_99 = arith.constant 0 : index
      %c0_100 = arith.constant 0 : index
      %284 = vector.load %arg6[%c0_99, %c0_100] : memref<8x128xf32, #tpu.memory_space<vmem>>, vector<8x128xf32>
      %c0_101 = arith.constant 0 : index
      %c0_102 = arith.constant 0 : index
      %285 = vector.load %arg9[%c0_101, %c0_102] : memref<8x128xf32, #tpu.memory_space<vmem>>, vector<8x128xf32>
      tpu.vector_store %arg9[%c0_101, %c0_102], %284 {strides = array<i32>} : memref<8x128xf32, #tpu.memory_space<vmem>>, vector<8x128xf32>,
      %c0_103 = arith.constant 0 : index
      %c0_104 = arith.constant 0 : index
      %286 = vector.load %arg7[%c0_103, %c0_104] : memref<8x128xf32, #tpu.memory_space<vmem>>, vector<8x128xf32>
      %c0_105 = arith.constant 0 : index
      %c0_106 = arith.constant 0 : index
      %287 = vector.load %arg10[%c0_105, %c0_106] : memref<8x128xf32, #tpu.memory_space<vmem>>, vector<8x128xf32>
      tpu.vector_store %arg10[%c0_105, %c0_106], %286 {strides = array<i32>} : memref<8x128xf32, #tpu.memory_space<vmem>>, vector<8x128xf32>,
    } else {
    }
    %c0 = arith.constant 0 : index
    %c0_1 = arith.constant 0 : index
    %c0_2 = arith.constant 0 : index
    %3 = vector.load %arg2[%c0, %c0_1, %c0_2] : memref<8x8x128xbf16, #tpu.memory_space<vmem>>, vector<8x8x128xbf16>
    %4 = vector.shape_cast %3 : vector<8x8x128xbf16> to vector<64x128xbf16>
    %c0_3 = arith.constant 0 : index
    %c0_4 = arith.constant 0 : index
    %5 = vector.load %arg3[%c0_3, %c0_4] : memref<128x512xbf16, #tpu.memory_space<vmem>>, vector<128x512xbf16>
    %cst = arith.constant dense<0.000000e+00> : vector<64x512xf32>
    %6 = tpu.matmul %4, %5, %cst {dimension_numbers = #tpu.dot_dimension_numbers<[1], [0], [0], [1], [0, 0, 1, 1], [], []>} : vector<64x128xbf16>, vector<128x512xbf16>, vector<64x512xf32> -> vector<64x512xf32>
    %c0_5 = arith.constant 0 : index
    %c0_6 = arith.constant 0 : index
    %7 = vector.load %arg5[%c0_5, %c0_6] : memref<1x512xf32, #tpu.memory_space<vmem>>, vector<1x512xf32>
    %8 = vector.broadcast %7 : vector<1x512xf32> to vector<64x512xf32>
    %9 = arith.addf %6, %8 : vector<64x512xf32>
    %10 = vector.shape_cast %9 : vector<64x512xf32> to vector<8x8x512xf32>
    %c0_7 = arith.constant 0 : index
    %c0_8 = arith.constant 0 : index
    %c0_9 = arith.constant 0 : index
    %11 = vector.load %arg11[%c0_7, %c0_8, %c0_9] : memref<8x8x512xf32, #tpu.memory_space<vmem>>, vector<8x8x512xf32>
    tpu.vector_store %arg11[%c0_7, %c0_8, %c0_9], %10 {strides = array<i32>} : memref<8x8x512xf32, #tpu.memory_space<vmem>>, vector<8x8x512xf32>,
    %c0_10 = arith.constant 0 : index
    %c0_11 = arith.constant 0 : index
    %12 = vector.load %arg4[%c0_10, %c0_11] : memref<128x512xbf16, #tpu.memory_space<vmem>>, vector<128x512xbf16>
    %c0_12 = arith.constant 0 : index
    %c0_13 = arith.constant 0 : index
    %13 = vector.load %arg9[%c0_12, %c0_13] : memref<8x128xf32, #tpu.memory_space<vmem>>, vector<8x128xf32>
    %c0_14 = arith.constant 0 : index
    %c0_15 = arith.constant 0 : index
    %14 = vector.load %arg10[%c0_14, %c0_15] : memref<8x128xf32, #tpu.memory_space<vmem>>, vector<8x128xf32>
    %c0_16 = arith.constant 0 : index
    %c0_17 = arith.constant 0 : index
    %c0_18 = arith.constant 0 : index
    %15 = vector.load %arg11[%c0_16, %c0_17, %c0_18] : memref<8x8x512xf32, #tpu.memory_space<vmem>>, vector<8x1x512xf32>
    %16 = vector.shape_cast %15 : vector<8x1x512xf32> to vector<8x512xf32>
    %17 = arith.truncf %13 : vector<8x128xf32> to vector<8x128xbf16>
    %cst_19 = arith.constant dense<0.000000e+00> : vector<8x512xf32>
    %18 = tpu.matmul %17, %12, %cst_19 {dimension_numbers = #tpu.dot_dimension_numbers<[1], [0], [0], [1], [0, 0, 1, 1], [], []>} : vector<8x128xbf16>, vector<128x512xbf16>, vector<8x512xf32> -> vector<8x512xf32>
    %19 = arith.addf %16, %18 : vector<8x512xf32>
    %20 = vector.extract_strided_slice %19 {offsets = [0, 0], sizes = [8, 128], strides = [1, 1]} : vector<8x512xf32> to vector<8x128xf32>
    %21 = arith.negf %20 : vector<8x128xf32>
    %22 = math.exp %21 : vector<8x128xf32>
    %cst_20 = arith.constant 1.000000e+00 : f32
    %23 = vector.broadcast %cst_20 : f32 to vector<8x128xf32>
    %24 = arith.addf %23, %22 : vector<8x128xf32>
    %25 = arith.divf %23, %24 : vector<8x128xf32>
    %26 = vector.extract_strided_slice %19 {offsets = [0, 128], sizes = [8, 128], strides = [1, 1]} : vector<8x512xf32> to vector<8x128xf32>
    %27 = arith.negf %26 : vector<8x128xf32>
    %28 = math.exp %27 : vector<8x128xf32>
    %cst_21 = arith.constant 1.000000e+00 : f32
    %29 = vector.broadcast %cst_21 : f32 to vector<8x128xf32>
    %30 = arith.addf %29, %28 : vector<8x128xf32>
    %31 = arith.divf %29, %30 : vector<8x128xf32>
    %32 = vector.extract_strided_slice %19 {offsets = [0, 256], sizes = [8, 128], strides = [1, 1]} : vector<8x512xf32> to vector<8x128xf32>
    %33 = math.tanh %32 : vector<8x128xf32>
    %34 = vector.extract_strided_slice %19 {offsets = [0, 384], sizes = [8, 128], strides = [1, 1]} : vector<8x512xf32> to vector<8x128xf32>
    %35 = arith.negf %34 : vector<8x128xf32>
    %36 = math.exp %35 : vector<8x128xf32>
    %cst_22 = arith.constant 1.000000e+00 : f32
    %37 = vector.broadcast %cst_22 : f32 to vector<8x128xf32>
    %38 = arith.addf %37, %36 : vector<8x128xf32>
    %39 = arith.divf %37, %38 : vector<8x128xf32>
    %40 = arith.mulf %31, %14 : vector<8x128xf32>
    %41 = arith.mulf %25, %33 : vector<8x128xf32>
    %42 = arith.addf %40, %41 : vector<8x128xf32>
    %43 = math.tanh %42 : vector<8x128xf32>
    %44 = arith.mulf %39, %43 : vector<8x128xf32>
    %c0_23 = arith.constant 0 : index
    %c0_24 = arith.constant 0 : index
    %c0_25 = arith.constant 0 : index
    %45 = vector.load %arg12[%c0_23, %c0_24, %c0_25] : memref<8x8x128xf32, #tpu.memory_space<vmem>>, vector<8x1x128xf32>
    %46 = vector.shape_cast %45 : vector<8x1x128xf32> to vector<8x128xf32>
    %47 = vector.shape_cast %44 : vector<8x128xf32> to vector<8x1x128xf32>
    tpu.vector_store %arg12[%c0_23, %c0_24, %c0_25], %47 {strides = array<i32>} : memref<8x8x128xf32, #tpu.memory_space<vmem>>, vector<8x1x128xf32>,
    %c0_26 = arith.constant 0 : index
    %c1 = arith.constant 1 : index
    %c0_27 = arith.constant 0 : index
    %48 = vector.load %arg11[%c0_26, %c1, %c0_27] : memref<8x8x512xf32, #tpu.memory_space<vmem>>, vector<8x1x512xf32>
    %49 = vector.shape_cast %48 : vector<8x1x512xf32> to vector<8x512xf32>
    %50 = arith.truncf %44 : vector<8x128xf32> to vector<8x128xbf16>
    %cst_28 = arith.constant dense<0.000000e+00> : vector<8x512xf32>
    %51 = tpu.matmul %50, %12, %cst_28 {dimension_numbers = #tpu.dot_dimension_numbers<[1], [0], [0], [1], [0, 0, 1, 1], [], []>} : vector<8x128xbf16>, vector<128x512xbf16>, vector<8x512xf32> -> vector<8x512xf32>
    %52 = arith.addf %49, %51 : vector<8x512xf32>
    %53 = vector.extract_strided_slice %52 {offsets = [0, 0], sizes = [8, 128], strides = [1, 1]} : vector<8x512xf32> to vector<8x128xf32>
    %54 = arith.negf %53 : vector<8x128xf32>
    %55 = math.exp %54 : vector<8x128xf32>
    %cst_29 = arith.constant 1.000000e+00 : f32
    %56 = vector.broadcast %cst_29 : f32 to vector<8x128xf32>
    %57 = arith.addf %56, %55 : vector<8x128xf32>
    %58 = arith.divf %56, %57 : vector<8x128xf32>
    %59 = vector.extract_strided_slice %52 {offsets = [0, 128], sizes = [8, 128], strides = [1, 1]} : vector<8x512xf32> to vector<8x128xf32>
    %60 = arith.negf %59 : vector<8x128xf32>
    %61 = math.exp %60 : vector<8x128xf32>
    %cst_30 = arith.constant 1.000000e+00 : f32
    %62 = vector.broadcast %cst_30 : f32 to vector<8x128xf32>
    %63 = arith.addf %62, %61 : vector<8x128xf32>
    %64 = arith.divf %62, %63 : vector<8x128xf32>
    %65 = vector.extract_strided_slice %52 {offsets = [0, 256], sizes = [8, 128], strides = [1, 1]} : vector<8x512xf32> to vector<8x128xf32>
    %66 = math.tanh %65 : vector<8x128xf32>
    %67 = vector.extract_strided_slice %52 {offsets = [0, 384], sizes = [8, 128], strides = [1, 1]} : vector<8x512xf32> to vector<8x128xf32>
    %68 = arith.negf %67 : vector<8x128xf32>
    %69 = math.exp %68 : vector<8x128xf32>
    %cst_31 = arith.constant 1.000000e+00 : f32
    %70 = vector.broadcast %cst_31 : f32 to vector<8x128xf32>
    %71 = arith.addf %70, %69 : vector<8x128xf32>
    %72 = arith.divf %70, %71 : vector<8x128xf32>
    %73 = arith.mulf %64, %42 : vector<8x128xf32>
    %74 = arith.mulf %58, %66 : vector<8x128xf32>
    %75 = arith.addf %73, %74 : vector<8x128xf32>
    %76 = math.tanh %75 : vector<8x128xf32>
    %77 = arith.mulf %72, %76 : vector<8x128xf32>
    %c0_32 = arith.constant 0 : index
    %c1_33 = arith.constant 1 : index
    %c0_34 = arith.constant 0 : index
    %78 = vector.load %arg12[%c0_32, %c1_33, %c0_34] : memref<8x8x128xf32, #tpu.memory_space<vmem>>, vector<8x1x128xf32>
    %79 = vector.shape_cast %78 : vector<8x1x128xf32> to vector<8x128xf32>
    %80 = vector.shape_cast %77 : vector<8x128xf32> to vector<8x1x128xf32>
    tpu.vector_store %arg12[%c0_32, %c1_33, %c0_34], %80 {strides = array<i32>} : memref<8x8x128xf32, #tpu.memory_space<vmem>>, vector<8x1x128xf32>,
    %c0_35 = arith.constant 0 : index
    %c2 = arith.constant 2 : index
    %c0_36 = arith.constant 0 : index
    %81 = vector.load %arg11[%c0_35, %c2, %c0_36] : memref<8x8x512xf32, #tpu.memory_space<vmem>>, vector<8x1x512xf32>
    %82 = vector.shape_cast %81 : vector<8x1x512xf32> to vector<8x512xf32>
    %83 = arith.truncf %77 : vector<8x128xf32> to vector<8x128xbf16>
    %cst_37 = arith.constant dense<0.000000e+00> : vector<8x512xf32>
    %84 = tpu.matmul %83, %12, %cst_37 {dimension_numbers = #tpu.dot_dimension_numbers<[1], [0], [0], [1], [0, 0, 1, 1], [], []>} : vector<8x128xbf16>, vector<128x512xbf16>, vector<8x512xf32> -> vector<8x512xf32>
    %85 = arith.addf %82, %84 : vector<8x512xf32>
    %86 = vector.extract_strided_slice %85 {offsets = [0, 0], sizes = [8, 128], strides = [1, 1]} : vector<8x512xf32> to vector<8x128xf32>
    %87 = arith.negf %86 : vector<8x128xf32>
    %88 = math.exp %87 : vector<8x128xf32>
    %cst_38 = arith.constant 1.000000e+00 : f32
    %89 = vector.broadcast %cst_38 : f32 to vector<8x128xf32>
    %90 = arith.addf %89, %88 : vector<8x128xf32>
    %91 = arith.divf %89, %90 : vector<8x128xf32>
    %92 = vector.extract_strided_slice %85 {offsets = [0, 128], sizes = [8, 128], strides = [1, 1]} : vector<8x512xf32> to vector<8x128xf32>
    %93 = arith.negf %92 : vector<8x128xf32>
    %94 = math.exp %93 : vector<8x128xf32>
    %cst_39 = arith.constant 1.000000e+00 : f32
    %95 = vector.broadcast %cst_39 : f32 to vector<8x128xf32>
    %96 = arith.addf %95, %94 : vector<8x128xf32>
    %97 = arith.divf %95, %96 : vector<8x128xf32>
    %98 = vector.extract_strided_slice %85 {offsets = [0, 256], sizes = [8, 128], strides = [1, 1]} : vector<8x512xf32> to vector<8x128xf32>
    %99 = math.tanh %98 : vector<8x128xf32>
    %100 = vector.extract_strided_slice %85 {offsets = [0, 384], sizes = [8, 128], strides = [1, 1]} : vector<8x512xf32> to vector<8x128xf32>
    %101 = arith.negf %100 : vector<8x128xf32>
    %102 = math.exp %101 : vector<8x128xf32>
    %cst_40 = arith.constant 1.000000e+00 : f32
    %103 = vector.broadcast %cst_40 : f32 to vector<8x128xf32>
    %104 = arith.addf %103, %102 : vector<8x128xf32>
    %105 = arith.divf %103, %104 : vector<8x128xf32>
    %106 = arith.mulf %97, %75 : vector<8x128xf32>
    %107 = arith.mulf %91, %99 : vector<8x128xf32>
    %108 = arith.addf %106, %107 : vector<8x128xf32>
    %109 = math.tanh %108 : vector<8x128xf32>
    %110 = arith.mulf %105, %109 : vector<8x128xf32>
    %c0_41 = arith.constant 0 : index
    %c2_42 = arith.constant 2 : index
    %c0_43 = arith.constant 0 : index
    %111 = vector.load %arg12[%c0_41, %c2_42, %c0_43] : memref<8x8x128xf32, #tpu.memory_space<vmem>>, vector<8x1x128xf32>
    %112 = vector.shape_cast %111 : vector<8x1x128xf32> to vector<8x128xf32>
    %113 = vector.shape_cast %110 : vector<8x128xf32> to vector<8x1x128xf32>
    tpu.vector_store %arg12[%c0_41, %c2_42, %c0_43], %113 {strides = array<i32>} : memref<8x8x128xf32, #tpu.memory_space<vmem>>, vector<8x1x128xf32>,
    %c0_44 = arith.constant 0 : index
    %c3 = arith.constant 3 : index
    %c0_45 = arith.constant 0 : index
    %114 = vector.load %arg11[%c0_44, %c3, %c0_45] : memref<8x8x512xf32, #tpu.memory_space<vmem>>, vector<8x1x512xf32>
    %115 = vector.shape_cast %114 : vector<8x1x512xf32> to vector<8x512xf32>
    %116 = arith.truncf %110 : vector<8x128xf32> to vector<8x128xbf16>
    %cst_46 = arith.constant dense<0.000000e+00> : vector<8x512xf32>
    %117 = tpu.matmul %116, %12, %cst_46 {dimension_numbers = #tpu.dot_dimension_numbers<[1], [0], [0], [1], [0, 0, 1, 1], [], []>} : vector<8x128xbf16>, vector<128x512xbf16>, vector<8x512xf32> -> vector<8x512xf32>
    %118 = arith.addf %115, %117 : vector<8x512xf32>
    %119 = vector.extract_strided_slice %118 {offsets = [0, 0], sizes = [8, 128], strides = [1, 1]} : vector<8x512xf32> to vector<8x128xf32>
    %120 = arith.negf %119 : vector<8x128xf32>
    %121 = math.exp %120 : vector<8x128xf32>
    %cst_47 = arith.constant 1.000000e+00 : f32
    %122 = vector.broadcast %cst_47 : f32 to vector<8x128xf32>
    %123 = arith.addf %122, %121 : vector<8x128xf32>
    %124 = arith.divf %122, %123 : vector<8x128xf32>
    %125 = vector.extract_strided_slice %118 {offsets = [0, 128], sizes = [8, 128], strides = [1, 1]} : vector<8x512xf32> to vector<8x128xf32>
    %126 = arith.negf %125 : vector<8x128xf32>
    %127 = math.exp %126 : vector<8x128xf32>
    %cst_48 = arith.constant 1.000000e+00 : f32
    %128 = vector.broadcast %cst_48 : f32 to vector<8x128xf32>
    %129 = arith.addf %128, %127 : vector<8x128xf32>
    %130 = arith.divf %128, %129 : vector<8x128xf32>
    %131 = vector.extract_strided_slice %118 {offsets = [0, 256], sizes = [8, 128], strides = [1, 1]} : vector<8x512xf32> to vector<8x128xf32>
    %132 = math.tanh %131 : vector<8x128xf32>
    %133 = vector.extract_strided_slice %118 {offsets = [0, 384], sizes = [8, 128], strides = [1, 1]} : vector<8x512xf32> to vector<8x128xf32>
    %134 = arith.negf %133 : vector<8x128xf32>
    %135 = math.exp %134 : vector<8x128xf32>
    %cst_49 = arith.constant 1.000000e+00 : f32
    %136 = vector.broadcast %cst_49 : f32 to vector<8x128xf32>
    %137 = arith.addf %136, %135 : vector<8x128xf32>
    %138 = arith.divf %136, %137 : vector<8x128xf32>
    %139 = arith.mulf %130, %108 : vector<8x128xf32>
    %140 = arith.mulf %124, %132 : vector<8x128xf32>
    %141 = arith.addf %139, %140 : vector<8x128xf32>
    %142 = math.tanh %141 : vector<8x128xf32>
    %143 = arith.mulf %138, %142 : vector<8x128xf32>
    %c0_50 = arith.constant 0 : index
    %c3_51 = arith.constant 3 : index
    %c0_52 = arith.constant 0 : index
    %144 = vector.load %arg12[%c0_50, %c3_51, %c0_52] : memref<8x8x128xf32, #tpu.memory_space<vmem>>, vector<8x1x128xf32>
    %145 = vector.shape_cast %144 : vector<8x1x128xf32> to vector<8x128xf32>
    %146 = vector.shape_cast %143 : vector<8x128xf32> to vector<8x1x128xf32>
    tpu.vector_store %arg12[%c0_50, %c3_51, %c0_52], %146 {strides = array<i32>} : memref<8x8x128xf32, #tpu.memory_space<vmem>>, vector<8x1x128xf32>,
    %c0_53 = arith.constant 0 : index
    %c4 = arith.constant 4 : index
    %c0_54 = arith.constant 0 : index
    %147 = vector.load %arg11[%c0_53, %c4, %c0_54] : memref<8x8x512xf32, #tpu.memory_space<vmem>>, vector<8x1x512xf32>
    %148 = vector.shape_cast %147 : vector<8x1x512xf32> to vector<8x512xf32>
    %149 = arith.truncf %143 : vector<8x128xf32> to vector<8x128xbf16>
    %cst_55 = arith.constant dense<0.000000e+00> : vector<8x512xf32>
    %150 = tpu.matmul %149, %12, %cst_55 {dimension_numbers = #tpu.dot_dimension_numbers<[1], [0], [0], [1], [0, 0, 1, 1], [], []>} : vector<8x128xbf16>, vector<128x512xbf16>, vector<8x512xf32> -> vector<8x512xf32>
    %151 = arith.addf %148, %150 : vector<8x512xf32>
    %152 = vector.extract_strided_slice %151 {offsets = [0, 0], sizes = [8, 128], strides = [1, 1]} : vector<8x512xf32> to vector<8x128xf32>
    %153 = arith.negf %152 : vector<8x128xf32>
    %154 = math.exp %153 : vector<8x128xf32>
    %cst_56 = arith.constant 1.000000e+00 : f32
    %155 = vector.broadcast %cst_56 : f32 to vector<8x128xf32>
    %156 = arith.addf %155, %154 : vector<8x128xf32>
    %157 = arith.divf %155, %156 : vector<8x128xf32>
    %158 = vector.extract_strided_slice %151 {offsets = [0, 128], sizes = [8, 128], strides = [1, 1]} : vector<8x512xf32> to vector<8x128xf32>
    %159 = arith.negf %158 : vector<8x128xf32>
    %160 = math.exp %159 : vector<8x128xf32>
    %cst_57 = arith.constant 1.000000e+00 : f32
    %161 = vector.broadcast %cst_57 : f32 to vector<8x128xf32>
    %162 = arith.addf %161, %160 : vector<8x128xf32>
    %163 = arith.divf %161, %162 : vector<8x128xf32>
    %164 = vector.extract_strided_slice %151 {offsets = [0, 256], sizes = [8, 128], strides = [1, 1]} : vector<8x512xf32> to vector<8x128xf32>
    %165 = math.tanh %164 : vector<8x128xf32>
    %166 = vector.extract_strided_slice %151 {offsets = [0, 384], sizes = [8, 128], strides = [1, 1]} : vector<8x512xf32> to vector<8x128xf32>
    %167 = arith.negf %166 : vector<8x128xf32>
    %168 = math.exp %167 : vector<8x128xf32>
    %cst_58 = arith.constant 1.000000e+00 : f32
    %169 = vector.broadcast %cst_58 : f32 to vector<8x128xf32>
    %170 = arith.addf %169, %168 : vector<8x128xf32>
    %171 = arith.divf %169, %170 : vector<8x128xf32>
    %172 = arith.mulf %163, %141 : vector<8x128xf32>
    %173 = arith.mulf %157, %165 : vector<8x128xf32>
    %174 = arith.addf %172, %173 : vector<8x128xf32>
    %175 = math.tanh %174 : vector<8x128xf32>
    %176 = arith.mulf %171, %175 : vector<8x128xf32>
    %c0_59 = arith.constant 0 : index
    %c4_60 = arith.constant 4 : index
    %c0_61 = arith.constant 0 : index
    %177 = vector.load %arg12[%c0_59, %c4_60, %c0_61] : memref<8x8x128xf32, #tpu.memory_space<vmem>>, vector<8x1x128xf32>
    %178 = vector.shape_cast %177 : vector<8x1x128xf32> to vector<8x128xf32>
    %179 = vector.shape_cast %176 : vector<8x128xf32> to vector<8x1x128xf32>
    tpu.vector_store %arg12[%c0_59, %c4_60, %c0_61], %179 {strides = array<i32>} : memref<8x8x128xf32, #tpu.memory_space<vmem>>, vector<8x1x128xf32>,
    %c0_62 = arith.constant 0 : index
    %c5 = arith.constant 5 : index
    %c0_63 = arith.constant 0 : index
    %180 = vector.load %arg11[%c0_62, %c5, %c0_63] : memref<8x8x512xf32, #tpu.memory_space<vmem>>, vector<8x1x512xf32>
    %181 = vector.shape_cast %180 : vector<8x1x512xf32> to vector<8x512xf32>
    %182 = arith.truncf %176 : vector<8x128xf32> to vector<8x128xbf16>
    %cst_64 = arith.constant dense<0.000000e+00> : vector<8x512xf32>
    %183 = tpu.matmul %182, %12, %cst_64 {dimension_numbers = #tpu.dot_dimension_numbers<[1], [0], [0], [1], [0, 0, 1, 1], [], []>} : vector<8x128xbf16>, vector<128x512xbf16>, vector<8x512xf32> -> vector<8x512xf32>
    %184 = arith.addf %181, %183 : vector<8x512xf32>
    %185 = vector.extract_strided_slice %184 {offsets = [0, 0], sizes = [8, 128], strides = [1, 1]} : vector<8x512xf32> to vector<8x128xf32>
    %186 = arith.negf %185 : vector<8x128xf32>
    %187 = math.exp %186 : vector<8x128xf32>
    %cst_65 = arith.constant 1.000000e+00 : f32
    %188 = vector.broadcast %cst_65 : f32 to vector<8x128xf32>
    %189 = arith.addf %188, %187 : vector<8x128xf32>
    %190 = arith.divf %188, %189 : vector<8x128xf32>
    %191 = vector.extract_strided_slice %184 {offsets = [0, 128], sizes = [8, 128], strides = [1, 1]} : vector<8x512xf32> to vector<8x128xf32>
    %192 = arith.negf %191 : vector<8x128xf32>
    %193 = math.exp %192 : vector<8x128xf32>
    %cst_66 = arith.constant 1.000000e+00 : f32
    %194 = vector.broadcast %cst_66 : f32 to vector<8x128xf32>
    %195 = arith.addf %194, %193 : vector<8x128xf32>
    %196 = arith.divf %194, %195 : vector<8x128xf32>
    %197 = vector.extract_strided_slice %184 {offsets = [0, 256], sizes = [8, 128], strides = [1, 1]} : vector<8x512xf32> to vector<8x128xf32>
    %198 = math.tanh %197 : vector<8x128xf32>
    %199 = vector.extract_strided_slice %184 {offsets = [0, 384], sizes = [8, 128], strides = [1, 1]} : vector<8x512xf32> to vector<8x128xf32>
    %200 = arith.negf %199 : vector<8x128xf32>
    %201 = math.exp %200 : vector<8x128xf32>
    %cst_67 = arith.constant 1.000000e+00 : f32
    %202 = vector.broadcast %cst_67 : f32 to vector<8x128xf32>
    %203 = arith.addf %202, %201 : vector<8x128xf32>
    %204 = arith.divf %202, %203 : vector<8x128xf32>
    %205 = arith.mulf %196, %174 : vector<8x128xf32>
    %206 = arith.mulf %190, %198 : vector<8x128xf32>
    %207 = arith.addf %205, %206 : vector<8x128xf32>
    %208 = math.tanh %207 : vector<8x128xf32>
    %209 = arith.mulf %204, %208 : vector<8x128xf32>
    %c0_68 = arith.constant 0 : index
    %c5_69 = arith.constant 5 : index
    %c0_70 = arith.constant 0 : index
    %210 = vector.load %arg12[%c0_68, %c5_69, %c0_70] : memref<8x8x128xf32, #tpu.memory_space<vmem>>, vector<8x1x128xf32>
    %211 = vector.shape_cast %210 : vector<8x1x128xf32> to vector<8x128xf32>
    %212 = vector.shape_cast %209 : vector<8x128xf32> to vector<8x1x128xf32>
    tpu.vector_store %arg12[%c0_68, %c5_69, %c0_70], %212 {strides = array<i32>} : memref<8x8x128xf32, #tpu.memory_space<vmem>>, vector<8x1x128xf32>,
    %c0_71 = arith.constant 0 : index
    %c6 = arith.constant 6 : index
    %c0_72 = arith.constant 0 : index
    %213 = vector.load %arg11[%c0_71, %c6, %c0_72] : memref<8x8x512xf32, #tpu.memory_space<vmem>>, vector<8x1x512xf32>
    %214 = vector.shape_cast %213 : vector<8x1x512xf32> to vector<8x512xf32>
    %215 = arith.truncf %209 : vector<8x128xf32> to vector<8x128xbf16>
    %cst_73 = arith.constant dense<0.000000e+00> : vector<8x512xf32>
    %216 = tpu.matmul %215, %12, %cst_73 {dimension_numbers = #tpu.dot_dimension_numbers<[1], [0], [0], [1], [0, 0, 1, 1], [], []>} : vector<8x128xbf16>, vector<128x512xbf16>, vector<8x512xf32> -> vector<8x512xf32>
    %217 = arith.addf %214, %216 : vector<8x512xf32>
    %218 = vector.extract_strided_slice %217 {offsets = [0, 0], sizes = [8, 128], strides = [1, 1]} : vector<8x512xf32> to vector<8x128xf32>
    %219 = arith.negf %218 : vector<8x128xf32>
    %220 = math.exp %219 : vector<8x128xf32>
    %cst_74 = arith.constant 1.000000e+00 : f32
    %221 = vector.broadcast %cst_74 : f32 to vector<8x128xf32>
    %222 = arith.addf %221, %220 : vector<8x128xf32>
    %223 = arith.divf %221, %222 : vector<8x128xf32>
    %224 = vector.extract_strided_slice %217 {offsets = [0, 128], sizes = [8, 128], strides = [1, 1]} : vector<8x512xf32> to vector<8x128xf32>
    %225 = arith.negf %224 : vector<8x128xf32>
    %226 = math.exp %225 : vector<8x128xf32>
    %cst_75 = arith.constant 1.000000e+00 : f32
    %227 = vector.broadcast %cst_75 : f32 to vector<8x128xf32>
    %228 = arith.addf %227, %226 : vector<8x128xf32>
    %229 = arith.divf %227, %228 : vector<8x128xf32>
    %230 = vector.extract_strided_slice %217 {offsets = [0, 256], sizes = [8, 128], strides = [1, 1]} : vector<8x512xf32> to vector<8x128xf32>
    %231 = math.tanh %230 : vector<8x128xf32>
    %232 = vector.extract_strided_slice %217 {offsets = [0, 384], sizes = [8, 128], strides = [1, 1]} : vector<8x512xf32> to vector<8x128xf32>
    %233 = arith.negf %232 : vector<8x128xf32>
    %234 = math.exp %233 : vector<8x128xf32>
    %cst_76 = arith.constant 1.000000e+00 : f32
    %235 = vector.broadcast %cst_76 : f32 to vector<8x128xf32>
    %236 = arith.addf %235, %234 : vector<8x128xf32>
    %237 = arith.divf %235, %236 : vector<8x128xf32>
    %238 = arith.mulf %229, %207 : vector<8x128xf32>
    %239 = arith.mulf %223, %231 : vector<8x128xf32>
    %240 = arith.addf %238, %239 : vector<8x128xf32>
    %241 = math.tanh %240 : vector<8x128xf32>
    %242 = arith.mulf %237, %241 : vector<8x128xf32>
    %c0_77 = arith.constant 0 : index
    %c6_78 = arith.constant 6 : index
    %c0_79 = arith.constant 0 : index
    %243 = vector.load %arg12[%c0_77, %c6_78, %c0_79] : memref<8x8x128xf32, #tpu.memory_space<vmem>>, vector<8x1x128xf32>
    %244 = vector.shape_cast %243 : vector<8x1x128xf32> to vector<8x128xf32>
    %245 = vector.shape_cast %242 : vector<8x128xf32> to vector<8x1x128xf32>
    tpu.vector_store %arg12[%c0_77, %c6_78, %c0_79], %245 {strides = array<i32>} : memref<8x8x128xf32, #tpu.memory_space<vmem>>, vector<8x1x128xf32>,
    %c0_80 = arith.constant 0 : index
    %c7 = arith.constant 7 : index
    %c0_81 = arith.constant 0 : index
    %246 = vector.load %arg11[%c0_80, %c7, %c0_81] : memref<8x8x512xf32, #tpu.memory_space<vmem>>, vector<8x1x512xf32>
    %247 = vector.shape_cast %246 : vector<8x1x512xf32> to vector<8x512xf32>
    %248 = arith.truncf %242 : vector<8x128xf32> to vector<8x128xbf16>
    %cst_82 = arith.constant dense<0.000000e+00> : vector<8x512xf32>
    %249 = tpu.matmul %248, %12, %cst_82 {dimension_numbers = #tpu.dot_dimension_numbers<[1], [0], [0], [1], [0, 0, 1, 1], [], []>} : vector<8x128xbf16>, vector<128x512xbf16>, vector<8x512xf32> -> vector<8x512xf32>
    %250 = arith.addf %247, %249 : vector<8x512xf32>
    %251 = vector.extract_strided_slice %250 {offsets = [0, 0], sizes = [8, 128], strides = [1, 1]} : vector<8x512xf32> to vector<8x128xf32>
    %252 = arith.negf %251 : vector<8x128xf32>
    %253 = math.exp %252 : vector<8x128xf32>
    %cst_83 = arith.constant 1.000000e+00 : f32
    %254 = vector.broadcast %cst_83 : f32 to vector<8x128xf32>
    %255 = arith.addf %254, %253 : vector<8x128xf32>
    %256 = arith.divf %254, %255 : vector<8x128xf32>
    %257 = vector.extract_strided_slice %250 {offsets = [0, 128], sizes = [8, 128], strides = [1, 1]} : vector<8x512xf32> to vector<8x128xf32>
    %258 = arith.negf %257 : vector<8x128xf32>
    %259 = math.exp %258 : vector<8x128xf32>
    %cst_84 = arith.constant 1.000000e+00 : f32
    %260 = vector.broadcast %cst_84 : f32 to vector<8x128xf32>
    %261 = arith.addf %260, %259 : vector<8x128xf32>
    %262 = arith.divf %260, %261 : vector<8x128xf32>
    %263 = vector.extract_strided_slice %250 {offsets = [0, 256], sizes = [8, 128], strides = [1, 1]} : vector<8x512xf32> to vector<8x128xf32>
    %264 = math.tanh %263 : vector<8x128xf32>
    %265 = vector.extract_strided_slice %250 {offsets = [0, 384], sizes = [8, 128], strides = [1, 1]} : vector<8x512xf32> to vector<8x128xf32>
    %266 = arith.negf %265 : vector<8x128xf32>
    %267 = math.exp %266 : vector<8x128xf32>
    %cst_85 = arith.constant 1.000000e+00 : f32
    %268 = vector.broadcast %cst_85 : f32 to vector<8x128xf32>
    %269 = arith.addf %268, %267 : vector<8x128xf32>
    %270 = arith.divf %268, %269 : vector<8x128xf32>
    %271 = arith.mulf %262, %240 : vector<8x128xf32>
    %272 = arith.mulf %256, %264 : vector<8x128xf32>
    %273 = arith.addf %271, %272 : vector<8x128xf32>
    %274 = math.tanh %273 : vector<8x128xf32>
    %275 = arith.mulf %270, %274 : vector<8x128xf32>
    %c0_86 = arith.constant 0 : index
    %c7_87 = arith.constant 7 : index
    %c0_88 = arith.constant 0 : index
    %276 = vector.load %arg12[%c0_86, %c7_87, %c0_88] : memref<8x8x128xf32, #tpu.memory_space<vmem>>, vector<8x1x128xf32>
    %277 = vector.shape_cast %276 : vector<8x1x128xf32> to vector<8x128xf32>
    %278 = vector.shape_cast %275 : vector<8x128xf32> to vector<8x1x128xf32>
    tpu.vector_store %arg12[%c0_86, %c7_87, %c0_88], %278 {strides = array<i32>} : memref<8x8x128xf32, #tpu.memory_space<vmem>>, vector<8x1x128xf32>,
    %c0_89 = arith.constant 0 : index
    %c0_90 = arith.constant 0 : index
    %c0_91 = arith.constant 0 : index
    %279 = vector.load %arg12[%c0_89, %c0_90, %c0_91] : memref<8x8x128xf32, #tpu.memory_space<vmem>>, vector<8x8x128xf32>
    %280 = arith.truncf %279 : vector<8x8x128xf32> to vector<8x8x128xbf16>
    %c0_92 = arith.constant 0 : index
    %c0_93 = arith.constant 0 : index
    %c0_94 = arith.constant 0 : index
    %281 = vector.load %arg8[%c0_92, %c0_93, %c0_94] : memref<8x8x128xbf16, #tpu.memory_space<vmem>>, vector<8x8x128xbf16>
    tpu.vector_store %arg8[%c0_92, %c0_93, %c0_94], %280 {strides = array<i32>} : memref<8x8x128xbf16, #tpu.memory_space<vmem>>, vector<8x8x128xbf16>,
    %c0_95 = arith.constant 0 : index
    %c0_96 = arith.constant 0 : index
    %282 = vector.load %arg9[%c0_95, %c0_96] : memref<8x128xf32, #tpu.memory_space<vmem>>, vector<8x128xf32>
    tpu.vector_store %arg9[%c0_95, %c0_96], %275 {strides = array<i32>} : memref<8x128xf32, #tpu.memory_space<vmem>>, vector<8x128xf32>,
    %c0_97 = arith.constant 0 : index
    %c0_98 = arith.constant 0 : index
    %283 = vector.load %arg10[%c0_97, %c0_98] : memref<8x128xf32, #tpu.memory_space<vmem>>, vector<8x128xf32>
    tpu.vector_store %arg10[%c0_97, %c0_98], %273 {strides = array<i32>} : memref<8x128xf32, #tpu.memory_space<vmem>>, vector<8x128xf32>,
    return
  }
  func.func @transform_0(%arg0: i32, %arg1: i32) -> (i32, i32, i32) {
    %c0_i32 = arith.constant 0 : i32
    %c0_i32_0 = arith.constant 0 : i32
    return %arg0, %arg1, %c0_i32 : i32, i32, i32
  }
  func.func @transform_1(%arg0: i32, %arg1: i32) -> (i32, i32) {
    %c0_i32 = arith.constant 0 : i32
    %c0_i32_0 = arith.constant 0 : i32
    %c0_i32_1 = arith.constant 0 : i32
    return %c0_i32, %c0_i32_0 : i32, i32
  }
  func.func @transform_2(%arg0: i32, %arg1: i32) -> (i32, i32) {
    %c0_i32 = arith.constant 0 : i32
    %c0_i32_0 = arith.constant 0 : i32
    %c0_i32_1 = arith.constant 0 : i32
    return %c0_i32, %c0_i32_0 : i32, i32
  }
  func.func @transform_3(%arg0: i32, %arg1: i32) -> (i32, i32) {
    %c0_i32 = arith.constant 0 : i32
    %c0_i32_0 = arith.constant 0 : i32
    %c0_i32_1 = arith.constant 0 : i32
    return %c0_i32, %c0_i32_0 : i32, i32
  }
  func.func @transform_4(%arg0: i32, %arg1: i32) -> (i32, i32) {
    %c0_i32 = arith.constant 0 : i32
    %c0_i32_0 = arith.constant 0 : i32
    return %arg0, %c0_i32 : i32, i32
  }
  func.func @transform_5(%arg0: i32, %arg1: i32) -> (i32, i32) {
    %c0_i32 = arith.constant 0 : i32
    %c0_i32_0 = arith.constant 0 : i32
    return %arg0, %c0_i32 : i32, i32
  }
  func.func @transform_6(%arg0: i32, %arg1: i32) -> (i32, i32, i32) {
    %c0_i32 = arith.constant 0 : i32
    %c0_i32_0 = arith.constant 0 : i32
    return %arg0, %arg1, %c0_i32 : i32, i32, i32
  }
  func.func @transform_7(%arg0: i32, %arg1: i32) -> (i32, i32) {
    %c0_i32 = arith.constant 0 : i32
    %c0_i32_0 = arith.constant 0 : i32
    return %arg0, %c0_i32 : i32, i32
  }
  func.func @transform_8(%arg0: i32, %arg1: i32) -> (i32, i32) {
    %c0_i32 = arith.constant 0 : i32
    %c0_i32_0 = arith.constant 0 : i32
    return %arg0, %c0_i32 : i32, i32
  }
}

</mosaic_0001>

<bundles_post_ra>
// kernel: rnn_language_model_forward.5
= control target key start
LH: loop header
LB: loop body
LE: loop exit
PB: predicated region body
PF: predicated region fallthrough
CT: control target
= control target key end

     0   :  { %s323_s1 = inlined_call_operand.vmem [shape: bf16[128,128], index: 1, kind: input, shape index: {}]   ;;  %s324_s2 = inlined_call_operand.vmem [shape: f32[1,128], index: 2, kind: input, shape index: {}]   ;;  %s325_s0 = inlined_call_operand.vmem [shape: bf16[64,128], index: 0, kind: input, shape index: {}]   ;;  %s326_s3 = inlined_call_operand.vmem [shape: f32[64,128], index: 3, kind: output, shape index: {}]  }
   0x1   :  { %v214_v0 = vld [vmem:[%s323_s1 + $0x38] sm:$0xff]  ;;  %v213_v1 = vld [vmem:[%s323_s1 + $0x30] sm:$0xff]  ;;  %v212_v2 = vld [vmem:[%s323_s1 + $0x28] sm:$0xff] }
   0x2   :  { %114 = vmatpush.bf16.msra.mxu0 %v214_v0  ;;  %215 = vmatpush.bf16.msra.mxu1 %v214_v0  ;;  %v211_v3 = vld [vmem:[%s323_s1 + $0x20] sm:$0xff]  ;;  %v210_v4 = vld [vmem:[%s323_s1 + $0x18] sm:$0xff]  ;;  %v209_v5 = vld [vmem:[%s323_s1 + $0x10] sm:$0xff] }
   0x3   :  { %216 = vmatpush.bf16.msra.mxu2 %v214_v0  ;;  %217 = vmatpush.bf16.msra.mxu3 %v214_v0  ;;  %v208_v6 = vld [vmem:[%s323_s1 + $0x8] sm:$0xff]  ;;  %v207_v7 = vld [vmem:[%s323_s1] sm:$0xff]  ;;  %v205_v10 = vld [vmem:[%s325_s0 + $0x10] sm:$0xff] }
   0x4   :  { %v203_v8 = vld [vmem:[%s325_s0] sm:$0xff]  ;;  %v204_v9 = vld [vmem:[%s325_s0 + $0x8] sm:$0xff]  ;;  %v206_v11 = vld [vmem:[%s325_s0 + $0x18] sm:$0xff] }
   0x5   :  { %v239_v12 = vld [vmem:[%s324_s2] ss:$0 sm:$0xff] }
   0x6   :  { %115 = vmatpush.bf16.msra.mxu0 %v213_v1  ;;  %218 = vmatpush.bf16.msra.mxu1 %v213_v1 }
   0x7   :  { %219 = vmatpush.bf16.msra.mxu2 %v213_v1  ;;  %220 = vmatpush.bf16.msra.mxu3 %v213_v1 }
   0xa   :  { %116 = vmatpush.bf16.msra.mxu0 %v212_v2  ;;  %221 = vmatpush.bf16.msra.mxu1 %v212_v2 }
   0xb   :  { %222 = vmatpush.bf16.msra.mxu2 %v212_v2  ;;  %223 = vmatpush.bf16.msra.mxu3 %v212_v2 }
   0xe   :  { %117 = vmatpush.bf16.msra.mxu0 %v211_v3  ;;  %224 = vmatpush.bf16.msra.mxu1 %v211_v3 }
   0xf   :  { %225 = vmatpush.bf16.msra.mxu2 %v211_v3  ;;  %226 = vmatpush.bf16.msra.mxu3 %v211_v3 }
  0x12   :  { %118 = vmatpush.bf16.msra.mxu0 %v210_v4  ;;  %227 = vmatpush.bf16.msra.mxu1 %v210_v4 }
  0x13   :  { %228 = vmatpush.bf16.msra.mxu2 %v210_v4  ;;  %229 = vmatpush.bf16.msra.mxu3 %v210_v4 }
  0x16   :  { %119 = vmatpush.bf16.msra.mxu0 %v209_v5  ;;  %230 = vmatpush.bf16.msra.mxu1 %v209_v5 }
  0x17   :  { %231 = vmatpush.bf16.msra.mxu2 %v209_v5  ;;  %232 = vmatpush.bf16.msra.mxu3 %v209_v5 }
  0x1a   :  { %120 = vmatpush.bf16.msra.mxu0 %v208_v6  ;;  %233 = vmatpush.bf16.msra.mxu1 %v208_v6 }
  0x1b   :  { %234 = vmatpush.bf16.msra.mxu2 %v208_v6  ;;  %235 = vmatpush.bf16.msra.mxu3 %v208_v6 }
  0x1e   :  { %121 = vmatpush.bf16.msra.mxu0 %v207_v7  ;;  %236 = vmatpush.bf16.msra.mxu1 %v207_v7 }
  0x1f   :  { %237 = vmatpush.bf16.msra.mxu2 %v207_v7  ;;  %238 = vmatpush.bf16.msra.mxu3 %v207_v7 }
  0x21   :  { %122 = vmatmul.bf16.vlgmr.msra.gmra.mxu0 %v203_v8  ;;  %127 = vmatmul.bf16.vlgmr.msra.gmra.mxu1 %v204_v9 }
  0x22   :  { %132 = vmatmul.bf16.vlgmr.msra.gmra.mxu2 %v205_v10  ;;  %137 = vmatmul.bf16.vlgmr.msra.gmra.mxu3 %v206_v11 }
  0x9e   :  { %v123_v13 = vpop.f32.mrf.mxu0  ;;  %v128_v14 = vpop.f32.mrf.mxu1 }
  0x9f   :  { %v124_v15 = vadd.f32 %v239_v12, %v123_v13  ;;  %v129_v16 = vadd.f32 %v239_v12, %v128_v14 }
  0xa1   :  { %143 = vst [vmem:[%s326_s3] sm:$0xff] %v124_v15 }
  0xa2   :  { %145 = vst [vmem:[%s326_s3 + $0x10] sm:$0xff] %v129_v16 }
  0xa5   :  { %v133_v17 = vpop.f32.mrf.mxu2  ;;  %v138_v18 = vpop.f32.mrf.mxu3 }
  0xa6   :  { %v134_v19 = vadd.f32 %v239_v12, %v133_v17  ;;  %v139_v20 = vadd.f32 %v239_v12, %v138_v18  ;;  %v125_v21 = vpop.f32.mrf.mxu0  ;;  %v130_v22 = vpop.f32.mrf.mxu1 }
  0xa7   :  { %v126_v23 = vadd.f32 %v239_v12, %v125_v21  ;;  %v131_v24 = vadd.f32 %v239_v12, %v130_v22 }
  0xa8   :  { %147 = vst [vmem:[%s326_s3 + $0x20] sm:$0xff] %v134_v19 }
  0xa9   :  { %149 = vst [vmem:[%s326_s3 + $0x30] sm:$0xff] %v139_v20 }
  0xaa   :  { %144 = vst [vmem:[%s326_s3 + $0x8] sm:$0xff] %v126_v23 }
  0xab   :  { %146 = vst [vmem:[%s326_s3 + $0x18] sm:$0xff] %v131_v24 }
  0xad   :  { %v135_v25 = vpop.f32.mrf.mxu2  ;;  %v140_v26 = vpop.f32.mrf.mxu3 }
  0xae   :  { %v136_v27 = vadd.f32 %v239_v12, %v135_v25  ;;  %v141_v28 = vadd.f32 %v239_v12, %v140_v26 }
  0xb0   :  { %148 = vst [vmem:[%s326_s3 + $0x28] sm:$0xff] %v136_v27 }
  0xb1   :  { %150 = vst [vmem:[%s326_s3 + $0x38] sm:$0xff] %v141_v28 }

// kernel: rnn_language_model_forward.3
= control target key start
LH: loop header
LB: loop body
LE: loop exit
PB: predicated region body
PF: predicated region fallthrough
CT: control target
= control target key end

     0   :  { %14 = vsyncpa [#allocation5], 0  ;;  %s16051_s0 = inlined_call_operand.vmem [shape: bf16[8,8,128], index: 0, kind: input, shape index: {}]   ;;  %s16052_s1 = inlined_call_operand.hbm [shape: bf16[128,512], index: 1, kind: input, shape index: {}]   ;;  %s16053_s2 = inlined_call_operand.hbm [shape: bf16[128,512], index: 2, kind: input, shape index: {}]   ;;  %s16054_s3 = inlined_call_operand.vmem [shape: f32[1,512], index: 3, kind: input, shape index: {}]   ;;  %s16055_s4 = inlined_call_operand.vmem [shape: f32[8,128], index: 4, kind: input, shape index: {}]   ;;  %s16056_s5 = inlined_call_operand.vmem [shape: f32[8,128], index: 5, kind: input, shape index: {}]   ;;  %s16057_s6 = inlined_call_operand.vmem [shape: bf16[8,8,128], index: 6, kind: output, shape index: {0}]   ;;  %s16058_s7 = inlined_call_operand.vmem [shape: f32[8,128], index: 7, kind: output, shape index: {1}]   ;;  %s16059_s8 = inlined_call_operand.vmem [shape: f32[8,128], index: 8, kind: output, shape index: {2}]  }
   0x1   :  { %s22_s29 = sshll.u32 %s16052_s1, 4  ;;  %s23_s29 = int_to_ptr.hbm [resolvable:$true] %s22_s29 }
   0x2   :  { %15 = vsyncpa [#allocation7], 0  ;;  %s8199_s30 = smov [#allocation4]   ;;  %s35_s12 = sshll.u32 %s16053_s2, 4  ;;  %s36_s12 = int_to_ptr.hbm [resolvable:$true] %s35_s12 }
   0x3   :  { %s24_s9 = sshll.u32 %s8199_s30, 4  ;;  %s8200_s13 = smov 256   ;;  %s25_s9 = int_to_ptr.vmem [resolvable:$true] %s24_s9 }
   0x4   :  { %s8201_s14 = smov 16   ;;  %s8202_s15 = smov [#allocation6]  }
   0x5   :  { %30 = dma.hbm_to_vmem [thread:$0]  %s23_s29, 4096, %s25_s9, [#allocation5], %s8200_s13, %s8200_s13, %s8201_s14  }
   0x6   :  { %s37_s16 = sshll.u32 %s8202_s15, 4  ;;  %s38_s16 = int_to_ptr.vmem [resolvable:$true] %s37_s16 }
   0x7   :  { %43 = dma.hbm_to_vmem [thread:$0]  %s36_s12, 4096, %s38_s16, [#allocation7], %s8200_s13, %s8200_s13, %s8201_s14  }
   0x8   :  { %8195 = dma.done.wait [#allocation5], 4096  }
   0x9   :  { %8196 = vsyncadd [#allocation5], 4294963200 }
   0xa   :  { %8197 = dma.done.wait [#allocation7], 4096  }
   0xb   :  { %8198 = vsyncadd [#allocation7], 4294963200  ;;  %v6694_v0 = vld [vmem:[#allocation4 + $0xe0] sm:$0xf]  ;;  %v7062_v1 = vld [vmem:[#allocation4 + $0xec] sm:$0xf0] }
   0xc   :  { %v7060_v2 = vld [vmem:[#allocation4 + $0xe4] sm:$0xf]  ;;  %v6695_v3 = vor.u32 %v7062_v1, %v6694_v0  ;;  %v6696_v4 = vld [vmem:[#allocation4 + $0xf0] sm:$0xf0]  ;;  %v6702_v5 = vld [vmem:[#allocation4 + $0xe8] sm:$0xf] }
   0xd   :  { %v7063_v6 = vld [vmem:[#allocation4 + $0xf4] sm:$0xf0]  ;;  %v6699_v7 = vor.u32 %v7060_v2, %v6696_v4  ;;  %v7061_v9 = vld [vmem:[#allocation4 + $0xec] sm:$0xf]  ;;  %v6704_v10 = vld [vmem:[#allocation4 + $0xf8] sm:$0xf0] }
   0xe   :  { %v6703_v8 = vor.u32 %v7063_v6, %v6702_v5  ;;  %v6678_v11 = vld [vmem:[#allocation4 + $0xc0] sm:$0xf]  ;;  %300 = vmatpush.bf16.msra.mxu0 %v6695_v3  ;;  %v6707_v12 = vor.u32 %v7061_v9, %v6704_v10  ;;  %v7058_v13 = vld [vmem:[#allocation4 + $0xcc] sm:$0xf0]  ;;  %v7056_v14 = vld [vmem:[#allocation4 + $0xc4] sm:$0xf] }
   0xf   :  { %v6680_v15 = vld [vmem:[#allocation4 + $0xd0] sm:$0xf0]  ;;  %329 = vmatpush.bf16.msra.mxu1 %v6699_v7  ;;  %v6679_v16 = vor.u32 %v7058_v13, %v6678_v11  ;;  %v6686_v18 = vld [vmem:[#allocation4 + $0xc8] sm:$0xf]  ;;  %v7059_v19 = vld [vmem:[#allocation4 + $0xd4] sm:$0xf0] }
  0x10   :  { %358 = vmatpush.bf16.msra.mxu2 %v6703_v8  ;;  %v6683_v17 = vor.u32 %v7056_v14, %v6680_v15  ;;  %v7057_v20 = vld [vmem:[#allocation4 + $0xcc] sm:$0xf]  ;;  %387 = vmatpush.bf16.msra.mxu3 %v6707_v12  ;;  %v6687_v21 = vor.u32 %v7059_v19, %v6686_v18  ;;  %v6688_v22 = vld [vmem:[#allocation4 + $0xd8] sm:$0xf0]  ;;  %v6662_v23 = vld [vmem:[#allocation4 + $0xa0] sm:$0xf] }
  0x11   :  { %v7054_v24 = vld [vmem:[#allocation4 + $0xac] sm:$0xf0]  ;;  %v6691_v25 = vor.u32 %v7057_v20, %v6688_v22  ;;  %v7052_v26 = vld [vmem:[#allocation4 + $0xa4] sm:$0xf]  ;;  %v6664_v27 = vld [vmem:[#allocation4 + $0xb0] sm:$0xf0] }
  0x12   :  { %v6670_v28 = vld [vmem:[#allocation4 + $0xa8] sm:$0xf]  ;;  %301 = vmatpush.bf16.msra.mxu0 %v6679_v16  ;;  %v6663_v29 = vor.u32 %v7054_v24, %v6662_v23  ;;  %v7055_v30 = vld [vmem:[#allocation4 + $0xb4] sm:$0xf0]  ;;  %v7053_v31 = vld [vmem:[#allocation4 + $0xac] sm:$0xf]  ;;  %v6667_v33 = vor.u32 %v7052_v26, %v6664_v27 }
  0x13   :  { %v6672_v32 = vld [vmem:[#allocation4 + $0xb8] sm:$0xf0]  ;;  %330 = vmatpush.bf16.msra.mxu1 %v6683_v17  ;;  %v6671_v34 = vor.u32 %v7055_v30, %v6670_v28  ;;  %v6646_v35 = vld [vmem:[#allocation4 + $0x80] sm:$0xf]  ;;  %v7050_v36 = vld [vmem:[#allocation4 + $0x8c] sm:$0xf0] }
  0x14   :  { %359 = vmatpush.bf16.msra.mxu2 %v6687_v21  ;;  %v7048_v37 = vld [vmem:[#allocation4 + $0x84] sm:$0xf]  ;;  %388 = vmatpush.bf16.msra.mxu3 %v6691_v25  ;;  %v6675_v38 = vor.u32 %v7053_v31, %v6672_v32  ;;  %v6648_v39 = vld [vmem:[#allocation4 + $0x90] sm:$0xf0]  ;;  %v6654_v40 = vld [vmem:[#allocation4 + $0x88] sm:$0xf]  ;;  %v6647_v44 = vor.u32 %v7050_v36, %v6646_v35 }
  0x15   :  { %v7051_v41 = vld [vmem:[#allocation4 + $0x94] sm:$0xf0]  ;;  %v7049_v42 = vld [vmem:[#allocation4 + $0x8c] sm:$0xf]  ;;  %v6656_v43 = vld [vmem:[#allocation4 + $0x98] sm:$0xf0]  ;;  %v6651_v45 = vor.u32 %v7048_v37, %v6648_v39 }
  0x16   :  { %302 = vmatpush.bf16.msra.mxu0 %v6663_v29  ;;  %v6655_v46 = vor.u32 %v7051_v41, %v6654_v40  ;;  %v6630_v47 = vld [vmem:[#allocation4 + $0x60] sm:$0xf]  ;;  %v7046_v48 = vld [vmem:[#allocation4 + $0x6c] sm:$0xf0]  ;;  %v7044_v49 = vld [vmem:[#allocation4 + $0x64] sm:$0xf]  ;;  %v6659_v50 = vor.u32 %v7049_v42, %v6656_v43 }
  0x17   :  { %331 = vmatpush.bf16.msra.mxu1 %v6667_v33  ;;  %v6632_v51 = vld [vmem:[#allocation4 + $0x70] sm:$0xf0]  ;;  %v6638_v52 = vld [vmem:[#allocation4 + $0x68] sm:$0xf]  ;;  %v7047_v53 = vld [vmem:[#allocation4 + $0x74] sm:$0xf0]  ;;  %v6631_v56 = vor.u32 %v7046_v48, %v6630_v47 }
  0x18   :  { %360 = vmatpush.bf16.msra.mxu2 %v6671_v34  ;;  %389 = vmatpush.bf16.msra.mxu3 %v6675_v38  ;;  %v7045_v54 = vld [vmem:[#allocation4 + $0x6c] sm:$0xf]  ;;  %v6640_v55 = vld [vmem:[#allocation4 + $0x78] sm:$0xf0]  ;;  %v6635_v57 = vor.u32 %v7044_v49, %v6632_v51  ;;  %v6639_v58 = vor.u32 %v7047_v53, %v6638_v52  ;;  %v6614_v59 = vld [vmem:[#allocation4 + $0x40] sm:$0xf] }
  0x19   :  { %v7042_v60 = vld [vmem:[#allocation4 + $0x4c] sm:$0xf0]  ;;  %v7040_v61 = vld [vmem:[#allocation4 + $0x44] sm:$0xf]  ;;  %v6643_v62 = vor.u32 %v7045_v54, %v6640_v55  ;;  %v6616_v63 = vld [vmem:[#allocation4 + $0x50] sm:$0xf0] }
  0x1a   :  { %303 = vmatpush.bf16.msra.mxu0 %v6647_v44  ;;  %v6622_v0 = vld [vmem:[#allocation4 + $0x48] sm:$0xf]  ;;  %v7043_v1 = vld [vmem:[#allocation4 + $0x54] sm:$0xf0]  ;;  %v7041_v2 = vld [vmem:[#allocation4 + $0x4c] sm:$0xf]  ;;  %v6615_v4 = vor.u32 %v7042_v60, %v6614_v59  ;;  %v6619_v5 = vor.u32 %v7040_v61, %v6616_v63 }
  0x1b   :  { %332 = vmatpush.bf16.msra.mxu1 %v6651_v45  ;;  %v6624_v3 = vld [vmem:[#allocation4 + $0x58] sm:$0xf0]  ;;  %v6623_v6 = vor.u32 %v7043_v1, %v6622_v0  ;;  %v6598_v7 = vld [vmem:[#allocation4 + $0x20] sm:$0xf]  ;;  %v7038_v8 = vld [vmem:[#allocation4 + $0x2c] sm:$0xf0] }
  0x1c   :  { %361 = vmatpush.bf16.msra.mxu2 %v6655_v46  ;;  %390 = vmatpush.bf16.msra.mxu3 %v6659_v50  ;;  %v7036_v9 = vld [vmem:[#allocation4 + $0x24] sm:$0xf]  ;;  %v6627_v10 = vor.u32 %v7041_v2, %v6624_v3  ;;  %v6600_v11 = vld [vmem:[#allocation4 + $0x30] sm:$0xf0]  ;;  %v6606_v12 = vld [vmem:[#allocation4 + $0x28] sm:$0xf]  ;;  %v6599_v16 = vor.u32 %v7038_v8, %v6598_v7 }
  0x1d   :  { %v7039_v13 = vld [vmem:[#allocation4 + $0x34] sm:$0xf0]  ;;  %v7037_v14 = vld [vmem:[#allocation4 + $0x2c] sm:$0xf]  ;;  %v6608_v15 = vld [vmem:[#allocation4 + $0x38] sm:$0xf0]  ;;  %v6603_v18 = vor.u32 %v7036_v9, %v6600_v11 }
  0x1e   :  { %304 = vmatpush.bf16.msra.mxu0 %v6631_v56  ;;  %v6582_v17 = vld [vmem:[#allocation4] sm:$0xf]  ;;  %v6607_v19 = vor.u32 %v7039_v13, %v6606_v12  ;;  %v7034_v20 = vld [vmem:[#allocation4 + $0xc] sm:$0xf0]  ;;  %v7032_v21 = vld [vmem:[#allocation4 + $0x4] sm:$0xf]  ;;  %v6611_v23 = vor.u32 %v7037_v14, %v6608_v15 }
  0x1f   :  { %333 = vmatpush.bf16.msra.mxu1 %v6635_v57  ;;  %v6584_v22 = vld [vmem:[#allocation4 + $0x10] sm:$0xf0]  ;;  %v6590_v24 = vld [vmem:[#allocation4 + $0x8] sm:$0xf]  ;;  %v7035_v25 = vld [vmem:[#allocation4 + $0x14] sm:$0xf0]  ;;  %v6583_v30 = vor.u32 %v7034_v20, %v6582_v17 }
  0x20   :  { %362 = vmatpush.bf16.msra.mxu2 %v6639_v58  ;;  %391 = vmatpush.bf16.msra.mxu3 %v6643_v62  ;;  %v7033_v26 = vld [vmem:[#allocation4 + $0xc] sm:$0xf]  ;;  %v6592_v27 = vld [vmem:[#allocation4 + $0x18] sm:$0xf0]  ;;  %v6830_v28 = vld [vmem:[#allocation6 + $0xe8] sm:$0xf]  ;;  %v6587_v33 = vor.u32 %v7032_v21, %v6584_v22  ;;  %v6591_v34 = vor.u32 %v7035_v25, %v6590_v24 }
  0x21   :  { %v7095_v29 = vld [vmem:[#allocation6 + $0xf4] sm:$0xf0]  ;;  %v7093_v31 = vld [vmem:[#allocation6 + $0xec] sm:$0xf]  ;;  %v6832_v32 = vld [vmem:[#allocation6 + $0xf8] sm:$0xf0]  ;;  %v6595_v36 = vor.u32 %v7033_v26, %v6592_v27 }
  0x22   :  { %305 = vmatpush.bf16.msra.mxu0 %v6615_v4  ;;  %v7028_v35 = vld [vmem:[%s16051_s0] sm:$0xff]  ;;  %v8257_v37 = vor.u32 %v7095_v29, %v6830_v28  ;;  %v7092_v38 = vld [vmem:[#allocation6 + $0xe4] sm:$0xf]  ;;  %v6824_v39 = vld [vmem:[#allocation6 + $0xf0] sm:$0xf0]  ;;  %v8259_v41 = vor.u32 %v7093_v31, %v6832_v32  ;;  %vm16099_vm0 = vcmask 1040384  }
  0x23   :  { %334 = vmatpush.bf16.msra.mxu1 %v6619_v5  ;;  %v6822_v40 = vld [vmem:[#allocation6 + $0xe0] sm:$0xf]  ;;  %v7094_v42 = vld [vmem:[#allocation6 + $0xec] sm:$0xf0]  ;;  %v6814_v43 = vld [vmem:[#allocation6 + $0xc8] sm:$0xf]  ;;  %v8261_v47 = vor.u32 %v7092_v38, %v6824_v39 }
  0x24   :  { %363 = vmatpush.bf16.msra.mxu2 %v6623_v6  ;;  %392 = vmatpush.bf16.msra.mxu3 %v6627_v10  ;;  %16143 = vst [vmem:[#allocation10_spill] sm:$0xff] %v8257_v37  ;;  %v7091_v44 = vld [vmem:[#allocation6 + $0xd4] sm:$0xf0]  ;;  %v7089_v45 = vld [vmem:[#allocation6 + $0xcc] sm:$0xf]  ;;  %v8264_v48 = vor.u32 %v7094_v42, %v6822_v40  ;;  %vm719_vm1 = vcmask 1042434  }
  0x25   :  { %16144 = vst [vmem:[#allocation11_spill] sm:$0xff] %v8259_v41  ;;  %v6816_v46 = vld [vmem:[#allocation6 + $0xd8] sm:$0xf0]  ;;  %v8266_v49 = vor.u32 %v7091_v44, %v6814_v43  ;;  %v7088_v50 = vld [vmem:[#allocation6 + $0xc4] sm:$0xf]  ;;  %vm723_vm2 = vcmask 1041409  }
  0x26   :  { %306 = vmatpush.bf16.msra.mxu0 %v6599_v16  ;;  %16145 = vst [vmem:[#allocation12_spill] sm:$0xff] %v8261_v47  ;;  %v6808_v51 = vld [vmem:[#allocation6 + $0xd0] sm:$0xf0]  ;;  %v6806_v52 = vld [vmem:[#allocation6 + $0xc0] sm:$0xf]  ;;  %v8269_v53 = vor.u32 %v7089_v45, %v6816_v46  ;;  %vm725_vm3 = vcmask 1043459  }
  0x27   :  { %335 = vmatpush.bf16.msra.mxu1 %v6603_v18  ;;  %16146 = vst [vmem:[#allocation13_spill] sm:$0xff] %v8264_v48  ;;  %v7090_v54 = vld [vmem:[#allocation6 + $0xcc] sm:$0xf0]  ;;  %v6798_v55 = vld [vmem:[#allocation6 + $0xa8] sm:$0xf]  ;;  %v8272_v59 = vor.u32 %v7088_v50, %v6808_v51  ;;  %vm731_vm4 = vcmask 1044484  }
  0x28   :  { %364 = vmatpush.bf16.msra.mxu2 %v6607_v19  ;;  %393 = vmatpush.bf16.msra.mxu3 %v6611_v23  ;;  %16147 = vst [vmem:[#allocation14_spill] sm:$0xff] %v8266_v49  ;;  %v7087_v56 = vld [vmem:[#allocation6 + $0xb4] sm:$0xf0]  ;;  %v7085_v57 = vld [vmem:[#allocation6 + $0xac] sm:$0xf]  ;;  %v8276_v60 = vor.u32 %v7090_v54, %v6806_v52  ;;  %v7029_v19 = vld [vmem:[%s16051_s0 + $0x8] sm:$0xff] }
  0x29   :  { %16148 = vst [vmem:[#allocation15_spill] sm:$0xff] %v8269_v53  ;;  %v6800_v58 = vld [vmem:[#allocation6 + $0xb8] sm:$0xf0]  ;;  %v8278_v61 = vor.u32 %v7087_v56, %v6798_v55  ;;  %v7084_v62 = vld [vmem:[#allocation6 + $0xa4] sm:$0xf]  ;;  %vm16115_vm5 = vcmask 1045509  }
  0x2a   :  { %307 = vmatpush.bf16.msra.mxu0 %v6583_v30  ;;  %16149 = vst [vmem:[#allocation16_spill] sm:$0xff] %v8272_v59  ;;  %v6792_v63 = vld [vmem:[#allocation6 + $0xb0] sm:$0xf0]  ;;  %v6790_v0 = vld [vmem:[#allocation6 + $0xa0] sm:$0xf]  ;;  %v8281_v1 = vor.u32 %v7085_v57, %v6800_v58  ;;  %vm16114_vm6 = vcmask 1046534  }
  0x2b   :  { %336 = vmatpush.bf16.msra.mxu1 %v6587_v33  ;;  %16150 = vst [vmem:[#allocation17_spill] sm:$0xff] %v8276_v60  ;;  %v7086_v2 = vld [vmem:[#allocation6 + $0xac] sm:$0xf0]  ;;  %v6782_v3 = vld [vmem:[#allocation6 + $0x88] sm:$0xf]  ;;  %v8284_v7 = vor.u32 %v7084_v62, %v6792_v63  ;;  %vm16098_vm7 = vcmask 1046528  }
  0x2c   :  { %365 = vmatpush.bf16.msra.mxu2 %v6591_v34  ;;  %394 = vmatpush.bf16.msra.mxu3 %v6595_v36  ;;  %16151 = vst [vmem:[#allocation18_spill] sm:$0xff] %v8278_v61  ;;  %v7083_v4 = vld [vmem:[#allocation6 + $0x94] sm:$0xf0]  ;;  %v7081_v5 = vld [vmem:[#allocation6 + $0x8c] sm:$0xf]  ;;  %v8288_v8 = vor.u32 %v7086_v2, %v6790_v0  ;;  %vm16095_vm8 = vcmask 1041408  }
  0x2d   :  { %308 = vmatmul.bf16.vlgmr.msra.gmra.mxu0 %v7028_v35  ;;  %16152 = vst [vmem:[#allocation19_spill] sm:$0xff] %v8281_v1  ;;  %v6784_v6 = vld [vmem:[#allocation6 + $0x98] sm:$0xf0]  ;;  %v8290_v9 = vor.u32 %v7083_v4, %v6782_v3  ;;  %v7080_v10 = vld [vmem:[#allocation6 + $0x84] sm:$0xf]  ;;  %vm16084_vm9 = vcmask 1042433  }
  0x2e   :  { %337 = vmatmul.bf16.vlgmr.msra.gmra.mxu1 %v7028_v35  ;;  %658 = vmatpush.bf16.msrb.mxu0 %v8264_v48  ;;  %16153 = vst [vmem:[#allocation20_spill] sm:$0xff] %v8284_v7  ;;  %v6776_v11 = vld [vmem:[#allocation6 + $0x90] sm:$0xf0]  ;;  %v6774_v12 = vld [vmem:[#allocation6 + $0x80] sm:$0xf]  ;;  %v8293_v13 = vor.u32 %v7081_v5, %v6784_v6  ;;  %vm16083_vm10 = vcmask 1043458  }
  0x2f   :  { %366 = vmatmul.bf16.vlgmr.msra.gmra.mxu2 %v7028_v35  ;;  %395 = vmatmul.bf16.vlgmr.msra.gmra.mxu3 %v7028_v35  ;;  %16154 = vst [vmem:[#allocation21_spill] sm:$0xff] %v8288_v8  ;;  %v7082_v14 = vld [vmem:[#allocation6 + $0x8c] sm:$0xf0]  ;;  %v6766_v15 = vld [vmem:[#allocation6 + $0x68] sm:$0xf]  ;;  %v8299_v20 = vor.u32 %v7080_v10, %v6776_v11  ;;  %vm16080_vm11 = vcmask 1044483  }
  0x30   :  { %684 = vmatpush.bf16.msrb.mxu2 %v8257_v37  ;;  %697 = vmatpush.bf16.msrb.mxu3 %v8259_v41  ;;  %16155 = vst [vmem:[#allocation22_spill] sm:$0xff] %v8290_v9  ;;  %v7079_v16 = vld [vmem:[#allocation6 + $0x74] sm:$0xf0]  ;;  %v7077_v17 = vld [vmem:[#allocation6 + $0x6c] sm:$0xf]  ;;  %v8303_v21 = vor.u32 %v7082_v14, %v6774_v12  ;;  %vm16079_vm12 = vcmask 1045508  }
  0x31   :  { %671 = vmatpush.bf16.msrb.mxu1 %v8261_v47  ;;  %16156 = vst [vmem:[#allocation23_spill] sm:$0xff] %v8293_v13  ;;  %v6768_v18 = vld [vmem:[#allocation6 + $0x78] sm:$0xf0]  ;;  %v8305_v22 = vor.u32 %v7079_v16, %v6766_v15  ;;  %v7076_v23 = vld [vmem:[#allocation6 + $0x64] sm:$0xf]  ;;  %v7030_v16 = vld [vmem:[%s16051_s0 + $0x10] sm:$0xff] }
  0x32   :  { %659 = vmatpush.bf16.msrb.mxu0 %v8276_v60  ;;  %16157 = vst [vmem:[#allocation24_spill] sm:$0xff] %v8299_v20  ;;  %v6760_v24 = vld [vmem:[#allocation6 + $0x70] sm:$0xf0]  ;;  %v6758_v25 = vld [vmem:[#allocation6 + $0x60] sm:$0xf]  ;;  %v8308_v26 = vor.u32 %v7077_v17, %v6768_v18  ;;  %v62_v18 = vld [vmem:[%s16055_s4] sm:$0xff] }
  0x33   :  { %16158 = vst [vmem:[#allocation25_spill] sm:$0xff] %v8303_v21  ;;  %v7078_v27 = vld [vmem:[#allocation6 + $0x6c] sm:$0xf0]  ;;  %v6750_v28 = vld [vmem:[#allocation6 + $0x48] sm:$0xf]  ;;  %v8311_v32 = vor.u32 %v7076_v23, %v6760_v24  ;;  %vm16078_vm13 = vcmask 1046533  }
  0x34   :  { %685 = vmatpush.bf16.msrb.mxu2 %v8266_v49  ;;  %698 = vmatpush.bf16.msrb.mxu3 %v8269_v53  ;;  %16159 = vst [vmem:[#allocation26_spill] sm:$0xff] %v8305_v22  ;;  %v7075_v29 = vld [vmem:[#allocation6 + $0x54] sm:$0xf0]  ;;  %v7073_v30 = vld [vmem:[#allocation6 + $0x4c] sm:$0xf]  ;;  %v8315_v33 = vor.u32 %v7078_v27, %v6758_v25  ;;  %v7031_v17 = vld [vmem:[%s16051_s0 + $0x18] sm:$0xff] }
  0x35   :  { %672 = vmatpush.bf16.msrb.mxu1 %v8272_v59  ;;  %16160 = vst [vmem:[#allocation27_spill] sm:$0xff] %v8308_v26  ;;  %v6752_v31 = vld [vmem:[#allocation6 + $0x58] sm:$0xf0]  ;;  %v8317_v34 = vor.u32 %v7075_v29, %v6750_v28  ;;  %v7072_v35 = vld [vmem:[#allocation6 + $0x44] sm:$0xf]  ;;  %vm16077_vm14 = vcmask 1045504  }
  0x36   :  { %660 = vmatpush.bf16.msrb.mxu0 %v8288_v8  ;;  %16161 = vst [vmem:[#allocation28_spill] sm:$0xff] %v8311_v32  ;;  %v6744_v36 = vld [vmem:[#allocation6 + $0x50] sm:$0xf0]  ;;  %v8320_v38 = vor.u32 %v7073_v30, %v6752_v31  ;;  %v6742_v40 = vld [vmem:[#allocation6 + $0x40] sm:$0xf]  ;;  %vm16076_vm15 = vcmask 1046529  }
  0x37   :  { %16162 = vst [vmem:[#allocation29_spill] sm:$0xff] %v8315_v33  ;;  %v8323_v39 = vor.u32 %v7072_v35, %v6744_v36  ;;  %v7074_v42 = vld [vmem:[#allocation6 + $0x4c] sm:$0xf0]  ;;  %v6734_v43 = vld [vmem:[#allocation6 + $0x28] sm:$0xf] }
  0x38   :  { %686 = vmatpush.bf16.msrb.mxu2 %v8278_v61  ;;  %699 = vmatpush.bf16.msrb.mxu3 %v8281_v1  ;;  %16163 = vst [vmem:[#allocation30_spill] sm:$0xff] %v8317_v34  ;;  %v8327_v44 = vor.u32 %v7074_v42, %v6742_v40  ;;  %v7071_v45 = vld [vmem:[#allocation6 + $0x34] sm:$0xf0]  ;;  %v7069_v46 = vld [vmem:[#allocation6 + $0x2c] sm:$0xf] }
  0x39   :  { %673 = vmatpush.bf16.msrb.mxu1 %v8284_v7  ;;  %16164 = vst [vmem:[#allocation31_spill] sm:$0xff] %v8320_v38  ;;  %v6736_v50 = vld [vmem:[#allocation6 + $0x38] sm:$0xf0]  ;;  %v8330_v51 = vor.u32 %v7071_v45, %v6734_v43  ;;  %v7068_v54 = vld [vmem:[#allocation6 + $0x24] sm:$0xf] }
  0x3a   :  { %661 = vmatpush.bf16.msrb.mxu0 %v8303_v21  ;;  %16165 = vst [vmem:[#allocation32_spill] sm:$0xff] %v8323_v39  ;;  %v8332_v52 = vor.u32 %v7069_v46, %v6736_v50  ;;  %v6728_v55 = vld [vmem:[#allocation6 + $0x30] sm:$0xf0]  ;;  %v6726_v56 = vld [vmem:[#allocation6 + $0x20] sm:$0xf] }
  0x3b   :  { %16166 = vst [vmem:[#allocation33_spill] sm:$0xff] %v8327_v44  ;;  %v7070_v57 = vld [vmem:[#allocation6 + $0x2c] sm:$0xf0]  ;;  %v6718_v58 = vld [vmem:[#allocation6 + $0x8] sm:$0xf]  ;;  %v8335_v63 = vor.u32 %v7068_v54, %v6728_v55 }
  0x3c   :  { %687 = vmatpush.bf16.msrb.mxu2 %v8290_v9  ;;  %700 = vmatpush.bf16.msrb.mxu3 %v8293_v13  ;;  %16167 = vst [vmem:[#allocation34_spill] sm:$0xff] %v8330_v51  ;;  %v7067_v62 = vld [vmem:[#allocation6 + $0x14] sm:$0xf0]  ;;  %v7065_v0 = vld [vmem:[#allocation6 + $0xc] sm:$0xf]  ;;  %v8339_v3 = vor.u32 %v7070_v57, %v6726_v56 }
  0x3d   :  { %674 = vmatpush.bf16.msrb.mxu1 %v8299_v20  ;;  %313 = vmatmul.bf16.gmra.mxu0 %v7029_v19  ;;  %16168 = vst [vmem:[#allocation35_spill] sm:$0xff] %v8332_v52  ;;  %v6720_v2 = vld [vmem:[#allocation6 + $0x18] sm:$0xf0]  ;;  %v8341_v4 = vor.u32 %v7067_v62, %v6718_v58  ;;  %v7064_v5 = vld [vmem:[#allocation6 + $0x4] sm:$0xf] }
  0x3e   :  { %342 = vmatmul.bf16.gmra.mxu1 %v7029_v19  ;;  %662 = vmatpush.bf16.msrb.mxu0 %v8315_v33  ;;  %16169 = vst [vmem:[#allocation36_spill] sm:$0xff] %v8335_v63  ;;  %v6712_v6 = vld [vmem:[#allocation6 + $0x10] sm:$0xf0]  ;;  %v8344_v10 = vor.u32 %v7065_v0, %v6720_v2  ;;  %v6710_v11 = vld [vmem:[#allocation6] sm:$0xf] }
  0x3f   :  { %371 = vmatmul.bf16.gmra.mxu2 %v7029_v19  ;;  %400 = vmatmul.bf16.gmra.mxu3 %v7029_v19  ;;  %16170 = vst [vmem:[#allocation37_spill] sm:$0xff] %v8339_v3  ;;  %v7066_v12 = vld [vmem:[#allocation6 + $0xc] sm:$0xf0]  ;;  %v8347_v14 = vor.u32 %v7064_v5, %v6712_v6  ;;  %v497_v19 = vpack.c.bf16 %v62_v18, %v62_v18  ;;  %v106_v23 = vld [vmem:[%s16054_s3] sm:$0xf] }
  0x40   :  { %688 = vmatpush.bf16.msrb.mxu2 %v8305_v22  ;;  %701 = vmatpush.bf16.msrb.mxu3 %v8308_v26  ;;  %16171 = vst [vmem:[#allocation38_spill] sm:$0xff] %v8341_v4  ;;  %v8351_v15 = vor.u32 %v7066_v12, %v6710_v11  ;;  %v8432_v24 = vperm.slane %v106_v23, 0  ;;  %v8434_v25 = vperm.slane %v106_v23, 1  ;;  %v8438_v31 = vperm.slane %v106_v23, 2 }
  0x41   :  { %675 = vmatpush.bf16.msrb.mxu1 %v8311_v32  ;;  %16172 = vst [vmem:[#allocation39_spill] sm:$0xff] %v8344_v10  ;;  %v8440_v35 = vperm.slane %v106_v23, 3 }
  0x42   :  { %663 = vmatpush.bf16.msrb.mxu0 %v8327_v44  ;;  %16173 = vst [vmem:[#allocation40_spill] sm:$0xff] %v8347_v14 }
  0x43   :  { %16174 = vst [vmem:[#allocation41_spill] sm:$0xff] %v8351_v15 }
  0x44   :  { %689 = vmatpush.bf16.msrb.mxu2 %v8317_v34  ;;  %702 = vmatpush.bf16.msrb.mxu3 %v8320_v38 }
  0x45   :  { %676 = vmatpush.bf16.msrb.mxu1 %v8323_v39 }
  0x46   :  { %664 = vmatpush.bf16.msrb.mxu0 %v8339_v3 }
  0x48   :  { %690 = vmatpush.bf16.msrb.mxu2 %v8330_v51  ;;  %703 = vmatpush.bf16.msrb.mxu3 %v8332_v52 }
  0x49   :  { %677 = vmatpush.bf16.msrb.mxu1 %v8335_v63 }
  0x4a   :  { %665 = vmatpush.bf16.msrb.mxu0 %v8351_v15 }
  0x4c   :  { %691 = vmatpush.bf16.msrb.mxu2 %v8341_v4  ;;  %704 = vmatpush.bf16.msrb.mxu3 %v8344_v10 }
  0x4d   :  { %678 = vmatpush.bf16.msrb.mxu1 %v8347_v14  ;;  %318 = vmatmul.bf16.gmra.mxu0 %v7030_v16 }
  0x4e   :  { %347 = vmatmul.bf16.gmra.mxu1 %v7030_v16  ;;  %1420 = vmatpush.bf16.msra.mxu0 %v8264_v48 }
  0x4f   :  { %376 = vmatmul.bf16.gmra.mxu2 %v7030_v16  ;;  %405 = vmatmul.bf16.gmra.mxu3 %v7030_v16 }
  0x50   :  { %1446 = vmatpush.bf16.msra.mxu2 %v8257_v37  ;;  %1459 = vmatpush.bf16.msra.mxu3 %v8259_v41 }
  0x51   :  { %1433 = vmatpush.bf16.msra.mxu1 %v8261_v47 }
  0x52   :  { %1421 = vmatpush.bf16.msra.mxu0 %v8276_v60 }
  0x54   :  { %1447 = vmatpush.bf16.msra.mxu2 %v8266_v49  ;;  %1460 = vmatpush.bf16.msra.mxu3 %v8269_v53 }
  0x55   :  { %1434 = vmatpush.bf16.msra.mxu1 %v8272_v59 }
  0x56   :  { %1422 = vmatpush.bf16.msra.mxu0 %v8288_v8 }
  0x58   :  { %1448 = vmatpush.bf16.msra.mxu2 %v8278_v61  ;;  %1461 = vmatpush.bf16.msra.mxu3 %v8281_v1 }
  0x59   :  { %1435 = vmatpush.bf16.msra.mxu1 %v8284_v7 }
  0x5a   :  { %1423 = vmatpush.bf16.msra.mxu0 %v8303_v21 }
  0x5c   :  { %1449 = vmatpush.bf16.msra.mxu2 %v8290_v9  ;;  %1462 = vmatpush.bf16.msra.mxu3 %v8293_v13 }
  0x5d   :  { %1436 = vmatpush.bf16.msra.mxu1 %v8299_v20  ;;  %323 = vmatmul.bf16.gmra.mxu0 %v7031_v17 }
  0x5e   :  { %352 = vmatmul.bf16.gmra.mxu1 %v7031_v17  ;;  %1424 = vmatpush.bf16.msra.mxu0 %v8315_v33 }
  0x5f   :  { %381 = vmatmul.bf16.gmra.mxu2 %v7031_v17  ;;  %410 = vmatmul.bf16.gmra.mxu3 %v7031_v17 }
  0x60   :  { %1450 = vmatpush.bf16.msra.mxu2 %v8305_v22  ;;  %1463 = vmatpush.bf16.msra.mxu3 %v8308_v26 }
  0x61   :  { %1437 = vmatpush.bf16.msra.mxu1 %v8311_v32 }
  0x62   :  { %1425 = vmatpush.bf16.msra.mxu0 %v8327_v44 }
  0x64   :  { %1451 = vmatpush.bf16.msra.mxu2 %v8317_v34  ;;  %1464 = vmatpush.bf16.msra.mxu3 %v8320_v38 }
  0x65   :  { %1438 = vmatpush.bf16.msra.mxu1 %v8323_v39 }
  0x66   :  { %1426 = vmatpush.bf16.msra.mxu0 %v8339_v3 }
  0x68   :  { %1452 = vmatpush.bf16.msra.mxu2 %v8330_v51  ;;  %1465 = vmatpush.bf16.msra.mxu3 %v8332_v52 }
  0x69   :  { %1439 = vmatpush.bf16.msra.mxu1 %v8335_v63 }
  0x6a   :  { %1427 = vmatpush.bf16.msra.mxu0 %v8351_v15 }
  0x6c   :  { %1453 = vmatpush.bf16.msra.mxu2 %v8341_v4  ;;  %1466 = vmatpush.bf16.msra.mxu3 %v8344_v10 }
  0x6d   :  { %1440 = vmatpush.bf16.msra.mxu1 %v8347_v14  ;;  %666 = vmatmul.bf16.vlgmr.msrb.gmra.mxu0 %v497_v19 }
  0x6e   :  { %679 = vmatmul.bf16.vlgmr.msrb.gmra.mxu1 %v497_v19  ;;  %2150 = vmatpush.bf16.msrb.mxu0 %v8264_v48 }
  0x6f   :  { %692 = vmatmul.bf16.vlgmr.msrb.gmra.mxu2 %v497_v19  ;;  %705 = vmatmul.bf16.vlgmr.msrb.gmra.mxu3 %v497_v19 }
  0x70   :  { %2176 = vmatpush.bf16.msrb.mxu2 %v8257_v37  ;;  %2189 = vmatpush.bf16.msrb.mxu3 %v8259_v41 }
  0x71   :  { %2163 = vmatpush.bf16.msrb.mxu1 %v8261_v47 }
  0x72   :  { %2151 = vmatpush.bf16.msrb.mxu0 %v8276_v60 }
  0x74   :  { %2177 = vmatpush.bf16.msrb.mxu2 %v8266_v49  ;;  %2190 = vmatpush.bf16.msrb.mxu3 %v8269_v53 }
  0x75   :  { %2164 = vmatpush.bf16.msrb.mxu1 %v8272_v59 }
  0x76   :  { %2152 = vmatpush.bf16.msrb.mxu0 %v8288_v8 }
  0x78   :  { %2178 = vmatpush.bf16.msrb.mxu2 %v8278_v61  ;;  %2191 = vmatpush.bf16.msrb.mxu3 %v8281_v1 }
  0x79   :  { %2165 = vmatpush.bf16.msrb.mxu1 %v8284_v7 }
  0x7a   :  { %2153 = vmatpush.bf16.msrb.mxu0 %v8303_v21 }
  0x7c   :  { %2179 = vmatpush.bf16.msrb.mxu2 %v8290_v9  ;;  %2192 = vmatpush.bf16.msrb.mxu3 %v8293_v13 }
  0x7d   :  { %2166 = vmatpush.bf16.msrb.mxu1 %v8299_v20 }
  0x7e   :  { %2154 = vmatpush.bf16.msrb.mxu0 %v8315_v33 }
  0x80   :  { %2180 = vmatpush.bf16.msrb.mxu2 %v8305_v22  ;;  %2193 = vmatpush.bf16.msrb.mxu3 %v8308_v26 }
  0x81   :  { %2167 = vmatpush.bf16.msrb.mxu1 %v8311_v32 }
  0x82   :  { %2155 = vmatpush.bf16.msrb.mxu0 %v8327_v44 }
  0x84   :  { %2181 = vmatpush.bf16.msrb.mxu2 %v8317_v34  ;;  %2194 = vmatpush.bf16.msrb.mxu3 %v8320_v38 }
  0x85   :  { %2168 = vmatpush.bf16.msrb.mxu1 %v8323_v39 }
  0x86   :  { %2156 = vmatpush.bf16.msrb.mxu0 %v8339_v3 }
  0x88   :  { %2182 = vmatpush.bf16.msrb.mxu2 %v8330_v51  ;;  %2195 = vmatpush.bf16.msrb.mxu3 %v8332_v52 }
  0x89   :  { %2169 = vmatpush.bf16.msrb.mxu1 %v8335_v63 }
  0x8a   :  { %2157 = vmatpush.bf16.msrb.mxu0 %v8351_v15 }
  0x8c   :  { %2183 = vmatpush.bf16.msrb.mxu2 %v8341_v4  ;;  %2196 = vmatpush.bf16.msrb.mxu3 %v8344_v10 }
  0x8d   :  { %2170 = vmatpush.bf16.msrb.mxu1 %v8347_v14 }
  0xaa   :  { %v309_v27 = vpop.f32.mrf.mxu0 }
  0xab   :  { %v310_v28 = vadd.f32 %v309_v27, %v8432_v24  ;;  %v338_v29 = vpop.f32.mrf.mxu1 }
  0xac   :  { %v339_v30 = vadd.f32 %v338_v29, %v8434_v25 }
  0xad   :  { %416 = vst [vmem:[#allocation2] sm:$0xff] %v310_v28 }
  0xae   :  { %417 = vst [vmem:[#allocation2 + $0x8] sm:$0xff] %v339_v30 }
  0xb2   :  { %v367_v36 = vpop.f32.mrf.mxu2  ;;  %v396_v42 = vpop.f32.mrf.mxu3 }
  0xb3   :  { %v368_v40 = vadd.f32 %v367_v36, %v8438_v31  ;;  %v311_v43 = vpop.f32.mrf.mxu0  ;;  %v397_v45 = vadd.f32 %v396_v42, %v8440_v35  ;;  %v340_v50 = vpop.f32.mrf.mxu1 }
  0xb4   :  { %v312_v46 = vadd.f32 %v311_v43, %v8432_v24  ;;  %v341_v54 = vadd.f32 %v340_v50, %v8434_v25 }
  0xb5   :  { %418 = vst [vmem:[#allocation2 + $0x10] sm:$0xff] %v368_v40 }
  0xb6   :  { %419 = vst [vmem:[#allocation2 + $0x18] sm:$0xff] %v397_v45 }
  0xb7   :  { %420 = vst [vmem:[#allocation2 + $0x20] sm:$0xff] %v312_v46 }
  0xb8   :  { %421 = vst [vmem:[#allocation2 + $0x28] sm:$0xff] %v341_v54 }
  0xba   :  { %v369_v55 = vpop.f32.mrf.mxu2  ;;  %v398_v56 = vpop.f32.mrf.mxu3 }
  0xbb   :  { %v314_v57 = vpop.f32.mrf.mxu0  ;;  %v343_v58 = vpop.f32.mrf.mxu1  ;;  %v370_v62 = vadd.f32 %v369_v55, %v8438_v31  ;;  %v399_v0 = vadd.f32 %v398_v56, %v8440_v35 }
  0xbc   :  { %v315_v2 = vadd.f32 %v314_v57, %v8432_v24  ;;  %v344_v5 = vadd.f32 %v343_v58, %v8434_v25 }
  0xbd   :  { %422 = vst [vmem:[#allocation2 + $0x30] sm:$0xff] %v370_v62 }
  0xbe   :  { %423 = vst [vmem:[#allocation2 + $0x38] sm:$0xff] %v399_v0 }
  0xbf   :  { %424 = vst [vmem:[#allocation2 + $0x40] sm:$0xff] %v315_v2 }
  0xc0   :  { %425 = vst [vmem:[#allocation2 + $0x48] sm:$0xff] %v344_v5 }
  0xc2   :  { %v372_v6 = vpop.f32.mrf.mxu2  ;;  %v401_v12 = vpop.f32.mrf.mxu3 }
  0xc3   :  { %v373_v11 = vadd.f32 %v372_v6, %v8438_v31  ;;  %v316_v16 = vpop.f32.mrf.mxu0  ;;  %v402_v17 = vadd.f32 %v401_v12, %v8440_v35  ;;  %v345_v19 = vpop.f32.mrf.mxu1 }
  0xc4   :  { %v317_v18 = vadd.f32 %v316_v16, %v8432_v24  ;;  %v346_v23 = vadd.f32 %v345_v19, %v8434_v25 }
  0xc5   :  { %426 = vst [vmem:[#allocation2 + $0x50] sm:$0xff] %v373_v11 }
  0xc6   :  { %427 = vst [vmem:[#allocation2 + $0x58] sm:$0xff] %v402_v17 }
  0xc7   :  { %428 = vst [vmem:[#allocation2 + $0x60] sm:$0xff] %v317_v18 }
  0xc8   :  { %429 = vst [vmem:[#allocation2 + $0x68] sm:$0xff] %v346_v23 }
  0xca   :  { %v374_v27 = vpop.f32.mrf.mxu2  ;;  %v403_v28 = vpop.f32.mrf.mxu3 }
  0xcb   :  { %v319_v29 = vpop.f32.mrf.mxu0  ;;  %v348_v30 = vpop.f32.mrf.mxu1  ;;  %v375_v36 = vadd.f32 %v374_v27, %v8438_v31  ;;  %v404_v40 = vadd.f32 %v403_v28, %v8440_v35 }
  0xcc   :  { %v320_v42 = vadd.f32 %v319_v29, %v8432_v24  ;;  %v349_v43 = vadd.f32 %v348_v30, %v8434_v25 }
  0xcd   :  { %430 = vst [vmem:[#allocation2 + $0x70] sm:$0xff] %v375_v36 }
  0xce   :  { %431 = vst [vmem:[#allocation2 + $0x78] sm:$0xff] %v404_v40 }
  0xcf   :  { %432 = vst [vmem:[#allocation2 + $0x80] sm:$0xff] %v320_v42 }
  0xd0   :  { %433 = vst [vmem:[#allocation2 + $0x88] sm:$0xff] %v349_v43 }
  0xd2   :  { %v377_v45 = vpop.f32.mrf.mxu2  ;;  %v406_v50 = vpop.f32.mrf.mxu3 }
  0xd3   :  { %v378_v46 = vadd.f32 %v377_v45, %v8438_v31  ;;  %v321_v54 = vpop.f32.mrf.mxu0  ;;  %v407_v55 = vadd.f32 %v406_v50, %v8440_v35  ;;  %v350_v57 = vpop.f32.mrf.mxu1 }
  0xd4   :  { %v322_v56 = vadd.f32 %v321_v54, %v8432_v24  ;;  %v351_v58 = vadd.f32 %v350_v57, %v8434_v25 }
  0xd5   :  { %434 = vst [vmem:[#allocation2 + $0x90] sm:$0xff] %v378_v46 }
  0xd6   :  { %435 = vst [vmem:[#allocation2 + $0x98] sm:$0xff] %v407_v55 }
  0xd7   :  { %436 = vst [vmem:[#allocation2 + $0xa0] sm:$0xff] %v322_v56 }
  0xd8   :  { %437 = vst [vmem:[#allocation2 + $0xa8] sm:$0xff] %v351_v58 }
  0xda   :  { %v379_v62 = vpop.f32.mrf.mxu2  ;;  %v408_v0 = vpop.f32.mrf.mxu3 }
  0xdb   :  { %v324_v2 = vpop.f32.mrf.mxu0  ;;  %v353_v5 = vpop.f32.mrf.mxu1  ;;  %v380_v6 = vadd.f32 %v379_v62, %v8438_v31  ;;  %v409_v11 = vadd.f32 %v408_v0, %v8440_v35 }
  0xdc   :  { %v325_v12 = vadd.f32 %v324_v2, %v8432_v24  ;;  %v354_v16 = vadd.f32 %v353_v5, %v8434_v25 }
  0xdd   :  { %438 = vst [vmem:[#allocation2 + $0xb0] sm:$0xff] %v380_v6 }
  0xde   :  { %439 = vst [vmem:[#allocation2 + $0xb8] sm:$0xff] %v409_v11 }
  0xdf   :  { %440 = vst [vmem:[#allocation2 + $0xc0] sm:$0xff] %v325_v12 }
  0xe0   :  { %441 = vst [vmem:[#allocation2 + $0xc8] sm:$0xff] %v354_v16 }
  0xe2   :  { %v382_v17 = vpop.f32.mrf.mxu2  ;;  %v411_v19 = vpop.f32.mrf.mxu3 }
  0xe3   :  { %v383_v18 = vadd.f32 %v382_v17, %v8438_v31  ;;  %v326_v23 = vpop.f32.mrf.mxu0  ;;  %v412_v27 = vadd.f32 %v411_v19, %v8440_v35  ;;  %v355_v29 = vpop.f32.mrf.mxu1 }
  0xe4   :  { %v327_v28 = vadd.f32 %v326_v23, %v8432_v24  ;;  %v356_v30 = vadd.f32 %v355_v29, %v8434_v25 }
  0xe5   :  { %442 = vst [vmem:[#allocation2 + $0xd0] sm:$0xff] %v383_v18 }
  0xe6   :  { %443 = vst [vmem:[#allocation2 + $0xd8] sm:$0xff] %v412_v27 }
  0xe7   :  { %444 = vst [vmem:[#allocation2 + $0xe0] sm:$0xff] %v327_v28 }
  0xe8   :  { %445 = vst [vmem:[#allocation2 + $0xe8] sm:$0xff] %v356_v30 }
  0xea   :  { %v384_v36 = vpop.f32.mrf.mxu2  ;;  %v413_v40 = vpop.f32.mrf.mxu3 }
  0xeb   :  { %v667_v42 = vpop.f32.mrf.mxu0  ;;  %v680_v43 = vpop.f32.mrf.mxu1  ;;  %v385_v45 = vadd.f32 %v384_v36, %v8438_v31  ;;  %v414_v46 = vadd.f32 %v413_v40, %v8440_v35  ;;  %v482_v40 = vld [vmem:[#allocation2] ss:$8 sm:$0xf] }
  0xec   :  { %v714_v24 = vrot.slane %v680_v43, 7 }
  0xed   :  { %446 = vst [vmem:[#allocation2 + $0xf0] sm:$0xff] %v385_v45 }
  0xee   :  { %447 = vst [vmem:[#allocation2 + $0xf8] sm:$0xff] %v414_v46  ;;  %v718_v50 = vsel %vm16099_vm0, %v667_v42, %v714_v24  ;;  %v724_v31 = vsel %vm723_vm2, %v667_v42, %v714_v24  ;;  %v730_v35 = vsel %vm719_vm1, %v667_v42, %v714_v24  ;;  %v736_v54 = vsel %vm725_vm3, %v667_v42, %v714_v24 }
  0xef   :  { %v742_v57 = vsel %vm731_vm4, %v667_v42, %v714_v24  ;;  %v748_v58 = vsel %vm16115_vm5, %v667_v42, %v714_v24  ;;  %v754_v62 = vsel %vm16114_vm6, %v667_v42, %v714_v24  ;;  %v759_v0 = vsel %vm16098_vm7, %v714_v24, %v667_v42 }
  0xf2   :  { %v693_v25 = vpop.f32.mrf.mxu2  ;;  %v706_v55 = vpop.f32.mrf.mxu3 }
  0xf3   :  { %v669_v56 = vpop.f32.mrf.mxu0  ;;  %v682_v2 = vpop.f32.mrf.mxu1  ;;  %v715_v5 = vrot.slane %v693_v25, 6  ;;  %v716_v6 = vrot.slane %v706_v55, 5 }
  0xf4   :  { %v488_v2 = vld [vmem:[#allocation2 + $0x60] ss:$8 sm:$0xf] }
  0xf5   :  { %v720_v11 = vsel %vm719_vm1, %v715_v5, %v716_v6  ;;  %v726_v12 = vsel %vm725_vm3, %v715_v5, %v716_v6  ;;  %v732_v16 = vsel %vm731_vm4, %v715_v5, %v716_v6  ;;  %v738_v17 = vsel %vm16115_vm5, %v715_v5, %v716_v6 }
  0xf6   :  { %v722_v18 = vsel %vm16095_vm8, %v718_v50, %v720_v11  ;;  %v728_v19 = vsel %vm16084_vm9, %v724_v31, %v726_v12  ;;  %v734_v23 = vsel %vm16083_vm10, %v730_v35, %v732_v16  ;;  %v740_v27 = vsel %vm16080_vm11, %v736_v54, %v738_v17  ;;  %v484_v31 = vld [vmem:[#allocation2 + $0x20] ss:$8 sm:$0xf] }
  0xf7   :  { %v744_v28 = vsel %vm16114_vm6, %v715_v5, %v716_v6  ;;  %v750_v29 = vsel %vm16098_vm7, %v716_v6, %v715_v5  ;;  %v755_v30 = vsel %vm16099_vm0, %v715_v5, %v716_v6  ;;  %v760_v36 = vsel %vm723_vm2, %v715_v5, %v716_v6  ;;  %v486_v35 = vld [vmem:[#allocation2 + $0x40] ss:$8 sm:$0xf] }
  0xf8   :  { %v746_v42 = vsel %vm16079_vm12, %v742_v57, %v744_v28  ;;  %v752_v43 = vsel %vm16078_vm13, %v748_v58, %v750_v29  ;;  %v757_v45 = vsel %vm16077_vm14, %v755_v30, %v754_v62  ;;  %v762_v46 = vsel %vm16076_vm15, %v760_v36, %v759_v0  ;;  %v490_v16 = vld [vmem:[#allocation2 + $0x80] ss:$8 sm:$0xf] }
  0xf9   :  { %v8496_v25 = vadd.f32 %v722_v18, %v482_v40  ;;  %v729_v54 = vrot.slane %v728_v19, 1  ;;  %v735_v55 = vrot.slane %v734_v23, 2  ;;  %v741_v56 = vrot.slane %v740_v27, 3  ;;  %v492_v40 = vld [vmem:[#allocation2 + $0xa0] ss:$8 sm:$0xf] }
  0xfa   :  { %v695_v24 = vpop.f32.mrf.mxu2  ;;  %v708_v50 = vpop.f32.mrf.mxu3  ;;  %v747_v62 = vrot.slane %v746_v42, 4  ;;  %v753_v23 = vrot.slane %v752_v43, 5  ;;  %v758_v29 = vrot.slane %v757_v45, 6 }
  0xfb   :  { %v6836_v5 = vmul.f32 -1.442695, %v8496_v25  ;;  %v8499_v6 = vadd.f32 %v729_v54, %v484_v31  ;;  %v8501_v57 = vadd.f32 %v735_v55, %v486_v35  ;;  %v8503_v58 = vadd.f32 %v741_v56, %v488_v2  ;;  %v494_v50 = vld [vmem:[#allocation2 + $0xc0] ss:$8 sm:$0xf] }
  0xfc   :  { %v8508_v17 = vadd.f32 %v747_v62, %v490_v16  ;;  %v940_v36 = vrot.slane %v8496_v25, 1  ;;  %v8516_v31 = vadd.f32 %v753_v23, %v492_v40  ;;  %v8520_v54 = vadd.f32 %v758_v29, %v494_v50 }
  0xfd   :  { %v6837_v0 = vmul.f32 -1.442695, %v8499_v6  ;;  %v6838_v11 = vmul.f32 -1.442695, %v8501_v57  ;;  %7123 = vpow2.f32 %v6836_v5  ;;  %v6839_v12 = vmul.f32 -1.442695, %v8503_v58 }
  0xfe   :  { %v6840_v27 = vmul.f32 -1.442695, %v8508_v17  ;;  %v941_v43 = vrot.slane %v8499_v6, 1  ;;  %v6844_v45 = vmul.f32 -1.442695, %v940_v36  ;;  %v763_v55 = vrot.slane %v762_v46, 7 }
  0xff   :  { %7125 = vpow2.f32 %v6837_v0  ;;  %v6841_v2 = vmul.f32 -1.442695, %v8516_v31  ;;  %v6842_v5 = vmul.f32 -1.442695, %v8520_v54  ;;  %v943_v46 = vrot.slane %v8503_v58, 1 }
 0x100   :  { %7127 = vpow2.f32 %v6838_v11  ;;  %v496_v0 = vld [vmem:[#allocation2 + $0xe0] ss:$8 sm:$0xf]  ;;  %v942_v11 = vrot.slane %v8501_v57, 1  ;;  %v945_v23 = vrot.slane %v8516_v31, 1 }
 0x101   :  { %7129 = vpow2.f32 %v6839_v12  ;;  %v6845_v12 = vmul.f32 -1.442695, %v941_v43  ;;  %v8531_v16 = vadd.f32 %v763_v55, %v496_v0  ;;  %v6847_v50 = vmul.f32 -1.442695, %v943_v46 }
 0x102   :  { %7131 = vpow2.f32 %v6840_v27  ;;  %v946_v27 = vrot.slane %v8520_v54, 1  ;;  %v6846_v40 = vmul.f32 -1.442695, %v942_v11  ;;  %v1132_v43 = vrot.slane %v8496_v25, 3 }
 0x103   :  { %v7124_v18 = vpop.eup %7123  ;;  %v6849_v0 = vmul.f32 -1.442695, %v945_v23  ;;  %v1133_v11 = vrot.slane %v8499_v6, 3  ;;  %v1109_v23 = vrot.slane %v8499_v6, 2 }
 0x104   :  { %v8511_v30 = vadd.f32 1.0, %v7124_v18  ;;  %v6850_v10 = vmul.f32 -1.442695, %v946_v27  ;;  %v8562_v14 = vmul.f32 -1.442695, %v1132_v43 }
 0x105   :  { %v7126_v19 = vpop.eup %7125 }
 0x106   :  { %v7128_v28 = vpop.eup %7127  ;;  %v8514_v42 = vadd.f32 1.0, %v7126_v19  ;;  %7133 = vrcp.f32 %v8511_v30  ;;  %v944_v19 = vrot.slane %v8508_v17, 1  ;;  %v823_v52 = vand.u32 2147483648, %v8511_v30 }
 0x107   :  { %v7130_v24 = vpop.eup %7129  ;;  %v8518_v35 = vadd.f32 1.0, %v7128_v28  ;;  %vm817_vm15 = vweird.f32 %v8511_v30 }
 0x108   :  { %v8524_v56 = vadd.f32 1.0, %v7130_v24  ;;  %7135 = vrcp.f32 %v8514_v42  ;;  %v7132_v62 = vpop.eup %7131  ;;  %vm832_vm14 = vweird.f32 %v8514_v42  ;;  %v838_v27 = vand.u32 2147483648, %v8514_v42 }
 0x109   :  { %7137 = vrcp.f32 %v8518_v35  ;;  %v8542_v29 = vadd.f32 1.0, %v7132_v62  ;;  %vm847_vm10 = vweird.f32 %v8518_v35 }
 0x10a   :  { %7139 = vpow2.f32 %v6844_v45 }
 0x10b   :  { %7141 = vrcp.f32 %v8524_v56 }
 0x10c   :  { %v8535_v18 = vpop.eup %7133  ;;  %7143 = vpow2.f32 %v6841_v2  ;;  %v6848_v2 = vmul.f32 -1.442695, %v944_v19  ;;  %v1108_v19 = vrot.slane %v8496_v25, 2  ;;  %v8569_v25 = vmul.f32 -1.442695, %v1133_v11 }
 0x10d   :  { %7145 = vpow2.f32 %v6842_v5  ;;  %v813_v45 = vmul.f32 %v8535_v18, %v8511_v30  ;;  %vm818_vm13 = vweird.f32 %v8535_v18 }
 0x10e   :  { %v8540_v28 = vpop.eup %7135  ;;  %7147 = vpow2.f32 %v6845_v12  ;;  %v6843_v12 = vmul.f32 -1.442695, %v8531_v16  ;;  %vm8629_vm7 = vmor %vm817_vm15, %vm818_vm13 }
 0x10f   :  { %v8544_v36 = vpop.eup %7137  ;;  %v828_v5 = vmul.f32 %v8540_v28, %v8514_v42  ;;  %7149 = vrcp.f32 %v8542_v29  ;;  %v814_v15 = vsub.f32 1.0, %v813_v45  ;;  %v821_v45 = vand.u32 2147483647, %v8511_v30 }
 0x110   :  { %v7140_v55 = vpop.eup %7139  ;;  %v843_v46 = vmul.f32 %v8544_v36, %v8518_v35  ;;  %7151 = vpow2.f32 %v6846_v40  ;;  %vm833_vm9 = vweird.f32 %v8540_v28  ;;  %vm848_vm8 = vweird.f32 %v8544_v36 }
 0x111   :  { %v8552_v62 = vpop.eup %7141  ;;  %7153 = vpow2.f32 %v6847_v50  ;;  %v8565_v63 = vadd.f32 1.0, %v7140_v55  ;;  %v829_v3 = vsub.f32 1.0, %v828_v5  ;;  %v836_v55 = vand.u32 2147483647, %v8514_v42  ;;  %vm8647_vm13 = vmor %vm832_vm14, %vm833_vm9 }
 0x112   :  { %v7144_v24 = vpop.eup %7143  ;;  %7155 = vpow2.f32 %v6848_v2  ;;  %v858_v40 = vmul.f32 %v8552_v62, %v8524_v56  ;;  %v844_v50 = vsub.f32 1.0, %v843_v46  ;;  %v815_v11 = vmul.f32 %v8535_v18, %v814_v15 }
 0x113   :  { %v7146_v4 = vpop.eup %7145  ;;  %7157 = vpow2.f32 %v6843_v12  ;;  %v8571_v6 = vadd.f32 1.0, %v7144_v24  ;;  %v824_v12 = vor.u32 1.1754944e-38, %v823_v52  ;;  %vm8590_vm12 = vcmp.eq.f32.partialorder %v821_v45, 8.507059e+37 }
 0x114   :  { %v7148_v51 = vpop.eup %7147  ;;  %7159 = vpow2.f32 %v6849_v0  ;;  %v8574_v43 = vadd.f32 1.0, %v7146_v4  ;;  %v830_v4 = vmul.f32 %v8540_v28, %v829_v3  ;;  %v859_v0 = vsub.f32 1.0, %v858_v40 }
 0x115   :  { %v8578_v2 = vpop.eup %7149  ;;  %7161 = vpow2.f32 %v6850_v10  ;;  %v8580_v5 = vadd.f32 1.0, %v7148_v51  ;;  %v845_v10 = vmul.f32 %v8544_v36, %v844_v50  ;;  %vm8594_vm11 = vcmp.eq.f32.partialorder %v836_v55, 8.507059e+37 }
 0x116   :  { %v7152_v24 = vpop.eup %7151  ;;  %7163 = vrcp.f32 %v8565_v63  ;;  %v851_v52 = vand.u32 2147483647, %v8518_v35  ;;  %v853_v3 = vand.u32 2147483648, %v8518_v35  ;;  %v816_v45 = vadd.f32 %v8535_v18, %v815_v11 }
 0x117   :  { %v7154_v46 = vpop.eup %7153  ;;  %7165 = vrcp.f32 %v8571_v6  ;;  %v8602_v50 = vadd.f32 1.0, %v7152_v24  ;;  %v831_v39 = vadd.f32 %v8540_v28, %v830_v4  ;;  %v860_v44 = vmul.f32 %v8552_v62, %v859_v0 }
 0x118   :  { %v7156_v51 = vpop.eup %7155  ;;  %7167 = vrcp.f32 %v8574_v43  ;;  %v873_v26 = vmul.f32 %v8578_v2, %v8542_v29  ;;  %v8617_v24 = vadd.f32 1.0, %v7154_v46  ;;  %v846_v11 = vadd.f32 %v8544_v36, %v845_v10 }
 0x119   :  { %v7158_v40 = vpop.eup %7157  ;;  %7169 = vrcp.f32 %v8580_v5  ;;  %v839_v0 = vor.u32 1.1754944e-38, %v838_v27  ;;  %vm8633_vm0 = vcmp.eq.f32.partialorder %v851_v52, 8.507059e+37  ;;  %v854_v27 = vor.u32 1.1754944e-38, %v853_v3 }
 0x11a   :  { %v8607_v55 = vpop.eup %7159  ;;  %v8609_v34 = vadd.f32 1.0, %v7158_v40  ;;  %7171 = vtanh.f32 %v1108_v19  ;;  %v8623_v40 = vadd.f32 1.0, %v7156_v51  ;;  %vm863_vm15 = vweird.f32 %v8552_v62 }
 0x11b   :  { %v8615_v22 = vpop.eup %7161  ;;  %7173 = vtanh.f32 %v1109_v23  ;;  %v820_v23 = vsel %vm8629_vm7, %v8535_v18, %v816_v45  ;;  %v835_v51 = vsel %vm8647_vm13, %v8540_v28, %v831_v39  ;;  %vm8661_vm7 = vmor %vm847_vm10, %vm848_vm8  ;;  %v861_v42 = vadd.f32 %v8552_v62, %v860_v44 }
 0x11c   :  { %v8621_v32 = vpop.eup %7163  ;;  %7175 = vrcp.f32 %v8602_v50  ;;  %v874_v52 = vsub.f32 1.0, %v873_v26  ;;  %v850_v39 = vsel %vm8661_vm7, %v8544_v36, %v846_v11  ;;  %v866_v28 = vand.u32 2147483647, %v8524_v56 }
 0x11d   :  { %v8637_v46 = vpop.eup %7165  ;;  %7177 = vrcp.f32 %v8609_v34  ;;  %v868_v35 = vand.u32 2147483648, %v8524_v56  ;;  %vm862_vm8 = vweird.f32 %v8524_v56  ;;  %v989_v44 = vmul.f32 %v8621_v32, %v8565_v63 }
 0x11e   :  { %v8652_v10 = vpop.eup %7167  ;;  %7179 = vrcp.f32 %v8617_v24  ;;  %v888_v26 = vmul.f32 %v8637_v46, %v8571_v6  ;;  %v8686_v36 = vsel %vm8590_vm12, %v824_v12, %v820_v23  ;;  %v8690_v11 = vsel %vm8594_vm11, %v839_v0, %v835_v51  ;;  %vm8694_vm9 = vmor %vm862_vm8, %vm863_vm15 }
 0x11f   :  { %v8667_v3 = vpop.eup %7169  ;;  %7181 = vrcp.f32 %v8623_v40  ;;  %v903_v4 = vmul.f32 %v8652_v10, %v8574_v43  ;;  %v865_v38 = vsel %vm8694_vm9, %v8552_v62, %v861_v42  ;;  %v875_v12 = vmul.f32 %v8578_v2, %v874_v52 }
 0x120   :  { %v8681_v45 = vpop.eup %7171  ;;  %7183 = vpow2.f32 %v8562_v14  ;;  %v8705_v14 = vsel %vm8633_vm0, %v854_v27, %v850_v39  ;;  %vm867_vm10 = vcmp.eq.f32.partialorder %v866_v28, 8.507059e+37  ;;  %v869_v0 = vor.u32 1.1754944e-38, %v868_v35 }
 0x121   :  { %v8700_v30 = vpop.eup %7173  ;;  %7185 = vpow2.f32 %v8569_v25  ;;  %v881_v23 = vand.u32 2147483647, %v8542_v29  ;;  %v883_v51 = vand.u32 2147483648, %v8542_v29  ;;  %vm877_vm11 = vweird.f32 %v8542_v29 }
 0x122   :  { %v8711_v15 = vpop.eup %7175  ;;  %v889_v25 = vsub.f32 1.0, %v888_v26  ;;  %v16189_v19 = vrot.slane %v8531_v16, 1  ;;  %v990_v39 = vsub.f32 1.0, %v989_v44  ;;  %v8722_v42 = vsel %vm867_vm10, %v869_v0, %v865_v38 }
 0x123   :  { %v8715_v18 = vpop.eup %7177  ;;  %vm878_vm0 = vweird.f32 %v8578_v2  ;;  %v898_v52 = vand.u32 2147483648, %v8571_v6  ;;  %v904_v28 = vsub.f32 1.0, %v903_v4  ;;  %v876_v56 = vadd.f32 %v8578_v2, %v875_v12 }
 0x124   :  { %v6851_v27 = vmul.f32 -1.442695, %v16189_v19  ;;  %v8720_v62 = vpop.eup %7179  ;;  %vm892_vm12 = vweird.f32 %v8571_v6  ;;  %v896_v26 = vand.u32 2147483647, %v8571_v6  ;;  %v913_v19 = vand.u32 2147483648, %v8574_v43  ;;  %vm8752_vm15 = vmor %vm877_vm11, %vm878_vm0 }
 0x125   :  { %v8726_v35 = vpop.eup %7181  ;;  %v1004_v44 = vmul.f32 %v8667_v3, %v8580_v5  ;;  %vm8736_vm14 = vcmp.eq.f32.partialorder %v881_v23, 8.507059e+37  ;;  %v884_v4 = vor.u32 1.1754944e-38, %v883_v51  ;;  %v911_v33 = vand.u32 2147483647, %v8574_v43 }
 0x126   :  { %v8734_v38 = vpop.eup %7183  ;;  %v918_v12 = vmul.f32 %v8715_v18, %v8609_v34  ;;  %v890_v9 = vmul.f32 %v8637_v46, %v889_v25  ;;  %vm907_vm13 = vweird.f32 %v8574_v43  ;;  %7187 = vpow2.f32 %v6851_v27 }
 0x127   :  { %v8743_v13 = vpop.eup %7185  ;;  %v991_v20 = vmul.f32 %v8621_v32, %v990_v39  ;;  %v899_v51 = vor.u32 1.1754944e-38, %v898_v52  ;;  %v905_v21 = vmul.f32 %v8652_v10, %v904_v28  ;;  %v8758_v1 = vadd.f32 1.0, %v8607_v55 }
 0x128   :  { %v8761_v25 = vadd.f32 1.0, %v8615_v22  ;;  %v880_v27 = vsel %vm8752_vm15, %v8578_v2, %v876_v56  ;;  %vm8766_vm7 = vcmp.eq.f32.partialorder %v896_v26, 8.507059e+37  ;;  %v914_v29 = vor.u32 1.1754944e-38, %v913_v19 }
 0x129   :  { %v1005_v61 = vsub.f32 1.0, %v1004_v44  ;;  %v1019_v52 = vmul.f32 %v8711_v15, %v8602_v50  ;;  %vm8772_vm8 = vcmp.eq.f32.partialorder %v911_v33, 8.507059e+37  ;;  %v919_v55 = vsub.f32 1.0, %v918_v12 }
 0x12a   :  { %v928_v22 = vand.u32 2147483648, %v8609_v34  ;;  %vm994_vm9 = vweird.f32 %v8621_v32  ;;  %v997_v2 = vand.u32 2147483647, %v8565_v63  ;;  %v891_v56 = vadd.f32 %v8637_v46, %v890_v9 }
 0x12b   :  { %vm893_vm10 = vweird.f32 %v8637_v46  ;;  %v992_v26 = vadd.f32 %v8621_v32, %v991_v20  ;;  %vm993_vm11 = vweird.f32 %v8565_v63  ;;  %v906_v33 = vadd.f32 %v8652_v10, %v905_v21 }
 0x12c   :  { %vm908_vm0 = vweird.f32 %v8652_v10  ;;  %v926_v19 = vand.u32 2147483647, %v8609_v34  ;;  %v999_v44 = vand.u32 2147483648, %v8565_v63  ;;  %v7188_v12 = vpop.eup %7187  ;;  %v8789_v23 = vsel %vm8736_vm14, %v884_v4, %v880_v27  ;;  %vm8792_vm6 = vmor %vm993_vm11, %vm994_vm9 }
 0x12d   :  { %vm922_vm15 = vweird.f32 %v8609_v34  ;;  %v1006_v20 = vmul.f32 %v8667_v3, %v1005_v61  ;;  %v1020_v21 = vsub.f32 1.0, %v1019_v52  ;;  %vm8799_vm5 = vmor %vm892_vm12, %vm893_vm10  ;;  %v920_v63 = vmul.f32 %v8715_v18, %v919_v55 }
 0x12e   :  { %v929_v0 = vor.u32 1.1754944e-38, %v928_v22  ;;  %vm8804_vm14 = vcmp.eq.f32.partialorder %v997_v2, 8.507059e+37  ;;  %v1012_v27 = vand.u32 2147483647, %v8580_v5  ;;  %v895_v61 = vsel %vm8799_vm5, %v8637_v46, %v891_v56  ;;  %vm8816_vm12 = vmor %vm907_vm13, %vm908_vm0 }
 0x12f   :  { %v996_v52 = vsel %vm8792_vm6, %v8621_v32, %v992_v26  ;;  %vm1008_vm9 = vweird.f32 %v8580_v5  ;;  %v1034_v55 = vmul.f32 %v8720_v62, %v8617_v24  ;;  %v910_v7 = vsel %vm8816_vm12, %v8652_v10, %v906_v33 }
 0x130   :  { %vm8829_vm5 = vcmp.eq.f32.partialorder %v926_v19, 8.507059e+37  ;;  %v8833_v43 = vadd.f32 1.0, %v7188_v12  ;;  %v1000_v22 = vor.u32 1.1754944e-38, %v999_v44  ;;  %v1014_v2 = vand.u32 2147483648, %v8580_v5 }
 0x131   :  { %vm923_vm6 = vweird.f32 %v8715_v18  ;;  %v1007_v32 = vadd.f32 %v8667_v3, %v1006_v20  ;;  %vm1009_vm13 = vweird.f32 %v8667_v3  ;;  %v1021_v56 = vmul.f32 %v8711_v15, %v1020_v21 }
 0x132   :  { %v8842_v10 = vsel %vm8766_vm7, %v899_v51, %v895_v61  ;;  %v921_v26 = vadd.f32 %v8715_v18, %v920_v63  ;;  %v8847_v33 = vsel %vm8804_vm14, %v1000_v22, %v996_v52  ;;  %vm8849_vm10 = vcmp.eq.f32.partialorder %v1012_v27, 8.507059e+37  ;;  %vm8862_vm7 = vmor %vm1008_vm9, %vm1009_vm13 }
 0x133   :  { %v8855_v44 = vsel %vm8772_vm8, %v914_v29, %v910_v7  ;;  %v1035_v12 = vsub.f32 1.0, %v1034_v55  ;;  %v1049_v39 = vmul.f32 %v8726_v35, %v8623_v40  ;;  %7189 = vrcp.f32 %v8758_v1  ;;  %vm8873_vm8 = vmor %vm922_vm15, %vm923_vm6 }
 0x134   :  { %v1015_v9 = vor.u32 1.1754944e-38, %v1014_v2  ;;  %v1027_v20 = vand.u32 2147483647, %v8602_v50  ;;  %v1029_v21 = vand.u32 2147483648, %v8602_v50  ;;  %7191 = vrcp.f32 %v8761_v25 }
 0x135   :  { %v1011_v5 = vsel %vm8862_vm7, %v8667_v3, %v1007_v32  ;;  %v1022_v28 = vadd.f32 %v8711_v15, %v1021_v56  ;;  %vm1024_vm11 = vweird.f32 %v8711_v15  ;;  %v1042_v63 = vand.u32 2147483647, %v8617_v24 }
 0x136   :  { %v925_v4 = vsel %vm8873_vm8, %v8715_v18, %v921_v26  ;;  %vm1023_vm0 = vweird.f32 %v8602_v50  ;;  %vm1038_vm15 = vweird.f32 %v8617_v24  ;;  %v1135_v34 = vrot.slane %v8503_v58, 3 }
 0x137   :  { %v1036_v27 = vmul.f32 %v8720_v62, %v1035_v12  ;;  %v1044_v3 = vand.u32 2147483648, %v8617_v24  ;;  %v1050_v61 = vsub.f32 1.0, %v1049_v39  ;;  %7193 = vrcp.f32 %v8833_v43  ;;  %vm8896_vm14 = vmor %vm1023_vm0, %vm1024_vm11 }
 0x138   :  { %v8894_v6 = vsel %vm8849_vm10, %v1015_v9, %v1011_v5  ;;  %vm8900_vm12 = vcmp.eq.f32.partialorder %v1027_v20, 8.507059e+37  ;;  %v1030_v18 = vor.u32 1.1754944e-38, %v1029_v21  ;;  %v1136_v55 = vrot.slane %v8508_v17, 3 }
 0x139   :  { %v8905_v7 = vpop.eup %7189  ;;  %v8909_v22 = vsel %vm8829_vm5, %v929_v0, %v925_v4  ;;  %v1026_v2 = vsel %vm8896_vm14, %v8711_v15, %v1022_v28  ;;  %vm1039_vm9 = vweird.f32 %v8720_v62  ;;  %vm8915_vm6 = vcmp.eq.f32.partialorder %v1042_v63, 8.507059e+37 }
 0x13a   :  { %v8919_v56 = vpop.eup %7191  ;;  %vm1053_vm13 = vweird.f32 %v8623_v40  ;;  %v1137_v26 = vrot.slane %v8516_v31, 3  ;;  %v16220_v46 = vrot.slane %v8501_v57, 3  ;;  %v6855_v19 = vmul.f32 -1.442695, %v1135_v34  ;;  %vm8945_vm10 = vmor %vm1038_vm15, %vm1039_vm9 }
 0x13b   :  { %v1037_v12 = vadd.f32 %v8720_v62, %v1036_v27  ;;  %v1045_v39 = vor.u32 1.1754944e-38, %v1044_v3  ;;  %v1051_v15 = vmul.f32 %v8726_v35, %v1050_v61  ;;  %vm1054_vm5 = vweird.f32 %v8726_v35 }
 0x13c   :  { %v6854_v0 = vmul.f32 -1.442695, %v16220_v46  ;;  %v8930_v51 = vsel %vm8900_vm12, %v1030_v18, %v1026_v2  ;;  %v1057_v9 = vand.u32 2147483647, %v8623_v40  ;;  %v1064_v20 = vmul.f32 %v8905_v7, %v8758_v1  ;;  %vm8976_vm8 = vmor %vm1053_vm13, %vm1054_vm5 }
 0x13d   :  { %v6856_v21 = vmul.f32 -1.442695, %v1136_v55  ;;  %v8935_v29 = vpop.eup %7193  ;;  %v1059_v5 = vand.u32 2147483648, %v8623_v40  ;;  %v1079_v28 = vmul.f32 %v8919_v56, %v8761_v25  ;;  %v1138_v63 = vrot.slane %v8520_v54, 3 }
 0x13e   :  { %7195 = vpow2.f32 %v6854_v0  ;;  %v1072_v34 = vand.u32 2147483647, %v8758_v1  ;;  %v1074_v27 = vand.u32 2147483648, %v8758_v1  ;;  %v6857_v3 = vmul.f32 -1.442695, %v1137_v26 }
 0x13f   :  { %7197 = vpow2.f32 %v6855_v19  ;;  %v1041_v61 = vsel %vm8945_vm10, %v8720_v62, %v1037_v12  ;;  %v1052_v52 = vadd.f32 %v8726_v35, %v1051_v15  ;;  %v8956_v50 = vadd.f32 1.0, %v8734_v38 }
 0x140   :  { %7199 = vpow2.f32 %v6856_v21  ;;  %vm8958_vm7 = vcmp.eq.f32.partialorder %v1057_v9, 8.507059e+37  ;;  %v1065_v18 = vsub.f32 1.0, %v1064_v20  ;;  %v1094_v55 = vmul.f32 %v8935_v29, %v8833_v43 }
 0x141   :  { %v8965_v2 = vadd.f32 1.0, %v8743_v13  ;;  %v1060_v26 = vor.u32 1.1754944e-38, %v1059_v5  ;;  %v1080_v46 = vsub.f32 1.0, %v1079_v28  ;;  %v1139_v62 = vrot.slane %v8531_v16, 3 }
 0x142   :  { %v6858_v0 = vmul.f32 -1.442695, %v1138_v63  ;;  %v8970_v38 = vsel %vm8915_vm6, %v1045_v39, %v1041_v61  ;;  %vm1068_vm11 = vweird.f32 %v8758_v1  ;;  %v8981_v13 = vor.u32 1.1754944e-38, %v1074_v27 }
 0x143   :  { %v1087_v12 = vand.u32 2147483647, %v8761_v25  ;;  %7201 = vpow2.f32 %v6857_v3  ;;  %v1056_v32 = vsel %vm8976_vm8, %v8726_v35, %v1052_v52  ;;  %vm1083_vm0 = vweird.f32 %v8761_v25 }
 0x144   :  { %v7196_v15 = vpop.eup %7195  ;;  %v1089_v40 = vand.u32 2147483648, %v8761_v25  ;;  %v1110_v39 = vrot.slane %v8501_v57, 2  ;;  %7203 = vrcp.f32 %v8956_v50  ;;  %v1066_v20 = vmul.f32 %v8905_v7, %v1065_v18 }
 0x145   :  { %v7198_v9 = vpop.eup %7197  ;;  %v1095_v21 = vsub.f32 1.0, %v1094_v55  ;;  %v8992_v5 = vadd.f32 1.0, %v7196_v15  ;;  %7205 = vrcp.f32 %v8965_v2  ;;  %v1081_v63 = vmul.f32 %v8919_v56, %v1080_v46 }
 0x146   :  { %v7200_v28 = vpop.eup %7199  ;;  %7207 = vpow2.f32 %v6858_v0  ;;  %v6859_v35 = vmul.f32 -1.442695, %v1139_v62  ;;  %v8996_v4 = vadd.f32 1.0, %v7198_v9  ;;  %v9000_v57 = vsel %vm8958_vm7, %v1060_v26, %v1056_v32 }
 0x147   :  { %vm9002_vm15 = vcmp.eq.f32.partialorder %v1072_v34, 8.507059e+37  ;;  %vm1098_vm14 = vweird.f32 %v8833_v43  ;;  %v1102_v3 = vand.u32 2147483647, %v8833_v43  ;;  %v1111_v61 = vrot.slane %v8503_v58, 2 }
 0x148   :  { %7209 = vrcp.f32 %v8992_v5  ;;  %vm1069_vm12 = vweird.f32 %v8905_v7  ;;  %vm9011_vm9 = vcmp.eq.f32.partialorder %v1087_v12, 8.507059e+37  ;;  %v1104_v24 = vand.u32 2147483648, %v8833_v43 }
 0x149   :  { %v1112_v34 = vrot.slane %v8508_v17, 2  ;;  %7211 = vtanh.f32 %v1110_v39  ;;  %v7202_v18 = vpop.eup %7201  ;;  %v1067_v55 = vadd.f32 %v8905_v7, %v1066_v20  ;;  %v1096_v26 = vmul.f32 %v8935_v29, %v1095_v21  ;;  %vm9036_vm13 = vmor %vm1068_vm11, %vm1069_vm12 }
 0x14a   :  { %v9019_v46 = vadd.f32 1.0, %v7200_v28  ;;  %7213 = vrcp.f32 %v8996_v4  ;;  %v9022_v58 = vpop.eup %7203  ;;  %v1082_v62 = vadd.f32 %v8919_v56, %v1081_v63  ;;  %vm1084_vm6 = vweird.f32 %v8919_v56 }
 0x14b   :  { %v1113_v0 = vrot.slane %v8516_v31, 2  ;;  %7215 = vpow2.f32 %v6859_v35  ;;  %v9027_v17 = vpop.eup %7205  ;;  %v1090_v19 = vor.u32 1.1754944e-38, %v1089_v40  ;;  %v1114_v12 = vrot.slane %v8520_v54, 2  ;;  %vm9056_vm10 = vmor %vm1083_vm0, %vm1084_vm6 }
 0x14c   :  { %7217 = vtanh.f32 %v1111_v61  ;;  %v1181_v15 = vmul.f32 %v9022_v58, %v8956_v50  ;;  %v7208_v32 = vpop.eup %7207  ;;  %vm9040_vm5 = vcmp.eq.f32.partialorder %v1102_v3, 8.507059e+37  ;;  %v1115_v40 = vrot.slane %v8531_v16, 2 }
 0x14d   :  { %7219 = vtanh.f32 %v1112_v34  ;;  %v1196_v54 = vmul.f32 %v9027_v17, %v8965_v2  ;;  %v1071_v1 = vsel %vm9036_vm13, %v8905_v7, %v1067_v55  ;;  %v1097_v16 = vadd.f32 %v8935_v29, %v1096_v26 }
 0x14e   :  { %v9047_v9 = vpop.eup %7209  ;;  %vm1099_vm7 = vweird.f32 %v8935_v29  ;;  %7221 = vrcp.f32 %v9019_v46  ;;  %v1086_v7 = vsel %vm9056_vm10, %v8919_v56, %v1082_v62  ;;  %v1105_v28 = vor.u32 1.1754944e-38, %v1104_v24 }
 0x14f   :  { %v9063_v21 = vpop.eup %7211  ;;  %7223 = vtanh.f32 %v1113_v0  ;;  %v1182_v63 = vsub.f32 1.0, %v1181_v15  ;;  %v9070_v35 = vadd.f32 1.0, %v7202_v18  ;;  %v1197_v3 = vsub.f32 1.0, %v1196_v54  ;;  %vm9081_vm8 = vmor %vm1098_vm14, %vm1099_vm7 }
 0x150   :  { %v9068_v25 = vpop.eup %7213  ;;  %7225 = vtanh.f32 %v1114_v12  ;;  %v1211_v61 = vmul.f32 %v9047_v9, %v8992_v5  ;;  %v9077_v55 = vsel %vm9002_vm15, %v8981_v13, %v1071_v1  ;;  %v9085_v24 = vadd.f32 1.0, %v7208_v32 }
 0x151   :  { %v7216_v34 = vpop.eup %7215  ;;  %7227 = vtanh.f32 %v1115_v40  ;;  %v1189_v18 = vand.u32 2147483647, %v8956_v50  ;;  %v9092_v62 = vsel %vm9011_vm9, %v1090_v19, %v1086_v7  ;;  %v1101_v13 = vsel %vm9081_vm8, %v8935_v29, %v1097_v16 }
 0x152   :  { %v9088_v26 = vpop.eup %7217  ;;  %v1191_v43 = vand.u32 2147483648, %v8956_v50  ;;  %v1204_v27 = vand.u32 2147483647, %v8965_v2  ;;  %v1183_v12 = vmul.f32 %v9022_v58, %v1182_v63  ;;  %vm1185_vm11 = vweird.f32 %v8956_v50 }
 0x153   :  { %v9099_v0 = vpop.eup %7219  ;;  %vm1200_vm0 = vweird.f32 %v8965_v2  ;;  %v1226_v52 = vmul.f32 %v9068_v25, %v8996_v4  ;;  %v9108_v15 = vadd.f32 1.0, %v7216_v34  ;;  %v1198_v29 = vmul.f32 %v9027_v17, %v1197_v3 }
 0x154   :  { %v9106_v19 = vpop.eup %7221  ;;  %v1212_v32 = vsub.f32 1.0, %v1211_v61  ;;  %7229 = vrcp.f32 %v9070_v35  ;;  %v9116_v40 = vsel %vm9040_vm5, %v1105_v28, %v1101_v13  ;;  %vm9118_vm15 = vcmp.eq.f32.partialorder %v1189_v18, 8.507059e+37 }
 0x155   :  { %v9112_v39 = vpop.eup %7223  ;;  %v1206_v1 = vand.u32 2147483648, %v8965_v2  ;;  %7231 = vrcp.f32 %v9085_v24  ;;  %v1192_v16 = vor.u32 1.1754944e-38, %v1191_v43  ;;  %vm9126_vm14 = vcmp.eq.f32.partialorder %v1204_v27, 8.507059e+37 }
 0x156   :  { %v9124_v20 = vpop.eup %7225  ;;  %v1221_v63 = vand.u32 2147483648, %v8992_v5  ;;  %v1236_v31 = vand.u32 2147483648, %v8996_v4  ;;  %v1184_v3 = vadd.f32 %v9022_v58, %v1183_v12  ;;  %vm1186_vm12 = vweird.f32 %v9022_v58 }
 0x157   :  { %v9132_v28 = vpop.eup %7227  ;;  %v1227_v61 = vsub.f32 1.0, %v1226_v52  ;;  %v1241_v34 = vmul.f32 %v9106_v19, %v9019_v46  ;;  %v1199_v56 = vadd.f32 %v9027_v17, %v1198_v29  ;;  %vm1201_vm9 = vweird.f32 %v9027_v17  ;;  %v9150_v52 = vld [vmem:[%s16056_s5] sm:$0xff]  ;;  %vm9154_vm13 = vmor %vm1185_vm11, %vm1186_vm12 }
 0x158   :  { %v1213_v18 = vmul.f32 %v9047_v9, %v1212_v32  ;;  %7233 = vrcp.f32 %v9108_v15  ;;  %v1207_v13 = vor.u32 1.1754944e-38, %v1206_v1  ;;  %vm1215_vm6 = vweird.f32 %v8992_v5  ;;  %vm9173_vm5 = vmor %vm1200_vm0, %vm1201_vm9 }
 0x159   :  { %v1219_v43 = vand.u32 2147483647, %v8992_v5  ;;  %v1251_v27 = vand.u32 2147483648, %v9019_v46  ;;  %v9158_v32 = vor.u32 1.1754944e-38, %v1221_v63  ;;  %v1234_v1 = vand.u32 2147483647, %v8996_v4 }
 0x15a   :  { %v9145_v12 = vpop.eup %7229  ;;  %v9161_v8 = vor.u32 1.1754944e-38, %v1236_v31  ;;  %v1266_v53 = vand.u32 2147483648, %v9070_v35  ;;  %v1188_v59 = vsel %vm9154_vm13, %v9022_v58, %v1184_v3  ;;  %v1228_v63 = vmul.f32 %v9068_v25, %v1227_v61 }
 0x15b   :  { %v9164_v49 = vpop.eup %7231  ;;  %v1242_v31 = vsub.f32 1.0, %v1241_v34  ;;  %v1249_v60 = vand.u32 2147483647, %v9019_v46  ;;  %v1203_v41 = vsel %vm9173_vm5, %v9027_v17, %v1199_v56  ;;  %v9183_v29 = vadd.f32 %v9047_v9, %v1213_v18 }
 0x15c   :  { %vm1216_vm10 = vweird.f32 %v9047_v9  ;;  %vm1231_vm7 = vweird.f32 %v9068_v25  ;;  %v9188_v58 = vor.u32 1.1754944e-38, %v1251_v27  ;;  %v1256_v3 = vmul.f32 %v9145_v12, %v9070_v35 }
 0x15d   :  { %v1301_v61 = vrot.slane %v9150_v52, 1  ;;  %v1302_v34 = vrot.slane %v9150_v52, 2  ;;  %v9198_v17 = vsel %vm9118_vm15, %v1192_v16, %v1188_v59  ;;  %v9200_v56 = vor.u32 1.1754944e-38, %v1266_v53  ;;  %vm9211_vm8 = vmor %vm1215_vm6, %vm1216_vm10 }
 0x15e   :  { %v9194_v50 = vpop.eup %7233  ;;  %v1271_v18 = vmul.f32 %v9164_v49, %v9085_v24  ;;  %v1303_v27 = vrot.slane %v9150_v52, 3  ;;  %v9207_v2 = vsel %vm9126_vm14, %v1207_v13, %v1203_v41  ;;  %v9216_v59 = vadd.f32 %v9068_v25, %v1228_v63 }
 0x15f   :  { %16247 = vst [vmem:[#allocation42_spill] sm:$0xff] %v9200_v56  ;;  %vm1230_vm11 = vweird.f32 %v8996_v4  ;;  %v1243_v53 = vmul.f32 %v9106_v19, %v1242_v31  ;;  %v1304_v54 = vrot.slane %v9150_v52, 4  ;;  %v1218_v41 = vsel %vm9211_vm8, %v9047_v9, %v9183_v29 }
 0x160   :  { %v1286_v5 = vmul.f32 %v9194_v50, %v9108_v15  ;;  %v1305_v16 = vrot.slane %v9150_v52, 5  ;;  %v1306_v7 = vrot.slane %v9150_v52, 6  ;;  %vm9229_vm0 = vcmp.eq.f32.partialorder %v1219_v43, 8.507059e+37  ;;  %vm9288_vm10 = vmor %vm1230_vm11, %vm1231_vm7 }
 0x161   :  { %vm1246_vm15 = vweird.f32 %v9106_v19  ;;  %v1257_v63 = vsub.f32 1.0, %v1256_v3  ;;  %v1315_v31 = vmul.f32 %v8847_v33, %v9150_v52  ;;  %v1316_v37 = vmul.f32 %v1301_v61, %v8894_v6 }
 0x162   :  { %v1317_v9 = vmul.f32 %v1302_v34, %v8930_v51  ;;  %vm1261_vm14 = vweird.f32 %v9145_v12  ;;  %v1272_v29 = vsub.f32 1.0, %v1271_v18  ;;  %v1279_v47 = vand.u32 2147483647, %v9085_v24 }
 0x163   :  { %v1307_v43 = vrot.slane %v9150_v52, 7  ;;  %v1318_v48 = vmul.f32 %v1303_v27, %v8970_v38  ;;  %vm9242_vm12 = vcmp.eq.f32.partialorder %v1234_v1, 8.507059e+37  ;;  %vm1245_vm9 = vweird.f32 %v9019_v46 }
 0x164   :  { %v1319_v33 = vmul.f32 %v1304_v54, %v9000_v57  ;;  %v1323_v6 = vmul.f32 %v8681_v45, %v8686_v36  ;;  %v1324_v51 = vmul.f32 %v8700_v30, %v8690_v11  ;;  %v1325_v3 = vmul.f32 %v9063_v21, %v8705_v14  ;;  %vm9330_vm11 = vmor %vm1245_vm9, %vm1246_vm15 }
 0x165   :  { %vm1260_vm6 = vweird.f32 %v9070_v35  ;;  %v1287_v38 = vsub.f32 1.0, %v1286_v5  ;;  %v1320_v52 = vmul.f32 %v1305_v16, %v9077_v55  ;;  %v1321_v1 = vmul.f32 %v1306_v7, %v9092_v62 }
 0x166   :  { %v1326_v61 = vmul.f32 %v9088_v26, %v8722_v42  ;;  %vm1275_vm13 = vweird.f32 %v9085_v24  ;;  %v1327_v45 = vmul.f32 %v9099_v0, %v8789_v23  ;;  %v9262_v36 = vadd.f32 %v1323_v6, %v1315_v31 }
 0x167   :  { %v9264_v11 = vadd.f32 %v1324_v51, %v1316_v37  ;;  %v9266_v30 = vadd.f32 %v1325_v3, %v1317_v9  ;;  %v1258_v14 = vmul.f32 %v9145_v12, %v1257_v63  ;;  %v1322_v57 = vmul.f32 %v1307_v43, %v9116_v40 }
 0x168   :  { %v1328_v21 = vmul.f32 %v9112_v39, %v8842_v10  ;;  %v9272_v55 = vadd.f32 %v1326_v61, %v1318_v48  ;;  %vm9274_vm5 = vcmp.eq.f32.partialorder %v1249_v60, 8.507059e+37  ;;  %v1273_v23 = vmul.f32 %v9164_v49, %v1272_v29 }
 0x169   :  { %v1329_v26 = vmul.f32 %v9124_v20, %v8855_v44  ;;  %v9281_v62 = vadd.f32 %v1327_v45, %v1319_v33  ;;  %7235 = vtanh.f32 %v9262_v36  ;;  %v1288_v60 = vmul.f32 %v9194_v50, %v1287_v38 }
 0x16a   :  { %v1330_v10 = vmul.f32 %v9132_v28, %v8909_v22  ;;  %v9295_v0 = vadd.f32 %v1328_v21, %v1320_v52  ;;  %7237 = vtanh.f32 %v9264_v11  ;;  %v1233_v44 = vsel %vm9288_vm10, %v9068_v25, %v9216_v59 }
 0x16b   :  { %v1244_v4 = vadd.f32 %v9106_v19, %v1243_v53  ;;  %v16258_v39 = vand.u32 2147483647, %v9070_v35  ;;  %v9309_v20 = vadd.f32 %v1329_v26, %v1321_v1  ;;  %7239 = vtanh.f32 %v9266_v30 }
 0x16c   :  { %v1223_v22 = vsel %vm9229_vm0, %v9158_v32, %v1218_v41  ;;  %v1281_v28 = vand.u32 2147483648, %v9085_v24  ;;  %v9316_v34 = vadd.f32 %v1330_v10, %v1322_v57  ;;  %7241 = vtanh.f32 %v9272_v55 }
 0x16d   :  { %vm9305_vm7 = vcmp.eq.f32.partialorder %v16258_v39, 8.507059e+37  ;;  %v1259_v25 = vadd.f32 %v9145_v12, %v1258_v14  ;;  %v1274_v18 = vadd.f32 %v9164_v49, %v1273_v23  ;;  %vm1276_vm8 = vweird.f32 %v9164_v49 }
 0x16e   :  { %16261 = vst [vmem:[#allocation43_spill] sm:$0xff] %v9316_v34  ;;  %7243 = vtanh.f32 %v9281_v62  ;;  %v1238_v27 = vsel %vm9242_vm12, %v9161_v8, %v1233_v44  ;;  %v1289_v59 = vadd.f32 %v9194_v50, %v1288_v60  ;;  %vm1291_vm0 = vweird.f32 %v9194_v50  ;;  %vm9344_vm12 = vmor %vm1260_vm6, %vm1261_vm14 }
 0x16f   :  { %7245 = vtanh.f32 %v9295_v0  ;;  %v7236_v53 = vpop.eup %7235  ;;  %v1248_v56 = vsel %vm9330_vm11, %v9106_v19, %v1244_v4  ;;  %v1294_v46 = vand.u32 2147483647, %v9108_v15  ;;  %v1296_v54 = vand.u32 2147483648, %v9108_v15  ;;  %vm9353_vm15 = vmor %vm1275_vm13, %vm1276_vm8 }
 0x170   :  { %7247 = vtanh.f32 %v9309_v20  ;;  %v7238_v41 = vpop.eup %7237  ;;  %vm9357_vm9 = vcmp.eq.f32.partialorder %v1279_v47, 8.507059e+37  ;;  %vm1290_vm14 = vweird.f32 %v9108_v15  ;;  %v1347_v35 = vmul.f32 %v7236_v53, %v9198_v17  ;;  %v16280_v47 = vld [vmem:[#allocation16_spill] sm:$0xff] }
 0x171   :  { %7249 = vtanh.f32 %v9316_v34  ;;  %v7240_v16 = vpop.eup %7239  ;;  %v1263_v7 = vsel %vm9344_vm12, %v9145_v12, %v1259_v25  ;;  %v1278_v24 = vsel %vm9353_vm15, %v9164_v49, %v1274_v18  ;;  %v1282_v13 = vor.u32 1.1754944e-38, %v1281_v28  ;;  %vm9372_vm6 = vmor %vm1290_vm14, %vm1291_vm0 }
 0x172   :  { %v1348_v15 = vmul.f32 %v7238_v41, %v9207_v2  ;;  %v7242_v63 = vpop.eup %7241  ;;  %v1253_v17 = vsel %vm9274_vm5, %v9188_v58, %v1248_v56  ;;  %v1293_v12 = vsel %vm9372_vm6, %v9194_v50, %v1289_v59  ;;  %v1349_v31 = vmul.f32 %v7240_v16, %v1223_v22  ;;  %1355 = vst [vmem:[#allocation3] sm:$0x1] %v1347_v35  ;;  %v16272_v2 = vld [vmem:[#allocation42_spill] sm:$0xff]  ;;  %v16276_v16 = vld [vmem:[#allocation12_spill] sm:$0xff] }
 0x173   :  { %v1379_v49 = vpack.c.bf16 %v1347_v35, %v1347_v35  ;;  %vm1295_vm13 = vcmp.eq.f32.partialorder %v1294_v46, 8.507059e+37  ;;  %v1297_v9 = vor.u32 1.1754944e-38, %v1296_v54  ;;  %v1350_v29 = vmul.f32 %v7242_v63, %v1238_v27  ;;  %v16275_v35 = vld [vmem:[#allocation13_spill] sm:$0xff]  ;;  %v16282_v63 = vld [vmem:[#allocation15_spill] sm:$0xff] }
 0x174   :  { %v7244_v37 = vpop.eup %7243  ;;  %1356 = vst [vmem:[#allocation3 + $0x8] sm:$0x1] %v1348_v15  ;;  %v1380_v43 = vpack.c.bf16 %v1348_v15, %v1348_v15  ;;  %v1268_v6 = vsel %vm9305_vm7, %v16272_v2, %v1263_v7  ;;  %v1283_v58 = vsel %vm9357_vm9, %v1282_v13, %v1278_v24  ;;  %v1381_v50 = vpack.c.bf16 %v1349_v31, %v1349_v31  ;;  %v16277_v7 = vld [vmem:[#allocation10_spill] sm:$0xff]  ;;  %v16278_v24 = vld [vmem:[#allocation11_spill] sm:$0xff]  ;;  %v16279_v13 = vld [vmem:[#allocation17_spill] sm:$0xff] }
 0x175   :  { %v7246_v33 = vpop.eup %7245  ;;  %v1351_v51 = vmul.f32 %v7244_v37, %v1253_v17  ;;  %1357 = vst [vmem:[#allocation3 + $0x10] sm:$0x1] %v1349_v31  ;;  %v1298_v38 = vsel %vm1295_vm13, %v1297_v9, %v1293_v12  ;;  %v1382_v1 = vpack.c.bf16 %v1350_v29, %v1350_v29  ;;  %v1395_v21 = vunpack.c.l.b16 %v1379_v49  ;;  %v16281_v15 = vld [vmem:[#allocation14_spill] sm:$0xff]  ;;  %v16283_v17 = vld [vmem:[#allocation21_spill] sm:$0xff]  ;;  %v16284_v12 = vld [vmem:[#allocation20_spill] sm:$0xff] }
 0x176   :  { %v7248_v3 = vpop.eup %7247  ;;  %v1352_v52 = vmul.f32 %v7246_v33, %v1268_v6  ;;  %1358 = vst [vmem:[#allocation3 + $0x18] sm:$0x1] %v1350_v29  ;;  %v1396_v61 = vunpack.c.l.b16 %v1380_v43  ;;  %v1397_v42 = vunpack.c.l.b16 %v1381_v50  ;;  %vm16137_vm5 = vcmask 1047559   ;;  %v16285_v31 = vld [vmem:[#allocation18_spill] sm:$0xff]  ;;  %v16286_v49 = vld [vmem:[#allocation19_spill] sm:$0xff]  ;;  %v16287_v37 = vld [vmem:[#allocation25_spill] sm:$0xff] }
 0x177   :  { %v7250_v45 = vpop.eup %7249  ;;  %v1353_v14 = vmul.f32 %v7248_v3, %v1283_v58  ;;  %1359 = vst [vmem:[#allocation3 + $0x20] sm:$0x1] %v1351_v51  ;;  %v1383_v57 = vpack.c.bf16 %v1351_v51, %v1351_v51  ;;  %v1398_v48 = vunpack.c.l.b16 %v1382_v1  ;;  %vm16273_vm10 = vcmask 1045509   ;;  %v16288_v9 = vld [vmem:[#allocation24_spill] sm:$0xff]  ;;  %v16289_v29 = vld [vmem:[#allocation22_spill] sm:$0xff]  ;;  %v16290_v43 = vld [vmem:[#allocation23_spill] sm:$0xff] }
 0x178   :  { %v1354_v23 = vmul.f32 %v7250_v45, %v1298_v38  ;;  %1360 = vst [vmem:[#allocation3 + $0x28] sm:$0x1] %v1352_v52  ;;  %v1384_v26 = vpack.c.bf16 %v1352_v52, %v1352_v52  ;;  %v1403_v60 = vrot.slane %v1396_v61, 7  ;;  %v1405_v4 = vrot.slane %v1397_v42, 6  ;;  %v16291_v33 = vld [vmem:[#allocation29_spill] sm:$0xff]  ;;  %v16292_v2 = vld [vmem:[#allocation28_spill] sm:$0xff]  ;;  %vm16308_vm11 = vmmov %vm16273_vm10 }
 0x179   :  { %1361 = vst [vmem:[#allocation3 + $0x30] sm:$0x1] %v1353_v14  ;;  %v1385_v10 = vpack.c.bf16 %v1353_v14, %v1353_v14  ;;  %v1399_v44 = vunpack.c.l.b16 %v1383_v57  ;;  %v1407_v28 = vrot.slane %v1398_v48, 5  ;;  %vm16274_vm7 = vcmask 1046534   ;;  %v16293_v6 = vld [vmem:[#allocation26_spill] sm:$0xff]  ;;  %v16294_v58 = vld [vmem:[#allocation27_spill] sm:$0xff]  ;;  %vm16311_vm15 = vmmov %vm16273_vm10 }
 0x17a   :  { %1362 = vst [vmem:[#allocation3 + $0x38] sm:$0x1] %v1354_v23  ;;  %v1386_v39 = vpack.c.bf16 %v1354_v23, %v1354_v23  ;;  %v1400_v40 = vunpack.c.l.b16 %v1384_v26  ;;  %v1404_v22 = vsel %vm723_vm2, %v1403_v60, %v1395_v21  ;;  %v16295_v51 = vld [vmem:[#allocation33_spill] sm:$0xff]  ;;  %v16296_v50 = vld [vmem:[#allocation32_spill] sm:$0xff]  ;;  %v16297_v3 = vld [vmem:[#allocation30_spill] sm:$0xff]  ;;  %vm16307_vm8 = vcmask 1040384  }
 0x17b   :  { %v1401_v25 = vunpack.c.l.b16 %v1385_v10  ;;  %v1406_v18 = vsel %vm719_vm1, %v1405_v4, %v1404_v22  ;;  %v1409_v27 = vrot.slane %v1399_v44, 4  ;;  %v16298_v38 = vld [vmem:[#allocation31_spill] sm:$0xff]  ;;  %v16299_v52 = vld [vmem:[#allocation37_spill] sm:$0xff]  ;;  %v16300_v1 = vld [vmem:[#allocation36_spill] sm:$0xff]  ;;  %vm16310_vm12 = vcmask 1046528  }
 0x17c   :  { %v1402_v32 = vunpack.c.l.b16 %v1386_v39  ;;  %v1408_v59 = vsel %vm725_vm3, %v1407_v28, %v1406_v18  ;;  %v1411_v53 = vrot.slane %v1400_v40, 3  ;;  %v16301_v61 = vld [vmem:[#allocation34_spill] sm:$0xff]  ;;  %v16302_v45 = vld [vmem:[#allocation35_spill] sm:$0xff]  ;;  %v16303_v14 = vld [vmem:[#allocation41_spill] sm:$0xff]  ;;  %vm16312_vm9 = vcmask 1041408  }
 0x17d   :  { %v1410_v56 = vsel %vm731_vm4, %v1409_v27, %v1408_v59  ;;  %v1413_v8 = vrot.slane %v1401_v25, 2  ;;  %v16304_v57 = vld [vmem:[#allocation40_spill] sm:$0xff]  ;;  %v16305_v21 = vld [vmem:[#allocation38_spill] sm:$0xff]  ;;  %v16306_v42 = vld [vmem:[#allocation39_spill] sm:$0xff]  ;;  %vm16313_vm14 = vcmask 1042433   ;;  %vm16314_vm6 = vcmask 1043458  }
 0x17e   :  { %v1412_v46 = vsel %vm16273_vm10, %v1411_v53, %v1410_v56  ;;  %v1415_v54 = vrot.slane %v1402_v32, 1  ;;  %vm16309_vm0 = vmmov %vm16274_vm7  ;;  %vm16315_vm13 = vcmask 1044483  }
 0x17f   :  { %v1414_v41 = vsel %vm16274_vm7, %v1413_v8, %v1412_v46  ;;  %vm16316_vm10 = vmmov %vm16309_vm0  ;;  %vm16317_vm7 = vcmask 1045508  }
 0x180   :  { %v1417_v5 = vsel %vm16137_vm5, %v1415_v54, %v1414_v41 }
 0x181   :  { %v1418_v19 = vpack.c.b16 %v1417_v5, %v1417_v5 }
 0x183   :  { %1428 = vmatmul.bf16.vlgmr.msra.gmra.mxu0 %v1418_v19  ;;  %1441 = vmatmul.bf16.vlgmr.msra.gmra.mxu1 %v1418_v19 }
 0x184   :  { %1454 = vmatmul.bf16.vlgmr.msra.gmra.mxu2 %v1418_v19  ;;  %1467 = vmatmul.bf16.vlgmr.msra.gmra.mxu3 %v1418_v19 }
 0x185   :  { %2880 = vmatpush.bf16.msra.mxu0 %v16275_v35  ;;  %2893 = vmatpush.bf16.msra.mxu1 %v16276_v16 }
 0x186   :  { %2906 = vmatpush.bf16.msra.mxu2 %v16277_v7  ;;  %2919 = vmatpush.bf16.msra.mxu3 %v16278_v24 }
 0x189   :  { %2881 = vmatpush.bf16.msra.mxu0 %v16279_v13  ;;  %2894 = vmatpush.bf16.msra.mxu1 %v16280_v47 }
 0x18a   :  { %2907 = vmatpush.bf16.msra.mxu2 %v16281_v15  ;;  %2920 = vmatpush.bf16.msra.mxu3 %v16282_v63 }
 0x18d   :  { %2882 = vmatpush.bf16.msra.mxu0 %v16283_v17  ;;  %2895 = vmatpush.bf16.msra.mxu1 %v16284_v12 }
 0x18e   :  { %2908 = vmatpush.bf16.msra.mxu2 %v16285_v31  ;;  %2921 = vmatpush.bf16.msra.mxu3 %v16286_v49 }
 0x191   :  { %2883 = vmatpush.bf16.msra.mxu0 %v16287_v37  ;;  %2896 = vmatpush.bf16.msra.mxu1 %v16288_v9 }
 0x192   :  { %2909 = vmatpush.bf16.msra.mxu2 %v16289_v29  ;;  %2922 = vmatpush.bf16.msra.mxu3 %v16290_v43 }
 0x195   :  { %2884 = vmatpush.bf16.msra.mxu0 %v16291_v33  ;;  %2897 = vmatpush.bf16.msra.mxu1 %v16292_v2 }
 0x196   :  { %2910 = vmatpush.bf16.msra.mxu2 %v16293_v6  ;;  %2923 = vmatpush.bf16.msra.mxu3 %v16294_v58 }
 0x199   :  { %2885 = vmatpush.bf16.msra.mxu0 %v16295_v51  ;;  %2898 = vmatpush.bf16.msra.mxu1 %v16296_v50 }
 0x19a   :  { %2911 = vmatpush.bf16.msra.mxu2 %v16297_v3  ;;  %2924 = vmatpush.bf16.msra.mxu3 %v16298_v38 }
 0x19d   :  { %2886 = vmatpush.bf16.msra.mxu0 %v16299_v52  ;;  %2899 = vmatpush.bf16.msra.mxu1 %v16300_v1 }
 0x19e   :  { %2912 = vmatpush.bf16.msra.mxu2 %v16301_v61  ;;  %2925 = vmatpush.bf16.msra.mxu3 %v16302_v45 }
 0x1a1   :  { %2887 = vmatpush.bf16.msra.mxu0 %v16303_v14  ;;  %2900 = vmatpush.bf16.msra.mxu1 %v16304_v57 }
 0x1a2   :  { %2913 = vmatpush.bf16.msra.mxu2 %v16305_v21  ;;  %2926 = vmatpush.bf16.msra.mxu3 %v16306_v42 }
 0x200   :  { %v1429_v23 = vpop.f32.mrf.mxu0  ;;  %v1442_v26 = vpop.f32.mrf.mxu1 }
 0x201   :  { %v1476_v48 = vrot.slane %v1442_v26, 7 }
 0x203   :  { %v1479_v60 = vsel %vm16307_vm8, %v1429_v23, %v1476_v48  ;;  %v1482_v10 = vsel %vm723_vm2, %v1429_v23, %v1476_v48  ;;  %v1486_v44 = vsel %vm719_vm1, %v1429_v23, %v1476_v48  ;;  %v1490_v4 = vsel %vm725_vm3, %v1429_v23, %v1476_v48  ;;  %vm16318_vm8 = vmmov %vm16310_vm12 }
 0x204   :  { %v1494_v39 = vsel %vm731_vm4, %v1429_v23, %v1476_v48  ;;  %v1498_v40 = vsel %vm16308_vm11, %v1429_v23, %v1476_v48  ;;  %v1502_v22 = vsel %vm16309_vm0, %v1429_v23, %v1476_v48  ;;  %v1506_v28 = vsel %vm16310_vm12, %v1476_v48, %v1429_v23 }
 0x205   :  { %vm16319_vm11 = vcmask 1040384   ;;  %vm16320_vm0 = vcmask 1046533   ;;  %vm16321_vm12 = vcmask 1045504  }
 0x207   :  { %v1455_v25 = vpop.f32.mrf.mxu2  ;;  %v1468_v18 = vpop.f32.mrf.mxu3 }
 0x208   :  { %v1477_v27 = vrot.slane %v1455_v25, 6  ;;  %v1478_v32 = vrot.slane %v1468_v18, 5  ;;  %v1431_v59 = vpop.f32.mrf.mxu0  ;;  %v1444_v53 = vpop.f32.mrf.mxu1 }
 0x20a   :  { %v1480_v56 = vsel %vm719_vm1, %v1477_v27, %v1478_v32  ;;  %v1483_v8 = vsel %vm725_vm3, %v1477_v27, %v1478_v32  ;;  %v1487_v46 = vsel %vm731_vm4, %v1477_v27, %v1478_v32  ;;  %v1491_v54 = vsel %vm16311_vm15, %v1477_v27, %v1478_v32 }
 0x20b   :  { %v1481_v41 = vsel %vm16312_vm9, %v1479_v60, %v1480_v56  ;;  %v1484_v5 = vsel %vm16313_vm14, %v1482_v10, %v1483_v8  ;;  %v1488_v19 = vsel %vm16314_vm6, %v1486_v44, %v1487_v46  ;;  %v1492_v23 = vsel %vm16315_vm13, %v1490_v4, %v1491_v54  ;;  %v1364_v60 = vld [vmem:[#allocation2 + $0x1] ss:$8 sm:$0xf] }
 0x20c   :  { %v1485_v26 = vrot.slane %v1484_v5, 1  ;;  %v1489_v48 = vrot.slane %v1488_v19, 2  ;;  %v1493_v25 = vrot.slane %v1492_v23, 3  ;;  %v1495_v18 = vsel %vm16316_vm10, %v1477_v27, %v1478_v32  ;;  %v1366_v56 = vld [vmem:[#allocation2 + $0x21] ss:$8 sm:$0xf] }
 0x20d   :  { %v1496_v59 = vsel %vm16317_vm7, %v1494_v39, %v1495_v18  ;;  %v1499_v53 = vsel %vm16318_vm8, %v1478_v32, %v1477_v27  ;;  %v1503_v42 = vsel %vm16319_vm11, %v1477_v27, %v1478_v32  ;;  %v1507_v21 = vsel %vm723_vm2, %v1477_v27, %v1478_v32  ;;  %v1368_v8 = vld [vmem:[#allocation2 + $0x41] ss:$8 sm:$0xf] }
 0x20e   :  { %v1500_v10 = vsel %vm16320_vm0, %v1498_v40, %v1499_v53  ;;  %v1504_v44 = vsel %vm16321_vm12, %v1503_v42, %v1502_v22  ;;  %vm16322_vm15 = vcmask 1046529   ;;  %v1370_v46 = vld [vmem:[#allocation2 + $0x61] ss:$8 sm:$0xf]  ;;  %v9451_v54 = vadd.f32 %v1481_v41, %v1364_v60 }
 0x20f   :  { %v1508_v4 = vsel %vm16322_vm15, %v1507_v21, %v1506_v28  ;;  %v1457_v5 = vpop.f32.mrf.mxu2  ;;  %v1470_v39 = vpop.f32.mrf.mxu3  ;;  %v9453_v19 = vadd.f32 %v1485_v26, %v1366_v56  ;;  %v9455_v23 = vadd.f32 %v1489_v48, %v1368_v8  ;;  %v9457_v18 = vadd.f32 %v1493_v25, %v1370_v46  ;;  %v1372_v22 = vld [vmem:[#allocation2 + $0x81] ss:$8 sm:$0xf] }
 0x210   :  { %v6860_v27 = vmul.f32 -1.442695, %v9451_v54  ;;  %v1497_v32 = vrot.slane %v1496_v59, 4  ;;  %v1501_v41 = vrot.slane %v1500_v10, 5  ;;  %v1505_v60 = vrot.slane %v1504_v44, 6 }
 0x211   :  { %v6861_v40 = vmul.f32 -1.442695, %v9453_v19  ;;  %v6862_v42 = vmul.f32 -1.442695, %v9455_v23  ;;  %v6863_v21 = vmul.f32 -1.442695, %v9457_v18 }
 0x212   :  { %7251 = vpow2.f32 %v6860_v27  ;;  %v9463_v28 = vadd.f32 %v1497_v32, %v1372_v22  ;;  %v1374_v25 = vld [vmem:[#allocation2 + $0xa1] ss:$8 sm:$0xf]  ;;  %v1686_v5 = vrot.slane %v9451_v54, 1  ;;  %v1687_v32 = vrot.slane %v9453_v19, 1 }
 0x213   :  { %7253 = vpow2.f32 %v6861_v40  ;;  %v9466_v56 = vadd.f32 %v1501_v41, %v1374_v25  ;;  %v1376_v10 = vld [vmem:[#allocation2 + $0xc1] ss:$8 sm:$0xf]  ;;  %v1509_v44 = vrot.slane %v1508_v4, 7  ;;  %v1688_v41 = vrot.slane %v9455_v23, 1 }
 0x214   :  { %7255 = vpow2.f32 %v6862_v42  ;;  %v6864_v53 = vmul.f32 -1.442695, %v9463_v28  ;;  %v9476_v40 = vadd.f32 %v1505_v60, %v1376_v10  ;;  %v1878_v14 = vrot.slane %v9451_v54, 3 }
 0x215   :  { %7257 = vpow2.f32 %v6863_v21  ;;  %v6865_v42 = vmul.f32 -1.442695, %v9466_v56  ;;  %v6868_v21 = vmul.f32 -1.442695, %v1686_v5  ;;  %v1690_v5 = vrot.slane %v9463_v28, 1 }
 0x216   :  { %7259 = vpow2.f32 %v6864_v53  ;;  %v6866_v25 = vmul.f32 -1.442695, %v9476_v40  ;;  %v1689_v53 = vrot.slane %v9457_v18, 1  ;;  %v1879_v45 = vrot.slane %v9453_v19, 3 }
 0x217   :  { %v6872_v1 = vmul.f32 -1.442695, %v1690_v5  ;;  %v1855_v5 = vrot.slane %v9453_v19, 2  ;;  %v9517_v51 = vmul.f32 -1.442695, %v1878_v14 }
 0x218   :  { %v7252_v26 = vpop.eup %7251 }
 0x219   :  { %v7254_v48 = vpop.eup %7253  ;;  %v9468_v8 = vadd.f32 1.0, %v7252_v26  ;;  %v6869_v26 = vmul.f32 -1.442695, %v1687_v32  ;;  %v1692_v32 = vrot.slane %v9476_v40, 1 }
 0x21a   :  { %v7256_v59 = vpop.eup %7255  ;;  %v9470_v46 = vadd.f32 1.0, %v7254_v48  ;;  %v1378_v48 = vld [vmem:[#allocation2 + $0xe1] ss:$8 sm:$0xf] }
 0x21b   :  { %v9473_v39 = vadd.f32 1.0, %v7256_v59  ;;  %v7258_v27 = vpop.eup %7257  ;;  %7261 = vrcp.f32 %v9468_v8  ;;  %v9487_v60 = vadd.f32 %v1509_v44, %v1378_v48  ;;  %v6871_v44 = vmul.f32 -1.442695, %v1689_v53 }
 0x21c   :  { %7263 = vrcp.f32 %v9470_v46  ;;  %v9481_v22 = vadd.f32 1.0, %v7258_v27  ;;  %v7260_v59 = vpop.eup %7259  ;;  %v1691_v27 = vrot.slane %v9466_v56, 1  ;;  %v1854_v53 = vrot.slane %v9451_v54, 2 }
 0x21d   :  { %7265 = vrcp.f32 %v9473_v39  ;;  %v9499_v48 = vadd.f32 1.0, %v7260_v59  ;;  %v6867_v3 = vmul.f32 -1.442695, %v9487_v60  ;;  %v1569_v54 = vand.u32 2147483648, %v9468_v8 }
 0x21e   :  { %7267 = vpow2.f32 %v6865_v42  ;;  %v6870_v42 = vmul.f32 -1.442695, %v1688_v41  ;;  %v6873_v52 = vmul.f32 -1.442695, %v1691_v27  ;;  %vm1563_vm9 = vweird.f32 %v9468_v8 }
 0x21f   :  { %7269 = vpow2.f32 %v6868_v21  ;;  %vm1578_vm14 = vweird.f32 %v9470_v46  ;;  %vm1593_vm0 = vweird.f32 %v9473_v39 }
 0x220   :  { %7271 = vrcp.f32 %v9481_v22 }
 0x221   :  { %v9489_v4 = vpop.eup %7261  ;;  %7273 = vpow2.f32 %v6869_v26 }
 0x222   :  { %v9494_v10 = vpop.eup %7263  ;;  %7275 = vpow2.f32 %v6866_v25  ;;  %v1559_v38 = vmul.f32 %v9489_v4, %v9468_v8  ;;  %v6874_v25 = vmul.f32 -1.442695, %v1692_v32  ;;  %v9519_v32 = vmul.f32 -1.442695, %v1879_v45 }
 0x223   :  { %v9497_v57 = vpop.eup %7265  ;;  %v1574_v41 = vmul.f32 %v9494_v10, %v9470_v46  ;;  %7277 = vpow2.f32 %v6870_v42  ;;  %v1567_v45 = vand.u32 2147483647, %v9468_v8  ;;  %vm1564_vm6 = vweird.f32 %v9489_v4 }
 0x224   :  { %v7268_v61 = vpop.eup %7267  ;;  %v1589_v59 = vmul.f32 %v9497_v57, %v9473_v39  ;;  %7279 = vpow2.f32 %v6871_v44  ;;  %v1560_v44 = vsub.f32 1.0, %v1559_v38  ;;  %vm1579_vm10 = vweird.f32 %v9494_v10  ;;  %vm9582_vm8 = vmor %vm1563_vm9, %vm1564_vm6 }
 0x225   :  { %v7270_v26 = vpop.eup %7269  ;;  %7281 = vrcp.f32 %v9499_v48  ;;  %v1575_v6 = vsub.f32 1.0, %v1574_v41  ;;  %v9524_v19 = vadd.f32 1.0, %v7268_v61  ;;  %v1582_v61 = vand.u32 2147483647, %v9470_v46  ;;  %vm9598_vm12 = vmor %vm1578_vm14, %vm1579_vm10 }
 0x226   :  { %v9511_v21 = vpop.eup %7271  ;;  %7283 = vpow2.f32 %v6872_v1  ;;  %v9522_v58 = vadd.f32 1.0, %v7270_v26  ;;  %v1590_v27 = vsub.f32 1.0, %v1589_v59  ;;  %v1561_v26 = vmul.f32 %v9489_v4, %v1560_v44 }
 0x227   :  { %v7274_v50 = vpop.eup %7273  ;;  %7285 = vpow2.f32 %v6873_v52  ;;  %v1604_v14 = vmul.f32 %v9511_v21, %v9481_v22  ;;  %v9535_v52 = vor.u32 1.1754944e-38, %v1569_v54  ;;  %vm9551_vm13 = vcmp.eq.f32.partialorder %v1567_v45, 8.507059e+37 }
 0x228   :  { %v7276_v42 = vpop.eup %7275  ;;  %v9529_v2 = vadd.f32 1.0, %v7274_v50  ;;  %7287 = vpow2.f32 %v6867_v3  ;;  %v1576_v50 = vmul.f32 %v9494_v10, %v1575_v6  ;;  %v1584_v3 = vand.u32 2147483648, %v9470_v46 }
 0x229   :  { %v7278_v1 = vpop.eup %7277  ;;  %7289 = vpow2.f32 %v6874_v25  ;;  %v9533_v38 = vadd.f32 1.0, %v7276_v42  ;;  %v1591_v33 = vmul.f32 %v9497_v57, %v1590_v27  ;;  %v1597_v25 = vand.u32 2147483647, %v9473_v39 }
 0x22a   :  { %v7280_v41 = vpop.eup %7279  ;;  %7291 = vrcp.f32 %v9522_v58  ;;  %v1605_v42 = vsub.f32 1.0, %v1604_v14  ;;  %v9547_v43 = vadd.f32 1.0, %v7278_v1  ;;  %v1599_v44 = vand.u32 2147483648, %v9473_v39 }
 0x22b   :  { %v9542_v59 = vpop.eup %7281  ;;  %7293 = vrcp.f32 %v9524_v19  ;;  %v9558_v27 = vadd.f32 1.0, %v7280_v41  ;;  %vm1594_vm7 = vweird.f32 %v9497_v57  ;;  %v1562_v1 = vadd.f32 %v9489_v4, %v1561_v26 }
 0x22c   :  { %v7284_v54 = vpop.eup %7283  ;;  %7295 = vrcp.f32 %v9529_v2  ;;  %v1577_v45 = vadd.f32 %v9494_v10, %v1576_v50  ;;  %v1619_v9 = vmul.f32 %v9542_v59, %v9499_v48  ;;  %v1592_v41 = vadd.f32 %v9497_v57, %v1591_v33  ;;  %vm9616_vm9 = vmor %vm1593_vm0, %vm1594_vm7 }
 0x22d   :  { %v9556_v29 = vpop.eup %7285  ;;  %7297 = vtanh.f32 %v1854_v53  ;;  %v1606_v53 = vmul.f32 %v9511_v21, %v1605_v42  ;;  %vm9586_vm11 = vcmp.eq.f32.partialorder %v1582_v61, 8.507059e+37  ;;  %v1585_v42 = vor.u32 1.1754944e-38, %v1584_v3 }
 0x22e   :  { %v7288_v14 = vpop.eup %7287  ;;  %7299 = vtanh.f32 %v1855_v5  ;;  %v9575_v5 = vadd.f32 1.0, %v7284_v54  ;;  %vm9602_vm15 = vcmp.eq.f32.partialorder %v1597_v25, 8.507059e+37  ;;  %v1600_v54 = vor.u32 1.1754944e-38, %v1599_v44 }
 0x22f   :  { %v9566_v37 = vpop.eup %7289  ;;  %v9568_v49 = vadd.f32 1.0, %v7288_v14  ;;  %7301 = vrcp.f32 %v9533_v38  ;;  %v1566_v39 = vsel %vm9582_vm8, %v9489_v4, %v1562_v1  ;;  %v1581_v46 = vsel %vm9598_vm12, %v9494_v10, %v1577_v45 }
 0x230   :  { %v9573_v31 = vpop.eup %7291  ;;  %7303 = vrcp.f32 %v9547_v43  ;;  %v1612_v3 = vand.u32 2147483647, %v9481_v22  ;;  %v1620_v25 = vsub.f32 1.0, %v1619_v9  ;;  %v1596_v26 = vsel %vm9616_vm9, %v9497_v57, %v1592_v41 }
 0x231   :  { %v9591_v50 = vpop.eup %7293  ;;  %7305 = vrcp.f32 %v9558_v27  ;;  %v1607_v4 = vadd.f32 %v9511_v21, %v1606_v53  ;;  %vm1609_vm14 = vweird.f32 %v9511_v21  ;;  %v1614_v1 = vand.u32 2147483648, %v9481_v22 }
 0x232   :  { %v9606_v14 = vpop.eup %7295  ;;  %7307 = vrcp.f32 %v9568_v49  ;;  %v1634_v9 = vmul.f32 %v9591_v50, %v9524_v19  ;;  %v1735_v45 = vmul.f32 %v9573_v31, %v9522_v58  ;;  %v9643_v57 = vsel %vm9551_vm13, %v9535_v52, %v1566_v39 }
 0x233   :  { %v9621_v44 = vpop.eup %7297  ;;  %7309 = vrcp.f32 %v9575_v5  ;;  %v9647_v41 = vsel %vm9586_vm11, %v1585_v42, %v1581_v46  ;;  %vm1608_vm6 = vweird.f32 %v9481_v22  ;;  %v9655_v8 = vsel %vm9602_vm15, %v1600_v54, %v1596_v26 }
 0x234   :  { %v9629_v10 = vpop.eup %7299  ;;  %7311 = vpow2.f32 %v9517_v51  ;;  %vm9659_vm10 = vmor %vm1608_vm6, %vm1609_vm14  ;;  %vm9663_vm13 = vcmp.eq.f32.partialorder %v1612_v3, 8.507059e+37  ;;  %v1621_v22 = vmul.f32 %v9542_v59, %v1620_v25  ;;  %v1627_v33 = vand.u32 2147483647, %v9499_v48 }
 0x235   :  { %v9637_v12 = vpop.eup %7301  ;;  %7313 = vpow2.f32 %v9519_v32  ;;  %v1611_v32 = vsel %vm9659_vm10, %v9511_v21, %v1607_v4  ;;  %v1629_v42 = vand.u32 2147483648, %v9499_v48  ;;  %v1644_v61 = vand.u32 2147483648, %v9524_v19 }
 0x236   :  { %v9650_v53 = vpop.eup %7303  ;;  %v1615_v54 = vor.u32 1.1754944e-38, %v1614_v1  ;;  %v1635_v39 = vsub.f32 1.0, %v1634_v9  ;;  %v1649_v46 = vmul.f32 %v9637_v12, %v9533_v38  ;;  %v1736_v3 = vsub.f32 1.0, %v1735_v45 }
 0x237   :  { %v9668_v6 = vpop.eup %7305  ;;  %vm1623_vm7 = vweird.f32 %v9499_v48  ;;  %vm1624_vm8 = vweird.f32 %v9542_v59  ;;  %v16339_v21 = vrot.slane %v9487_v60, 1  ;;  %v1750_v4 = vmul.f32 %v9606_v14, %v9529_v2 }
 0x238   :  { %v9678_v26 = vpop.eup %7307  ;;  %v9690_v1 = vsel %vm9663_vm13, %v1615_v54, %v1611_v32  ;;  %v1622_v9 = vadd.f32 %v9542_v59, %v1621_v22  ;;  %vm1638_vm11 = vweird.f32 %v9524_v19  ;;  %v1642_v45 = vand.u32 2147483647, %v9524_v19  ;;  %vm9712_vm12 = vmor %vm1623_vm7, %vm1624_vm8 }
 0x239   :  { %v6875_v25 = vmul.f32 -1.442695, %v16339_v21  ;;  %v9686_v51 = vpop.eup %7309  ;;  %vm9697_vm0 = vcmp.eq.f32.partialorder %v1627_v33, 8.507059e+37  ;;  %v1630_v21 = vor.u32 1.1754944e-38, %v1629_v42  ;;  %v1645_v15 = vor.u32 1.1754944e-38, %v1644_v61 }
 0x23a   :  { %v9695_v17 = vpop.eup %7311  ;;  %v1657_v47 = vand.u32 2147483647, %v9533_v38  ;;  %v1636_v52 = vmul.f32 %v9591_v50, %v1635_v39  ;;  %v1650_v32 = vsub.f32 1.0, %v1649_v46  ;;  %v1664_v22 = vmul.f32 %v9678_v26, %v9568_v49 }
 0x23b   :  { %v9702_v13 = vpop.eup %7313  ;;  %v1737_v54 = vmul.f32 %v9573_v31, %v1736_v3  ;;  %v1659_v42 = vand.u32 2147483648, %v9533_v38  ;;  %7315 = vpow2.f32 %v6875_v25  ;;  %v9718_v61 = vadd.f32 1.0, %v9556_v29 }
 0x23c   :  { %v1751_v39 = vsub.f32 1.0, %v1750_v4  ;;  %v1626_v46 = vsel %vm9712_vm12, %v9542_v59, %v1622_v9  ;;  %vm9723_vm15 = vcmp.eq.f32.partialorder %v1642_v45, 8.507059e+37  ;;  %vm1653_vm9 = vweird.f32 %v9533_v38 }
 0x23d   :  { %v9729_v48 = vadd.f32 1.0, %v9566_v37  ;;  %vm1739_vm14 = vweird.f32 %v9522_v58  ;;  %v1765_v29 = vmul.f32 %v9650_v53, %v9547_v43  ;;  %vm1639_vm6 = vweird.f32 %v9591_v50 }
 0x23e   :  { %v1674_v25 = vand.u32 2147483648, %v9568_v49  ;;  %vm1740_vm10 = vweird.f32 %v9573_v31  ;;  %v1743_v59 = vand.u32 2147483647, %v9522_v58  ;;  %v1637_v4 = vadd.f32 %v9591_v50, %v1636_v52  ;;  %vm9749_vm13 = vmor %vm1638_vm11, %vm1639_vm6 }
 0x23f   :  { %v1651_v9 = vmul.f32 %v9637_v12, %v1650_v32  ;;  %v1665_v45 = vsub.f32 1.0, %v1664_v22  ;;  %v1738_v37 = vadd.f32 %v9573_v31, %v1737_v54  ;;  %v9743_v33 = vsel %vm9697_vm0, %v1630_v21, %v1626_v46  ;;  %vm9766_vm11 = vmor %vm1739_vm14, %vm1740_vm10 }
 0x240   :  { %v1660_v24 = vor.u32 1.1754944e-38, %v1659_v42  ;;  %v1745_v7 = vand.u32 2147483648, %v9522_v58  ;;  %v1752_v16 = vmul.f32 %v9606_v14, %v1751_v39  ;;  %vm9753_vm7 = vcmp.eq.f32.partialorder %v1657_v47, 8.507059e+37 }
 0x241   :  { %vm1668_vm8 = vweird.f32 %v9568_v49  ;;  %v1672_v63 = vand.u32 2147483647, %v9568_v49  ;;  %v1766_v21 = vsub.f32 1.0, %v1765_v29  ;;  %v1780_v32 = vmul.f32 %v9668_v6, %v9558_v27  ;;  %v7316_v22 = vpop.eup %7315 }
 0x242   :  { %vm1654_vm0 = vweird.f32 %v9637_v12  ;;  %v1675_v19 = vor.u32 1.1754944e-38, %v1674_v25  ;;  %vm9770_vm12 = vcmp.eq.f32.partialorder %v1743_v59, 8.507059e+37  ;;  %v1758_v42 = vand.u32 2147483647, %v9529_v2 }
 0x243   :  { %v1641_v39 = vsel %vm9749_vm13, %v9591_v50, %v1637_v4  ;;  %v1652_v46 = vadd.f32 %v9637_v12, %v1651_v9  ;;  %v1666_v29 = vmul.f32 %v9678_v26, %v1665_v45  ;;  %v1742_v58 = vsel %vm9766_vm11, %v9573_v31, %v1738_v37  ;;  %vm9802_vm13 = vmor %vm1653_vm9, %vm1654_vm0 }
 0x244   :  { %v1746_v25 = vor.u32 1.1754944e-38, %v1745_v7  ;;  %v1753_v59 = vadd.f32 %v9606_v14, %v1752_v16  ;;  %vm1754_vm14 = vweird.f32 %v9529_v2  ;;  %vm1755_vm6 = vweird.f32 %v9606_v14 }
 0x245   :  { %vm9786_vm10 = vcmp.eq.f32.partialorder %v1672_v63, 8.507059e+37  ;;  %v9790_v35 = vadd.f32 1.0, %v7316_v22  ;;  %v1760_v50 = vand.u32 2147483648, %v9529_v2  ;;  %v1767_v4 = vmul.f32 %v9650_v53, %v1766_v21 }
 0x246   :  { %v1781_v9 = vsub.f32 1.0, %v1780_v32  ;;  %v9796_v7 = vsel %vm9723_vm15, %v1645_v15, %v1641_v39  ;;  %vm1669_vm11 = vweird.f32 %v9678_v26  ;;  %v9809_v31 = vsel %vm9770_vm12, %v1746_v25, %v1742_v58  ;;  %vm9819_vm15 = vmor %vm1754_vm14, %vm1755_vm6 }
 0x247   :  { %vm9811_vm5 = vcmp.eq.f32.partialorder %v1758_v42, 8.507059e+37  ;;  %v1656_v15 = vsel %vm9802_vm13, %v9637_v12, %v1652_v46  ;;  %v1667_v38 = vadd.f32 %v9678_v26, %v1666_v29  ;;  %v1773_v45 = vand.u32 2147483647, %v9547_v43  ;;  %vm9843_vm0 = vmor %vm1668_vm8, %vm1669_vm11 }
 0x248   :  { %7317 = vrcp.f32 %v9718_v61  ;;  %v1757_v37 = vsel %vm9819_vm15, %v9606_v14, %v1753_v59  ;;  %v1775_v63 = vand.u32 2147483648, %v9547_v43  ;;  %v1795_v21 = vmul.f32 %v9686_v51, %v9575_v5 }
 0x249   :  { %7319 = vrcp.f32 %v9729_v48  ;;  %v1761_v12 = vor.u32 1.1754944e-38, %v1760_v50  ;;  %v1768_v32 = vadd.f32 %v9650_v53, %v1767_v4  ;;  %vm1770_vm9 = vweird.f32 %v9650_v53 }
 0x24a   :  { %v1782_v22 = vmul.f32 %v9668_v6, %v1781_v9  ;;  %v9837_v47 = vsel %vm9753_vm7, %v1660_v24, %v1656_v15  ;;  %vm1769_vm12 = vweird.f32 %v9547_v43  ;;  %v1788_v54 = vand.u32 2147483647, %v9558_v27 }
 0x24b   :  { %v1790_v42 = vand.u32 2147483648, %v9558_v27  ;;  %v1671_v52 = vsel %vm9843_vm0, %v9678_v26, %v1667_v38  ;;  %v9855_v24 = vsel %vm9811_vm5, %v1761_v12, %v1757_v37  ;;  %vm1784_vm7 = vweird.f32 %v9558_v27  ;;  %vm9859_vm8 = vmor %vm1769_vm12, %vm1770_vm9 }
 0x24c   :  { %v1881_v49 = vrot.slane %v9457_v18, 3  ;;  %vm9863_vm14 = vcmp.eq.f32.partialorder %v1773_v45, 8.507059e+37  ;;  %v1776_v46 = vor.u32 1.1754944e-38, %v1775_v63  ;;  %v1796_v29 = vsub.f32 1.0, %v1795_v21 }
 0x24d   :  { %7321 = vrcp.f32 %v9790_v35  ;;  %v1772_v58 = vsel %vm9859_vm8, %v9650_v53, %v1768_v32  ;;  %v1783_v25 = vadd.f32 %v9668_v6, %v1782_v22  ;;  %vm1785_vm5 = vweird.f32 %v9668_v6 }
 0x24e   :  { %v9868_v26 = vpop.eup %7317  ;;  %v1882_v59 = vrot.slane %v9463_v28, 3  ;;  %v9880_v4 = vsel %vm9786_vm10, %v1675_v19, %v1671_v52  ;;  %vm9882_vm6 = vcmp.eq.f32.partialorder %v1788_v54, 8.507059e+37  ;;  %v1791_v16 = vor.u32 1.1754944e-38, %v1790_v42  ;;  %vm9897_vm10 = vmor %vm1784_vm7, %vm1785_vm5 }
 0x24f   :  { %v9876_v50 = vpop.eup %7319  ;;  %16368 = vst [vmem:[#allocation42_spill] sm:$0xff] %v9880_v4  ;;  %vm1800_vm13 = vweird.f32 %v9686_v51  ;;  %v1805_v53 = vand.u32 2147483648, %v9575_v5  ;;  %v1883_v2 = vrot.slane %v9466_v56, 3  ;;  %v16371_v15 = vrot.slane %v9455_v23, 3 }
 0x250   :  { %v6879_v3 = vmul.f32 -1.442695, %v1881_v49  ;;  %v9893_v34 = vsel %vm9863_vm14, %v1776_v46, %v1772_v58  ;;  %v1797_v45 = vmul.f32 %v9686_v51, %v1796_v29  ;;  %vm1799_vm11 = vweird.f32 %v9575_v5 }
 0x251   :  { %v6878_v38 = vmul.f32 -1.442695, %v16371_v15  ;;  %v1803_v37 = vand.u32 2147483647, %v9575_v5  ;;  %v1810_v63 = vmul.f32 %v9868_v26, %v9718_v61  ;;  %v1787_v21 = vsel %vm9897_vm10, %v9668_v6, %v1783_v25  ;;  %vm9949_vm12 = vmor %vm1799_vm11, %vm1800_vm13 }
 0x252   :  { %v1825_v27 = vmul.f32 %v9876_v50, %v9729_v48  ;;  %v1856_v12 = vrot.slane %v9455_v23, 2  ;;  %v6880_v32 = vmul.f32 -1.442695, %v1882_v59  ;;  %v1818_v14 = vand.u32 2147483647, %v9718_v61 }
 0x253   :  { %v9912_v22 = vpop.eup %7321  ;;  %v1857_v54 = vrot.slane %v9457_v18, 2  ;;  %v1884_v42 = vrot.slane %v9476_v40, 3  ;;  %7323 = vpow2.f32 %v6878_v38  ;;  %v1806_v52 = vor.u32 1.1754944e-38, %v1805_v53 }
 0x254   :  { %v1820_v49 = vand.u32 2147483648, %v9718_v61  ;;  %7325 = vpow2.f32 %v6879_v3  ;;  %v6881_v6 = vmul.f32 -1.442695, %v1883_v2  ;;  %v9920_v39 = vsel %vm9882_vm6, %v1791_v16, %v1787_v21 }
 0x255   :  { %v1811_v23 = vsub.f32 1.0, %v1810_v63  ;;  %7327 = vpow2.f32 %v6880_v32  ;;  %v9923_v43 = vadd.f32 1.0, %v9695_v17  ;;  %vm9925_vm15 = vcmp.eq.f32.partialorder %v1803_v37, 8.507059e+37 }
 0x256   :  { %v1826_v18 = vsub.f32 1.0, %v1825_v27  ;;  %v1840_v29 = vmul.f32 %v9912_v22, %v9790_v35  ;;  %7329 = vtanh.f32 %v1856_v12  ;;  %v9932_v58 = vadd.f32 1.0, %v9702_v13 }
 0x257   :  { %v1798_v25 = vadd.f32 %v9686_v51, %v1797_v45  ;;  %vm1814_vm9 = vweird.f32 %v9718_v61  ;;  %7331 = vtanh.f32 %v1857_v54  ;;  %v1885_v17 = vrot.slane %v9487_v60, 3 }
 0x258   :  { %v6882_v59 = vmul.f32 -1.442695, %v1884_v42  ;;  %v9937_v9 = vor.u32 1.1754944e-38, %v1820_v49  ;;  %vm1829_vm0 = vweird.f32 %v9729_v48  ;;  %v1833_v16 = vand.u32 2147483647, %v9729_v48 }
 0x259   :  { %7333 = vpow2.f32 %v6881_v6  ;;  %v7324_v53 = vpop.eup %7323  ;;  %v1812_v2 = vmul.f32 %v9868_v26, %v1811_v23  ;;  %v1835_v13 = vand.u32 2147483648, %v9729_v48  ;;  %v1858_v15 = vrot.slane %v9463_v28, 2 }
 0x25a   :  { %7335 = vrcp.f32 %v9923_v43  ;;  %v7326_v38 = vpop.eup %7325  ;;  %v1827_v19 = vmul.f32 %v9876_v50, %v1826_v18  ;;  %v1841_v45 = vsub.f32 1.0, %v1840_v29  ;;  %v9954_v37 = vadd.f32 1.0, %v7324_v53 }
 0x25b   :  { %7337 = vrcp.f32 %v9932_v58  ;;  %v7328_v63 = vpop.eup %7327  ;;  %v1802_v28 = vsel %vm9949_vm12, %v9686_v51, %v1798_v25  ;;  %v6883_v21 = vmul.f32 -1.442695, %v1885_v17  ;;  %v9960_v27 = vadd.f32 1.0, %v7326_v38 }
 0x25c   :  { %7339 = vpow2.f32 %v6882_v59  ;;  %v9962_v5 = vpop.eup %7329  ;;  %vm9964_vm7 = vcmp.eq.f32.partialorder %v1818_v14, 8.507059e+37  ;;  %vm1844_vm8 = vweird.f32 %v9790_v35  ;;  %v1848_v32 = vand.u32 2147483647, %v9790_v35 }
 0x25d   :  { %v1859_v54 = vrot.slane %v9466_v56, 2  ;;  %7341 = vrcp.f32 %v9954_v37  ;;  %v9972_v42 = vpop.eup %7331  ;;  %vm1815_vm14 = vweird.f32 %v9868_v26  ;;  %vm1830_vm5 = vweird.f32 %v9876_v50 }
 0x25e   :  { %v9976_v51 = vadd.f32 1.0, %v7328_v63  ;;  %7343 = vrcp.f32 %v9960_v27  ;;  %v1813_v49 = vadd.f32 %v9868_v26, %v1812_v2  ;;  %v1828_v6 = vadd.f32 %v9876_v50, %v1827_v19  ;;  %vm9999_vm13 = vmor %vm1814_vm9, %vm1815_vm14 }
 0x25f   :  { %v7334_v14 = vpop.eup %7333  ;;  %v1842_v23 = vmul.f32 %v9912_v22, %v1841_v45  ;;  %7345 = vtanh.f32 %v1858_v15  ;;  %v9986_v18 = vsel %vm9925_vm15, %v1806_v52, %v1802_v28  ;;  %vm9988_vm6 = vcmp.eq.f32.partialorder %v1833_v16, 8.507059e+37  ;;  %vm10011_vm10 = vmor %vm1829_vm0, %vm1830_vm5 }
 0x260   :  { %v9982_v56 = vpop.eup %7335  ;;  %v1860_v25 = vrot.slane %v9476_v40, 2  ;;  %7347 = vpow2.f32 %v6883_v21  ;;  %v1850_v52 = vand.u32 2147483648, %v9790_v35  ;;  %v1861_v46 = vrot.slane %v9487_v60, 2 }
 0x261   :  { %v9993_v17 = vpop.eup %7337  ;;  %7349 = vtanh.f32 %v1859_v54  ;;  %v1927_v16 = vmul.f32 %v9982_v56, %v9923_v43  ;;  %v1836_v61 = vor.u32 1.1754944e-38, %v1835_v13  ;;  %vm1845_vm11 = vweird.f32 %v9912_v22 }
 0x262   :  { %v7340_v40 = vpop.eup %7339  ;;  %v1942_v2 = vmul.f32 %v9993_v17, %v9932_v58  ;;  %7351 = vrcp.f32 %v9976_v51  ;;  %v1817_v15 = vsel %vm9999_vm13, %v9868_v26, %v1813_v49  ;;  %v1832_v48 = vsel %vm10011_vm10, %v9876_v50, %v1828_v6  ;;  %vm10055_vm9 = vmor %vm1844_vm8, %vm1845_vm11 }
 0x263   :  { %v10019_v60 = vpop.eup %7341  ;;  %v1843_v38 = vadd.f32 %v9912_v22, %v1842_v23  ;;  %v1928_v13 = vsub.f32 1.0, %v1927_v16  ;;  %7353 = vtanh.f32 %v1860_v25  ;;  %v10030_v19 = vadd.f32 1.0, %v7334_v14 }
 0x264   :  { %v10028_v3 = vpop.eup %7343  ;;  %v1943_v45 = vsub.f32 1.0, %v1942_v2  ;;  %v1957_v63 = vmul.f32 %v10019_v60, %v9954_v37  ;;  %vm10036_vm15 = vcmp.eq.f32.partialorder %v1848_v32, 8.507059e+37  ;;  %v1851_v21 = vor.u32 1.1754944e-38, %v1850_v52 }
 0x265   :  { %v10034_v28 = vpop.eup %7345  ;;  %7355 = vtanh.f32 %v1861_v46  ;;  %v10040_v50 = vadd.f32 1.0, %v7340_v40  ;;  %v10045_v14 = vsel %vm9964_vm7, %v9937_v9, %v1817_v15  ;;  %v10049_v49 = vsel %vm9988_vm6, %v1836_v61, %v1832_v48 }
 0x266   :  { %v7348_v54 = vpop.eup %7347  ;;  %v1935_v6 = vand.u32 2147483647, %v9923_v43  ;;  %v1937_v23 = vand.u32 2147483648, %v9923_v43  ;;  %v1847_v9 = vsel %vm10055_vm9, %v9912_v22, %v1843_v38  ;;  %v1929_v12 = vmul.f32 %v9982_v56, %v1928_v13 }
 0x267   :  { %v10061_v25 = vpop.eup %7349  ;;  %vm1931_vm0 = vweird.f32 %v9923_v43  ;;  %v1972_v35 = vmul.f32 %v10028_v3, %v9960_v27  ;;  %v1944_v59 = vmul.f32 %v9993_v17, %v1943_v45  ;;  %vm1946_vm12 = vweird.f32 %v9932_v58 }
 0x268   :  { %v10070_v29 = vpop.eup %7351  ;;  %v1958_v52 = vsub.f32 1.0, %v1957_v63  ;;  %7357 = vrcp.f32 %v10030_v19  ;;  %v10075_v46 = vadd.f32 1.0, %v7348_v54  ;;  %v1950_v22 = vand.u32 2147483647, %v9932_v58 }
 0x269   :  { %v1952_v16 = vand.u32 2147483648, %v9932_v58  ;;  %7359 = vrcp.f32 %v10040_v50  ;;  %v10080_v40 = vpop.eup %7353  ;;  %v10084_v53 = vsel %vm10036_vm15, %v1851_v21, %v1847_v9  ;;  %vm10086_vm7 = vcmp.eq.f32.partialorder %v1935_v6, 8.507059e+37 }
 0x26a   :  { %16390 = vst [vmem:[#allocation44_spill] sm:$0xff] %v10080_v40  ;;  %v1938_v2 = vor.u32 1.1754944e-38, %v1937_v23  ;;  %v1967_v15 = vand.u32 2147483648, %v9954_v37  ;;  %v1930_v38 = vadd.f32 %v9982_v56, %v1929_v12  ;;  %vm1932_vm8 = vweird.f32 %v9982_v56 }
 0x26b   :  { %v10091_v48 = vpop.eup %7355  ;;  %v1973_v13 = vsub.f32 1.0, %v1972_v35  ;;  %v1987_v45 = vmul.f32 %v10070_v29, %v9976_v51  ;;  %v1945_v63 = vadd.f32 %v9993_v17, %v1944_v59  ;;  %vm1947_vm14 = vweird.f32 %v9993_v17  ;;  %vm10111_vm13 = vmor %vm1931_vm0, %vm1932_vm8 }
 0x26c   :  { %16393 = vst [vmem:[#allocation45_spill] sm:$0xff] %v10091_v48  ;;  %v1959_v26 = vmul.f32 %v10019_v60, %v1958_v52  ;;  %v1982_v21 = vand.u32 2147483648, %v9960_v27  ;;  %vm10101_vm5 = vcmp.eq.f32.partialorder %v1950_v22, 8.507059e+37  ;;  %v1953_v32 = vor.u32 1.1754944e-38, %v1952_v16  ;;  %vm10128_vm10 = vmor %vm1946_vm12, %vm1947_vm14 }
 0x26d   :  { %vm1961_vm6 = vweird.f32 %v9954_v37  ;;  %7361 = vrcp.f32 %v10075_v46  ;;  %v1965_v9 = vand.u32 2147483647, %v9954_v37  ;;  %v1980_v12 = vand.u32 2147483647, %v9960_v27 }
 0x26e   :  { %v10107_v6 = vpop.eup %7357  ;;  %v1997_v35 = vand.u32 2147483648, %v9976_v51  ;;  %v2012_v59 = vand.u32 2147483648, %v10030_v19  ;;  %v1934_v22 = vsel %vm10111_vm13, %v9982_v56, %v1930_v38  ;;  %v10132_v16 = vor.u32 1.1754944e-38, %v1967_v15 }
 0x26f   :  { %v10119_v52 = vpop.eup %7359  ;;  %v1974_v48 = vmul.f32 %v10028_v3, %v1973_v13  ;;  %v1988_v4 = vsub.f32 1.0, %v1987_v45  ;;  %v1949_v40 = vsel %vm10128_vm10, %v9993_v17, %v1945_v63  ;;  %v10139_v23 = vadd.f32 %v10019_v60, %v1959_v26 }
 0x270   :  { %vm1962_vm11 = vweird.f32 %v10019_v60  ;;  %v10142_v56 = vor.u32 1.1754944e-38, %v1982_v21  ;;  %vm1977_vm15 = vweird.f32 %v10028_v3  ;;  %v1995_v58 = vand.u32 2147483647, %v9976_v51 }
 0x271   :  { %v2002_v15 = vmul.f32 %v10107_v6, %v10030_v19  ;;  %v2010_v38 = vand.u32 2147483647, %v10030_v19  ;;  %v10151_v13 = vsel %vm10086_vm7, %v1938_v2, %v1934_v22  ;;  %vm1976_vm9 = vweird.f32 %v9960_v27  ;;  %vm10168_vm0 = vmor %vm1961_vm6, %vm1962_vm11 }
 0x272   :  { %v10154_v17 = vor.u32 1.1754944e-38, %v1997_v35  ;;  %v10156_v45 = vor.u32 1.1754944e-38, %v2012_v59  ;;  %v2017_v63 = vmul.f32 %v10119_v52, %v10040_v50  ;;  %v10164_v21 = vsel %vm10101_vm5, %v1953_v32, %v1949_v40  ;;  %vm10245_vm11 = vmor %vm1976_vm9, %vm1977_vm15 }
 0x273   :  { %v10160_v26 = vpop.eup %7361  ;;  %v1975_v2 = vadd.f32 %v10028_v3, %v1974_v48  ;;  %v1989_v35 = vmul.f32 %v10070_v29, %v1988_v4  ;;  %v2046_v59 = vmul.f32 %v9809_v31, %v9262_v36  ;;  %v1964_v54 = vsel %vm10168_vm0, %v10019_v60, %v10139_v23 }
 0x274   :  { %vm10180_vm12 = vcmp.eq.f32.partialorder %v1965_v9, 8.507059e+37  ;;  %vm1992_vm7 = vweird.f32 %v10070_v29  ;;  %v2032_v37 = vmul.f32 %v10160_v26, %v10075_v46  ;;  %v2047_v4 = vmul.f32 %v9855_v24, %v9264_v11 }
 0x275   :  { %v2048_v36 = vmul.f32 %v9893_v34, %v9266_v30  ;;  %v2003_v31 = vsub.f32 1.0, %v2002_v15  ;;  %vm2007_vm8 = vweird.f32 %v10107_v6  ;;  %v2025_v60 = vand.u32 2147483647, %v10040_v50 }
 0x276   :  { %v2049_v48 = vmul.f32 %v9920_v39, %v9272_v55  ;;  %v2054_v32 = vmul.f32 %v9621_v44, %v9643_v57  ;;  %vm10197_vm14 = vcmp.eq.f32.partialorder %v1980_v12, 8.507059e+37  ;;  %vm1991_vm5 = vweird.f32 %v9976_v51  ;;  %v16413_v12 = vld [vmem:[#allocation45_spill] sm:$0xff] }
 0x277   :  { %v2018_v11 = vsub.f32 1.0, %v2017_v63  ;;  %v2050_v30 = vmul.f32 %v9986_v18, %v9281_v62  ;;  %v2055_v24 = vmul.f32 %v9629_v10, %v9647_v41  ;;  %v2056_v34 = vmul.f32 %v9962_v5, %v9655_v8  ;;  %vm10284_vm9 = vmor %vm1991_vm5, %vm1992_vm7 }
 0x278   :  { %vm2006_vm6 = vweird.f32 %v10030_v19  ;;  %v2033_v55 = vsub.f32 1.0, %v2032_v37  ;;  %v2051_v44 = vmul.f32 %v10045_v14, %v9295_v0  ;;  %v2057_v57 = vmul.f32 %v9972_v42, %v9690_v1  ;;  %v16406_v0 = vld [vmem:[#allocation43_spill] sm:$0xff] }
 0x279   :  { %v10213_v39 = vadd.f32 %v2054_v32, %v2046_v59  ;;  %vm2021_vm13 = vweird.f32 %v10040_v50  ;;  %v2052_v62 = vmul.f32 %v10049_v49, %v9309_v20  ;;  %v2058_v10 = vmul.f32 %v10034_v28, %v9743_v33  ;;  %v16409_v33 = vld [vmem:[#allocation44_spill] sm:$0xff] }
 0x27a   :  { %v10220_v41 = vadd.f32 %v2055_v24, %v2047_v4  ;;  %v10222_v8 = vadd.f32 %v2056_v34, %v2048_v36  ;;  %v2004_v5 = vmul.f32 %v10107_v6, %v2003_v31  ;;  %v2053_v18 = vmul.f32 %v10084_v53, %v16406_v0  ;;  %v16412_v53 = vld [vmem:[#allocation42_spill] sm:$0xff] }
 0x27b   :  { %v2059_v1 = vmul.f32 %v10061_v25, %v9796_v7  ;;  %v10229_v42 = vadd.f32 %v2057_v57, %v2049_v48  ;;  %vm10231_vm10 = vcmp.eq.f32.partialorder %v1995_v58, 8.507059e+37  ;;  %v2019_v20 = vmul.f32 %v10119_v52, %v2018_v11 }
 0x27c   :  { %v2060_v28 = vmul.f32 %v16409_v33, %v9837_v47  ;;  %v10238_v49 = vadd.f32 %v2058_v10, %v2050_v30  ;;  %7363 = vtanh.f32 %v10213_v39  ;;  %v2034_v25 = vmul.f32 %v10160_v26, %v2033_v55 }
 0x27d   :  { %v2061_v22 = vmul.f32 %v16413_v12, %v16412_v53  ;;  %v10252_v43 = vadd.f32 %v2059_v1, %v2051_v44  ;;  %7365 = vtanh.f32 %v10220_v41  ;;  %v1979_v47 = vsel %vm10245_vm11, %v10028_v3, %v1975_v2 }
 0x27e   :  { %v1990_v23 = vadd.f32 %v10070_v29, %v1989_v35  ;;  %vm10259_vm0 = vcmp.eq.f32.partialorder %v2010_v38, 8.507059e+37  ;;  %v10263_v58 = vadd.f32 %v2060_v28, %v2052_v62  ;;  %7367 = vtanh.f32 %v10222_v8 }
 0x27f   :  { %v1969_v15 = vsel %vm10180_vm12, %v10132_v16, %v1964_v54  ;;  %v2027_v63 = vand.u32 2147483648, %v10040_v50  ;;  %v10270_v61 = vadd.f32 %v2061_v22, %v2053_v18  ;;  %7369 = vtanh.f32 %v10229_v42 }
 0x280   :  { %v2005_v3 = vadd.f32 %v10107_v6, %v2004_v5  ;;  %v2020_v38 = vadd.f32 %v10119_v52, %v2019_v20  ;;  %vm2022_vm15 = vweird.f32 %v10119_v52  ;;  %7371 = vtanh.f32 %v10238_v49 }
 0x281   :  { %16416 = vst [vmem:[#allocation43_spill] sm:$0xff] %v10270_v61  ;;  %v1984_v2 = vsel %vm10197_vm14, %v10142_v56, %v1979_v47  ;;  %v2035_v35 = vadd.f32 %v10160_v26, %v2034_v25  ;;  %vm2037_vm12 = vweird.f32 %v10160_v26  ;;  %7373 = vtanh.f32 %v10252_v43  ;;  %vm10298_vm14 = vmor %vm2006_vm6, %vm2007_vm8 }
 0x282   :  { %v7364_v59 = vpop.eup %7363  ;;  %v1994_v54 = vsel %vm10284_vm9, %v10070_v29, %v1990_v23  ;;  %v2040_v56 = vand.u32 2147483647, %v10075_v46  ;;  %v2042_v40 = vand.u32 2147483648, %v10075_v46  ;;  %7375 = vtanh.f32 %v10263_v58  ;;  %vm10307_vm7 = vmor %vm2021_vm13, %vm2022_vm15  ;;  %v16430_v29 = vld [vmem:[#allocation13_spill] sm:$0xff] }
 0x283   :  { %v7366_v37 = vpop.eup %7365  ;;  %vm10311_vm5 = vcmp.eq.f32.partialorder %v2025_v60, 8.507059e+37  ;;  %vm2036_vm8 = vweird.f32 %v10075_v46  ;;  %7377 = vtanh.f32 %v10270_v61  ;;  %v2078_v19 = vmul.f32 %v7364_v59, %v10151_v13  ;;  %v16436_v60 = vld [vmem:[#allocation14_spill] sm:$0xff] }
 0x284   :  { %v7368_v36 = vpop.eup %7367  ;;  %v2009_v31 = vsel %vm10298_vm14, %v10107_v6, %v2005_v3  ;;  %v2024_v50 = vsel %vm10307_vm7, %v10119_v52, %v2020_v38  ;;  %v2028_v48 = vor.u32 1.1754944e-38, %v2027_v63  ;;  %vm10326_vm6 = vmor %vm2036_vm8, %vm2037_vm12  ;;  %v2079_v46 = vmul.f32 %v7366_v37, %v10164_v21 }
 0x285   :  { %v7370_v32 = vpop.eup %7369  ;;  %v1999_v13 = vsel %vm10231_vm10, %v10154_v17, %v1994_v54  ;;  %v2039_v6 = vsel %vm10326_vm6, %v10160_v26, %v2035_v35  ;;  %v2080_v9 = vmul.f32 %v7368_v36, %v1969_v15  ;;  %2086 = vst [vmem:[#allocation3 + $0x1] sm:$0x1] %v2078_v19  ;;  %v2110_v52 = vpack.c.bf16 %v2078_v19, %v2078_v19  ;;  %v16431_v19 = vld [vmem:[#allocation12_spill] sm:$0xff]  ;;  %v16432_v36 = vld [vmem:[#allocation10_spill] sm:$0xff] }
 0x286   :  { %v7372_v11 = vpop.eup %7371  ;;  %vm2041_vm13 = vcmp.eq.f32.partialorder %v2040_v56, 8.507059e+37  ;;  %v2043_v30 = vor.u32 1.1754944e-38, %v2042_v40  ;;  %v2081_v24 = vmul.f32 %v7370_v32, %v1984_v2  ;;  %2087 = vst [vmem:[#allocation3 + $0x9] sm:$0x1] %v2079_v46  ;;  %v2111_v34 = vpack.c.bf16 %v2079_v46, %v2079_v46  ;;  %v16437_v46 = vld [vmem:[#allocation15_spill] sm:$0xff]  ;;  %v16438_v32 = vld [vmem:[#allocation21_spill] sm:$0xff] }
 0x287   :  { %v7374_v55 = vpop.eup %7373  ;;  %v2014_v21 = vsel %vm10259_vm0, %v10156_v45, %v2009_v31  ;;  %v2029_v17 = vsel %vm10311_vm5, %v2028_v48, %v2024_v50  ;;  %v2082_v44 = vmul.f32 %v7372_v11, %v1999_v13  ;;  %2088 = vst [vmem:[#allocation3 + $0x11] sm:$0x1] %v2080_v9  ;;  %v2112_v26 = vpack.c.bf16 %v2080_v9, %v2080_v9  ;;  %v16433_v31 = vld [vmem:[#allocation11_spill] sm:$0xff]  ;;  %v16434_v50 = vld [vmem:[#allocation17_spill] sm:$0xff]  ;;  %v16435_v48 = vld [vmem:[#allocation16_spill] sm:$0xff] }
 0x288   :  { %v7376_v57 = vpop.eup %7375  ;;  %v2044_v62 = vsel %vm2041_vm13, %v2043_v30, %v2039_v6  ;;  %v2083_v10 = vmul.f32 %v7374_v55, %v2014_v21  ;;  %2089 = vst [vmem:[#allocation3 + $0x19] sm:$0x1] %v2081_v24  ;;  %v2113_v5 = vpack.c.bf16 %v2081_v24, %v2081_v24  ;;  %v2127_v0 = vunpack.c.l.b16 %v2111_v34  ;;  %v16439_v13 = vld [vmem:[#allocation20_spill] sm:$0xff]  ;;  %v16440_v6 = vld [vmem:[#allocation18_spill] sm:$0xff]  ;;  %v16441_v9 = vld [vmem:[#allocation19_spill] sm:$0xff] }
 0x289   :  { %v7378_v18 = vpop.eup %7377  ;;  %v2084_v1 = vmul.f32 %v7376_v57, %v2029_v17  ;;  %2090 = vst [vmem:[#allocation3 + $0x21] sm:$0x1] %v2082_v44  ;;  %v2114_v14 = vpack.c.bf16 %v2082_v44, %v2082_v44  ;;  %v2126_v20 = vunpack.c.l.b16 %v2110_v52  ;;  %v2128_v33 = vunpack.c.l.b16 %v2112_v26  ;;  %v16442_v52 = vld [vmem:[#allocation25_spill] sm:$0xff]  ;;  %v16443_v11 = vld [vmem:[#allocation24_spill] sm:$0xff]  ;;  %v16444_v30 = vld [vmem:[#allocation22_spill] sm:$0xff] }
 0x28a   :  { %v2085_v28 = vmul.f32 %v7378_v18, %v2044_v62  ;;  %2091 = vst [vmem:[#allocation3 + $0x29] sm:$0x1] %v2083_v10  ;;  %v2115_v45 = vpack.c.bf16 %v2083_v10, %v2083_v10  ;;  %v2129_v7 = vunpack.c.l.b16 %v2113_v5  ;;  %v2134_v25 = vrot.slane %v2127_v0, 7  ;;  %v16445_v24 = vld [vmem:[#allocation23_spill] sm:$0xff]  ;;  %v16446_v34 = vld [vmem:[#allocation29_spill] sm:$0xff]  ;;  %v16447_v55 = vld [vmem:[#allocation28_spill] sm:$0xff] }
 0x28b   :  { %2092 = vst [vmem:[#allocation3 + $0x31] sm:$0x1] %v2084_v1  ;;  %v2116_v53 = vpack.c.bf16 %v2084_v1, %v2084_v1  ;;  %v2130_v12 = vunpack.c.l.b16 %v2114_v14  ;;  %v2136_v22 = vrot.slane %v2128_v33, 6  ;;  %vm16427_vm10 = vcmask 1045509   ;;  %v16448_v21 = vld [vmem:[#allocation26_spill] sm:$0xff]  ;;  %v16449_v17 = vld [vmem:[#allocation27_spill] sm:$0xff] }
 0x28c   :  { %2093 = vst [vmem:[#allocation3 + $0x39] sm:$0x1] %v2085_v28  ;;  %v2117_v47 = vpack.c.bf16 %v2085_v28, %v2085_v28  ;;  %v2131_v23 = vunpack.c.l.b16 %v2115_v45  ;;  %v2135_v27 = vsel %vm723_vm2, %v2134_v25, %v2126_v20  ;;  %v2138_v15 = vrot.slane %v2129_v7, 5  ;;  %v16450_v44 = vld [vmem:[#allocation33_spill] sm:$0xff]  ;;  %v16451_v26 = vld [vmem:[#allocation32_spill] sm:$0xff]  ;;  %v16452_v57 = vld [vmem:[#allocation30_spill] sm:$0xff] }
 0x28d   :  { %v2132_v63 = vunpack.c.l.b16 %v2116_v53  ;;  %v2137_v3 = vsel %vm719_vm1, %v2136_v22, %v2135_v27  ;;  %v2140_v38 = vrot.slane %v2130_v12, 4  ;;  %vm16428_vm11 = vcmask 1046534   ;;  %v16453_v62 = vld [vmem:[#allocation31_spill] sm:$0xff]  ;;  %v16454_v10 = vld [vmem:[#allocation37_spill] sm:$0xff]  ;;  %v16455_v5 = vld [vmem:[#allocation36_spill] sm:$0xff] }
 0x28e   :  { %v2133_v2 = vunpack.c.l.b16 %v2117_v47  ;;  %v2139_v16 = vsel %vm725_vm3, %v2138_v15, %v2137_v3  ;;  %v2142_v35 = vrot.slane %v2131_v23, 3  ;;  %vm16429_vm0 = vcmask 1047559   ;;  %v16456_v0 = vld [vmem:[#allocation34_spill] sm:$0xff]  ;;  %v16457_v18 = vld [vmem:[#allocation35_spill] sm:$0xff]  ;;  %v16458_v1 = vld [vmem:[#allocation41_spill] sm:$0xff] }
 0x28f   :  { %v2141_v59 = vsel %vm731_vm4, %v2140_v38, %v2139_v16  ;;  %v2144_v54 = vrot.slane %v2132_v63, 2  ;;  %v16459_v14 = vld [vmem:[#allocation40_spill] sm:$0xff]  ;;  %v16460_v20 = vld [vmem:[#allocation38_spill] sm:$0xff]  ;;  %v16461_v33 = vld [vmem:[#allocation39_spill] sm:$0xff]  ;;  %vm16462_vm15 = vcmask 1040384   ;;  %vm16465_vm14 = vcmask 1046528  }
 0x290   :  { %v2143_v51 = vsel %vm16427_vm10, %v2142_v35, %v2141_v59  ;;  %v2146_v56 = vrot.slane %v2133_v2, 1  ;;  %vm16463_vm9 = vmmov %vm16427_vm10  ;;  %vm16467_vm5 = vcmask 1041408   ;;  %vm16468_vm8 = vcmask 1042433  }
 0x291   :  { %v2145_v40 = vsel %vm16428_vm11, %v2144_v54, %v2143_v51  ;;  %vm16464_vm12 = vmmov %vm16428_vm11  ;;  %vm16469_vm6 = vcmask 1043458   ;;  %vm16470_vm13 = vcmask 1044483  }
 0x292   :  { %v2147_v37 = vsel %vm16429_vm0, %v2146_v56, %v2145_v40  ;;  %vm16466_vm7 = vmmov %vm16463_vm9 }
 0x293   :  { %v2148_v4 = vpack.c.b16 %v2147_v37, %v2147_v37  ;;  %vm16471_vm10 = vmmov %vm16428_vm11  ;;  %vm16472_vm11 = vcmask 1045508  }
 0x294   :  { %vm16473_vm0 = vmmov %vm16465_vm14 }
 0x295   :  { %2158 = vmatmul.bf16.vlgmr.msrb.gmra.mxu0 %v2148_v4  ;;  %2171 = vmatmul.bf16.vlgmr.msrb.gmra.mxu1 %v2148_v4 }
 0x296   :  { %2184 = vmatmul.bf16.vlgmr.msrb.gmra.mxu2 %v2148_v4  ;;  %2197 = vmatmul.bf16.vlgmr.msrb.gmra.mxu3 %v2148_v4 }
 0x297   :  { %3610 = vmatpush.bf16.msrb.mxu0 %v16430_v29  ;;  %3623 = vmatpush.bf16.msrb.mxu1 %v16431_v19 }
 0x298   :  { %3636 = vmatpush.bf16.msrb.mxu2 %v16432_v36  ;;  %3649 = vmatpush.bf16.msrb.mxu3 %v16433_v31 }
 0x29b   :  { %3611 = vmatpush.bf16.msrb.mxu0 %v16434_v50  ;;  %3624 = vmatpush.bf16.msrb.mxu1 %v16435_v48 }
 0x29c   :  { %3637 = vmatpush.bf16.msrb.mxu2 %v16436_v60  ;;  %3650 = vmatpush.bf16.msrb.mxu3 %v16437_v46 }
 0x29f   :  { %3612 = vmatpush.bf16.msrb.mxu0 %v16438_v32  ;;  %3625 = vmatpush.bf16.msrb.mxu1 %v16439_v13 }
 0x2a0   :  { %3638 = vmatpush.bf16.msrb.mxu2 %v16440_v6  ;;  %3651 = vmatpush.bf16.msrb.mxu3 %v16441_v9 }
 0x2a3   :  { %3613 = vmatpush.bf16.msrb.mxu0 %v16442_v52  ;;  %3626 = vmatpush.bf16.msrb.mxu1 %v16443_v11 }
 0x2a4   :  { %3639 = vmatpush.bf16.msrb.mxu2 %v16444_v30  ;;  %3652 = vmatpush.bf16.msrb.mxu3 %v16445_v24 }
 0x2a7   :  { %3614 = vmatpush.bf16.msrb.mxu0 %v16446_v34  ;;  %3627 = vmatpush.bf16.msrb.mxu1 %v16447_v55 }
 0x2a8   :  { %3640 = vmatpush.bf16.msrb.mxu2 %v16448_v21  ;;  %3653 = vmatpush.bf16.msrb.mxu3 %v16449_v17 }
 0x2ab   :  { %3615 = vmatpush.bf16.msrb.mxu0 %v16450_v44  ;;  %3628 = vmatpush.bf16.msrb.mxu1 %v16451_v26 }
 0x2ac   :  { %3641 = vmatpush.bf16.msrb.mxu2 %v16452_v57  ;;  %3654 = vmatpush.bf16.msrb.mxu3 %v16453_v62 }
 0x2af   :  { %3616 = vmatpush.bf16.msrb.mxu0 %v16454_v10  ;;  %3629 = vmatpush.bf16.msrb.mxu1 %v16455_v5 }
 0x2b0   :  { %3642 = vmatpush.bf16.msrb.mxu2 %v16456_v0  ;;  %3655 = vmatpush.bf16.msrb.mxu3 %v16457_v18 }
 0x2b3   :  { %3617 = vmatpush.bf16.msrb.mxu0 %v16458_v1  ;;  %3630 = vmatpush.bf16.msrb.mxu1 %v16459_v14 }
 0x2b4   :  { %3643 = vmatpush.bf16.msrb.mxu2 %v16460_v20  ;;  %3656 = vmatpush.bf16.msrb.mxu3 %v16461_v33 }
 0x312   :  { %v2159_v28 = vpop.f32.mrf.mxu0  ;;  %v2172_v45 = vpop.f32.mrf.mxu1 }
 0x313   :  { %v2206_v7 = vrot.slane %v2172_v45, 7 }
 0x315   :  { %v2209_v25 = vsel %vm16462_vm15, %v2159_v28, %v2206_v7  ;;  %v2212_v53 = vsel %vm723_vm2, %v2159_v28, %v2206_v7  ;;  %v2216_v12 = vsel %vm719_vm1, %v2159_v28, %v2206_v7  ;;  %v2220_v22 = vsel %vm725_vm3, %v2159_v28, %v2206_v7 }
 0x316   :  { %v2224_v47 = vsel %vm731_vm4, %v2159_v28, %v2206_v7  ;;  %v2228_v23 = vsel %vm16463_vm9, %v2159_v28, %v2206_v7  ;;  %v2232_v27 = vsel %vm16464_vm12, %v2159_v28, %v2206_v7  ;;  %v2236_v15 = vsel %vm16465_vm14, %v2206_v7, %v2159_v28 }
 0x317   :  { %vm16474_vm9 = vcmask 1046533   ;;  %vm16475_vm12 = vcmask 1045504   ;;  %vm16476_vm14 = vcmask 1046529  }
 0x319   :  { %v2185_v63 = vpop.f32.mrf.mxu2  ;;  %v2198_v3 = vpop.f32.mrf.mxu3 }
 0x31a   :  { %v2207_v38 = vrot.slane %v2185_v63, 6  ;;  %v2208_v2 = vrot.slane %v2198_v3, 5  ;;  %v2161_v16 = vpop.f32.mrf.mxu0  ;;  %v2174_v35 = vpop.f32.mrf.mxu1 }
 0x31c   :  { %v2210_v59 = vsel %vm719_vm1, %v2207_v38, %v2208_v2  ;;  %v2213_v54 = vsel %vm725_vm3, %v2207_v38, %v2208_v2  ;;  %v2217_v51 = vsel %vm731_vm4, %v2207_v38, %v2208_v2  ;;  %v2221_v56 = vsel %vm16466_vm7, %v2207_v38, %v2208_v2 }
 0x31d   :  { %v2211_v40 = vsel %vm16467_vm5, %v2209_v25, %v2210_v59  ;;  %v2214_v37 = vsel %vm16468_vm8, %v2212_v53, %v2213_v54  ;;  %v2218_v4 = vsel %vm16469_vm6, %v2216_v12, %v2217_v51  ;;  %v2222_v28 = vsel %vm16470_vm13, %v2220_v22, %v2221_v56  ;;  %v2095_v25 = vld [vmem:[#allocation2 + $0x2] ss:$8 sm:$0xf] }
 0x31e   :  { %v2215_v45 = vrot.slane %v2214_v37, 1  ;;  %v2219_v7 = vrot.slane %v2218_v4, 2  ;;  %v2223_v63 = vrot.slane %v2222_v28, 3  ;;  %v2225_v3 = vsel %vm16471_vm10, %v2207_v38, %v2208_v2  ;;  %v2097_v59 = vld [vmem:[#allocation2 + $0x22] ss:$8 sm:$0xf] }
 0x31f   :  { %v2226_v16 = vsel %vm16472_vm11, %v2224_v47, %v2225_v3  ;;  %v2229_v35 = vsel %vm16473_vm0, %v2208_v2, %v2207_v38  ;;  %v2233_v33 = vsel %vm16462_vm15, %v2207_v38, %v2208_v2  ;;  %v2237_v20 = vsel %vm723_vm2, %v2207_v38, %v2208_v2  ;;  %v2099_v54 = vld [vmem:[#allocation2 + $0x42] ss:$8 sm:$0xf] }
 0x320   :  { %v2230_v53 = vsel %vm16474_vm9, %v2228_v23, %v2229_v35  ;;  %v2234_v12 = vsel %vm16475_vm12, %v2233_v33, %v2232_v27  ;;  %v2238_v22 = vsel %vm16476_vm14, %v2237_v20, %v2236_v15  ;;  %v2101_v51 = vld [vmem:[#allocation2 + $0x62] ss:$8 sm:$0xf]  ;;  %v10405_v56 = vadd.f32 %v2211_v40, %v2095_v25 }
 0x321   :  { %v2187_v37 = vpop.f32.mrf.mxu2  ;;  %v2200_v47 = vpop.f32.mrf.mxu3  ;;  %v10407_v4 = vadd.f32 %v2215_v45, %v2097_v59  ;;  %v10409_v28 = vadd.f32 %v2219_v7, %v2099_v54  ;;  %v10411_v3 = vadd.f32 %v2223_v63, %v2101_v51  ;;  %v2227_v2 = vrot.slane %v2226_v16, 4  ;;  %v2103_v27 = vld [vmem:[#allocation2 + $0x82] ss:$8 sm:$0xf] }
 0x322   :  { %v6884_v38 = vmul.f32 -1.442695, %v10405_v56  ;;  %v2231_v40 = vrot.slane %v2230_v53, 5  ;;  %v2105_v63 = vld [vmem:[#allocation2 + $0xa2] ss:$8 sm:$0xf] }
 0x323   :  { %v6885_v23 = vmul.f32 -1.442695, %v10407_v4  ;;  %v6886_v33 = vmul.f32 -1.442695, %v10409_v28  ;;  %v6887_v20 = vmul.f32 -1.442695, %v10411_v3  ;;  %v10417_v15 = vadd.f32 %v2227_v2, %v2103_v27 }
 0x324   :  { %7379 = vpow2.f32 %v6884_v38  ;;  %v2235_v25 = vrot.slane %v2234_v12, 6  ;;  %v10420_v59 = vadd.f32 %v2231_v40, %v2105_v63  ;;  %v2416_v37 = vrot.slane %v10405_v56, 1  ;;  %v2107_v53 = vld [vmem:[#allocation2 + $0xc2] ss:$8 sm:$0xf] }
 0x325   :  { %7381 = vpow2.f32 %v6885_v23  ;;  %v6888_v35 = vmul.f32 -1.442695, %v10417_v15  ;;  %v2417_v2 = vrot.slane %v10407_v4, 1  ;;  %v2239_v12 = vrot.slane %v2238_v22, 7 }
 0x326   :  { %7383 = vpow2.f32 %v6886_v33  ;;  %v10430_v23 = vadd.f32 %v2235_v25, %v2107_v53  ;;  %v6889_v33 = vmul.f32 -1.442695, %v10420_v59  ;;  %v2418_v40 = vrot.slane %v10409_v28, 1 }
 0x327   :  { %7385 = vpow2.f32 %v6887_v20  ;;  %v6892_v20 = vmul.f32 -1.442695, %v2416_v37  ;;  %v2420_v37 = vrot.slane %v10417_v15, 1  ;;  %v2608_v1 = vrot.slane %v10405_v56, 3 }
 0x328   :  { %7387 = vpow2.f32 %v6888_v35  ;;  %v6890_v63 = vmul.f32 -1.442695, %v10430_v23  ;;  %v2419_v35 = vrot.slane %v10411_v3, 1  ;;  %v2609_v18 = vrot.slane %v10407_v4, 3 }
 0x329   :  { %v6896_v5 = vmul.f32 -1.442695, %v2420_v37  ;;  %v2585_v37 = vrot.slane %v10407_v4, 2  ;;  %v10471_v44 = vmul.f32 -1.442695, %v2608_v1 }
 0x32a   :  { %v7380_v45 = vpop.eup %7379 }
 0x32b   :  { %v7382_v7 = vpop.eup %7381  ;;  %v10422_v54 = vadd.f32 1.0, %v7380_v45  ;;  %v6893_v45 = vmul.f32 -1.442695, %v2417_v2  ;;  %v2422_v2 = vrot.slane %v10430_v23, 1 }
 0x32c   :  { %v7384_v16 = vpop.eup %7383  ;;  %v10424_v51 = vadd.f32 1.0, %v7382_v7  ;;  %v2109_v7 = vld [vmem:[#allocation2 + $0xe2] ss:$8 sm:$0xf] }
 0x32d   :  { %v10427_v47 = vadd.f32 1.0, %v7384_v16  ;;  %v7386_v38 = vpop.eup %7385  ;;  %7389 = vrcp.f32 %v10422_v54  ;;  %v10441_v25 = vadd.f32 %v2239_v12, %v2109_v7  ;;  %v6895_v12 = vmul.f32 -1.442695, %v2419_v35 }
 0x32e   :  { %7391 = vrcp.f32 %v10424_v51  ;;  %v10435_v27 = vadd.f32 1.0, %v7386_v38  ;;  %v7388_v16 = vpop.eup %7387  ;;  %v2421_v38 = vrot.slane %v10420_v59, 1  ;;  %v2584_v35 = vrot.slane %v10405_v56, 2 }
 0x32f   :  { %7393 = vrcp.f32 %v10427_v47  ;;  %v10453_v7 = vadd.f32 1.0, %v7388_v16  ;;  %v6891_v57 = vmul.f32 -1.442695, %v10441_v25  ;;  %v2299_v56 = vand.u32 2147483648, %v10422_v54 }
 0x330   :  { %7395 = vpow2.f32 %v6889_v33  ;;  %v6894_v33 = vmul.f32 -1.442695, %v2418_v40  ;;  %v6897_v10 = vmul.f32 -1.442695, %v2421_v38  ;;  %vm2293_vm7 = vweird.f32 %v10422_v54 }
 0x331   :  { %7397 = vpow2.f32 %v6892_v20  ;;  %vm2308_vm5 = vweird.f32 %v10424_v51  ;;  %vm2323_vm15 = vweird.f32 %v10427_v47 }
 0x332   :  { %7399 = vrcp.f32 %v10435_v27 }
 0x333   :  { %v10443_v22 = vpop.eup %7389  ;;  %7401 = vpow2.f32 %v6893_v45 }
 0x334   :  { %v10448_v53 = vpop.eup %7391  ;;  %7403 = vpow2.f32 %v6890_v63  ;;  %v2289_v62 = vmul.f32 %v10443_v22, %v10422_v54  ;;  %v6898_v63 = vmul.f32 -1.442695, %v2422_v2  ;;  %v10473_v2 = vmul.f32 -1.442695, %v2609_v18 }
 0x335   :  { %v10451_v14 = vpop.eup %7393  ;;  %v2304_v40 = vmul.f32 %v10448_v53, %v10424_v51  ;;  %7405 = vpow2.f32 %v6894_v33  ;;  %v2297_v18 = vand.u32 2147483647, %v10422_v54  ;;  %vm2294_vm8 = vweird.f32 %v10443_v22 }
 0x336   :  { %v7396_v0 = vpop.eup %7395  ;;  %v2319_v16 = vmul.f32 %v10451_v14, %v10427_v47  ;;  %7407 = vpow2.f32 %v6895_v12  ;;  %v2290_v12 = vsub.f32 1.0, %v2289_v62  ;;  %vm2309_vm13 = vweird.f32 %v10448_v53  ;;  %vm10536_vm11 = vmor %vm2293_vm7, %vm2294_vm8 }
 0x337   :  { %v7398_v45 = vpop.eup %7397  ;;  %7409 = vrcp.f32 %v10453_v7  ;;  %v2305_v21 = vsub.f32 1.0, %v2304_v40  ;;  %v10478_v4 = vadd.f32 1.0, %v7396_v0  ;;  %v2312_v0 = vand.u32 2147483647, %v10424_v51  ;;  %vm10552_vm9 = vmor %vm2308_vm5, %vm2309_vm13 }
 0x338   :  { %v10465_v20 = vpop.eup %7399  ;;  %7411 = vpow2.f32 %v6896_v5  ;;  %v10476_v17 = vadd.f32 1.0, %v7398_v45  ;;  %v2320_v38 = vsub.f32 1.0, %v2319_v16  ;;  %v2291_v45 = vmul.f32 %v10443_v22, %v2290_v12 }
 0x339   :  { %v7402_v26 = vpop.eup %7401  ;;  %7413 = vpow2.f32 %v6897_v10  ;;  %v2334_v1 = vmul.f32 %v10465_v20, %v10435_v27  ;;  %v10489_v10 = vor.u32 1.1754944e-38, %v2299_v56  ;;  %vm10505_vm6 = vcmp.eq.f32.partialorder %v2297_v18, 8.507059e+37 }
 0x33a   :  { %v7404_v33 = vpop.eup %7403  ;;  %v10483_v55 = vadd.f32 1.0, %v7402_v26  ;;  %7415 = vpow2.f32 %v6891_v57  ;;  %v2306_v26 = vmul.f32 %v10448_v53, %v2305_v21  ;;  %v2314_v57 = vand.u32 2147483648, %v10424_v51 }
 0x33b   :  { %v7406_v5 = vpop.eup %7405  ;;  %7417 = vpow2.f32 %v6898_v63  ;;  %v10487_v62 = vadd.f32 1.0, %v7404_v33  ;;  %v2321_v34 = vmul.f32 %v10451_v14, %v2320_v38  ;;  %v2327_v63 = vand.u32 2147483647, %v10427_v47 }
 0x33c   :  { %v7408_v40 = vpop.eup %7407  ;;  %7419 = vrcp.f32 %v10476_v17  ;;  %v2335_v33 = vsub.f32 1.0, %v2334_v1  ;;  %v10501_v24 = vadd.f32 1.0, %v7406_v5  ;;  %v2329_v12 = vand.u32 2147483648, %v10427_v47 }
 0x33d   :  { %v10496_v16 = vpop.eup %7409  ;;  %7421 = vrcp.f32 %v10478_v4  ;;  %v10512_v38 = vadd.f32 1.0, %v7408_v40  ;;  %vm2324_vm10 = vweird.f32 %v10451_v14  ;;  %v2292_v5 = vadd.f32 %v10443_v22, %v2291_v45 }
 0x33e   :  { %v7412_v56 = vpop.eup %7411  ;;  %7423 = vrcp.f32 %v10483_v55  ;;  %v2307_v18 = vadd.f32 %v10448_v53, %v2306_v26  ;;  %v2349_v11 = vmul.f32 %v10496_v16, %v10453_v7  ;;  %v2322_v40 = vadd.f32 %v10451_v14, %v2321_v34  ;;  %vm10570_vm14 = vmor %vm2323_vm15, %vm2324_vm10 }
 0x33f   :  { %v10510_v30 = vpop.eup %7413  ;;  %7425 = vtanh.f32 %v2584_v35  ;;  %v2336_v35 = vmul.f32 %v10465_v20, %v2335_v33  ;;  %vm10540_vm0 = vcmp.eq.f32.partialorder %v2312_v0, 8.507059e+37  ;;  %v2315_v33 = vor.u32 1.1754944e-38, %v2314_v57 }
 0x340   :  { %v7416_v1 = vpop.eup %7415  ;;  %7427 = vtanh.f32 %v2585_v37  ;;  %v10529_v37 = vadd.f32 1.0, %v7412_v56  ;;  %vm10556_vm12 = vcmp.eq.f32.partialorder %v2327_v63, 8.507059e+37  ;;  %v2330_v56 = vor.u32 1.1754944e-38, %v2329_v12 }
 0x341   :  { %v10520_v52 = vpop.eup %7417  ;;  %v10522_v9 = vadd.f32 1.0, %v7416_v1  ;;  %7429 = vrcp.f32 %v10487_v62  ;;  %v2296_v47 = vsel %vm10536_vm11, %v10443_v22, %v2292_v5  ;;  %v2311_v51 = vsel %vm10552_vm9, %v10448_v53, %v2307_v18 }
 0x342   :  { %v10527_v6 = vpop.eup %7419  ;;  %7431 = vrcp.f32 %v10501_v24  ;;  %v2342_v57 = vand.u32 2147483647, %v10435_v27  ;;  %v2350_v63 = vsub.f32 1.0, %v2349_v11  ;;  %v2326_v45 = vsel %vm10570_vm14, %v10451_v14, %v2322_v40 }
 0x343   :  { %v10545_v26 = vpop.eup %7421  ;;  %7433 = vrcp.f32 %v10512_v38  ;;  %v2337_v22 = vadd.f32 %v10465_v20, %v2336_v35  ;;  %vm2339_vm7 = vweird.f32 %v10465_v20  ;;  %v2344_v5 = vand.u32 2147483648, %v10435_v27 }
 0x344   :  { %v10560_v1 = vpop.eup %7423  ;;  %7435 = vrcp.f32 %v10522_v9  ;;  %v2364_v11 = vmul.f32 %v10545_v26, %v10478_v4  ;;  %v2465_v18 = vmul.f32 %v10527_v6, %v10476_v17  ;;  %v10597_v14 = vsel %vm10505_vm6, %v10489_v10, %v2296_v47 }
 0x345   :  { %v10575_v12 = vpop.eup %7425  ;;  %7437 = vrcp.f32 %v10529_v37  ;;  %v10601_v40 = vsel %vm10540_vm0, %v2315_v33, %v2311_v51  ;;  %vm2338_vm5 = vweird.f32 %v10435_v27  ;;  %v10609_v54 = vsel %vm10556_vm12, %v2330_v56, %v2326_v45 }
 0x346   :  { %v10583_v53 = vpop.eup %7427  ;;  %7439 = vpow2.f32 %v10471_v44  ;;  %vm10613_vm8 = vmor %vm2338_vm5, %vm2339_vm7  ;;  %vm10617_vm6 = vcmp.eq.f32.partialorder %v2342_v57, 8.507059e+37  ;;  %v2351_v27 = vmul.f32 %v10496_v16, %v2350_v63  ;;  %v2357_v34 = vand.u32 2147483647, %v10453_v7 }
 0x347   :  { %v10591_v13 = vpop.eup %7429  ;;  %7441 = vpow2.f32 %v10473_v2  ;;  %v2341_v2 = vsel %vm10613_vm8, %v10465_v20, %v2337_v22  ;;  %v2359_v33 = vand.u32 2147483648, %v10453_v7  ;;  %v2374_v0 = vand.u32 2147483648, %v10478_v4 }
 0x348   :  { %v10604_v35 = vpop.eup %7431  ;;  %v2345_v56 = vor.u32 1.1754944e-38, %v2344_v5  ;;  %v2365_v47 = vsub.f32 1.0, %v2364_v11  ;;  %v2379_v51 = vmul.f32 %v10591_v13, %v10487_v62  ;;  %v2466_v57 = vsub.f32 1.0, %v2465_v18 }
 0x349   :  { %v10622_v21 = vpop.eup %7433  ;;  %vm2353_vm13 = vweird.f32 %v10453_v7  ;;  %vm2354_vm10 = vweird.f32 %v10496_v16  ;;  %v16493_v20 = vrot.slane %v10441_v25, 1  ;;  %v2480_v22 = vmul.f32 %v10560_v1, %v10483_v55 }
 0x34a   :  { %v10632_v45 = vpop.eup %7435  ;;  %v10644_v5 = vsel %vm10617_vm6, %v2345_v56, %v2341_v2  ;;  %v2352_v11 = vadd.f32 %v10496_v16, %v2351_v27  ;;  %vm2368_vm11 = vweird.f32 %v10478_v4  ;;  %v2372_v18 = vand.u32 2147483647, %v10478_v4  ;;  %vm10666_vm15 = vmor %vm2353_vm13, %vm2354_vm10 }
 0x34b   :  { %v6899_v63 = vmul.f32 -1.442695, %v16493_v20  ;;  %v10640_v44 = vpop.eup %7437  ;;  %vm10651_vm0 = vcmp.eq.f32.partialorder %v2357_v34, 8.507059e+37  ;;  %v2360_v20 = vor.u32 1.1754944e-38, %v2359_v33  ;;  %v2375_v60 = vor.u32 1.1754944e-38, %v2374_v0 }
 0x34c   :  { %v10649_v32 = vpop.eup %7439  ;;  %v2387_v48 = vand.u32 2147483647, %v10487_v62  ;;  %v2366_v10 = vmul.f32 %v10545_v26, %v2365_v47  ;;  %v2380_v2 = vsub.f32 1.0, %v2379_v51  ;;  %v2394_v27 = vmul.f32 %v10632_v45, %v10522_v9 }
 0x34d   :  { %v10656_v50 = vpop.eup %7441  ;;  %v2467_v56 = vmul.f32 %v10527_v6, %v2466_v57  ;;  %v2389_v33 = vand.u32 2147483648, %v10487_v62  ;;  %7443 = vpow2.f32 %v6899_v63  ;;  %v10672_v0 = vadd.f32 1.0, %v10510_v30 }
 0x34e   :  { %v2481_v47 = vsub.f32 1.0, %v2480_v22  ;;  %v2356_v51 = vsel %vm10666_vm15, %v10496_v16, %v2352_v11  ;;  %vm10677_vm9 = vcmp.eq.f32.partialorder %v2372_v18, 8.507059e+37  ;;  %vm2383_vm12 = vweird.f32 %v10487_v62 }
 0x34f   :  { %v10683_v7 = vadd.f32 1.0, %v10520_v52  ;;  %vm2469_vm14 = vweird.f32 %v10476_v17  ;;  %v2495_v30 = vmul.f32 %v10604_v35, %v10501_v24  ;;  %vm2369_vm7 = vweird.f32 %v10545_v26 }
 0x350   :  { %v2404_v63 = vand.u32 2147483648, %v10522_v9  ;;  %vm2470_vm5 = vweird.f32 %v10527_v6  ;;  %v2473_v16 = vand.u32 2147483647, %v10476_v17  ;;  %v2367_v22 = vadd.f32 %v10545_v26, %v2366_v10  ;;  %vm10703_vm8 = vmor %vm2368_vm11, %vm2369_vm7 }
 0x351   :  { %v2381_v11 = vmul.f32 %v10591_v13, %v2380_v2  ;;  %v2395_v18 = vsub.f32 1.0, %v2394_v27  ;;  %v2468_v52 = vadd.f32 %v10527_v6, %v2467_v56  ;;  %v10697_v34 = vsel %vm10651_vm0, %v2360_v20, %v2356_v51  ;;  %vm10720_vm11 = vmor %vm2469_vm14, %vm2470_vm5 }
 0x352   :  { %v2390_v31 = vor.u32 1.1754944e-38, %v2389_v33  ;;  %v2475_v36 = vand.u32 2147483648, %v10476_v17  ;;  %v2482_v19 = vmul.f32 %v10560_v1, %v2481_v47  ;;  %vm10707_vm6 = vcmp.eq.f32.partialorder %v2387_v48, 8.507059e+37 }
 0x353   :  { %vm2398_vm13 = vweird.f32 %v10522_v9  ;;  %v2402_v46 = vand.u32 2147483647, %v10522_v9  ;;  %v2496_v20 = vsub.f32 1.0, %v2495_v30  ;;  %v2510_v2 = vmul.f32 %v10622_v21, %v10512_v38  ;;  %v7444_v27 = vpop.eup %7443 }
 0x354   :  { %vm2384_vm10 = vweird.f32 %v10591_v13  ;;  %v2405_v4 = vor.u32 1.1754944e-38, %v2404_v63  ;;  %vm10724_vm0 = vcmp.eq.f32.partialorder %v2473_v16, 8.507059e+37  ;;  %v2488_v33 = vand.u32 2147483647, %v10483_v55 }
 0x355   :  { %v2371_v47 = vsel %vm10703_vm8, %v10545_v26, %v2367_v22  ;;  %v2382_v51 = vadd.f32 %v10591_v13, %v2381_v11  ;;  %v2396_v30 = vmul.f32 %v10632_v45, %v2395_v18  ;;  %v2472_v17 = vsel %vm10720_vm11, %v10527_v6, %v2468_v52  ;;  %vm10756_vm5 = vmor %vm2383_vm12, %vm2384_vm10 }
 0x356   :  { %v2476_v63 = vor.u32 1.1754944e-38, %v2475_v36  ;;  %v2483_v16 = vadd.f32 %v10560_v1, %v2482_v19  ;;  %vm2484_vm15 = vweird.f32 %v10483_v55  ;;  %vm2485_vm14 = vweird.f32 %v10560_v1 }
 0x357   :  { %vm10740_vm7 = vcmp.eq.f32.partialorder %v2402_v46, 8.507059e+37  ;;  %v10744_v29 = vadd.f32 1.0, %v7444_v27  ;;  %v2490_v26 = vand.u32 2147483648, %v10483_v55  ;;  %v2497_v22 = vmul.f32 %v10604_v35, %v2496_v20 }
 0x358   :  { %v2511_v11 = vsub.f32 1.0, %v2510_v2  ;;  %v10750_v36 = vsel %vm10677_vm9, %v2375_v60, %v2371_v47  ;;  %vm2399_vm8 = vweird.f32 %v10632_v45  ;;  %v10763_v6 = vsel %vm10724_vm0, %v2476_v63, %v2472_v17  ;;  %vm10773_vm9 = vmor %vm2484_vm15, %vm2485_vm14 }
 0x359   :  { %vm10765_vm11 = vcmp.eq.f32.partialorder %v2488_v33, 8.507059e+37  ;;  %v2386_v60 = vsel %vm10756_vm5, %v10591_v13, %v2382_v51  ;;  %v2397_v62 = vadd.f32 %v10632_v45, %v2396_v30  ;;  %v2503_v18 = vand.u32 2147483647, %v10501_v24  ;;  %vm10797_vm10 = vmor %vm2398_vm13, %vm2399_vm8 }
 0x35a   :  { %7445 = vrcp.f32 %v10672_v0  ;;  %v2487_v52 = vsel %vm10773_vm9, %v10560_v1, %v2483_v16  ;;  %v2505_v46 = vand.u32 2147483648, %v10501_v24  ;;  %v2525_v20 = vmul.f32 %v10640_v44, %v10529_v37 }
 0x35b   :  { %7447 = vrcp.f32 %v10683_v7  ;;  %v2491_v13 = vor.u32 1.1754944e-38, %v2490_v26  ;;  %v2498_v2 = vadd.f32 %v10604_v35, %v2497_v22  ;;  %vm2500_vm12 = vweird.f32 %v10604_v35 }
 0x35c   :  { %v2512_v27 = vmul.f32 %v10622_v21, %v2511_v11  ;;  %v10791_v48 = vsel %vm10707_vm6, %v2390_v31, %v2386_v60  ;;  %vm2499_vm0 = vweird.f32 %v10501_v24  ;;  %v2518_v56 = vand.u32 2147483647, %v10512_v38 }
 0x35d   :  { %v2520_v33 = vand.u32 2147483648, %v10512_v38  ;;  %v2401_v10 = vsel %vm10797_vm10, %v10632_v45, %v2397_v62  ;;  %v10809_v31 = vsel %vm10765_vm11, %v2491_v13, %v2487_v52  ;;  %vm2514_vm6 = vweird.f32 %v10512_v38  ;;  %vm10813_vm13 = vmor %vm2499_vm0, %vm2500_vm12 }
 0x35e   :  { %v2611_v9 = vrot.slane %v10411_v3, 3  ;;  %vm10817_vm15 = vcmp.eq.f32.partialorder %v2503_v18, 8.507059e+37  ;;  %v2506_v51 = vor.u32 1.1754944e-38, %v2505_v46  ;;  %v2526_v30 = vsub.f32 1.0, %v2525_v20 }
 0x35f   :  { %7449 = vrcp.f32 %v10744_v29  ;;  %v2502_v17 = vsel %vm10813_vm13, %v10604_v35, %v2498_v2  ;;  %v2513_v63 = vadd.f32 %v10622_v21, %v2512_v27  ;;  %vm2515_vm14 = vweird.f32 %v10622_v21 }
 0x360   :  { %v10822_v45 = vpop.eup %7445  ;;  %v2612_v16 = vrot.slane %v10417_v15, 3  ;;  %v10834_v22 = vsel %vm10740_vm7, %v2405_v4, %v2401_v10  ;;  %vm10836_vm5 = vcmp.eq.f32.partialorder %v2518_v56, 8.507059e+37  ;;  %v2521_v19 = vor.u32 1.1754944e-38, %v2520_v33  ;;  %vm10851_vm7 = vmor %vm2514_vm6, %vm2515_vm14 }
 0x361   :  { %v10830_v26 = vpop.eup %7447  ;;  %16522 = vst [vmem:[#allocation44_spill] sm:$0xff] %v10834_v22  ;;  %vm2530_vm8 = vweird.f32 %v10640_v44  ;;  %v2535_v35 = vand.u32 2147483648, %v10529_v37  ;;  %v2613_v55 = vrot.slane %v10420_v59, 3  ;;  %v16525_v60 = vrot.slane %v10409_v28, 3 }
 0x362   :  { %v6903_v57 = vmul.f32 -1.442695, %v2611_v9  ;;  %v10847_v61 = vsel %vm10817_vm15, %v2506_v51, %v2502_v17  ;;  %v2527_v18 = vmul.f32 %v10640_v44, %v2526_v30  ;;  %vm2529_vm11 = vweird.f32 %v10529_v37 }
 0x363   :  { %v6902_v62 = vmul.f32 -1.442695, %v16525_v60  ;;  %v2533_v52 = vand.u32 2147483647, %v10529_v37  ;;  %v2540_v46 = vmul.f32 %v10822_v45, %v10672_v0  ;;  %v2517_v20 = vsel %vm10851_vm7, %v10622_v21, %v2513_v63  ;;  %vm10903_vm0 = vmor %vm2529_vm11, %vm2530_vm8 }
 0x364   :  { %v2555_v38 = vmul.f32 %v10830_v26, %v10683_v7  ;;  %v2586_v13 = vrot.slane %v10409_v28, 2  ;;  %v6904_v2 = vmul.f32 -1.442695, %v2612_v16  ;;  %v2548_v1 = vand.u32 2147483647, %v10672_v0 }
 0x365   :  { %v10866_v27 = vpop.eup %7449  ;;  %v2587_v56 = vrot.slane %v10411_v3, 2  ;;  %v2614_v33 = vrot.slane %v10430_v23, 3  ;;  %7451 = vpow2.f32 %v6902_v62  ;;  %v2536_v10 = vor.u32 1.1754944e-38, %v2535_v35 }
 0x366   :  { %v2550_v9 = vand.u32 2147483648, %v10672_v0  ;;  %7453 = vpow2.f32 %v6903_v57  ;;  %v6905_v21 = vmul.f32 -1.442695, %v2613_v55  ;;  %v10874_v47 = vsel %vm10836_vm5, %v2521_v19, %v2517_v20 }
 0x367   :  { %v2541_v28 = vsub.f32 1.0, %v2540_v46  ;;  %7455 = vpow2.f32 %v6904_v2  ;;  %v10877_v24 = vadd.f32 1.0, %v10649_v32  ;;  %vm10879_vm9 = vcmp.eq.f32.partialorder %v2533_v52, 8.507059e+37 }
 0x368   :  { %v2556_v3 = vsub.f32 1.0, %v2555_v38  ;;  %v2570_v30 = vmul.f32 %v10866_v27, %v10744_v29  ;;  %7457 = vtanh.f32 %v2586_v13  ;;  %v10886_v17 = vadd.f32 1.0, %v10656_v50 }
 0x369   :  { %v2528_v63 = vadd.f32 %v10640_v44, %v2527_v18  ;;  %vm2544_vm12 = vweird.f32 %v10672_v0  ;;  %7459 = vtanh.f32 %v2587_v56  ;;  %v2615_v32 = vrot.slane %v10441_v25, 3 }
 0x36a   :  { %v6906_v16 = vmul.f32 -1.442695, %v2614_v33  ;;  %v10891_v11 = vor.u32 1.1754944e-38, %v2550_v9  ;;  %vm2559_vm10 = vweird.f32 %v10683_v7  ;;  %v2563_v19 = vand.u32 2147483647, %v10683_v7 }
 0x36b   :  { %7461 = vpow2.f32 %v6905_v21  ;;  %v7452_v35 = vpop.eup %7451  ;;  %v2542_v55 = vmul.f32 %v10822_v45, %v2541_v28  ;;  %v2565_v50 = vand.u32 2147483648, %v10683_v7  ;;  %v2588_v60 = vrot.slane %v10417_v15, 2 }
 0x36c   :  { %7463 = vrcp.f32 %v10877_v24  ;;  %v7454_v62 = vpop.eup %7453  ;;  %v2557_v4 = vmul.f32 %v10830_v26, %v2556_v3  ;;  %v2571_v18 = vsub.f32 1.0, %v2570_v30  ;;  %v10908_v52 = vadd.f32 1.0, %v7452_v35 }
 0x36d   :  { %7465 = vrcp.f32 %v10886_v17  ;;  %v7456_v46 = vpop.eup %7455  ;;  %v2532_v15 = vsel %vm10903_vm0, %v10640_v44, %v2528_v63  ;;  %v6907_v20 = vmul.f32 -1.442695, %v2615_v32  ;;  %v10914_v38 = vadd.f32 1.0, %v7454_v62 }
 0x36e   :  { %7467 = vpow2.f32 %v6906_v16  ;;  %v10916_v37 = vpop.eup %7457  ;;  %vm10918_vm6 = vcmp.eq.f32.partialorder %v2548_v1, 8.507059e+37  ;;  %vm2574_vm13 = vweird.f32 %v10744_v29  ;;  %v2578_v2 = vand.u32 2147483647, %v10744_v29 }
 0x36f   :  { %v2589_v56 = vrot.slane %v10420_v59, 2  ;;  %7469 = vrcp.f32 %v10908_v52  ;;  %v10926_v33 = vpop.eup %7459  ;;  %vm2545_vm15 = vweird.f32 %v10822_v45  ;;  %vm2560_vm14 = vweird.f32 %v10830_v26 }
 0x370   :  { %v10930_v44 = vadd.f32 1.0, %v7456_v46  ;;  %7471 = vrcp.f32 %v10914_v38  ;;  %v2543_v9 = vadd.f32 %v10822_v45, %v2542_v55  ;;  %v2558_v21 = vadd.f32 %v10830_v26, %v2557_v4  ;;  %vm10953_vm8 = vmor %vm2544_vm12, %vm2545_vm15 }
 0x371   :  { %v7462_v1 = vpop.eup %7461  ;;  %v2572_v28 = vmul.f32 %v10866_v27, %v2571_v18  ;;  %7473 = vtanh.f32 %v2588_v60  ;;  %v10940_v3 = vsel %vm10879_vm9, %v2536_v10, %v2532_v15  ;;  %vm10942_vm5 = vcmp.eq.f32.partialorder %v2563_v19, 8.507059e+37  ;;  %vm10965_vm7 = vmor %vm2559_vm10, %vm2560_vm14 }
 0x372   :  { %v10936_v59 = vpop.eup %7463  ;;  %v2590_v63 = vrot.slane %v10430_v23, 2  ;;  %7475 = vpow2.f32 %v6907_v20  ;;  %v2580_v10 = vand.u32 2147483648, %v10744_v29  ;;  %v2591_v51 = vrot.slane %v10441_v25, 2 }
 0x373   :  { %v10947_v32 = vpop.eup %7465  ;;  %7477 = vtanh.f32 %v2589_v56  ;;  %v2657_v19 = vmul.f32 %v10936_v59, %v10877_v24  ;;  %v2566_v0 = vor.u32 1.1754944e-38, %v2565_v50  ;;  %vm2575_vm11 = vweird.f32 %v10866_v27 }
 0x374   :  { %v7468_v23 = vpop.eup %7467  ;;  %v2672_v55 = vmul.f32 %v10947_v32, %v10886_v17  ;;  %7479 = vrcp.f32 %v10930_v44  ;;  %v2547_v60 = vsel %vm10953_vm8, %v10822_v45, %v2543_v9  ;;  %v2562_v7 = vsel %vm10965_vm7, %v10830_v26, %v2558_v21  ;;  %vm11009_vm12 = vmor %vm2574_vm13, %vm2575_vm11 }
 0x375   :  { %v10973_v25 = vpop.eup %7469  ;;  %v2573_v62 = vadd.f32 %v10866_v27, %v2572_v28  ;;  %v2658_v50 = vsub.f32 1.0, %v2657_v19  ;;  %7481 = vtanh.f32 %v2590_v63  ;;  %v10984_v4 = vadd.f32 1.0, %v7462_v1 }
 0x376   :  { %v10982_v57 = vpop.eup %7471  ;;  %v2673_v18 = vsub.f32 1.0, %v2672_v55  ;;  %v2687_v46 = vmul.f32 %v10973_v25, %v10908_v52  ;;  %vm10990_vm9 = vcmp.eq.f32.partialorder %v2578_v2, 8.507059e+37  ;;  %v2581_v20 = vor.u32 1.1754944e-38, %v2580_v10 }
 0x377   :  { %v10988_v15 = vpop.eup %7473  ;;  %7483 = vtanh.f32 %v2591_v51  ;;  %v10994_v26 = vadd.f32 1.0, %v7468_v23  ;;  %v10999_v1 = vsel %vm10918_vm6, %v10891_v11, %v2547_v60  ;;  %v11003_v9 = vsel %vm10942_vm5, %v2566_v0, %v2562_v7 }
 0x378   :  { %v7476_v56 = vpop.eup %7475  ;;  %v2665_v21 = vand.u32 2147483647, %v10877_v24  ;;  %v2667_v28 = vand.u32 2147483648, %v10877_v24  ;;  %v2577_v11 = vsel %vm11009_vm12, %v10866_v27, %v2573_v62  ;;  %v2659_v13 = vmul.f32 %v10936_v59, %v2658_v50 }
 0x379   :  { %v11015_v63 = vpop.eup %7477  ;;  %vm2661_vm10 = vweird.f32 %v10877_v24  ;;  %v2702_v29 = vmul.f32 %v10982_v57, %v10914_v38  ;;  %v2674_v16 = vmul.f32 %v10947_v32, %v2673_v18  ;;  %vm2676_vm0 = vweird.f32 %v10886_v17 }
 0x37a   :  { %v11024_v30 = vpop.eup %7479  ;;  %v2688_v10 = vsub.f32 1.0, %v2687_v46  ;;  %7485 = vrcp.f32 %v10984_v4  ;;  %v11029_v51 = vadd.f32 1.0, %v7476_v56  ;;  %v2680_v27 = vand.u32 2147483647, %v10886_v17 }
 0x37b   :  { %v2682_v19 = vand.u32 2147483648, %v10886_v17  ;;  %7487 = vrcp.f32 %v10994_v26  ;;  %v11034_v23 = vpop.eup %7481  ;;  %v11038_v35 = vsel %vm10990_vm9, %v2581_v20, %v2577_v11  ;;  %vm11040_vm6 = vcmp.eq.f32.partialorder %v2665_v21, 8.507059e+37 }
 0x37c   :  { %16544 = vst [vmem:[#allocation42_spill] sm:$0xff] %v11034_v23  ;;  %v2668_v55 = vor.u32 1.1754944e-38, %v2667_v28  ;;  %v2697_v60 = vand.u32 2147483648, %v10908_v52  ;;  %v2660_v62 = vadd.f32 %v10936_v59, %v2659_v13  ;;  %vm2662_vm13 = vweird.f32 %v10936_v59 }
 0x37d   :  { %v11045_v7 = vpop.eup %7483  ;;  %v2703_v50 = vsub.f32 1.0, %v2702_v29  ;;  %v2717_v18 = vmul.f32 %v11024_v30, %v10930_v44  ;;  %v2675_v46 = vadd.f32 %v10947_v32, %v2674_v16  ;;  %vm2677_vm15 = vweird.f32 %v10947_v32  ;;  %vm11065_vm8 = vmor %vm2661_vm10, %vm2662_vm13 }
 0x37e   :  { %16547 = vst [vmem:[#allocation45_spill] sm:$0xff] %v11045_v7  ;;  %v2689_v45 = vmul.f32 %v10973_v25, %v2688_v10  ;;  %v2712_v20 = vand.u32 2147483648, %v10914_v38  ;;  %vm11055_vm14 = vcmp.eq.f32.partialorder %v2680_v27, 8.507059e+37  ;;  %v2683_v2 = vor.u32 1.1754944e-38, %v2682_v19  ;;  %vm11082_vm7 = vmor %vm2676_vm0, %vm2677_vm15 }
 0x37f   :  { %vm2691_vm5 = vweird.f32 %v10908_v52  ;;  %7489 = vrcp.f32 %v11029_v51  ;;  %v2695_v11 = vand.u32 2147483647, %v10908_v52  ;;  %v2710_v13 = vand.u32 2147483647, %v10914_v38 }
 0x380   :  { %v11061_v21 = vpop.eup %7485  ;;  %v2727_v29 = vand.u32 2147483648, %v10930_v44  ;;  %v2742_v16 = vand.u32 2147483648, %v10984_v4  ;;  %v2664_v27 = vsel %vm11065_vm8, %v10936_v59, %v2660_v62  ;;  %v11086_v19 = vor.u32 1.1754944e-38, %v2697_v60 }
 0x381   :  { %v11073_v10 = vpop.eup %7487  ;;  %v2704_v7 = vmul.f32 %v10982_v57, %v2703_v50  ;;  %v2718_v22 = vsub.f32 1.0, %v2717_v18  ;;  %v2679_v23 = vsel %vm11082_vm7, %v10947_v32, %v2675_v46  ;;  %v11093_v28 = vadd.f32 %v10973_v25, %v2689_v45 }
 0x382   :  { %vm2692_vm11 = vweird.f32 %v10973_v25  ;;  %v11096_v59 = vor.u32 1.1754944e-38, %v2712_v20  ;;  %vm2707_vm9 = vweird.f32 %v10982_v57  ;;  %v2725_v17 = vand.u32 2147483647, %v10930_v44 }
 0x383   :  { %v2732_v60 = vmul.f32 %v11061_v21, %v10984_v4  ;;  %v2740_v62 = vand.u32 2147483647, %v10984_v4  ;;  %v11105_v50 = vsel %vm11040_vm6, %v2668_v55, %v2664_v27  ;;  %vm2706_vm12 = vweird.f32 %v10914_v38  ;;  %vm11122_vm10 = vmor %vm2691_vm5, %vm2692_vm11 }
 0x384   :  { %v11108_v32 = vor.u32 1.1754944e-38, %v2727_v29  ;;  %v11110_v18 = vor.u32 1.1754944e-38, %v2742_v16  ;;  %v2747_v46 = vmul.f32 %v11073_v10, %v10994_v26  ;;  %v11118_v20 = vsel %vm11055_vm14, %v2683_v2, %v2679_v23  ;;  %vm11199_vm11 = vmor %vm2706_vm12, %vm2707_vm9 }
 0x385   :  { %v11114_v45 = vpop.eup %7489  ;;  %v2705_v55 = vadd.f32 %v10982_v57, %v2704_v7  ;;  %v2719_v29 = vmul.f32 %v11024_v30, %v2718_v22  ;;  %v2776_v16 = vmul.f32 %v10763_v6, %v10213_v39  ;;  %v2694_v56 = vsel %vm11122_vm10, %v10973_v25, %v11093_v28 }
 0x386   :  { %vm11134_vm0 = vcmp.eq.f32.partialorder %v2695_v11, 8.507059e+37  ;;  %vm2722_vm6 = vweird.f32 %v11024_v30  ;;  %v2762_v52 = vmul.f32 %v11114_v45, %v11029_v51  ;;  %v2777_v22 = vmul.f32 %v10809_v31, %v10220_v41 }
 0x387   :  { %v2778_v39 = vmul.f32 %v10847_v61, %v10222_v8  ;;  %v2733_v6 = vsub.f32 1.0, %v2732_v60  ;;  %vm2737_vm13 = vweird.f32 %v11061_v21  ;;  %v2755_v25 = vand.u32 2147483647, %v10994_v26 }
 0x388   :  { %v2779_v7 = vmul.f32 %v10874_v47, %v10229_v42  ;;  %v2784_v2 = vmul.f32 %v10575_v12, %v10597_v14  ;;  %vm11151_vm15 = vcmp.eq.f32.partialorder %v2710_v13, 8.507059e+37  ;;  %vm2721_vm14 = vweird.f32 %v10930_v44  ;;  %v16567_v13 = vld [vmem:[#allocation45_spill] sm:$0xff] }
 0x389   :  { %v2748_v41 = vsub.f32 1.0, %v2747_v46  ;;  %v2780_v8 = vmul.f32 %v10940_v3, %v10238_v49  ;;  %v2785_v31 = vmul.f32 %v10583_v53, %v10601_v40  ;;  %v2786_v61 = vmul.f32 %v10916_v37, %v10609_v54  ;;  %vm11238_vm12 = vmor %vm2721_vm14, %vm2722_vm6 }
 0x38a   :  { %vm2736_vm5 = vweird.f32 %v10984_v4  ;;  %v2763_v42 = vsub.f32 1.0, %v2762_v52  ;;  %v2781_v12 = vmul.f32 %v10999_v1, %v10252_v43  ;;  %v2787_v14 = vmul.f32 %v10926_v33, %v10644_v5  ;;  %v16560_v43 = vld [vmem:[#allocation43_spill] sm:$0xff] }
 0x38b   :  { %v11167_v47 = vadd.f32 %v2784_v2, %v2776_v16  ;;  %vm2751_vm8 = vweird.f32 %v10994_v26  ;;  %v2782_v49 = vmul.f32 %v11003_v9, %v10263_v58  ;;  %v2788_v53 = vmul.f32 %v10988_v15, %v10697_v34  ;;  %v16563_v34 = vld [vmem:[#allocation42_spill] sm:$0xff] }
 0x38c   :  { %v11174_v40 = vadd.f32 %v2785_v31, %v2777_v22  ;;  %v11176_v54 = vadd.f32 %v2786_v61, %v2778_v39  ;;  %v2734_v37 = vmul.f32 %v11061_v21, %v2733_v6  ;;  %v2783_v3 = vmul.f32 %v11038_v35, %v16560_v43  ;;  %v16566_v35 = vld [vmem:[#allocation44_spill] sm:$0xff] }
 0x38d   :  { %v2789_v5 = vmul.f32 %v11015_v63, %v10750_v36  ;;  %v11183_v33 = vadd.f32 %v2787_v14, %v2779_v7  ;;  %vm11185_vm7 = vcmp.eq.f32.partialorder %v2725_v17, 8.507059e+37  ;;  %v2749_v58 = vmul.f32 %v11073_v10, %v2748_v41 }
 0x38e   :  { %v2790_v15 = vmul.f32 %v16563_v34, %v10791_v48  ;;  %v11192_v9 = vadd.f32 %v2788_v53, %v2780_v8  ;;  %7491 = vtanh.f32 %v11167_v47  ;;  %v2764_v63 = vmul.f32 %v11114_v45, %v2763_v42 }
 0x38f   :  { %v2791_v27 = vmul.f32 %v16567_v13, %v16566_v35  ;;  %v11206_v24 = vadd.f32 %v2789_v5, %v2781_v12  ;;  %7493 = vtanh.f32 %v11174_v40  ;;  %v2709_v48 = vsel %vm11199_vm11, %v10982_v57, %v2705_v55 }
 0x390   :  { %v2720_v28 = vadd.f32 %v11024_v30, %v2719_v29  ;;  %vm11213_vm10 = vcmp.eq.f32.partialorder %v2740_v62, 8.507059e+37  ;;  %v11217_v17 = vadd.f32 %v2790_v15, %v2782_v49  ;;  %7495 = vtanh.f32 %v11176_v54 }
 0x391   :  { %v2699_v60 = vsel %vm11134_vm0, %v11086_v19, %v2694_v56  ;;  %v2757_v46 = vand.u32 2147483648, %v10994_v26  ;;  %v11224_v0 = vadd.f32 %v2791_v27, %v2783_v3  ;;  %7497 = vtanh.f32 %v11183_v33 }
 0x392   :  { %v2735_v57 = vadd.f32 %v11061_v21, %v2734_v37  ;;  %v2750_v62 = vadd.f32 %v11073_v10, %v2749_v58  ;;  %vm2752_vm9 = vweird.f32 %v11073_v10  ;;  %7499 = vtanh.f32 %v11192_v9 }
 0x393   :  { %16570 = vst [vmem:[#allocation43_spill] sm:$0xff] %v11224_v0  ;;  %v2714_v55 = vsel %vm11151_vm15, %v11096_v59, %v2709_v48  ;;  %v2765_v29 = vadd.f32 %v11114_v45, %v2764_v63  ;;  %vm2767_vm0 = vweird.f32 %v11114_v45  ;;  %7501 = vtanh.f32 %v11206_v24  ;;  %vm11252_vm15 = vmor %vm2736_vm5, %vm2737_vm13 }
 0x394   :  { %v7492_v16 = vpop.eup %7491  ;;  %v2724_v56 = vsel %vm11238_vm12, %v11024_v30, %v2720_v28  ;;  %v2770_v59 = vand.u32 2147483647, %v11029_v51  ;;  %v2772_v23 = vand.u32 2147483648, %v11029_v51  ;;  %7503 = vtanh.f32 %v11217_v17  ;;  %vm11261_vm6 = vmor %vm2751_vm8, %vm2752_vm9  ;;  %v16584_v30 = vld [vmem:[#allocation13_spill] sm:$0xff] }
 0x395   :  { %v7494_v52 = vpop.eup %7493  ;;  %vm11265_vm14 = vcmp.eq.f32.partialorder %v2755_v25, 8.507059e+37  ;;  %vm2766_vm13 = vweird.f32 %v11029_v51  ;;  %7505 = vtanh.f32 %v11224_v0  ;;  %v2808_v4 = vmul.f32 %v7492_v16, %v11105_v50  ;;  %v16590_v25 = vld [vmem:[#allocation14_spill] sm:$0xff] }
 0x396   :  { %v7496_v39 = vpop.eup %7495  ;;  %v2739_v6 = vsel %vm11252_vm15, %v11061_v21, %v2735_v57  ;;  %v2754_v26 = vsel %vm11261_vm6, %v11073_v10, %v2750_v62  ;;  %v2758_v7 = vor.u32 1.1754944e-38, %v2757_v46  ;;  %vm11280_vm5 = vmor %vm2766_vm13, %vm2767_vm0  ;;  %v2809_v51 = vmul.f32 %v7494_v52, %v11118_v20 }
 0x397   :  { %v7498_v2 = vpop.eup %7497  ;;  %v2729_v50 = vsel %vm11185_vm7, %v11108_v32, %v2724_v56  ;;  %v2769_v21 = vsel %vm11280_vm5, %v11114_v45, %v2765_v29  ;;  %v2810_v11 = vmul.f32 %v7496_v39, %v2699_v60  ;;  %2816 = vst [vmem:[#allocation3 + $0x2] sm:$0x1] %v2808_v4  ;;  %v2840_v10 = vpack.c.bf16 %v2808_v4, %v2808_v4  ;;  %v16585_v4 = vld [vmem:[#allocation12_spill] sm:$0xff]  ;;  %v16586_v39 = vld [vmem:[#allocation10_spill] sm:$0xff] }
 0x398   :  { %v7500_v41 = vpop.eup %7499  ;;  %vm2771_vm8 = vcmp.eq.f32.partialorder %v2770_v59, 8.507059e+37  ;;  %v2773_v8 = vor.u32 1.1754944e-38, %v2772_v23  ;;  %v2811_v31 = vmul.f32 %v7498_v2, %v2714_v55  ;;  %2817 = vst [vmem:[#allocation3 + $0xa] sm:$0x1] %v2809_v51  ;;  %v2841_v61 = vpack.c.bf16 %v2809_v51, %v2809_v51  ;;  %v16591_v51 = vld [vmem:[#allocation15_spill] sm:$0xff]  ;;  %v16592_v2 = vld [vmem:[#allocation21_spill] sm:$0xff] }
 0x399   :  { %v7502_v42 = vpop.eup %7501  ;;  %v2744_v20 = vsel %vm11213_vm10, %v11110_v18, %v2739_v6  ;;  %v2759_v32 = vsel %vm11265_vm14, %v2758_v7, %v2754_v26  ;;  %v2812_v12 = vmul.f32 %v7500_v41, %v2729_v50  ;;  %2818 = vst [vmem:[#allocation3 + $0x12] sm:$0x1] %v2810_v11  ;;  %v2842_v45 = vpack.c.bf16 %v2810_v11, %v2810_v11  ;;  %v16587_v6 = vld [vmem:[#allocation11_spill] sm:$0xff]  ;;  %v16588_v26 = vld [vmem:[#allocation17_spill] sm:$0xff]  ;;  %v16589_v7 = vld [vmem:[#allocation16_spill] sm:$0xff] }
 0x39a   :  { %v7504_v14 = vpop.eup %7503  ;;  %v2774_v49 = vsel %vm2771_vm8, %v2773_v8, %v2769_v21  ;;  %v2813_v53 = vmul.f32 %v7502_v42, %v2744_v20  ;;  %2819 = vst [vmem:[#allocation3 + $0x1a] sm:$0x1] %v2811_v31  ;;  %v2843_v37 = vpack.c.bf16 %v2811_v31, %v2811_v31  ;;  %v2857_v43 = vunpack.c.l.b16 %v2841_v61  ;;  %v16593_v50 = vld [vmem:[#allocation20_spill] sm:$0xff]  ;;  %v16594_v21 = vld [vmem:[#allocation18_spill] sm:$0xff]  ;;  %v16595_v11 = vld [vmem:[#allocation19_spill] sm:$0xff] }
 0x39b   :  { %v7506_v3 = vpop.eup %7505  ;;  %v2814_v5 = vmul.f32 %v7504_v14, %v2759_v32  ;;  %2820 = vst [vmem:[#allocation3 + $0x22] sm:$0x1] %v2812_v12  ;;  %v2844_v1 = vpack.c.bf16 %v2812_v12, %v2812_v12  ;;  %v2856_v58 = vunpack.c.l.b16 %v2840_v10  ;;  %v2858_v34 = vunpack.c.l.b16 %v2842_v45  ;;  %v16596_v10 = vld [vmem:[#allocation25_spill] sm:$0xff]  ;;  %v16597_v41 = vld [vmem:[#allocation24_spill] sm:$0xff]  ;;  %v16598_v8 = vld [vmem:[#allocation22_spill] sm:$0xff] }
 0x39c   :  { %v2815_v15 = vmul.f32 %v7506_v3, %v2774_v49  ;;  %2821 = vst [vmem:[#allocation3 + $0x2a] sm:$0x1] %v2813_v53  ;;  %v2845_v18 = vpack.c.bf16 %v2813_v53, %v2813_v53  ;;  %v2859_v36 = vunpack.c.l.b16 %v2843_v37  ;;  %v2864_v63 = vrot.slane %v2857_v43, 7  ;;  %v16599_v31 = vld [vmem:[#allocation23_spill] sm:$0xff]  ;;  %v16600_v61 = vld [vmem:[#allocation29_spill] sm:$0xff]  ;;  %v16601_v42 = vld [vmem:[#allocation28_spill] sm:$0xff] }
 0x39d   :  { %2822 = vst [vmem:[#allocation3 + $0x32] sm:$0x1] %v2814_v5  ;;  %v2846_v35 = vpack.c.bf16 %v2814_v5, %v2814_v5  ;;  %v2860_v13 = vunpack.c.l.b16 %v2844_v1  ;;  %v2866_v27 = vrot.slane %v2858_v34, 6  ;;  %vm16581_vm7 = vcmask 1045509   ;;  %v16602_v20 = vld [vmem:[#allocation26_spill] sm:$0xff]  ;;  %v16603_v32 = vld [vmem:[#allocation27_spill] sm:$0xff] }
 0x39e   :  { %2823 = vst [vmem:[#allocation3 + $0x3a] sm:$0x1] %v2815_v15  ;;  %v2847_v48 = vpack.c.bf16 %v2815_v15, %v2815_v15  ;;  %v2861_v28 = vunpack.c.l.b16 %v2845_v18  ;;  %v2865_v38 = vsel %vm723_vm2, %v2864_v63, %v2856_v58  ;;  %v2868_v60 = vrot.slane %v2859_v36, 5  ;;  %v16604_v12 = vld [vmem:[#allocation33_spill] sm:$0xff]  ;;  %v16605_v45 = vld [vmem:[#allocation32_spill] sm:$0xff]  ;;  %v16606_v14 = vld [vmem:[#allocation30_spill] sm:$0xff] }
 0x39f   :  { %v2862_v46 = vunpack.c.l.b16 %v2846_v35  ;;  %v2867_v57 = vsel %vm719_vm1, %v2866_v27, %v2865_v38  ;;  %v2870_v62 = vrot.slane %v2860_v13, 4  ;;  %vm16582_vm11 = vcmask 1046534   ;;  %v16607_v49 = vld [vmem:[#allocation31_spill] sm:$0xff]  ;;  %v16608_v53 = vld [vmem:[#allocation37_spill] sm:$0xff]  ;;  %v16609_v37 = vld [vmem:[#allocation36_spill] sm:$0xff] }
 0x3a0   :  { %v2863_v55 = vunpack.c.l.b16 %v2847_v48  ;;  %v2869_v19 = vsel %vm725_vm3, %v2868_v60, %v2867_v57  ;;  %v2872_v29 = vrot.slane %v2861_v28, 3  ;;  %vm16583_vm10 = vcmask 1047559   ;;  %v16610_v43 = vld [vmem:[#allocation34_spill] sm:$0xff]  ;;  %v16611_v3 = vld [vmem:[#allocation35_spill] sm:$0xff]  ;;  %v16612_v5 = vld [vmem:[#allocation41_spill] sm:$0xff] }
 0x3a1   :  { %v2871_v16 = vsel %vm731_vm4, %v2870_v62, %v2869_v19  ;;  %v2874_v56 = vrot.slane %v2862_v46, 2  ;;  %v16613_v1 = vld [vmem:[#allocation40_spill] sm:$0xff]  ;;  %v16614_v58 = vld [vmem:[#allocation38_spill] sm:$0xff]  ;;  %v16615_v34 = vld [vmem:[#allocation39_spill] sm:$0xff]  ;;  %vm16616_vm9 = vcmask 1040384   ;;  %vm16619_vm15 = vcmask 1046528  }
 0x3a2   :  { %v2873_v44 = vsel %vm16581_vm7, %v2872_v29, %v2871_v16  ;;  %v2876_v59 = vrot.slane %v2863_v55, 1  ;;  %vm16617_vm12 = vmmov %vm16581_vm7  ;;  %vm16621_vm14 = vcmask 1041408   ;;  %vm16622_vm13 = vcmask 1042433  }
 0x3a3   :  { %v2875_v23 = vsel %vm16582_vm11, %v2874_v56, %v2873_v44  ;;  %vm16618_vm0 = vmmov %vm16582_vm11  ;;  %vm16623_vm5 = vcmask 1043458   ;;  %vm16624_vm8 = vcmask 1044483   ;;  %vm16626_vm11 = vcmask 1045508  }
 0x3a4   :  { %v2877_v52 = vsel %vm16583_vm10, %v2876_v59, %v2875_v23  ;;  %vm16620_vm6 = vmmov %vm16581_vm7 }
 0x3a5   :  { %v2878_v22 = vpack.c.b16 %v2877_v52, %v2877_v52  ;;  %vm16625_vm7 = vmmov %vm16618_vm0 }
 0x3a6   :  { %vm16627_vm10 = vmmov %vm16619_vm15 }
 0x3a7   :  { %2888 = vmatmul.bf16.vlgmr.msra.gmra.mxu0 %v2878_v22  ;;  %2901 = vmatmul.bf16.vlgmr.msra.gmra.mxu1 %v2878_v22 }
 0x3a8   :  { %2914 = vmatmul.bf16.vlgmr.msra.gmra.mxu2 %v2878_v22  ;;  %2927 = vmatmul.bf16.vlgmr.msra.gmra.mxu3 %v2878_v22 }
 0x3a9   :  { %4340 = vmatpush.bf16.msra.mxu0 %v16584_v30  ;;  %4353 = vmatpush.bf16.msra.mxu1 %v16585_v4 }
 0x3aa   :  { %4366 = vmatpush.bf16.msra.mxu2 %v16586_v39  ;;  %4379 = vmatpush.bf16.msra.mxu3 %v16587_v6 }
 0x3ad   :  { %4341 = vmatpush.bf16.msra.mxu0 %v16588_v26  ;;  %4354 = vmatpush.bf16.msra.mxu1 %v16589_v7 }
 0x3ae   :  { %4367 = vmatpush.bf16.msra.mxu2 %v16590_v25  ;;  %4380 = vmatpush.bf16.msra.mxu3 %v16591_v51 }
 0x3b1   :  { %4342 = vmatpush.bf16.msra.mxu0 %v16592_v2  ;;  %4355 = vmatpush.bf16.msra.mxu1 %v16593_v50 }
 0x3b2   :  { %4368 = vmatpush.bf16.msra.mxu2 %v16594_v21  ;;  %4381 = vmatpush.bf16.msra.mxu3 %v16595_v11 }
 0x3b5   :  { %4343 = vmatpush.bf16.msra.mxu0 %v16596_v10  ;;  %4356 = vmatpush.bf16.msra.mxu1 %v16597_v41 }
 0x3b6   :  { %4369 = vmatpush.bf16.msra.mxu2 %v16598_v8  ;;  %4382 = vmatpush.bf16.msra.mxu3 %v16599_v31 }
 0x3b9   :  { %4344 = vmatpush.bf16.msra.mxu0 %v16600_v61  ;;  %4357 = vmatpush.bf16.msra.mxu1 %v16601_v42 }
 0x3ba   :  { %4370 = vmatpush.bf16.msra.mxu2 %v16602_v20  ;;  %4383 = vmatpush.bf16.msra.mxu3 %v16603_v32 }
 0x3bd   :  { %4345 = vmatpush.bf16.msra.mxu0 %v16604_v12  ;;  %4358 = vmatpush.bf16.msra.mxu1 %v16605_v45 }
 0x3be   :  { %4371 = vmatpush.bf16.msra.mxu2 %v16606_v14  ;;  %4384 = vmatpush.bf16.msra.mxu3 %v16607_v49 }
 0x3c1   :  { %4346 = vmatpush.bf16.msra.mxu0 %v16608_v53  ;;  %4359 = vmatpush.bf16.msra.mxu1 %v16609_v37 }
 0x3c2   :  { %4372 = vmatpush.bf16.msra.mxu2 %v16610_v43  ;;  %4385 = vmatpush.bf16.msra.mxu3 %v16611_v3 }
 0x3c5   :  { %4347 = vmatpush.bf16.msra.mxu0 %v16612_v5  ;;  %4360 = vmatpush.bf16.msra.mxu1 %v16613_v1 }
 0x3c6   :  { %4373 = vmatpush.bf16.msra.mxu2 %v16614_v58  ;;  %4386 = vmatpush.bf16.msra.mxu3 %v16615_v34 }
 0x424   :  { %v2889_v15 = vpop.f32.mrf.mxu0  ;;  %v2902_v18 = vpop.f32.mrf.mxu1 }
 0x425   :  { %v2936_v36 = vrot.slane %v2902_v18, 7 }
 0x427   :  { %v2939_v63 = vsel %vm16616_vm9, %v2889_v15, %v2936_v36  ;;  %v2942_v35 = vsel %vm723_vm2, %v2889_v15, %v2936_v36  ;;  %v2946_v13 = vsel %vm719_vm1, %v2889_v15, %v2936_v36  ;;  %v2950_v27 = vsel %vm725_vm3, %v2889_v15, %v2936_v36 }
 0x428   :  { %v2954_v48 = vsel %vm731_vm4, %v2889_v15, %v2936_v36  ;;  %v2958_v28 = vsel %vm16617_vm12, %v2889_v15, %v2936_v36  ;;  %v2962_v38 = vsel %vm16618_vm0, %v2889_v15, %v2936_v36  ;;  %v2966_v60 = vsel %vm16619_vm15, %v2936_v36, %v2889_v15 }
 0x429   :  { %vm16628_vm12 = vcmask 1046533   ;;  %vm16629_vm0 = vcmask 1045504   ;;  %vm16630_vm15 = vcmask 1046529  }
 0x42b   :  { %v2915_v46 = vpop.f32.mrf.mxu2  ;;  %v2928_v57 = vpop.f32.mrf.mxu3 }
 0x42c   :  { %v2937_v62 = vrot.slane %v2915_v46, 6  ;;  %v2938_v55 = vrot.slane %v2928_v57, 5  ;;  %v2891_v19 = vpop.f32.mrf.mxu0  ;;  %v2904_v29 = vpop.f32.mrf.mxu1 }
 0x42e   :  { %v2940_v16 = vsel %vm719_vm1, %v2937_v62, %v2938_v55  ;;  %v2943_v56 = vsel %vm725_vm3, %v2937_v62, %v2938_v55  ;;  %v2947_v44 = vsel %vm731_vm4, %v2937_v62, %v2938_v55  ;;  %v2951_v59 = vsel %vm16620_vm6, %v2937_v62, %v2938_v55 }
 0x42f   :  { %v2941_v23 = vsel %vm16621_vm14, %v2939_v63, %v2940_v16  ;;  %v2944_v52 = vsel %vm16622_vm13, %v2942_v35, %v2943_v56  ;;  %v2948_v22 = vsel %vm16623_vm5, %v2946_v13, %v2947_v44  ;;  %v2952_v15 = vsel %vm16624_vm8, %v2950_v27, %v2951_v59  ;;  %v2825_v63 = vld [vmem:[#allocation2 + $0x3] ss:$8 sm:$0xf] }
 0x430   :  { %v2945_v18 = vrot.slane %v2944_v52, 1  ;;  %v2949_v36 = vrot.slane %v2948_v22, 2  ;;  %v2953_v46 = vrot.slane %v2952_v15, 3  ;;  %v2955_v57 = vsel %vm16625_vm7, %v2937_v62, %v2938_v55  ;;  %v2827_v16 = vld [vmem:[#allocation2 + $0x23] ss:$8 sm:$0xf] }
 0x431   :  { %v2956_v19 = vsel %vm16626_vm11, %v2954_v48, %v2955_v57  ;;  %v2959_v29 = vsel %vm16627_vm10, %v2938_v55, %v2937_v62  ;;  %v2963_v34 = vsel %vm16616_vm9, %v2937_v62, %v2938_v55  ;;  %v2967_v58 = vsel %vm723_vm2, %v2937_v62, %v2938_v55  ;;  %v2829_v56 = vld [vmem:[#allocation2 + $0x43] ss:$8 sm:$0xf] }
 0x432   :  { %v2960_v35 = vsel %vm16628_vm12, %v2958_v28, %v2959_v29  ;;  %v2964_v13 = vsel %vm16629_vm0, %v2963_v34, %v2962_v38  ;;  %v2968_v27 = vsel %vm16630_vm15, %v2967_v58, %v2966_v60  ;;  %v2831_v44 = vld [vmem:[#allocation2 + $0x63] ss:$8 sm:$0xf]  ;;  %v11359_v59 = vadd.f32 %v2941_v23, %v2825_v63 }
 0x433   :  { %v2917_v52 = vpop.f32.mrf.mxu2  ;;  %v2930_v48 = vpop.f32.mrf.mxu3  ;;  %v11361_v22 = vadd.f32 %v2945_v18, %v2827_v16  ;;  %v11363_v15 = vadd.f32 %v2949_v36, %v2829_v56  ;;  %v11365_v57 = vadd.f32 %v2953_v46, %v2831_v44  ;;  %v2957_v55 = vrot.slane %v2956_v19, 4  ;;  %v2833_v38 = vld [vmem:[#allocation2 + $0x83] ss:$8 sm:$0xf] }
 0x434   :  { %v6908_v62 = vmul.f32 -1.442695, %v11359_v59  ;;  %v2961_v23 = vrot.slane %v2960_v35, 5  ;;  %v2835_v46 = vld [vmem:[#allocation2 + $0xa3] ss:$8 sm:$0xf] }
 0x435   :  { %v6909_v28 = vmul.f32 -1.442695, %v11361_v22  ;;  %v6910_v34 = vmul.f32 -1.442695, %v11363_v15  ;;  %v6911_v58 = vmul.f32 -1.442695, %v11365_v57  ;;  %v11371_v60 = vadd.f32 %v2957_v55, %v2833_v38 }
 0x436   :  { %7507 = vpow2.f32 %v6908_v62  ;;  %v2965_v63 = vrot.slane %v2964_v13, 6  ;;  %v11374_v16 = vadd.f32 %v2961_v23, %v2835_v46  ;;  %v3146_v52 = vrot.slane %v11359_v59, 1  ;;  %v2837_v35 = vld [vmem:[#allocation2 + $0xc3] ss:$8 sm:$0xf] }
 0x437   :  { %7509 = vpow2.f32 %v6909_v28  ;;  %v6912_v29 = vmul.f32 -1.442695, %v11371_v60  ;;  %v3147_v55 = vrot.slane %v11361_v22, 1  ;;  %v2969_v13 = vrot.slane %v2968_v27, 7 }
 0x438   :  { %7511 = vpow2.f32 %v6910_v34  ;;  %v11384_v28 = vadd.f32 %v2965_v63, %v2837_v35  ;;  %v6913_v34 = vmul.f32 -1.442695, %v11374_v16  ;;  %v3148_v23 = vrot.slane %v11363_v15, 1 }
 0x439   :  { %7513 = vpow2.f32 %v6911_v58  ;;  %v6916_v58 = vmul.f32 -1.442695, %v3146_v52  ;;  %v3150_v52 = vrot.slane %v11371_v60, 1  ;;  %v3338_v5 = vrot.slane %v11359_v59, 3 }
 0x43a   :  { %7515 = vpow2.f32 %v6912_v29  ;;  %v6914_v46 = vmul.f32 -1.442695, %v11384_v28  ;;  %v3149_v29 = vrot.slane %v11365_v57, 1  ;;  %v3339_v3 = vrot.slane %v11361_v22, 3 }
 0x43b   :  { %v6920_v37 = vmul.f32 -1.442695, %v3150_v52  ;;  %v3315_v52 = vrot.slane %v11361_v22, 2  ;;  %v11425_v12 = vmul.f32 -1.442695, %v3338_v5 }
 0x43c   :  { %v7508_v18 = vpop.eup %7507 }
 0x43d   :  { %v7510_v36 = vpop.eup %7509  ;;  %v11376_v56 = vadd.f32 1.0, %v7508_v18  ;;  %v6917_v18 = vmul.f32 -1.442695, %v3147_v55  ;;  %v3152_v55 = vrot.slane %v11384_v28, 1 }
 0x43e   :  { %v7512_v19 = vpop.eup %7511  ;;  %v11378_v44 = vadd.f32 1.0, %v7510_v36  ;;  %v2839_v36 = vld [vmem:[#allocation2 + $0xe3] ss:$8 sm:$0xf] }
 0x43f   :  { %v11381_v48 = vadd.f32 1.0, %v7512_v19  ;;  %v7514_v62 = vpop.eup %7513  ;;  %7517 = vrcp.f32 %v11376_v56  ;;  %v11395_v63 = vadd.f32 %v2969_v13, %v2839_v36  ;;  %v6919_v13 = vmul.f32 -1.442695, %v3149_v29 }
 0x440   :  { %7519 = vrcp.f32 %v11378_v44  ;;  %v11389_v38 = vadd.f32 1.0, %v7514_v62  ;;  %v7516_v19 = vpop.eup %7515  ;;  %v3151_v62 = vrot.slane %v11374_v16, 1  ;;  %v3314_v29 = vrot.slane %v11359_v59, 2 }
 0x441   :  { %7521 = vrcp.f32 %v11381_v48  ;;  %v11407_v36 = vadd.f32 1.0, %v7516_v19  ;;  %v6915_v14 = vmul.f32 -1.442695, %v11395_v63  ;;  %v3029_v59 = vand.u32 2147483648, %v11376_v56 }
 0x442   :  { %7523 = vpow2.f32 %v6913_v34  ;;  %v6918_v34 = vmul.f32 -1.442695, %v3148_v23  ;;  %v6921_v53 = vmul.f32 -1.442695, %v3151_v62  ;;  %vm3023_vm6 = vweird.f32 %v11376_v56 }
 0x443   :  { %7525 = vpow2.f32 %v6916_v58  ;;  %vm3038_vm14 = vweird.f32 %v11378_v44  ;;  %vm3053_vm9 = vweird.f32 %v11381_v48 }
 0x444   :  { %7527 = vrcp.f32 %v11389_v38 }
 0x445   :  { %v11397_v27 = vpop.eup %7517  ;;  %7529 = vpow2.f32 %v6917_v18 }
 0x446   :  { %v11402_v35 = vpop.eup %7519  ;;  %7531 = vpow2.f32 %v6914_v46  ;;  %v3019_v49 = vmul.f32 %v11397_v27, %v11376_v56  ;;  %v6922_v46 = vmul.f32 -1.442695, %v3152_v55  ;;  %v11427_v55 = vmul.f32 -1.442695, %v3339_v3 }
 0x447   :  { %v11405_v1 = vpop.eup %7521  ;;  %v3034_v23 = vmul.f32 %v11402_v35, %v11378_v44  ;;  %7533 = vpow2.f32 %v6918_v34  ;;  %v3027_v3 = vand.u32 2147483647, %v11376_v56  ;;  %vm3024_vm13 = vweird.f32 %v11397_v27 }
 0x448   :  { %v7524_v43 = vpop.eup %7523  ;;  %v3049_v19 = vmul.f32 %v11405_v1, %v11381_v48  ;;  %7535 = vpow2.f32 %v6919_v13  ;;  %v3020_v13 = vsub.f32 1.0, %v3019_v49  ;;  %vm3039_vm8 = vweird.f32 %v11402_v35  ;;  %vm11490_vm11 = vmor %vm3023_vm6, %vm3024_vm13 }
 0x449   :  { %v7526_v18 = vpop.eup %7525  ;;  %7537 = vrcp.f32 %v11407_v36  ;;  %v3035_v20 = vsub.f32 1.0, %v3034_v23  ;;  %v11432_v22 = vadd.f32 1.0, %v7524_v43  ;;  %v3042_v43 = vand.u32 2147483647, %v11378_v44  ;;  %vm11506_vm12 = vmor %vm3038_vm14, %vm3039_vm8 }
 0x44a   :  { %v11419_v58 = vpop.eup %7527  ;;  %7539 = vpow2.f32 %v6920_v37  ;;  %v11430_v32 = vadd.f32 1.0, %v7526_v18  ;;  %v3050_v62 = vsub.f32 1.0, %v3049_v19  ;;  %v3021_v18 = vmul.f32 %v11397_v27, %v3020_v13 }
 0x44b   :  { %v7530_v45 = vpop.eup %7529  ;;  %7541 = vpow2.f32 %v6921_v53  ;;  %v3064_v5 = vmul.f32 %v11419_v58, %v11389_v38  ;;  %v11443_v53 = vor.u32 1.1754944e-38, %v3029_v59  ;;  %vm11459_vm5 = vcmp.eq.f32.partialorder %v3027_v3, 8.507059e+37 }
 0x44c   :  { %v7532_v34 = vpop.eup %7531  ;;  %v11437_v42 = vadd.f32 1.0, %v7530_v45  ;;  %7543 = vpow2.f32 %v6915_v14  ;;  %v3036_v45 = vmul.f32 %v11402_v35, %v3035_v20  ;;  %v3044_v14 = vand.u32 2147483648, %v11378_v44 }
 0x44d   :  { %v7534_v37 = vpop.eup %7533  ;;  %7545 = vpow2.f32 %v6922_v46  ;;  %v11441_v49 = vadd.f32 1.0, %v7532_v34  ;;  %v3051_v61 = vmul.f32 %v11405_v1, %v3050_v62  ;;  %v3057_v46 = vand.u32 2147483647, %v11381_v48 }
 0x44e   :  { %v7536_v23 = vpop.eup %7535  ;;  %7547 = vrcp.f32 %v11430_v32  ;;  %v3065_v34 = vsub.f32 1.0, %v3064_v5  ;;  %v11455_v31 = vadd.f32 1.0, %v7534_v37  ;;  %v3059_v13 = vand.u32 2147483648, %v11381_v48 }
 0x44f   :  { %v11450_v19 = vpop.eup %7537  ;;  %7549 = vrcp.f32 %v11432_v22  ;;  %v11466_v62 = vadd.f32 1.0, %v7536_v23  ;;  %vm3054_vm7 = vweird.f32 %v11405_v1  ;;  %v3022_v37 = vadd.f32 %v11397_v27, %v3021_v18 }
 0x450   :  { %v7540_v59 = vpop.eup %7539  ;;  %7551 = vrcp.f32 %v11437_v42  ;;  %v3037_v3 = vadd.f32 %v11402_v35, %v3036_v45  ;;  %v3079_v41 = vmul.f32 %v11450_v19, %v11407_v36  ;;  %v3052_v23 = vadd.f32 %v11405_v1, %v3051_v61  ;;  %vm11524_vm15 = vmor %vm3053_vm9, %vm3054_vm7 }
 0x451   :  { %v11464_v8 = vpop.eup %7541  ;;  %7553 = vtanh.f32 %v3314_v29  ;;  %v3066_v29 = vmul.f32 %v11419_v58, %v3065_v34  ;;  %vm11494_vm10 = vcmp.eq.f32.partialorder %v3042_v43, 8.507059e+37  ;;  %v3045_v34 = vor.u32 1.1754944e-38, %v3044_v14 }
 0x452   :  { %v7544_v5 = vpop.eup %7543  ;;  %7555 = vtanh.f32 %v3315_v52  ;;  %v11483_v52 = vadd.f32 1.0, %v7540_v59  ;;  %vm11510_vm0 = vcmp.eq.f32.partialorder %v3057_v46, 8.507059e+37  ;;  %v3060_v59 = vor.u32 1.1754944e-38, %v3059_v13 }
 0x453   :  { %v11474_v10 = vpop.eup %7545  ;;  %v11476_v11 = vadd.f32 1.0, %v7544_v5  ;;  %7557 = vrcp.f32 %v11441_v49  ;;  %v3026_v48 = vsel %vm11490_vm11, %v11397_v27, %v3022_v37  ;;  %v3041_v44 = vsel %vm11506_vm12, %v11402_v35, %v3037_v3 }
 0x454   :  { %v11481_v21 = vpop.eup %7547  ;;  %7559 = vrcp.f32 %v11455_v31  ;;  %v3072_v14 = vand.u32 2147483647, %v11389_v38  ;;  %v3080_v46 = vsub.f32 1.0, %v3079_v41  ;;  %v3056_v18 = vsel %vm11524_vm15, %v11405_v1, %v3052_v23 }
 0x455   :  { %v11499_v45 = vpop.eup %7549  ;;  %7561 = vrcp.f32 %v11466_v62  ;;  %v3067_v27 = vadd.f32 %v11419_v58, %v3066_v29  ;;  %vm3069_vm6 = vweird.f32 %v11419_v58  ;;  %v3074_v37 = vand.u32 2147483648, %v11389_v38 }
 0x456   :  { %v11514_v5 = vpop.eup %7551  ;;  %7563 = vrcp.f32 %v11476_v11  ;;  %v3094_v41 = vmul.f32 %v11499_v45, %v11432_v22  ;;  %v3195_v3 = vmul.f32 %v11481_v21, %v11430_v32  ;;  %v11551_v1 = vsel %vm11459_vm5, %v11443_v53, %v3026_v48 }
 0x457   :  { %v11529_v13 = vpop.eup %7553  ;;  %7565 = vrcp.f32 %v11483_v52  ;;  %v11555_v23 = vsel %vm11494_vm10, %v3045_v34, %v3041_v44  ;;  %vm3068_vm14 = vweird.f32 %v11389_v38  ;;  %v11563_v56 = vsel %vm11510_vm0, %v3060_v59, %v3056_v18 }
 0x458   :  { %v11537_v35 = vpop.eup %7555  ;;  %7567 = vpow2.f32 %v11425_v12  ;;  %vm11567_vm13 = vmor %vm3068_vm14, %vm3069_vm6  ;;  %vm11571_vm5 = vcmp.eq.f32.partialorder %v3072_v14, 8.507059e+37  ;;  %v3081_v38 = vmul.f32 %v11450_v19, %v3080_v46  ;;  %v3087_v61 = vand.u32 2147483647, %v11407_v36 }
 0x459   :  { %v11545_v50 = vpop.eup %7557  ;;  %7569 = vpow2.f32 %v11427_v55  ;;  %v3071_v55 = vsel %vm11567_vm13, %v11419_v58, %v3067_v27  ;;  %v3089_v34 = vand.u32 2147483648, %v11407_v36  ;;  %v3104_v43 = vand.u32 2147483648, %v11432_v22 }
 0x45a   :  { %v11558_v29 = vpop.eup %7559  ;;  %v3075_v59 = vor.u32 1.1754944e-38, %v3074_v37  ;;  %v3095_v48 = vsub.f32 1.0, %v3094_v41  ;;  %v3109_v44 = vmul.f32 %v11545_v50, %v11441_v49  ;;  %v3196_v14 = vsub.f32 1.0, %v3195_v3 }
 0x45b   :  { %v11576_v20 = vpop.eup %7561  ;;  %vm3083_vm8 = vweird.f32 %v11407_v36  ;;  %vm3084_vm7 = vweird.f32 %v11450_v19  ;;  %v16647_v58 = vrot.slane %v11395_v63, 1  ;;  %v3210_v27 = vmul.f32 %v11514_v5, %v11437_v42 }
 0x45c   :  { %v11586_v18 = vpop.eup %7563  ;;  %v11598_v37 = vsel %vm11571_vm5, %v3075_v59, %v3071_v55  ;;  %v3082_v41 = vadd.f32 %v11450_v19, %v3081_v38  ;;  %vm3098_vm11 = vweird.f32 %v11432_v22  ;;  %v3102_v3 = vand.u32 2147483647, %v11432_v22  ;;  %vm11620_vm9 = vmor %vm3083_vm8, %vm3084_vm7 }
 0x45d   :  { %v6923_v46 = vmul.f32 -1.442695, %v16647_v58  ;;  %v11594_v12 = vpop.eup %7565  ;;  %vm11605_vm10 = vcmp.eq.f32.partialorder %v3087_v61, 8.507059e+37  ;;  %v3090_v58 = vor.u32 1.1754944e-38, %v3089_v34  ;;  %v3105_v25 = vor.u32 1.1754944e-38, %v3104_v43 }
 0x45e   :  { %v11603_v2 = vpop.eup %7567  ;;  %v3117_v7 = vand.u32 2147483647, %v11441_v49  ;;  %v3096_v53 = vmul.f32 %v11499_v45, %v3095_v48  ;;  %v3110_v55 = vsub.f32 1.0, %v3109_v44  ;;  %v3124_v38 = vmul.f32 %v11586_v18, %v11476_v11 }
 0x45f   :  { %v11610_v26 = vpop.eup %7569  ;;  %v3197_v59 = vmul.f32 %v11481_v21, %v3196_v14  ;;  %v3119_v34 = vand.u32 2147483648, %v11441_v49  ;;  %7571 = vpow2.f32 %v6923_v46  ;;  %v11626_v43 = vadd.f32 1.0, %v11464_v8 }
 0x460   :  { %v3211_v48 = vsub.f32 1.0, %v3210_v27  ;;  %v3086_v44 = vsel %vm11620_vm9, %v11450_v19, %v3082_v41  ;;  %vm11631_vm12 = vcmp.eq.f32.partialorder %v3102_v3, 8.507059e+37  ;;  %vm3113_vm0 = vweird.f32 %v11441_v49 }
 0x461   :  { %v11637_v36 = vadd.f32 1.0, %v11474_v10  ;;  %vm3199_vm15 = vweird.f32 %v11430_v32  ;;  %v3225_v8 = vmul.f32 %v11558_v29, %v11455_v31  ;;  %vm3099_vm6 = vweird.f32 %v11499_v45 }
 0x462   :  { %v3134_v46 = vand.u32 2147483648, %v11476_v11  ;;  %vm3200_vm14 = vweird.f32 %v11481_v21  ;;  %v3203_v19 = vand.u32 2147483647, %v11430_v32  ;;  %v3097_v27 = vadd.f32 %v11499_v45, %v3096_v53  ;;  %vm11657_vm13 = vmor %vm3098_vm11, %vm3099_vm6 }
 0x463   :  { %v3111_v41 = vmul.f32 %v11545_v50, %v3110_v55  ;;  %v3125_v3 = vsub.f32 1.0, %v3124_v38  ;;  %v3198_v10 = vadd.f32 %v11481_v21, %v3197_v59  ;;  %v11651_v61 = vsel %vm11605_vm10, %v3090_v58, %v3086_v44  ;;  %vm11674_vm11 = vmor %vm3199_vm15, %vm3200_vm14 }
 0x464   :  { %v3120_v6 = vor.u32 1.1754944e-38, %v3119_v34  ;;  %v3205_v39 = vand.u32 2147483648, %v11430_v32  ;;  %v3212_v4 = vmul.f32 %v11514_v5, %v3211_v48  ;;  %vm11661_vm5 = vcmp.eq.f32.partialorder %v3117_v7, 8.507059e+37 }
 0x465   :  { %vm3128_vm8 = vweird.f32 %v11476_v11  ;;  %v3132_v51 = vand.u32 2147483647, %v11476_v11  ;;  %v3226_v58 = vsub.f32 1.0, %v3225_v8  ;;  %v3240_v55 = vmul.f32 %v11576_v20, %v11466_v62  ;;  %v7572_v38 = vpop.eup %7571 }
 0x466   :  { %vm3114_vm7 = vweird.f32 %v11545_v50  ;;  %v3135_v22 = vor.u32 1.1754944e-38, %v3134_v46  ;;  %vm11678_vm10 = vcmp.eq.f32.partialorder %v3203_v19, 8.507059e+37  ;;  %v3218_v34 = vand.u32 2147483647, %v11437_v42 }
 0x467   :  { %v3101_v48 = vsel %vm11657_vm13, %v11499_v45, %v3097_v27  ;;  %v3112_v44 = vadd.f32 %v11545_v50, %v3111_v41  ;;  %v3126_v8 = vmul.f32 %v11586_v18, %v3125_v3  ;;  %v3202_v32 = vsel %vm11674_vm11, %v11481_v21, %v3198_v10  ;;  %vm11710_vm14 = vmor %vm3113_vm0, %vm3114_vm7 }
 0x468   :  { %v3206_v46 = vor.u32 1.1754944e-38, %v3205_v39  ;;  %v3213_v19 = vadd.f32 %v11514_v5, %v3212_v4  ;;  %vm3214_vm9 = vweird.f32 %v11437_v42  ;;  %vm3215_vm15 = vweird.f32 %v11514_v5 }
 0x469   :  { %vm11694_vm6 = vcmp.eq.f32.partialorder %v3132_v51, 8.507059e+37  ;;  %v11698_v30 = vadd.f32 1.0, %v7572_v38  ;;  %v3220_v45 = vand.u32 2147483648, %v11437_v42  ;;  %v3227_v27 = vmul.f32 %v11558_v29, %v3226_v58 }
 0x46a   :  { %v3241_v41 = vsub.f32 1.0, %v3240_v55  ;;  %v11704_v39 = vsel %vm11631_vm12, %v3105_v25, %v3101_v48  ;;  %vm3129_vm13 = vweird.f32 %v11586_v18  ;;  %v11717_v21 = vsel %vm11678_vm10, %v3206_v46, %v3202_v32  ;;  %vm11727_vm12 = vmor %vm3214_vm9, %vm3215_vm15 }
 0x46b   :  { %vm11719_vm11 = vcmp.eq.f32.partialorder %v3218_v34, 8.507059e+37  ;;  %v3116_v25 = vsel %vm11710_vm14, %v11545_v50, %v3112_v44  ;;  %v3127_v49 = vadd.f32 %v11586_v18, %v3126_v8  ;;  %v3233_v3 = vand.u32 2147483647, %v11455_v31  ;;  %vm11751_vm7 = vmor %vm3128_vm8, %vm3129_vm13 }
 0x46c   :  { %7573 = vrcp.f32 %v11626_v43  ;;  %v3217_v10 = vsel %vm11727_vm12, %v11514_v5, %v3213_v19  ;;  %v3235_v51 = vand.u32 2147483648, %v11455_v31  ;;  %v3255_v58 = vmul.f32 %v11594_v12, %v11483_v52 }
 0x46d   :  { %7575 = vrcp.f32 %v11637_v36  ;;  %v3221_v50 = vor.u32 1.1754944e-38, %v3220_v45  ;;  %v3228_v55 = vadd.f32 %v11558_v29, %v3227_v27  ;;  %vm3230_vm0 = vweird.f32 %v11558_v29 }
 0x46e   :  { %v3242_v38 = vmul.f32 %v11576_v20, %v3241_v41  ;;  %v11745_v7 = vsel %vm11661_vm5, %v3120_v6, %v3116_v25  ;;  %vm3229_vm10 = vweird.f32 %v11455_v31  ;;  %v3248_v59 = vand.u32 2147483647, %v11466_v62 }
 0x46f   :  { %v3250_v34 = vand.u32 2147483648, %v11466_v62  ;;  %v3131_v53 = vsel %vm11751_vm7, %v11586_v18, %v3127_v49  ;;  %v11763_v6 = vsel %vm11719_vm11, %v3221_v50, %v3217_v10  ;;  %vm3244_vm5 = vweird.f32 %v11466_v62  ;;  %vm11767_vm8 = vmor %vm3229_vm10, %vm3230_vm0 }
 0x470   :  { %v3341_v11 = vrot.slane %v11365_v57, 3  ;;  %vm11771_vm9 = vcmp.eq.f32.partialorder %v3233_v3, 8.507059e+37  ;;  %v3236_v44 = vor.u32 1.1754944e-38, %v3235_v51  ;;  %v3256_v8 = vsub.f32 1.0, %v3255_v58 }
 0x471   :  { %7577 = vrcp.f32 %v11698_v30  ;;  %v3232_v32 = vsel %vm11767_vm8, %v11558_v29, %v3228_v55  ;;  %v3243_v46 = vadd.f32 %v11576_v20, %v3242_v38  ;;  %vm3245_vm15 = vweird.f32 %v11576_v20 }
 0x472   :  { %v11776_v18 = vpop.eup %7573  ;;  %v3342_v19 = vrot.slane %v11371_v60, 3  ;;  %v11788_v27 = vsel %vm11694_vm6, %v3135_v22, %v3131_v53  ;;  %vm11790_vm14 = vcmp.eq.f32.partialorder %v3248_v59, 8.507059e+37  ;;  %v3251_v4 = vor.u32 1.1754944e-38, %v3250_v34  ;;  %vm11805_vm6 = vmor %vm3244_vm5, %vm3245_vm15 }
 0x473   :  { %v11784_v45 = vpop.eup %7575  ;;  %16676 = vst [vmem:[#allocation42_spill] sm:$0xff] %v11788_v27  ;;  %vm3260_vm13 = vweird.f32 %v11594_v12  ;;  %v3265_v29 = vand.u32 2147483648, %v11483_v52  ;;  %v3343_v42 = vrot.slane %v11374_v16, 3  ;;  %v16679_v25 = vrot.slane %v11363_v15, 3 }
 0x474   :  { %v6927_v14 = vmul.f32 -1.442695, %v3341_v11  ;;  %v11801_v0 = vsel %vm11771_vm9, %v3236_v44, %v3232_v32  ;;  %v3257_v3 = vmul.f32 %v11594_v12, %v3256_v8  ;;  %vm3259_vm11 = vweird.f32 %v11483_v52 }
 0x475   :  { %v6926_v49 = vmul.f32 -1.442695, %v16679_v25  ;;  %v3263_v10 = vand.u32 2147483647, %v11483_v52  ;;  %v3270_v51 = vmul.f32 %v11776_v18, %v11626_v43  ;;  %v3247_v58 = vsel %vm11805_vm6, %v11576_v20, %v3243_v46  ;;  %vm11857_vm10 = vmor %vm3259_vm11, %vm3260_vm13 }
 0x476   :  { %v3285_v62 = vmul.f32 %v11784_v45, %v11637_v36  ;;  %v3316_v50 = vrot.slane %v11363_v15, 2  ;;  %v6928_v55 = vmul.f32 -1.442695, %v3342_v19  ;;  %v3278_v5 = vand.u32 2147483647, %v11626_v43 }
 0x477   :  { %v11820_v38 = vpop.eup %7577  ;;  %v3317_v59 = vrot.slane %v11365_v57, 2  ;;  %v3344_v34 = vrot.slane %v11384_v28, 3  ;;  %7579 = vpow2.f32 %v6926_v49  ;;  %v3266_v53 = vor.u32 1.1754944e-38, %v3265_v29 }
 0x478   :  { %v3280_v11 = vand.u32 2147483648, %v11626_v43  ;;  %7581 = vpow2.f32 %v6927_v14  ;;  %v6929_v20 = vmul.f32 -1.442695, %v3343_v42  ;;  %v11828_v48 = vsel %vm11790_vm14, %v3251_v4, %v3247_v58 }
 0x479   :  { %v3271_v15 = vsub.f32 1.0, %v3270_v51  ;;  %7583 = vpow2.f32 %v6928_v55  ;;  %v11831_v31 = vadd.f32 1.0, %v11603_v2  ;;  %vm11833_vm12 = vcmp.eq.f32.partialorder %v3263_v10, 8.507059e+37 }
 0x47a   :  { %v3286_v57 = vsub.f32 1.0, %v3285_v62  ;;  %v3300_v8 = vmul.f32 %v11820_v38, %v11698_v30  ;;  %7585 = vtanh.f32 %v3316_v50  ;;  %v11840_v32 = vadd.f32 1.0, %v11610_v26 }
 0x47b   :  { %v3258_v46 = vadd.f32 %v11594_v12, %v3257_v3  ;;  %vm3274_vm0 = vweird.f32 %v11626_v43  ;;  %7587 = vtanh.f32 %v3317_v59  ;;  %v3345_v2 = vrot.slane %v11395_v63, 3 }
 0x47c   :  { %v6930_v19 = vmul.f32 -1.442695, %v3344_v34  ;;  %v11845_v41 = vor.u32 1.1754944e-38, %v3280_v11  ;;  %vm3289_vm7 = vweird.f32 %v11637_v36  ;;  %v3293_v4 = vand.u32 2147483647, %v11637_v36 }
 0x47d   :  { %7589 = vpow2.f32 %v6929_v20  ;;  %v7580_v29 = vpop.eup %7579  ;;  %v3272_v42 = vmul.f32 %v11776_v18, %v3271_v15  ;;  %v3295_v26 = vand.u32 2147483648, %v11637_v36  ;;  %v3318_v25 = vrot.slane %v11371_v60, 2 }
 0x47e   :  { %7591 = vrcp.f32 %v11831_v31  ;;  %v7582_v49 = vpop.eup %7581  ;;  %v3287_v22 = vmul.f32 %v11784_v45, %v3286_v57  ;;  %v3301_v3 = vsub.f32 1.0, %v3300_v8  ;;  %v11862_v10 = vadd.f32 1.0, %v7580_v29 }
 0x47f   :  { %7593 = vrcp.f32 %v11840_v32  ;;  %v7584_v51 = vpop.eup %7583  ;;  %v3262_v60 = vsel %vm11857_vm10, %v11594_v12, %v3258_v46  ;;  %v6931_v58 = vmul.f32 -1.442695, %v3345_v2  ;;  %v11868_v62 = vadd.f32 1.0, %v7582_v49 }
 0x480   :  { %7595 = vpow2.f32 %v6930_v19  ;;  %v11870_v52 = vpop.eup %7585  ;;  %vm11872_vm5 = vcmp.eq.f32.partialorder %v3278_v5, 8.507059e+37  ;;  %vm3304_vm8 = vweird.f32 %v11698_v30  ;;  %v3308_v55 = vand.u32 2147483647, %v11698_v30 }
 0x481   :  { %v3319_v59 = vrot.slane %v11374_v16, 2  ;;  %7597 = vrcp.f32 %v11862_v10  ;;  %v11880_v34 = vpop.eup %7587  ;;  %vm3275_vm9 = vweird.f32 %v11776_v18  ;;  %vm3290_vm15 = vweird.f32 %v11784_v45 }
 0x482   :  { %v11884_v12 = vadd.f32 1.0, %v7584_v51  ;;  %7599 = vrcp.f32 %v11868_v62  ;;  %v3273_v11 = vadd.f32 %v11776_v18, %v3272_v42  ;;  %v3288_v20 = vadd.f32 %v11784_v45, %v3287_v22  ;;  %vm11907_vm13 = vmor %vm3274_vm0, %vm3275_vm9 }
 0x483   :  { %v7590_v5 = vpop.eup %7589  ;;  %v3302_v15 = vmul.f32 %v11820_v38, %v3301_v3  ;;  %7601 = vtanh.f32 %v3318_v25  ;;  %v11894_v57 = vsel %vm11833_vm12, %v3266_v53, %v3262_v60  ;;  %vm11896_vm14 = vcmp.eq.f32.partialorder %v3293_v4, 8.507059e+37  ;;  %vm11919_vm6 = vmor %vm3289_vm7, %vm3290_vm15 }
 0x484   :  { %v11890_v16 = vpop.eup %7591  ;;  %v3320_v46 = vrot.slane %v11384_v28, 2  ;;  %7603 = vpow2.f32 %v6931_v58  ;;  %v3310_v53 = vand.u32 2147483648, %v11698_v30  ;;  %v3321_v44 = vrot.slane %v11395_v63, 2 }
 0x485   :  { %v11901_v2 = vpop.eup %7593  ;;  %7605 = vtanh.f32 %v3319_v59  ;;  %v3387_v4 = vmul.f32 %v11890_v16, %v11831_v31  ;;  %v3296_v43 = vor.u32 1.1754944e-38, %v3295_v26  ;;  %vm3305_vm11 = vweird.f32 %v11820_v38 }
 0x486   :  { %v7596_v28 = vpop.eup %7595  ;;  %v3402_v42 = vmul.f32 %v11901_v2, %v11840_v32  ;;  %7607 = vrcp.f32 %v11884_v12  ;;  %v3277_v25 = vsel %vm11907_vm13, %v11776_v18, %v3273_v11  ;;  %v3292_v36 = vsel %vm11919_vm6, %v11784_v45, %v3288_v20  ;;  %vm11963_vm0 = vmor %vm3304_vm8, %vm3305_vm11 }
 0x487   :  { %v11927_v63 = vpop.eup %7597  ;;  %v3303_v49 = vadd.f32 %v11820_v38, %v3302_v15  ;;  %v3388_v26 = vsub.f32 1.0, %v3387_v4  ;;  %7609 = vtanh.f32 %v3320_v46  ;;  %v11938_v22 = vadd.f32 1.0, %v7590_v5 }
 0x488   :  { %v11936_v14 = vpop.eup %7599  ;;  %v3403_v3 = vsub.f32 1.0, %v3402_v42  ;;  %v3417_v51 = vmul.f32 %v11927_v63, %v11862_v10  ;;  %vm11944_vm12 = vcmp.eq.f32.partialorder %v3308_v55, 8.507059e+37  ;;  %v3311_v58 = vor.u32 1.1754944e-38, %v3310_v53 }
 0x489   :  { %v11942_v60 = vpop.eup %7601  ;;  %7611 = vtanh.f32 %v3321_v44  ;;  %v11948_v45 = vadd.f32 1.0, %v7596_v28  ;;  %v11953_v5 = vsel %vm11872_vm5, %v11845_v41, %v3277_v25  ;;  %v11957_v11 = vsel %vm11896_vm14, %v3296_v43, %v3292_v36 }
 0x48a   :  { %v7604_v59 = vpop.eup %7603  ;;  %v3395_v20 = vand.u32 2147483647, %v11831_v31  ;;  %v3397_v15 = vand.u32 2147483648, %v11831_v31  ;;  %v3307_v41 = vsel %vm11963_vm0, %v11820_v38, %v3303_v49  ;;  %v3389_v50 = vmul.f32 %v11890_v16, %v3388_v26 }
 0x48b   :  { %v11969_v46 = vpop.eup %7605  ;;  %vm3391_vm7 = vweird.f32 %v11831_v31  ;;  %v3432_v30 = vmul.f32 %v11936_v14, %v11868_v62  ;;  %v3404_v19 = vmul.f32 %v11901_v2, %v3403_v3  ;;  %vm3406_vm10 = vweird.f32 %v11840_v32 }
 0x48c   :  { %v11978_v8 = vpop.eup %7607  ;;  %v3418_v53 = vsub.f32 1.0, %v3417_v51  ;;  %7613 = vrcp.f32 %v11938_v22  ;;  %v11983_v44 = vadd.f32 1.0, %v7604_v59  ;;  %v3410_v38 = vand.u32 2147483647, %v11840_v32 }
 0x48d   :  { %v3412_v4 = vand.u32 2147483648, %v11840_v32  ;;  %7615 = vrcp.f32 %v11948_v45  ;;  %v11988_v28 = vpop.eup %7609  ;;  %v11992_v29 = vsel %vm11944_vm12, %v3311_v58, %v3307_v41  ;;  %vm11994_vm5 = vcmp.eq.f32.partialorder %v3395_v20, 8.507059e+37 }
 0x48e   :  { %16698 = vst [vmem:[#allocation44_spill] sm:$0xff] %v11988_v28  ;;  %v3398_v42 = vor.u32 1.1754944e-38, %v3397_v15  ;;  %v3427_v25 = vand.u32 2147483648, %v11862_v10  ;;  %v3390_v49 = vadd.f32 %v11890_v16, %v3389_v50  ;;  %vm3392_vm8 = vweird.f32 %v11890_v16 }
 0x48f   :  { %v11999_v36 = vpop.eup %7611  ;;  %v3433_v26 = vsub.f32 1.0, %v3432_v30  ;;  %v3447_v3 = vmul.f32 %v11978_v8, %v11884_v12  ;;  %v3405_v51 = vadd.f32 %v11901_v2, %v3404_v19  ;;  %vm3407_vm9 = vweird.f32 %v11901_v2  ;;  %vm12019_vm13 = vmor %vm3391_vm7, %vm3392_vm8 }
 0x490   :  { %16701 = vst [vmem:[#allocation45_spill] sm:$0xff] %v11999_v36  ;;  %v3419_v18 = vmul.f32 %v11927_v63, %v3418_v53  ;;  %v3442_v58 = vand.u32 2147483648, %v11868_v62  ;;  %vm12009_vm15 = vcmp.eq.f32.partialorder %v3410_v38, 8.507059e+37  ;;  %v3413_v55 = vor.u32 1.1754944e-38, %v3412_v4  ;;  %vm12036_vm6 = vmor %vm3406_vm10, %vm3407_vm9 }
 0x491   :  { %vm3421_vm14 = vweird.f32 %v11862_v10  ;;  %7617 = vrcp.f32 %v11983_v44  ;;  %v3425_v41 = vand.u32 2147483647, %v11862_v10  ;;  %v3440_v50 = vand.u32 2147483647, %v11868_v62 }
 0x492   :  { %v12015_v20 = vpop.eup %7613  ;;  %v3457_v30 = vand.u32 2147483648, %v11884_v12  ;;  %v3472_v19 = vand.u32 2147483648, %v11938_v22  ;;  %v3394_v38 = vsel %vm12019_vm13, %v11890_v16, %v3390_v49  ;;  %v12040_v4 = vor.u32 1.1754944e-38, %v3427_v25 }
 0x493   :  { %v12027_v53 = vpop.eup %7615  ;;  %v3434_v36 = vmul.f32 %v11936_v14, %v3433_v26  ;;  %v3448_v27 = vsub.f32 1.0, %v3447_v3  ;;  %v3409_v28 = vsel %vm12036_vm6, %v11901_v2, %v3405_v51  ;;  %v12047_v15 = vadd.f32 %v11927_v63, %v3419_v18 }
 0x494   :  { %vm3422_vm11 = vweird.f32 %v11927_v63  ;;  %v12050_v16 = vor.u32 1.1754944e-38, %v3442_v58  ;;  %vm3437_vm12 = vweird.f32 %v11936_v14  ;;  %v3455_v32 = vand.u32 2147483647, %v11884_v12 }
 0x495   :  { %v3462_v25 = vmul.f32 %v12015_v20, %v11938_v22  ;;  %v3470_v49 = vand.u32 2147483647, %v11938_v22  ;;  %v12059_v26 = vsel %vm11994_vm5, %v3398_v42, %v3394_v38  ;;  %vm3436_vm0 = vweird.f32 %v11868_v62  ;;  %vm12076_vm7 = vmor %vm3421_vm14, %vm3422_vm11 }
 0x496   :  { %v12062_v2 = vor.u32 1.1754944e-38, %v3457_v30  ;;  %v12064_v3 = vor.u32 1.1754944e-38, %v3472_v19  ;;  %v3477_v51 = vmul.f32 %v12027_v53, %v11948_v45  ;;  %v12072_v58 = vsel %vm12009_vm15, %v3413_v55, %v3409_v28  ;;  %vm12153_vm11 = vmor %vm3436_vm0, %vm3437_vm12 }
 0x497   :  { %v12068_v18 = vpop.eup %7617  ;;  %v3435_v42 = vadd.f32 %v11936_v14, %v3434_v36  ;;  %v3449_v30 = vmul.f32 %v11978_v8, %v3448_v27  ;;  %v3506_v19 = vmul.f32 %v11717_v21, %v11167_v47  ;;  %v3424_v59 = vsel %vm12076_vm7, %v11927_v63, %v12047_v15 }
 0x498   :  { %vm12088_vm10 = vcmp.eq.f32.partialorder %v3425_v41, 8.507059e+37  ;;  %vm3452_vm5 = vweird.f32 %v11978_v8  ;;  %v3492_v10 = vmul.f32 %v12068_v18, %v11983_v44  ;;  %v3507_v27 = vmul.f32 %v11763_v6, %v11174_v40 }
 0x499   :  { %v3508_v47 = vmul.f32 %v11801_v0, %v11176_v54  ;;  %v3463_v21 = vsub.f32 1.0, %v3462_v25  ;;  %vm3467_vm8 = vweird.f32 %v12015_v20  ;;  %v3485_v63 = vand.u32 2147483647, %v11948_v45 }
 0x49a   :  { %v3509_v36 = vmul.f32 %v11828_v48, %v11183_v33  ;;  %v3514_v55 = vmul.f32 %v11529_v13, %v11551_v1  ;;  %vm12105_vm9 = vcmp.eq.f32.partialorder %v3440_v50, 8.507059e+37  ;;  %vm3451_vm15 = vweird.f32 %v11884_v12  ;;  %v16721_v50 = vld [vmem:[#allocation45_spill] sm:$0xff] }
 0x49b   :  { %v3478_v40 = vsub.f32 1.0, %v3477_v51  ;;  %v3510_v54 = vmul.f32 %v11894_v57, %v11192_v9  ;;  %v3515_v6 = vmul.f32 %v11537_v35, %v11555_v23  ;;  %v3516_v0 = vmul.f32 %v11870_v52, %v11563_v56  ;;  %vm12192_vm0 = vmor %vm3451_vm15, %vm3452_vm5 }
 0x49c   :  { %vm3466_vm14 = vweird.f32 %v11938_v22  ;;  %v3493_v33 = vsub.f32 1.0, %v3492_v10  ;;  %v3511_v13 = vmul.f32 %v11953_v5, %v11206_v24  ;;  %v3517_v1 = vmul.f32 %v11880_v34, %v11598_v37  ;;  %v16714_v24 = vld [vmem:[#allocation43_spill] sm:$0xff] }
 0x49d   :  { %v12121_v48 = vadd.f32 %v3514_v55, %v3506_v19  ;;  %vm3481_vm13 = vweird.f32 %v11948_v45  ;;  %v3512_v9 = vmul.f32 %v11957_v11, %v11217_v17  ;;  %v3518_v35 = vmul.f32 %v11942_v60, %v11651_v61  ;;  %v16717_v61 = vld [vmem:[#allocation44_spill] sm:$0xff] }
 0x49e   :  { %v12128_v23 = vadd.f32 %v3515_v6, %v3507_v27  ;;  %v12130_v56 = vadd.f32 %v3516_v0, %v3508_v47  ;;  %v3464_v52 = vmul.f32 %v12015_v20, %v3463_v21  ;;  %v3513_v57 = vmul.f32 %v11992_v29, %v16714_v24  ;;  %v16720_v29 = vld [vmem:[#allocation42_spill] sm:$0xff] }
 0x49f   :  { %v3519_v37 = vmul.f32 %v11969_v46, %v11704_v39  ;;  %v12137_v34 = vadd.f32 %v3517_v1, %v3509_v36  ;;  %vm12139_vm6 = vcmp.eq.f32.partialorder %v3455_v32, 8.507059e+37  ;;  %v3479_v17 = vmul.f32 %v12027_v53, %v3478_v40 }
 0x4a0   :  { %v3520_v60 = vmul.f32 %v16717_v61, %v11745_v7  ;;  %v12146_v11 = vadd.f32 %v3518_v35, %v3510_v54  ;;  %7619 = vtanh.f32 %v12121_v48  ;;  %v3494_v46 = vmul.f32 %v12068_v18, %v3493_v33 }
 0x4a1   :  { %v3521_v38 = vmul.f32 %v16721_v50, %v16720_v29  ;;  %v12160_v31 = vadd.f32 %v3519_v37, %v3511_v13  ;;  %7621 = vtanh.f32 %v12128_v23  ;;  %v3439_v7 = vsel %vm12153_vm11, %v11936_v14, %v3435_v42 }
 0x4a2   :  { %v3450_v15 = vadd.f32 %v11978_v8, %v3449_v30  ;;  %vm12167_vm7 = vcmp.eq.f32.partialorder %v3470_v49, 8.507059e+37  ;;  %v12171_v32 = vadd.f32 %v3520_v60, %v3512_v9  ;;  %7623 = vtanh.f32 %v12130_v56 }
 0x4a3   :  { %v3429_v25 = vsel %vm12088_vm10, %v12040_v4, %v3424_v59  ;;  %v3487_v51 = vand.u32 2147483648, %v11948_v45  ;;  %v12178_v43 = vadd.f32 %v3521_v38, %v3513_v57  ;;  %7625 = vtanh.f32 %v12137_v34 }
 0x4a4   :  { %v3465_v14 = vadd.f32 %v12015_v20, %v3464_v52  ;;  %v3480_v49 = vadd.f32 %v12027_v53, %v3479_v17  ;;  %vm3482_vm12 = vweird.f32 %v12027_v53  ;;  %7627 = vtanh.f32 %v12146_v11 }
 0x4a5   :  { %16724 = vst [vmem:[#allocation43_spill] sm:$0xff] %v12178_v43  ;;  %v3444_v42 = vsel %vm12105_vm9, %v12050_v16, %v3439_v7  ;;  %v3495_v30 = vadd.f32 %v12068_v18, %v3494_v46  ;;  %vm3497_vm10 = vweird.f32 %v12068_v18  ;;  %7629 = vtanh.f32 %v12160_v31  ;;  %vm12206_vm9 = vmor %vm3466_vm14, %vm3467_vm8 }
 0x4a6   :  { %v7620_v19 = vpop.eup %7619  ;;  %v3454_v59 = vsel %vm12192_vm0, %v11978_v8, %v3450_v15  ;;  %v3500_v16 = vand.u32 2147483647, %v11983_v44  ;;  %v3502_v28 = vand.u32 2147483648, %v11983_v44  ;;  %7631 = vtanh.f32 %v12171_v32  ;;  %vm12215_vm5 = vmor %vm3481_vm13, %vm3482_vm12  ;;  %v16738_v8 = vld [vmem:[#allocation13_spill] sm:$0xff] }
 0x4a7   :  { %v7622_v10 = vpop.eup %7621  ;;  %vm12219_vm15 = vcmp.eq.f32.partialorder %v3485_v63, 8.507059e+37  ;;  %vm3496_vm8 = vweird.f32 %v11983_v44  ;;  %7633 = vtanh.f32 %v12178_v43  ;;  %v3538_v22 = vmul.f32 %v7620_v19, %v12059_v26  ;;  %v16744_v63 = vld [vmem:[#allocation14_spill] sm:$0xff] }
 0x4a8   :  { %v7624_v47 = vpop.eup %7623  ;;  %v3469_v21 = vsel %vm12206_vm9, %v12015_v20, %v3465_v14  ;;  %v3484_v45 = vsel %vm12215_vm5, %v12027_v53, %v3480_v49  ;;  %v3488_v36 = vor.u32 1.1754944e-38, %v3487_v51  ;;  %vm12234_vm14 = vmor %vm3496_vm8, %vm3497_vm10  ;;  %v3539_v44 = vmul.f32 %v7622_v10, %v12072_v58 }
 0x4a9   :  { %v7626_v55 = vpop.eup %7625  ;;  %v3459_v26 = vsel %vm12139_vm6, %v12062_v2, %v3454_v59  ;;  %v3499_v20 = vsel %vm12234_vm14, %v12068_v18, %v3495_v30  ;;  %v3540_v41 = vmul.f32 %v7624_v47, %v3429_v25  ;;  %3546 = vst [vmem:[#allocation3 + $0x3] sm:$0x1] %v3538_v22  ;;  %v3570_v53 = vpack.c.bf16 %v3538_v22, %v3538_v22  ;;  %v16739_v22 = vld [vmem:[#allocation12_spill] sm:$0xff]  ;;  %v16740_v47 = vld [vmem:[#allocation10_spill] sm:$0xff] }
 0x4aa   :  { %v7628_v40 = vpop.eup %7627  ;;  %vm3501_vm13 = vcmp.eq.f32.partialorder %v3500_v16, 8.507059e+37  ;;  %v3503_v54 = vor.u32 1.1754944e-38, %v3502_v28  ;;  %v3541_v6 = vmul.f32 %v7626_v55, %v3444_v42  ;;  %3547 = vst [vmem:[#allocation3 + $0xb] sm:$0x1] %v3539_v44  ;;  %v3571_v0 = vpack.c.bf16 %v3539_v44, %v3539_v44  ;;  %v16745_v44 = vld [vmem:[#allocation15_spill] sm:$0xff]  ;;  %v16746_v55 = vld [vmem:[#allocation21_spill] sm:$0xff] }
 0x4ab   :  { %v7630_v33 = vpop.eup %7629  ;;  %v3474_v58 = vsel %vm12167_vm7, %v12064_v3, %v3469_v21  ;;  %v3489_v2 = vsel %vm12219_vm15, %v3488_v36, %v3484_v45  ;;  %v3542_v13 = vmul.f32 %v7628_v40, %v3459_v26  ;;  %3548 = vst [vmem:[#allocation3 + $0x13] sm:$0x1] %v3540_v41  ;;  %v3572_v18 = vpack.c.bf16 %v3540_v41, %v3540_v41  ;;  %v16741_v21 = vld [vmem:[#allocation11_spill] sm:$0xff]  ;;  %v16742_v45 = vld [vmem:[#allocation17_spill] sm:$0xff]  ;;  %v16743_v36 = vld [vmem:[#allocation16_spill] sm:$0xff] }
 0x4ac   :  { %v7632_v1 = vpop.eup %7631  ;;  %v3504_v9 = vsel %vm3501_vm13, %v3503_v54, %v3499_v20  ;;  %v3543_v35 = vmul.f32 %v7630_v33, %v3474_v58  ;;  %3549 = vst [vmem:[#allocation3 + $0x1b] sm:$0x1] %v3541_v6  ;;  %v3573_v52 = vpack.c.bf16 %v3541_v6, %v3541_v6  ;;  %v3587_v24 = vunpack.c.l.b16 %v3571_v0  ;;  %v16747_v26 = vld [vmem:[#allocation20_spill] sm:$0xff]  ;;  %v16748_v20 = vld [vmem:[#allocation18_spill] sm:$0xff]  ;;  %v16749_v41 = vld [vmem:[#allocation19_spill] sm:$0xff] }
 0x4ad   :  { %v7634_v57 = vpop.eup %7633  ;;  %v3544_v37 = vmul.f32 %v7632_v1, %v3489_v2  ;;  %3550 = vst [vmem:[#allocation3 + $0x23] sm:$0x1] %v3542_v13  ;;  %v3574_v5 = vpack.c.bf16 %v3542_v13, %v3542_v13  ;;  %v3586_v17 = vunpack.c.l.b16 %v3570_v53  ;;  %v3588_v61 = vunpack.c.l.b16 %v3572_v18  ;;  %v16750_v53 = vld [vmem:[#allocation25_spill] sm:$0xff]  ;;  %v16751_v40 = vld [vmem:[#allocation24_spill] sm:$0xff]  ;;  %v16752_v54 = vld [vmem:[#allocation22_spill] sm:$0xff] }
 0x4ae   :  { %v3545_v60 = vmul.f32 %v7634_v57, %v3504_v9  ;;  %3551 = vst [vmem:[#allocation3 + $0x2b] sm:$0x1] %v3543_v35  ;;  %v3575_v3 = vpack.c.bf16 %v3543_v35, %v3543_v35  ;;  %v3589_v39 = vunpack.c.l.b16 %v3573_v52  ;;  %v3594_v46 = vrot.slane %v3587_v24, 7  ;;  %v16753_v6 = vld [vmem:[#allocation23_spill] sm:$0xff]  ;;  %v16754_v0 = vld [vmem:[#allocation29_spill] sm:$0xff]  ;;  %v16755_v33 = vld [vmem:[#allocation28_spill] sm:$0xff] }
 0x4af   :  { %3552 = vst [vmem:[#allocation3 + $0x33] sm:$0x1] %v3544_v37  ;;  %v3576_v29 = vpack.c.bf16 %v3544_v37, %v3544_v37  ;;  %v3590_v50 = vunpack.c.l.b16 %v3574_v5  ;;  %v3596_v38 = vrot.slane %v3588_v61, 6  ;;  %vm16735_vm6 = vcmask 1045509   ;;  %v16756_v58 = vld [vmem:[#allocation26_spill] sm:$0xff]  ;;  %v16757_v2 = vld [vmem:[#allocation27_spill] sm:$0xff] }
 0x4b0   :  { %3553 = vst [vmem:[#allocation3 + $0x3b] sm:$0x1] %v3545_v60  ;;  %v3577_v7 = vpack.c.bf16 %v3545_v60, %v3545_v60  ;;  %v3591_v15 = vunpack.c.l.b16 %v3575_v3  ;;  %v3595_v62 = vsel %vm723_vm2, %v3594_v46, %v3586_v17  ;;  %v3598_v25 = vrot.slane %v3589_v39, 5  ;;  %v16758_v13 = vld [vmem:[#allocation33_spill] sm:$0xff]  ;;  %v16759_v18 = vld [vmem:[#allocation32_spill] sm:$0xff]  ;;  %v16760_v1 = vld [vmem:[#allocation30_spill] sm:$0xff] }
 0x4b1   :  { %v3592_v51 = vunpack.c.l.b16 %v3576_v29  ;;  %v3597_v14 = vsel %vm719_vm1, %v3596_v38, %v3595_v62  ;;  %v3600_v49 = vrot.slane %v3590_v50, 4  ;;  %vm16736_vm11 = vcmask 1046534   ;;  %v16761_v9 = vld [vmem:[#allocation31_spill] sm:$0xff]  ;;  %v16762_v35 = vld [vmem:[#allocation37_spill] sm:$0xff]  ;;  %v16763_v52 = vld [vmem:[#allocation36_spill] sm:$0xff] }
 0x4b2   :  { %v3593_v42 = vunpack.c.l.b16 %v3577_v7  ;;  %v3599_v4 = vsel %vm725_vm3, %v3598_v25, %v3597_v14  ;;  %v3602_v30 = vrot.slane %v3591_v15, 3  ;;  %vm16737_vm7 = vcmask 1047559   ;;  %v16764_v24 = vld [vmem:[#allocation34_spill] sm:$0xff]  ;;  %v16765_v57 = vld [vmem:[#allocation35_spill] sm:$0xff]  ;;  %v16766_v37 = vld [vmem:[#allocation41_spill] sm:$0xff] }
 0x4b3   :  { %v3601_v19 = vsel %vm731_vm4, %v3600_v49, %v3599_v4  ;;  %v3604_v59 = vrot.slane %v3592_v51, 2  ;;  %v16767_v5 = vld [vmem:[#allocation40_spill] sm:$0xff]  ;;  %v16768_v17 = vld [vmem:[#allocation38_spill] sm:$0xff]  ;;  %v16769_v61 = vld [vmem:[#allocation39_spill] sm:$0xff]  ;;  %vm16770_vm12 = vcmask 1040384   ;;  %vm16773_vm9 = vcmask 1046528  }
 0x4b4   :  { %v3603_v12 = vsel %vm16735_vm6, %v3602_v30, %v3601_v19  ;;  %v3606_v16 = vrot.slane %v3593_v42, 1  ;;  %vm16771_vm0 = vmmov %vm16735_vm6  ;;  %vm16775_vm15 = vcmask 1041408   ;;  %vm16776_vm8 = vcmask 1042433  }
 0x4b5   :  { %v3605_v28 = vsel %vm16736_vm11, %v3604_v59, %v3603_v12  ;;  %vm16772_vm10 = vmmov %vm16736_vm11  ;;  %vm16777_vm14 = vcmask 1043458   ;;  %vm16778_vm13 = vcmask 1044483   ;;  %vm16780_vm11 = vcmask 1045508  }
 0x4b6   :  { %v3607_v10 = vsel %vm16737_vm7, %v3606_v16, %v3605_v28  ;;  %vm16774_vm5 = vmmov %vm16771_vm0 }
 0x4b7   :  { %v3608_v27 = vpack.c.b16 %v3607_v10, %v3607_v10  ;;  %vm16779_vm6 = vmmov %vm16772_vm10 }
 0x4b8   :  { %vm16781_vm7 = vmmov %vm16773_vm9 }
 0x4b9   :  { %3618 = vmatmul.bf16.vlgmr.msrb.gmra.mxu0 %v3608_v27  ;;  %3631 = vmatmul.bf16.vlgmr.msrb.gmra.mxu1 %v3608_v27 }
 0x4ba   :  { %3644 = vmatmul.bf16.vlgmr.msrb.gmra.mxu2 %v3608_v27  ;;  %3657 = vmatmul.bf16.vlgmr.msrb.gmra.mxu3 %v3608_v27 }
 0x4bb   :  { %5070 = vmatpush.bf16.msrb.mxu0 %v16738_v8  ;;  %5083 = vmatpush.bf16.msrb.mxu1 %v16739_v22 }
 0x4bc   :  { %5096 = vmatpush.bf16.msrb.mxu2 %v16740_v47  ;;  %5109 = vmatpush.bf16.msrb.mxu3 %v16741_v21 }
 0x4bf   :  { %5071 = vmatpush.bf16.msrb.mxu0 %v16742_v45  ;;  %5084 = vmatpush.bf16.msrb.mxu1 %v16743_v36 }
 0x4c0   :  { %5097 = vmatpush.bf16.msrb.mxu2 %v16744_v63  ;;  %5110 = vmatpush.bf16.msrb.mxu3 %v16745_v44 }
 0x4c3   :  { %5072 = vmatpush.bf16.msrb.mxu0 %v16746_v55  ;;  %5085 = vmatpush.bf16.msrb.mxu1 %v16747_v26 }
 0x4c4   :  { %5098 = vmatpush.bf16.msrb.mxu2 %v16748_v20  ;;  %5111 = vmatpush.bf16.msrb.mxu3 %v16749_v41 }
 0x4c7   :  { %5073 = vmatpush.bf16.msrb.mxu0 %v16750_v53  ;;  %5086 = vmatpush.bf16.msrb.mxu1 %v16751_v40 }
 0x4c8   :  { %5099 = vmatpush.bf16.msrb.mxu2 %v16752_v54  ;;  %5112 = vmatpush.bf16.msrb.mxu3 %v16753_v6 }
 0x4cb   :  { %5074 = vmatpush.bf16.msrb.mxu0 %v16754_v0  ;;  %5087 = vmatpush.bf16.msrb.mxu1 %v16755_v33 }
 0x4cc   :  { %5100 = vmatpush.bf16.msrb.mxu2 %v16756_v58  ;;  %5113 = vmatpush.bf16.msrb.mxu3 %v16757_v2 }
 0x4cf   :  { %5075 = vmatpush.bf16.msrb.mxu0 %v16758_v13  ;;  %5088 = vmatpush.bf16.msrb.mxu1 %v16759_v18 }
 0x4d0   :  { %5101 = vmatpush.bf16.msrb.mxu2 %v16760_v1  ;;  %5114 = vmatpush.bf16.msrb.mxu3 %v16761_v9 }
 0x4d3   :  { %5076 = vmatpush.bf16.msrb.mxu0 %v16762_v35  ;;  %5089 = vmatpush.bf16.msrb.mxu1 %v16763_v52 }
 0x4d4   :  { %5102 = vmatpush.bf16.msrb.mxu2 %v16764_v24  ;;  %5115 = vmatpush.bf16.msrb.mxu3 %v16765_v57 }
 0x4d7   :  { %5077 = vmatpush.bf16.msrb.mxu0 %v16766_v37  ;;  %5090 = vmatpush.bf16.msrb.mxu1 %v16767_v5 }
 0x4d8   :  { %5103 = vmatpush.bf16.msrb.mxu2 %v16768_v17  ;;  %5116 = vmatpush.bf16.msrb.mxu3 %v16769_v61 }
 0x536   :  { %v3619_v60 = vpop.f32.mrf.mxu0  ;;  %v3632_v3 = vpop.f32.mrf.mxu1 }
 0x537   :  { %v3666_v39 = vrot.slane %v3632_v3, 7 }
 0x539   :  { %v3669_v46 = vsel %vm16770_vm12, %v3619_v60, %v3666_v39  ;;  %v3672_v29 = vsel %vm723_vm2, %v3619_v60, %v3666_v39  ;;  %v3676_v50 = vsel %vm719_vm1, %v3619_v60, %v3666_v39  ;;  %v3680_v38 = vsel %vm725_vm3, %v3619_v60, %v3666_v39 }
 0x53a   :  { %v3684_v7 = vsel %vm731_vm4, %v3619_v60, %v3666_v39  ;;  %v3688_v15 = vsel %vm16771_vm0, %v3619_v60, %v3666_v39  ;;  %v3692_v62 = vsel %vm16772_vm10, %v3619_v60, %v3666_v39  ;;  %v3696_v25 = vsel %vm16773_vm9, %v3666_v39, %v3619_v60 }
 0x53b   :  { %vm16782_vm0 = vcmask 1046533   ;;  %vm16783_vm10 = vcmask 1045504   ;;  %vm16784_vm9 = vcmask 1046529  }
 0x53d   :  { %v3645_v51 = vpop.f32.mrf.mxu2  ;;  %v3658_v14 = vpop.f32.mrf.mxu3 }
 0x53e   :  { %v3667_v49 = vrot.slane %v3645_v51, 6  ;;  %v3668_v42 = vrot.slane %v3658_v14, 5  ;;  %v3621_v4 = vpop.f32.mrf.mxu0  ;;  %v3634_v30 = vpop.f32.mrf.mxu1 }
 0x540   :  { %v3670_v19 = vsel %vm719_vm1, %v3667_v49, %v3668_v42  ;;  %v3673_v59 = vsel %vm725_vm3, %v3667_v49, %v3668_v42  ;;  %v3677_v12 = vsel %vm731_vm4, %v3667_v49, %v3668_v42  ;;  %v3681_v16 = vsel %vm16774_vm5, %v3667_v49, %v3668_v42 }
 0x541   :  { %v3671_v28 = vsel %vm16775_vm15, %v3669_v46, %v3670_v19  ;;  %v3674_v10 = vsel %vm16776_vm8, %v3672_v29, %v3673_v59  ;;  %v3678_v27 = vsel %vm16777_vm14, %v3676_v50, %v3677_v12  ;;  %v3682_v60 = vsel %vm16778_vm13, %v3680_v38, %v3681_v16  ;;  %v3555_v46 = vld [vmem:[#allocation2 + $0x4] ss:$8 sm:$0xf] }
 0x542   :  { %v3675_v3 = vrot.slane %v3674_v10, 1  ;;  %v3679_v39 = vrot.slane %v3678_v27, 2  ;;  %v3683_v51 = vrot.slane %v3682_v60, 3  ;;  %v3685_v14 = vsel %vm16779_vm6, %v3667_v49, %v3668_v42  ;;  %v3557_v19 = vld [vmem:[#allocation2 + $0x24] ss:$8 sm:$0xf] }
 0x543   :  { %v3686_v4 = vsel %vm16780_vm11, %v3684_v7, %v3685_v14  ;;  %v3689_v30 = vsel %vm16781_vm7, %v3668_v42, %v3667_v49  ;;  %v3693_v61 = vsel %vm16770_vm12, %v3667_v49, %v3668_v42  ;;  %v3697_v17 = vsel %vm723_vm2, %v3667_v49, %v3668_v42  ;;  %v3559_v59 = vld [vmem:[#allocation2 + $0x44] ss:$8 sm:$0xf] }
 0x544   :  { %v3690_v29 = vsel %vm16782_vm0, %v3688_v15, %v3689_v30  ;;  %v3694_v50 = vsel %vm16783_vm10, %v3693_v61, %v3692_v62  ;;  %v3698_v38 = vsel %vm16784_vm9, %v3697_v17, %v3696_v25  ;;  %v3561_v12 = vld [vmem:[#allocation2 + $0x64] ss:$8 sm:$0xf]  ;;  %v12313_v16 = vadd.f32 %v3671_v28, %v3555_v46 }
 0x545   :  { %v3647_v10 = vpop.f32.mrf.mxu2  ;;  %v3660_v7 = vpop.f32.mrf.mxu3  ;;  %v12315_v27 = vadd.f32 %v3675_v3, %v3557_v19  ;;  %v12317_v60 = vadd.f32 %v3679_v39, %v3559_v59  ;;  %v12319_v14 = vadd.f32 %v3683_v51, %v3561_v12  ;;  %v3687_v42 = vrot.slane %v3686_v4, 4  ;;  %v3563_v62 = vld [vmem:[#allocation2 + $0x84] ss:$8 sm:$0xf] }
 0x546   :  { %v6932_v49 = vmul.f32 -1.442695, %v12313_v16  ;;  %v3691_v28 = vrot.slane %v3690_v29, 5  ;;  %v3565_v51 = vld [vmem:[#allocation2 + $0xa4] ss:$8 sm:$0xf] }
 0x547   :  { %v6933_v15 = vmul.f32 -1.442695, %v12315_v27  ;;  %v6934_v61 = vmul.f32 -1.442695, %v12317_v60  ;;  %v6935_v17 = vmul.f32 -1.442695, %v12319_v14  ;;  %v12325_v25 = vadd.f32 %v3687_v42, %v3563_v62 }
 0x548   :  { %7635 = vpow2.f32 %v6932_v49  ;;  %v3695_v46 = vrot.slane %v3694_v50, 6  ;;  %v12328_v19 = vadd.f32 %v3691_v28, %v3565_v51  ;;  %v3876_v10 = vrot.slane %v12313_v16, 1  ;;  %v3567_v29 = vld [vmem:[#allocation2 + $0xc4] ss:$8 sm:$0xf] }
 0x549   :  { %7637 = vpow2.f32 %v6933_v15  ;;  %v6936_v30 = vmul.f32 -1.442695, %v12325_v25  ;;  %v3877_v42 = vrot.slane %v12315_v27, 1  ;;  %v3699_v50 = vrot.slane %v3698_v38, 7 }
 0x54a   :  { %7639 = vpow2.f32 %v6934_v61  ;;  %v12338_v15 = vadd.f32 %v3695_v46, %v3567_v29  ;;  %v6937_v61 = vmul.f32 -1.442695, %v12328_v19  ;;  %v3878_v28 = vrot.slane %v12317_v60, 1 }
 0x54b   :  { %7641 = vpow2.f32 %v6935_v17  ;;  %v6940_v17 = vmul.f32 -1.442695, %v3876_v10  ;;  %v3880_v10 = vrot.slane %v12325_v25, 1  ;;  %v4068_v37 = vrot.slane %v12313_v16, 3 }
 0x54c   :  { %7643 = vpow2.f32 %v6936_v30  ;;  %v6938_v51 = vmul.f32 -1.442695, %v12338_v15  ;;  %v3879_v30 = vrot.slane %v12319_v14, 1  ;;  %v4069_v57 = vrot.slane %v12315_v27, 3 }
 0x54d   :  { %v6944_v52 = vmul.f32 -1.442695, %v3880_v10  ;;  %v4045_v10 = vrot.slane %v12315_v27, 2  ;;  %v12379_v13 = vmul.f32 -1.442695, %v4068_v37 }
 0x54e   :  { %v7636_v3 = vpop.eup %7635 }
 0x54f   :  { %v7638_v39 = vpop.eup %7637  ;;  %v12330_v59 = vadd.f32 1.0, %v7636_v3  ;;  %v6941_v3 = vmul.f32 -1.442695, %v3877_v42  ;;  %v3882_v42 = vrot.slane %v12338_v15, 1 }
 0x550   :  { %v7640_v4 = vpop.eup %7639  ;;  %v12332_v12 = vadd.f32 1.0, %v7638_v39  ;;  %v3569_v39 = vld [vmem:[#allocation2 + $0xe4] ss:$8 sm:$0xf] }
 0x551   :  { %v12335_v7 = vadd.f32 1.0, %v7640_v4  ;;  %v7642_v49 = vpop.eup %7641  ;;  %7645 = vrcp.f32 %v12330_v59  ;;  %v12349_v46 = vadd.f32 %v3699_v50, %v3569_v39  ;;  %v6943_v50 = vmul.f32 -1.442695, %v3879_v30 }
 0x552   :  { %7647 = vrcp.f32 %v12332_v12  ;;  %v12343_v62 = vadd.f32 1.0, %v7642_v49  ;;  %v7644_v4 = vpop.eup %7643  ;;  %v3881_v49 = vrot.slane %v12328_v19, 1  ;;  %v4044_v30 = vrot.slane %v12313_v16, 2 }
 0x553   :  { %7649 = vrcp.f32 %v12335_v7  ;;  %v12361_v39 = vadd.f32 1.0, %v7644_v4  ;;  %v6939_v1 = vmul.f32 -1.442695, %v12349_v46  ;;  %v3759_v16 = vand.u32 2147483648, %v12330_v59 }
 0x554   :  { %7651 = vpow2.f32 %v6937_v61  ;;  %v6942_v61 = vmul.f32 -1.442695, %v3878_v28  ;;  %v6945_v35 = vmul.f32 -1.442695, %v3881_v49  ;;  %vm3753_vm5 = vweird.f32 %v12330_v59 }
 0x555   :  { %7653 = vpow2.f32 %v6940_v17  ;;  %vm3768_vm15 = vweird.f32 %v12332_v12  ;;  %vm3783_vm12 = vweird.f32 %v12335_v7 }
 0x556   :  { %7655 = vrcp.f32 %v12343_v62 }
 0x557   :  { %v12351_v38 = vpop.eup %7645  ;;  %7657 = vpow2.f32 %v6941_v3 }
 0x558   :  { %v12356_v29 = vpop.eup %7647  ;;  %7659 = vpow2.f32 %v6938_v51  ;;  %v3749_v9 = vmul.f32 %v12351_v38, %v12330_v59  ;;  %v6946_v51 = vmul.f32 -1.442695, %v3882_v42  ;;  %v12381_v42 = vmul.f32 -1.442695, %v4069_v57 }
 0x559   :  { %v12359_v5 = vpop.eup %7649  ;;  %v3764_v28 = vmul.f32 %v12356_v29, %v12332_v12  ;;  %7661 = vpow2.f32 %v6942_v61  ;;  %v3757_v57 = vand.u32 2147483647, %v12330_v59  ;;  %vm3754_vm8 = vweird.f32 %v12351_v38 }
 0x55a   :  { %v7652_v24 = vpop.eup %7651  ;;  %v3779_v4 = vmul.f32 %v12359_v5, %v12335_v7  ;;  %7663 = vpow2.f32 %v6943_v50  ;;  %v3750_v50 = vsub.f32 1.0, %v3749_v9  ;;  %vm3769_vm13 = vweird.f32 %v12356_v29  ;;  %vm12444_vm11 = vmor %vm3753_vm5, %vm3754_vm8 }
 0x55b   :  { %v7654_v3 = vpop.eup %7653  ;;  %7665 = vrcp.f32 %v12361_v39  ;;  %v3765_v58 = vsub.f32 1.0, %v3764_v28  ;;  %v12386_v27 = vadd.f32 1.0, %v7652_v24  ;;  %v3772_v24 = vand.u32 2147483647, %v12332_v12  ;;  %vm12460_vm0 = vmor %vm3768_vm15, %vm3769_vm13 }
 0x55c   :  { %v12373_v17 = vpop.eup %7655  ;;  %7667 = vpow2.f32 %v6944_v52  ;;  %v12384_v2 = vadd.f32 1.0, %v7654_v3  ;;  %v3780_v49 = vsub.f32 1.0, %v3779_v4  ;;  %v3751_v3 = vmul.f32 %v12351_v38, %v3750_v50 }
 0x55d   :  { %v7658_v18 = vpop.eup %7657  ;;  %7669 = vpow2.f32 %v6945_v35  ;;  %v3794_v37 = vmul.f32 %v12373_v17, %v12343_v62  ;;  %v12397_v35 = vor.u32 1.1754944e-38, %v3759_v16  ;;  %vm12413_vm14 = vcmp.eq.f32.partialorder %v3757_v57, 8.507059e+37 }
 0x55e   :  { %v7660_v61 = vpop.eup %7659  ;;  %v12391_v33 = vadd.f32 1.0, %v7658_v18  ;;  %7671 = vpow2.f32 %v6939_v1  ;;  %v3766_v18 = vmul.f32 %v12356_v29, %v3765_v58  ;;  %v3774_v1 = vand.u32 2147483648, %v12332_v12 }
 0x55f   :  { %v7662_v52 = vpop.eup %7661  ;;  %7673 = vpow2.f32 %v6946_v51  ;;  %v12395_v9 = vadd.f32 1.0, %v7660_v61  ;;  %v3781_v0 = vmul.f32 %v12359_v5, %v3780_v49  ;;  %v3787_v51 = vand.u32 2147483647, %v12335_v7 }
 0x560   :  { %v7664_v28 = vpop.eup %7663  ;;  %7675 = vrcp.f32 %v12384_v2  ;;  %v3795_v61 = vsub.f32 1.0, %v3794_v37  ;;  %v12409_v6 = vadd.f32 1.0, %v7662_v52  ;;  %v3789_v50 = vand.u32 2147483648, %v12335_v7 }
 0x561   :  { %v12404_v4 = vpop.eup %7665  ;;  %7677 = vrcp.f32 %v12386_v27  ;;  %v12420_v49 = vadd.f32 1.0, %v7664_v28  ;;  %vm3784_vm6 = vweird.f32 %v12359_v5  ;;  %v3752_v52 = vadd.f32 %v12351_v38, %v3751_v3 }
 0x562   :  { %v7668_v16 = vpop.eup %7667  ;;  %7679 = vrcp.f32 %v12391_v33  ;;  %v3767_v57 = vadd.f32 %v12356_v29, %v3766_v18  ;;  %v3809_v40 = vmul.f32 %v12404_v4, %v12361_v39  ;;  %v3782_v28 = vadd.f32 %v12359_v5, %v3781_v0  ;;  %vm12478_vm9 = vmor %vm3783_vm12, %vm3784_vm6 }
 0x563   :  { %v12418_v54 = vpop.eup %7669  ;;  %7681 = vtanh.f32 %v4044_v30  ;;  %v3796_v30 = vmul.f32 %v12373_v17, %v3795_v61  ;;  %vm12448_vm7 = vcmp.eq.f32.partialorder %v3772_v24, 8.507059e+37  ;;  %v3775_v61 = vor.u32 1.1754944e-38, %v3774_v1 }
 0x564   :  { %v7672_v37 = vpop.eup %7671  ;;  %7683 = vtanh.f32 %v4045_v10  ;;  %v12437_v10 = vadd.f32 1.0, %v7668_v16  ;;  %vm12464_vm10 = vcmp.eq.f32.partialorder %v3787_v51, 8.507059e+37  ;;  %v3790_v16 = vor.u32 1.1754944e-38, %v3789_v50 }
 0x565   :  { %v12428_v53 = vpop.eup %7673  ;;  %v12430_v41 = vadd.f32 1.0, %v7672_v37  ;;  %7685 = vrcp.f32 %v12395_v9  ;;  %v3756_v7 = vsel %vm12444_vm11, %v12351_v38, %v3752_v52  ;;  %v3771_v12 = vsel %vm12460_vm0, %v12356_v29, %v3767_v57 }
 0x566   :  { %v12435_v20 = vpop.eup %7675  ;;  %7687 = vrcp.f32 %v12409_v6  ;;  %v3802_v1 = vand.u32 2147483647, %v12343_v62  ;;  %v3810_v51 = vsub.f32 1.0, %v3809_v40  ;;  %v3786_v3 = vsel %vm12478_vm9, %v12359_v5, %v3782_v28 }
 0x567   :  { %v12453_v18 = vpop.eup %7677  ;;  %7689 = vrcp.f32 %v12420_v49  ;;  %v3797_v38 = vadd.f32 %v12373_v17, %v3796_v30  ;;  %vm3799_vm5 = vweird.f32 %v12373_v17  ;;  %v3804_v52 = vand.u32 2147483648, %v12343_v62 }
 0x568   :  { %v12468_v37 = vpop.eup %7679  ;;  %7691 = vrcp.f32 %v12430_v41  ;;  %v3824_v40 = vmul.f32 %v12453_v18, %v12386_v27  ;;  %v3925_v57 = vmul.f32 %v12435_v20, %v12384_v2  ;;  %v12505_v5 = vsel %vm12413_vm14, %v12397_v35, %v3756_v7 }
 0x569   :  { %v12483_v50 = vpop.eup %7681  ;;  %7693 = vrcp.f32 %v12437_v10  ;;  %v12509_v28 = vsel %vm12448_vm7, %v3775_v61, %v3771_v12  ;;  %vm3798_vm15 = vweird.f32 %v12343_v62  ;;  %v12517_v59 = vsel %vm12464_vm10, %v3790_v16, %v3786_v3 }
 0x56a   :  { %v12491_v29 = vpop.eup %7683  ;;  %7695 = vpow2.f32 %v12379_v13  ;;  %vm12521_vm8 = vmor %vm3798_vm15, %vm3799_vm5  ;;  %vm12525_vm14 = vcmp.eq.f32.partialorder %v3802_v1, 8.507059e+37  ;;  %v3811_v62 = vmul.f32 %v12404_v4, %v3810_v51  ;;  %v3817_v0 = vand.u32 2147483647, %v12361_v39 }
 0x56b   :  { %v12499_v26 = vpop.eup %7685  ;;  %7697 = vpow2.f32 %v12381_v42  ;;  %v3801_v42 = vsel %vm12521_vm8, %v12373_v17, %v3797_v38  ;;  %v3819_v61 = vand.u32 2147483648, %v12361_v39  ;;  %v3834_v24 = vand.u32 2147483648, %v12386_v27 }
 0x56c   :  { %v12512_v30 = vpop.eup %7687  ;;  %v3805_v16 = vor.u32 1.1754944e-38, %v3804_v52  ;;  %v3825_v7 = vsub.f32 1.0, %v3824_v40  ;;  %v3839_v12 = vmul.f32 %v12499_v26, %v12395_v9  ;;  %v3926_v1 = vsub.f32 1.0, %v3925_v57 }
 0x56d   :  { %v12530_v58 = vpop.eup %7689  ;;  %vm3813_vm13 = vweird.f32 %v12361_v39  ;;  %vm3814_vm6 = vweird.f32 %v12404_v4  ;;  %v16801_v17 = vrot.slane %v12349_v46, 1  ;;  %v3940_v38 = vmul.f32 %v12468_v37, %v12391_v33 }
 0x56e   :  { %v12540_v3 = vpop.eup %7691  ;;  %v12552_v52 = vsel %vm12525_vm14, %v3805_v16, %v3801_v42  ;;  %v3812_v40 = vadd.f32 %v12404_v4, %v3811_v62  ;;  %vm3828_vm11 = vweird.f32 %v12386_v27  ;;  %v3832_v57 = vand.u32 2147483647, %v12386_v27  ;;  %vm12574_vm12 = vmor %vm3813_vm13, %vm3814_vm6 }
 0x56f   :  { %v6947_v51 = vmul.f32 -1.442695, %v16801_v17  ;;  %v12548_v13 = vpop.eup %7693  ;;  %vm12559_vm7 = vcmp.eq.f32.partialorder %v3817_v0, 8.507059e+37  ;;  %v3820_v17 = vor.u32 1.1754944e-38, %v3819_v61  ;;  %v3835_v63 = vor.u32 1.1754944e-38, %v3834_v24 }
 0x570   :  { %v12557_v55 = vpop.eup %7695  ;;  %v3847_v36 = vand.u32 2147483647, %v12395_v9  ;;  %v3826_v35 = vmul.f32 %v12453_v18, %v3825_v7  ;;  %v3840_v42 = vsub.f32 1.0, %v3839_v12  ;;  %v3854_v62 = vmul.f32 %v12540_v3, %v12430_v41 }
 0x571   :  { %v12564_v45 = vpop.eup %7697  ;;  %v3927_v16 = vmul.f32 %v12435_v20, %v3926_v1  ;;  %v3849_v61 = vand.u32 2147483648, %v12395_v9  ;;  %7699 = vpow2.f32 %v6947_v51  ;;  %v12580_v24 = vadd.f32 1.0, %v12418_v54 }
 0x572   :  { %v3941_v7 = vsub.f32 1.0, %v3940_v38  ;;  %v3816_v12 = vsel %vm12574_vm12, %v12404_v4, %v3812_v40  ;;  %vm12585_vm0 = vcmp.eq.f32.partialorder %v3832_v57, 8.507059e+37  ;;  %vm3843_vm10 = vweird.f32 %v12395_v9 }
 0x573   :  { %v12591_v39 = vadd.f32 1.0, %v12428_v53  ;;  %vm3929_vm9 = vweird.f32 %v12384_v2  ;;  %v3955_v54 = vmul.f32 %v12512_v30, %v12409_v6  ;;  %vm3829_vm5 = vweird.f32 %v12453_v18 }
 0x574   :  { %v3864_v51 = vand.u32 2147483648, %v12430_v41  ;;  %vm3930_vm15 = vweird.f32 %v12435_v20  ;;  %v3933_v4 = vand.u32 2147483647, %v12384_v2  ;;  %v3827_v38 = vadd.f32 %v12453_v18, %v3826_v35  ;;  %vm12611_vm8 = vmor %vm3828_vm11, %vm3829_vm5 }
 0x575   :  { %v3841_v40 = vmul.f32 %v12499_v26, %v3840_v42  ;;  %v3855_v57 = vsub.f32 1.0, %v3854_v62  ;;  %v3928_v53 = vadd.f32 %v12435_v20, %v3927_v16  ;;  %v12605_v0 = vsel %vm12559_vm7, %v3820_v17, %v3816_v12  ;;  %vm12628_vm11 = vmor %vm3929_vm9, %vm3930_vm15 }
 0x576   :  { %v3850_v21 = vor.u32 1.1754944e-38, %v3849_v61  ;;  %v3935_v47 = vand.u32 2147483648, %v12384_v2  ;;  %v3942_v22 = vmul.f32 %v12468_v37, %v3941_v7  ;;  %vm12615_vm14 = vcmp.eq.f32.partialorder %v3847_v36, 8.507059e+37 }
 0x577   :  { %vm3858_vm13 = vweird.f32 %v12430_v41  ;;  %v3862_v44 = vand.u32 2147483647, %v12430_v41  ;;  %v3956_v17 = vsub.f32 1.0, %v3955_v54  ;;  %v3970_v42 = vmul.f32 %v12530_v58, %v12420_v49  ;;  %v7700_v62 = vpop.eup %7699 }
 0x578   :  { %vm3844_vm6 = vweird.f32 %v12499_v26  ;;  %v3865_v27 = vor.u32 1.1754944e-38, %v3864_v51  ;;  %vm12632_vm7 = vcmp.eq.f32.partialorder %v3933_v4, 8.507059e+37  ;;  %v3948_v61 = vand.u32 2147483647, %v12391_v33 }
 0x579   :  { %v3831_v7 = vsel %vm12611_vm8, %v12453_v18, %v3827_v38  ;;  %v3842_v12 = vadd.f32 %v12499_v26, %v3841_v40  ;;  %v3856_v54 = vmul.f32 %v12540_v3, %v3855_v57  ;;  %v3932_v2 = vsel %vm12628_vm11, %v12435_v20, %v3928_v53  ;;  %vm12664_vm15 = vmor %vm3843_vm10, %vm3844_vm6 }
 0x57a   :  { %v3936_v51 = vor.u32 1.1754944e-38, %v3935_v47  ;;  %v3943_v4 = vadd.f32 %v12468_v37, %v3942_v22  ;;  %vm3944_vm12 = vweird.f32 %v12391_v33  ;;  %vm3945_vm9 = vweird.f32 %v12468_v37 }
 0x57b   :  { %vm12648_vm5 = vcmp.eq.f32.partialorder %v3862_v44, 8.507059e+37  ;;  %v12652_v8 = vadd.f32 1.0, %v7700_v62  ;;  %v3950_v18 = vand.u32 2147483648, %v12391_v33  ;;  %v3957_v38 = vmul.f32 %v12512_v30, %v3956_v17 }
 0x57c   :  { %v3971_v40 = vsub.f32 1.0, %v3970_v42  ;;  %v12658_v47 = vsel %vm12585_vm0, %v3835_v63, %v3831_v7  ;;  %vm3859_vm8 = vweird.f32 %v12540_v3  ;;  %v12671_v20 = vsel %vm12632_vm7, %v3936_v51, %v3932_v2  ;;  %vm12681_vm0 = vmor %vm3944_vm12, %vm3945_vm9 }
 0x57d   :  { %vm12673_vm11 = vcmp.eq.f32.partialorder %v3948_v61, 8.507059e+37  ;;  %v3846_v63 = vsel %vm12664_vm15, %v12499_v26, %v3842_v12  ;;  %v3857_v9 = vadd.f32 %v12540_v3, %v3856_v54  ;;  %v3963_v57 = vand.u32 2147483647, %v12409_v6  ;;  %vm12705_vm6 = vmor %vm3858_vm13, %vm3859_vm8 }
 0x57e   :  { %7701 = vrcp.f32 %v12580_v24  ;;  %v3947_v53 = vsel %vm12681_vm0, %v12468_v37, %v3943_v4  ;;  %v3965_v44 = vand.u32 2147483648, %v12409_v6  ;;  %v3985_v17 = vmul.f32 %v12548_v13, %v12437_v10 }
 0x57f   :  { %7703 = vrcp.f32 %v12591_v39  ;;  %v3951_v26 = vor.u32 1.1754944e-38, %v3950_v18  ;;  %v3958_v42 = vadd.f32 %v12512_v30, %v3957_v38  ;;  %vm3960_vm10 = vweird.f32 %v12512_v30 }
 0x580   :  { %v3972_v62 = vmul.f32 %v12530_v58, %v3971_v40  ;;  %v12699_v36 = vsel %vm12615_vm14, %v3850_v21, %v3846_v63  ;;  %vm3959_vm7 = vweird.f32 %v12409_v6  ;;  %v3978_v16 = vand.u32 2147483647, %v12420_v49 }
 0x581   :  { %v3980_v61 = vand.u32 2147483648, %v12420_v49  ;;  %v3861_v35 = vsel %vm12705_vm6, %v12540_v3, %v3857_v9  ;;  %v12717_v21 = vsel %vm12673_vm11, %v3951_v26, %v3947_v53  ;;  %vm3974_vm14 = vweird.f32 %v12420_v49  ;;  %vm12721_vm13 = vmor %vm3959_vm7, %vm3960_vm10 }
 0x582   :  { %v4071_v41 = vrot.slane %v12319_v14, 3  ;;  %vm12725_vm12 = vcmp.eq.f32.partialorder %v3963_v57, 8.507059e+37  ;;  %v3966_v12 = vor.u32 1.1754944e-38, %v3965_v44  ;;  %v3986_v54 = vsub.f32 1.0, %v3985_v17 }
 0x583   :  { %7705 = vrcp.f32 %v12652_v8  ;;  %v3962_v2 = vsel %vm12721_vm13, %v12512_v30, %v3958_v42  ;;  %v3973_v51 = vadd.f32 %v12530_v58, %v3972_v62  ;;  %vm3975_vm9 = vweird.f32 %v12530_v58 }
 0x584   :  { %v12730_v3 = vpop.eup %7701  ;;  %v4072_v4 = vrot.slane %v12325_v25, 3  ;;  %v12742_v38 = vsel %vm12648_vm5, %v3865_v27, %v3861_v35  ;;  %vm12744_vm15 = vcmp.eq.f32.partialorder %v3978_v16, 8.507059e+37  ;;  %v3981_v22 = vor.u32 1.1754944e-38, %v3980_v61  ;;  %vm12759_vm5 = vmor %vm3974_vm14, %vm3975_vm9 }
 0x585   :  { %v12738_v18 = vpop.eup %7703  ;;  %16830 = vst [vmem:[#allocation44_spill] sm:$0xff] %v12742_v38  ;;  %vm3990_vm8 = vweird.f32 %v12548_v13  ;;  %v3995_v30 = vand.u32 2147483648, %v12437_v10  ;;  %v4073_v33 = vrot.slane %v12328_v19, 3  ;;  %v16833_v63 = vrot.slane %v12317_v60, 3 }
 0x586   :  { %v6951_v1 = vmul.f32 -1.442695, %v4071_v41  ;;  %v12755_v43 = vsel %vm12725_vm12, %v3966_v12, %v3962_v2  ;;  %v3987_v57 = vmul.f32 %v12548_v13, %v3986_v54  ;;  %vm3989_vm11 = vweird.f32 %v12437_v10 }
 0x587   :  { %v6950_v9 = vmul.f32 -1.442695, %v16833_v63  ;;  %v3993_v53 = vand.u32 2147483647, %v12437_v10  ;;  %v4000_v44 = vmul.f32 %v12730_v3, %v12580_v24  ;;  %v3977_v17 = vsel %vm12759_vm5, %v12530_v58, %v3973_v51  ;;  %vm12811_vm7 = vmor %vm3989_vm11, %vm3990_vm8 }
 0x588   :  { %v4015_v49 = vmul.f32 %v12738_v18, %v12591_v39  ;;  %v4046_v26 = vrot.slane %v12317_v60, 2  ;;  %v6952_v42 = vmul.f32 -1.442695, %v4072_v4  ;;  %v4008_v37 = vand.u32 2147483647, %v12580_v24 }
 0x589   :  { %v12774_v62 = vpop.eup %7705  ;;  %v4047_v16 = vrot.slane %v12319_v14, 2  ;;  %v4074_v61 = vrot.slane %v12338_v15, 3  ;;  %7707 = vpow2.f32 %v6950_v9  ;;  %v3996_v35 = vor.u32 1.1754944e-38, %v3995_v30 }
 0x58a   :  { %v4010_v41 = vand.u32 2147483648, %v12580_v24  ;;  %7709 = vpow2.f32 %v6951_v1  ;;  %v6953_v58 = vmul.f32 -1.442695, %v4073_v33  ;;  %v12782_v7 = vsel %vm12744_vm15, %v3981_v22, %v3977_v17 }
 0x58b   :  { %v4001_v60 = vsub.f32 1.0, %v4000_v44  ;;  %7711 = vpow2.f32 %v6952_v42  ;;  %v12785_v6 = vadd.f32 1.0, %v12557_v55  ;;  %vm12787_vm0 = vcmp.eq.f32.partialorder %v3993_v53, 8.507059e+37 }
 0x58c   :  { %v4016_v14 = vsub.f32 1.0, %v4015_v49  ;;  %v4030_v54 = vmul.f32 %v12774_v62, %v12652_v8  ;;  %7713 = vtanh.f32 %v4046_v26  ;;  %v12794_v2 = vadd.f32 1.0, %v12564_v45 }
 0x58d   :  { %v3988_v51 = vadd.f32 %v12548_v13, %v3987_v57  ;;  %vm4004_vm10 = vweird.f32 %v12580_v24  ;;  %7715 = vtanh.f32 %v4047_v16  ;;  %v4075_v55 = vrot.slane %v12349_v46, 3 }
 0x58e   :  { %v6954_v4 = vmul.f32 -1.442695, %v4074_v61  ;;  %v12799_v40 = vor.u32 1.1754944e-38, %v4010_v41  ;;  %vm4019_vm6 = vweird.f32 %v12591_v39  ;;  %v4023_v22 = vand.u32 2147483647, %v12591_v39 }
 0x58f   :  { %7717 = vpow2.f32 %v6953_v58  ;;  %v7708_v30 = vpop.eup %7707  ;;  %v4002_v33 = vmul.f32 %v12730_v3, %v4001_v60  ;;  %v4025_v45 = vand.u32 2147483648, %v12591_v39  ;;  %v4048_v63 = vrot.slane %v12325_v25, 2 }
 0x590   :  { %7719 = vrcp.f32 %v12785_v6  ;;  %v7710_v9 = vpop.eup %7709  ;;  %v4017_v27 = vmul.f32 %v12738_v18, %v4016_v14  ;;  %v4031_v57 = vsub.f32 1.0, %v4030_v54  ;;  %v12816_v53 = vadd.f32 1.0, %v7708_v30 }
 0x591   :  { %7721 = vrcp.f32 %v12794_v2  ;;  %v7712_v44 = vpop.eup %7711  ;;  %v3992_v25 = vsel %vm12811_vm7, %v12548_v13, %v3988_v51  ;;  %v6955_v17 = vmul.f32 -1.442695, %v4075_v55  ;;  %v12822_v49 = vadd.f32 1.0, %v7710_v9 }
 0x592   :  { %7723 = vpow2.f32 %v6954_v4  ;;  %v12824_v10 = vpop.eup %7713  ;;  %vm12826_vm14 = vcmp.eq.f32.partialorder %v4008_v37, 8.507059e+37  ;;  %vm4034_vm13 = vweird.f32 %v12652_v8  ;;  %v4038_v42 = vand.u32 2147483647, %v12652_v8 }
 0x593   :  { %v4049_v16 = vrot.slane %v12328_v19, 2  ;;  %7725 = vrcp.f32 %v12816_v53  ;;  %v12834_v61 = vpop.eup %7715  ;;  %vm4005_vm12 = vweird.f32 %v12730_v3  ;;  %vm4020_vm9 = vweird.f32 %v12738_v18 }
 0x594   :  { %v12838_v13 = vadd.f32 1.0, %v7712_v44  ;;  %7727 = vrcp.f32 %v12822_v49  ;;  %v4003_v41 = vadd.f32 %v12730_v3, %v4002_v33  ;;  %v4018_v58 = vadd.f32 %v12738_v18, %v4017_v27  ;;  %vm12861_vm8 = vmor %vm4004_vm10, %vm4005_vm12 }
 0x595   :  { %v7718_v37 = vpop.eup %7717  ;;  %v4032_v60 = vmul.f32 %v12774_v62, %v4031_v57  ;;  %7729 = vtanh.f32 %v4048_v63  ;;  %v12848_v14 = vsel %vm12787_vm0, %v3996_v35, %v3992_v25  ;;  %vm12850_vm15 = vcmp.eq.f32.partialorder %v4023_v22, 8.507059e+37  ;;  %vm12873_vm5 = vmor %vm4019_vm6, %vm4020_vm9 }
 0x596   :  { %v12844_v19 = vpop.eup %7719  ;;  %v4050_v51 = vrot.slane %v12338_v15, 2  ;;  %7731 = vpow2.f32 %v6955_v17  ;;  %v4040_v35 = vand.u32 2147483648, %v12652_v8  ;;  %v4051_v12 = vrot.slane %v12349_v46, 2 }
 0x597   :  { %v12855_v55 = vpop.eup %7721  ;;  %7733 = vtanh.f32 %v4049_v16  ;;  %v4117_v22 = vmul.f32 %v12844_v19, %v12785_v6  ;;  %v4026_v24 = vor.u32 1.1754944e-38, %v4025_v45  ;;  %vm4035_vm11 = vweird.f32 %v12774_v62 }
 0x598   :  { %v7724_v15 = vpop.eup %7723  ;;  %v4132_v33 = vmul.f32 %v12855_v55, %v12794_v2  ;;  %7735 = vrcp.f32 %v12838_v13  ;;  %v4007_v63 = vsel %vm12861_vm8, %v12730_v3, %v4003_v41  ;;  %v4022_v39 = vsel %vm12873_vm5, %v12738_v18, %v4018_v58  ;;  %vm12917_vm10 = vmor %vm4034_vm13, %vm4035_vm11 }
 0x599   :  { %v12881_v46 = vpop.eup %7725  ;;  %v4033_v9 = vadd.f32 %v12774_v62, %v4032_v60  ;;  %v4118_v45 = vsub.f32 1.0, %v4117_v22  ;;  %7737 = vtanh.f32 %v4050_v51  ;;  %v12892_v27 = vadd.f32 1.0, %v7718_v37 }
 0x59a   :  { %v12890_v1 = vpop.eup %7727  ;;  %v4133_v57 = vsub.f32 1.0, %v4132_v33  ;;  %v4147_v44 = vmul.f32 %v12881_v46, %v12816_v53  ;;  %vm12898_vm0 = vcmp.eq.f32.partialorder %v4038_v42, 8.507059e+37  ;;  %v4041_v17 = vor.u32 1.1754944e-38, %v4040_v35 }
 0x59b   :  { %v12896_v25 = vpop.eup %7729  ;;  %7739 = vtanh.f32 %v4051_v12  ;;  %v12902_v18 = vadd.f32 1.0, %v7724_v15  ;;  %v12907_v37 = vsel %vm12826_vm14, %v12799_v40, %v4007_v63  ;;  %v12911_v41 = vsel %vm12850_vm15, %v4026_v24, %v4022_v39 }
 0x59c   :  { %v7732_v16 = vpop.eup %7731  ;;  %v4125_v58 = vand.u32 2147483647, %v12785_v6  ;;  %v4127_v60 = vand.u32 2147483648, %v12785_v6  ;;  %v4037_v40 = vsel %vm12917_vm10, %v12774_v62, %v4033_v9  ;;  %v4119_v26 = vmul.f32 %v12844_v19, %v4118_v45 }
 0x59d   :  { %v12923_v51 = vpop.eup %7733  ;;  %vm4121_vm6 = vweird.f32 %v12785_v6  ;;  %v4162_v8 = vmul.f32 %v12890_v1, %v12822_v49  ;;  %v4134_v4 = vmul.f32 %v12855_v55, %v4133_v57  ;;  %vm4136_vm7 = vweird.f32 %v12794_v2 }
 0x59e   :  { %v12932_v54 = vpop.eup %7735  ;;  %v4148_v35 = vsub.f32 1.0, %v4147_v44  ;;  %7741 = vrcp.f32 %v12892_v27  ;;  %v12937_v12 = vadd.f32 1.0, %v7732_v16  ;;  %v4140_v62 = vand.u32 2147483647, %v12794_v2 }
 0x59f   :  { %v4142_v22 = vand.u32 2147483648, %v12794_v2  ;;  %7743 = vrcp.f32 %v12902_v18  ;;  %v12942_v15 = vpop.eup %7737  ;;  %v12946_v30 = vsel %vm12898_vm0, %v4041_v17, %v4037_v40  ;;  %vm12948_vm14 = vcmp.eq.f32.partialorder %v4125_v58, 8.507059e+37 }
 0x5a0   :  { %16852 = vst [vmem:[#allocation42_spill] sm:$0xff] %v12942_v15  ;;  %v4128_v33 = vor.u32 1.1754944e-38, %v4127_v60  ;;  %v4157_v63 = vand.u32 2147483648, %v12816_v53  ;;  %v4120_v9 = vadd.f32 %v12844_v19, %v4119_v26  ;;  %vm4122_vm13 = vweird.f32 %v12844_v19 }
 0x5a1   :  { %v12953_v39 = vpop.eup %7739  ;;  %v4163_v45 = vsub.f32 1.0, %v4162_v8  ;;  %v4177_v57 = vmul.f32 %v12932_v54, %v12838_v13  ;;  %v4135_v44 = vadd.f32 %v12855_v55, %v4134_v4  ;;  %vm4137_vm12 = vweird.f32 %v12855_v55  ;;  %vm12973_vm8 = vmor %vm4121_vm6, %vm4122_vm13 }
 0x5a2   :  { %16855 = vst [vmem:[#allocation45_spill] sm:$0xff] %v12953_v39  ;;  %v4149_v3 = vmul.f32 %v12881_v46, %v4148_v35  ;;  %v4172_v17 = vand.u32 2147483648, %v12822_v49  ;;  %vm12963_vm9 = vcmp.eq.f32.partialorder %v4140_v62, 8.507059e+37  ;;  %v4143_v42 = vor.u32 1.1754944e-38, %v4142_v22  ;;  %vm12990_vm5 = vmor %vm4136_vm7, %vm4137_vm12 }
 0x5a3   :  { %vm4151_vm15 = vweird.f32 %v12816_v53  ;;  %7745 = vrcp.f32 %v12937_v12  ;;  %v4155_v40 = vand.u32 2147483647, %v12816_v53  ;;  %v4170_v26 = vand.u32 2147483647, %v12822_v49 }
 0x5a4   :  { %v12969_v58 = vpop.eup %7741  ;;  %v4187_v8 = vand.u32 2147483648, %v12838_v13  ;;  %v4202_v4 = vand.u32 2147483648, %v12892_v27  ;;  %v4124_v62 = vsel %vm12973_vm8, %v12844_v19, %v4120_v9  ;;  %v12994_v22 = vor.u32 1.1754944e-38, %v4157_v63 }
 0x5a5   :  { %v12981_v35 = vpop.eup %7743  ;;  %v4164_v39 = vmul.f32 %v12890_v1, %v4163_v45  ;;  %v4178_v38 = vsub.f32 1.0, %v4177_v57  ;;  %v4139_v15 = vsel %vm12990_vm5, %v12855_v55, %v4135_v44  ;;  %v13001_v60 = vadd.f32 %v12881_v46, %v4149_v3 }
 0x5a6   :  { %vm4152_vm11 = vweird.f32 %v12881_v46  ;;  %v13004_v19 = vor.u32 1.1754944e-38, %v4172_v17  ;;  %vm4167_vm0 = vweird.f32 %v12890_v1  ;;  %v4185_v2 = vand.u32 2147483647, %v12838_v13 }
 0x5a7   :  { %v4192_v63 = vmul.f32 %v12969_v58, %v12892_v27  ;;  %v4200_v9 = vand.u32 2147483647, %v12892_v27  ;;  %v13013_v45 = vsel %vm12948_vm14, %v4128_v33, %v4124_v62  ;;  %vm4166_vm10 = vweird.f32 %v12822_v49  ;;  %vm13030_vm6 = vmor %vm4151_vm15, %vm4152_vm11 }
 0x5a8   :  { %v13016_v55 = vor.u32 1.1754944e-38, %v4187_v8  ;;  %v13018_v57 = vor.u32 1.1754944e-38, %v4202_v4  ;;  %v4207_v44 = vmul.f32 %v12981_v35, %v12902_v18  ;;  %v13026_v17 = vsel %vm12963_vm9, %v4143_v42, %v4139_v15  ;;  %vm13107_vm11 = vmor %vm4166_vm10, %vm4167_vm0 }
 0x5a9   :  { %v13022_v3 = vpop.eup %7745  ;;  %v4165_v33 = vadd.f32 %v12890_v1, %v4164_v39  ;;  %v4179_v8 = vmul.f32 %v12932_v54, %v4178_v38  ;;  %v4236_v4 = vmul.f32 %v12671_v20, %v12121_v48  ;;  %v4154_v16 = vsel %vm13030_vm6, %v12881_v46, %v13001_v60 }
 0x5aa   :  { %vm13042_vm7 = vcmp.eq.f32.partialorder %v4155_v40, 8.507059e+37  ;;  %vm4182_vm14 = vweird.f32 %v12932_v54  ;;  %v4222_v53 = vmul.f32 %v13022_v3, %v12937_v12  ;;  %v4237_v38 = vmul.f32 %v12717_v21, %v12128_v23 }
 0x5ab   :  { %v4238_v48 = vmul.f32 %v12755_v43, %v12130_v56  ;;  %v4193_v20 = vsub.f32 1.0, %v4192_v63  ;;  %vm4197_vm13 = vweird.f32 %v12969_v58  ;;  %v4215_v46 = vand.u32 2147483647, %v12902_v18 }
 0x5ac   :  { %v4239_v39 = vmul.f32 %v12782_v7, %v12137_v34  ;;  %v4244_v42 = vmul.f32 %v12483_v50, %v12505_v5  ;;  %vm13059_vm12 = vcmp.eq.f32.partialorder %v4170_v26, 8.507059e+37  ;;  %vm4181_vm9 = vweird.f32 %v12838_v13  ;;  %v16875_v26 = vld [vmem:[#allocation45_spill] sm:$0xff] }
 0x5ad   :  { %v4208_v23 = vsub.f32 1.0, %v4207_v44  ;;  %v4240_v56 = vmul.f32 %v12848_v14, %v12146_v11  ;;  %v4245_v21 = vmul.f32 %v12491_v29, %v12509_v28  ;;  %v4246_v43 = vmul.f32 %v12824_v10, %v12517_v59  ;;  %vm13146_vm10 = vmor %vm4181_vm9, %vm4182_vm14 }
 0x5ae   :  { %vm4196_vm15 = vweird.f32 %v12892_v27  ;;  %v4223_v34 = vsub.f32 1.0, %v4222_v53  ;;  %v4241_v50 = vmul.f32 %v12907_v37, %v12160_v31  ;;  %v4247_v5 = vmul.f32 %v12834_v61, %v12552_v52  ;;  %v16868_v31 = vld [vmem:[#allocation43_spill] sm:$0xff] }
 0x5af   :  { %v13075_v7 = vadd.f32 %v4244_v42, %v4236_v4  ;;  %vm4211_vm8 = vweird.f32 %v12902_v18  ;;  %v4242_v11 = vmul.f32 %v12911_v41, %v12171_v32  ;;  %v4248_v29 = vmul.f32 %v12896_v25, %v12605_v0  ;;  %v16871_v0 = vld [vmem:[#allocation42_spill] sm:$0xff] }
 0x5b0   :  { %v13082_v28 = vadd.f32 %v4245_v21, %v4237_v38  ;;  %v13084_v59 = vadd.f32 %v4246_v43, %v4238_v48  ;;  %v4194_v10 = vmul.f32 %v12969_v58, %v4193_v20  ;;  %v4243_v14 = vmul.f32 %v12946_v30, %v16868_v31  ;;  %v16874_v30 = vld [vmem:[#allocation44_spill] sm:$0xff] }
 0x5b1   :  { %v4249_v52 = vmul.f32 %v12923_v51, %v12658_v47  ;;  %v13091_v61 = vadd.f32 %v4247_v5, %v4239_v39  ;;  %vm13093_vm5 = vcmp.eq.f32.partialorder %v4185_v2, 8.507059e+37  ;;  %v4209_v32 = vmul.f32 %v12981_v35, %v4208_v23 }
 0x5b2   :  { %v4250_v25 = vmul.f32 %v16871_v0, %v12699_v36  ;;  %v13100_v41 = vadd.f32 %v4248_v29, %v4240_v56  ;;  %7747 = vtanh.f32 %v13075_v7  ;;  %v4224_v51 = vmul.f32 %v13022_v3, %v4223_v34 }
 0x5b3   :  { %v4251_v62 = vmul.f32 %v16875_v26, %v16874_v30  ;;  %v13114_v6 = vadd.f32 %v4249_v52, %v4241_v50  ;;  %7749 = vtanh.f32 %v13082_v28  ;;  %v4169_v36 = vsel %vm13107_vm11, %v12890_v1, %v4165_v33 }
 0x5b4   :  { %v4180_v60 = vadd.f32 %v12932_v54, %v4179_v8  ;;  %vm13121_vm6 = vcmp.eq.f32.partialorder %v4200_v9, 8.507059e+37  ;;  %v13125_v2 = vadd.f32 %v4250_v25, %v4242_v11  ;;  %7751 = vtanh.f32 %v13084_v59 }
 0x5b5   :  { %v4159_v63 = vsel %vm13042_vm7, %v12994_v22, %v4154_v16  ;;  %v4217_v44 = vand.u32 2147483648, %v12902_v18  ;;  %v13132_v24 = vadd.f32 %v4251_v62, %v4243_v14  ;;  %7753 = vtanh.f32 %v13091_v61 }
 0x5b6   :  { %v4195_v1 = vadd.f32 %v12969_v58, %v4194_v10  ;;  %v4210_v9 = vadd.f32 %v12981_v35, %v4209_v32  ;;  %vm4212_vm0 = vweird.f32 %v12981_v35  ;;  %7755 = vtanh.f32 %v13100_v41 }
 0x5b7   :  { %16878 = vst [vmem:[#allocation43_spill] sm:$0xff] %v13132_v24  ;;  %v4174_v33 = vsel %vm13059_vm12, %v13004_v19, %v4169_v36  ;;  %v4225_v8 = vadd.f32 %v13022_v3, %v4224_v51  ;;  %vm4227_vm7 = vweird.f32 %v13022_v3  ;;  %7757 = vtanh.f32 %v13114_v6  ;;  %vm13160_vm12 = vmor %vm4196_vm15, %vm4197_vm13 }
 0x5b8   :  { %v7748_v4 = vpop.eup %7747  ;;  %v4184_v16 = vsel %vm13146_vm10, %v12932_v54, %v4180_v60  ;;  %v4230_v19 = vand.u32 2147483647, %v12937_v12  ;;  %v4232_v15 = vand.u32 2147483648, %v12937_v12  ;;  %7759 = vtanh.f32 %v13125_v2  ;;  %vm13169_vm14 = vmor %vm4211_vm8, %vm4212_vm0  ;;  %v16892_v54 = vld [vmem:[#allocation13_spill] sm:$0xff] }
 0x5b9   :  { %v7750_v53 = vpop.eup %7749  ;;  %vm13173_vm9 = vcmp.eq.f32.partialorder %v4215_v46, 8.507059e+37  ;;  %vm4226_vm13 = vweird.f32 %v12937_v12  ;;  %7761 = vtanh.f32 %v13132_v24  ;;  %v4268_v27 = vmul.f32 %v7748_v4, %v13013_v45  ;;  %v16898_v46 = vld [vmem:[#allocation14_spill] sm:$0xff] }
 0x5ba   :  { %v7752_v48 = vpop.eup %7751  ;;  %v4199_v20 = vsel %vm13160_vm12, %v12969_v58, %v4195_v1  ;;  %v4214_v18 = vsel %vm13169_vm14, %v12981_v35, %v4210_v9  ;;  %v4218_v39 = vor.u32 1.1754944e-38, %v4217_v44  ;;  %vm13188_vm15 = vmor %vm4226_vm13, %vm4227_vm7  ;;  %v4269_v12 = vmul.f32 %v7750_v53, %v13026_v17 }
 0x5bb   :  { %v7754_v42 = vpop.eup %7753  ;;  %v4189_v45 = vsel %vm13093_vm5, %v13016_v55, %v4184_v16  ;;  %v4229_v58 = vsel %vm13188_vm15, %v13022_v3, %v4225_v8  ;;  %v4270_v40 = vmul.f32 %v7752_v48, %v4159_v63  ;;  %4276 = vst [vmem:[#allocation3 + $0x4] sm:$0x1] %v4268_v27  ;;  %v4300_v35 = vpack.c.bf16 %v4268_v27, %v4268_v27  ;;  %v16893_v27 = vld [vmem:[#allocation12_spill] sm:$0xff]  ;;  %v16894_v48 = vld [vmem:[#allocation10_spill] sm:$0xff] }
 0x5bc   :  { %v7756_v23 = vpop.eup %7755  ;;  %vm4231_vm8 = vcmp.eq.f32.partialorder %v4230_v19, 8.507059e+37  ;;  %v4233_v56 = vor.u32 1.1754944e-38, %v4232_v15  ;;  %v4271_v21 = vmul.f32 %v7754_v42, %v4174_v33  ;;  %4277 = vst [vmem:[#allocation3 + $0xc] sm:$0x1] %v4269_v12  ;;  %v4301_v43 = vpack.c.bf16 %v4269_v12, %v4269_v12  ;;  %v16899_v12 = vld [vmem:[#allocation15_spill] sm:$0xff]  ;;  %v16900_v42 = vld [vmem:[#allocation21_spill] sm:$0xff] }
 0x5bd   :  { %v7758_v34 = vpop.eup %7757  ;;  %v4204_v17 = vsel %vm13121_vm6, %v13018_v57, %v4199_v20  ;;  %v4219_v55 = vsel %vm13173_vm9, %v4218_v39, %v4214_v18  ;;  %v4272_v50 = vmul.f32 %v7756_v23, %v4189_v45  ;;  %4278 = vst [vmem:[#allocation3 + $0x14] sm:$0x1] %v4270_v40  ;;  %v4302_v3 = vpack.c.bf16 %v4270_v40, %v4270_v40  ;;  %v16895_v20 = vld [vmem:[#allocation11_spill] sm:$0xff]  ;;  %v16896_v18 = vld [vmem:[#allocation17_spill] sm:$0xff]  ;;  %v16897_v39 = vld [vmem:[#allocation16_spill] sm:$0xff] }
 0x5be   :  { %v7760_v5 = vpop.eup %7759  ;;  %v4234_v11 = vsel %vm4231_vm8, %v4233_v56, %v4229_v58  ;;  %v4273_v29 = vmul.f32 %v7758_v34, %v4204_v17  ;;  %4279 = vst [vmem:[#allocation3 + $0x1c] sm:$0x1] %v4271_v21  ;;  %v4303_v10 = vpack.c.bf16 %v4271_v21, %v4271_v21  ;;  %v4317_v31 = vunpack.c.l.b16 %v4301_v43  ;;  %v16901_v45 = vld [vmem:[#allocation20_spill] sm:$0xff]  ;;  %v16902_v58 = vld [vmem:[#allocation18_spill] sm:$0xff]  ;;  %v16903_v40 = vld [vmem:[#allocation19_spill] sm:$0xff] }
 0x5bf   :  { %v7762_v14 = vpop.eup %7761  ;;  %v4274_v52 = vmul.f32 %v7760_v5, %v4219_v55  ;;  %4280 = vst [vmem:[#allocation3 + $0x24] sm:$0x1] %v4272_v50  ;;  %v4304_v37 = vpack.c.bf16 %v4272_v50, %v4272_v50  ;;  %v4316_v32 = vunpack.c.l.b16 %v4300_v35  ;;  %v4318_v0 = vunpack.c.l.b16 %v4302_v3  ;;  %v16904_v35 = vld [vmem:[#allocation25_spill] sm:$0xff]  ;;  %v16905_v23 = vld [vmem:[#allocation24_spill] sm:$0xff]  ;;  %v16906_v56 = vld [vmem:[#allocation22_spill] sm:$0xff] }
 0x5c0   :  { %v4275_v25 = vmul.f32 %v7762_v14, %v4234_v11  ;;  %4281 = vst [vmem:[#allocation3 + $0x2c] sm:$0x1] %v4273_v29  ;;  %v4305_v57 = vpack.c.bf16 %v4273_v29, %v4273_v29  ;;  %v4319_v47 = vunpack.c.l.b16 %v4303_v10  ;;  %v4324_v51 = vrot.slane %v4317_v31, 7  ;;  %v16907_v21 = vld [vmem:[#allocation23_spill] sm:$0xff]  ;;  %v16908_v43 = vld [vmem:[#allocation29_spill] sm:$0xff]  ;;  %v16909_v34 = vld [vmem:[#allocation28_spill] sm:$0xff] }
 0x5c1   :  { %4282 = vst [vmem:[#allocation3 + $0x34] sm:$0x1] %v4274_v52  ;;  %v4306_v30 = vpack.c.bf16 %v4274_v52, %v4274_v52  ;;  %v4320_v26 = vunpack.c.l.b16 %v4304_v37  ;;  %v4326_v62 = vrot.slane %v4318_v0, 6  ;;  %vm16889_vm5 = vcmask 1045509   ;;  %v16910_v17 = vld [vmem:[#allocation26_spill] sm:$0xff]  ;;  %v16911_v55 = vld [vmem:[#allocation27_spill] sm:$0xff] }
 0x5c2   :  { %4283 = vst [vmem:[#allocation3 + $0x3c] sm:$0x1] %v4275_v25  ;;  %v4307_v36 = vpack.c.bf16 %v4275_v25, %v4275_v25  ;;  %v4321_v60 = vunpack.c.l.b16 %v4305_v57  ;;  %v4325_v49 = vsel %vm723_vm2, %v4324_v51, %v4316_v32  ;;  %v4328_v63 = vrot.slane %v4319_v47, 5  ;;  %v16912_v50 = vld [vmem:[#allocation33_spill] sm:$0xff]  ;;  %v16913_v3 = vld [vmem:[#allocation32_spill] sm:$0xff]  ;;  %v16914_v5 = vld [vmem:[#allocation30_spill] sm:$0xff] }
 0x5c3   :  { %v4322_v44 = vunpack.c.l.b16 %v4306_v30  ;;  %v4327_v1 = vsel %vm719_vm1, %v4326_v62, %v4325_v49  ;;  %v4330_v9 = vrot.slane %v4320_v26, 4  ;;  %vm16890_vm11 = vcmask 1046534   ;;  %v16915_v11 = vld [vmem:[#allocation31_spill] sm:$0xff]  ;;  %v16916_v29 = vld [vmem:[#allocation37_spill] sm:$0xff]  ;;  %v16917_v10 = vld [vmem:[#allocation36_spill] sm:$0xff] }
 0x5c4   :  { %v4323_v33 = vunpack.c.l.b16 %v4307_v36  ;;  %v4329_v22 = vsel %vm725_vm3, %v4328_v63, %v4327_v1  ;;  %v4332_v8 = vrot.slane %v4321_v60, 3  ;;  %vm16891_vm6 = vcmask 1047559   ;;  %v16918_v31 = vld [vmem:[#allocation34_spill] sm:$0xff]  ;;  %v16919_v14 = vld [vmem:[#allocation35_spill] sm:$0xff]  ;;  %v16920_v52 = vld [vmem:[#allocation41_spill] sm:$0xff] }
 0x5c5   :  { %v4331_v4 = vsel %vm731_vm4, %v4330_v9, %v4329_v22  ;;  %v4334_v16 = vrot.slane %v4322_v44, 2  ;;  %v16921_v37 = vld [vmem:[#allocation40_spill] sm:$0xff]  ;;  %v16922_v32 = vld [vmem:[#allocation38_spill] sm:$0xff]  ;;  %v16923_v0 = vld [vmem:[#allocation39_spill] sm:$0xff]  ;;  %vm16924_vm0 = vcmask 1040384   ;;  %vm16927_vm12 = vcmask 1046528  }
 0x5c6   :  { %v4333_v13 = vsel %vm16889_vm5, %v4332_v8, %v4331_v4  ;;  %v4336_v19 = vrot.slane %v4323_v33, 1  ;;  %vm16925_vm10 = vmmov %vm16889_vm5  ;;  %vm16929_vm9 = vcmask 1041408   ;;  %vm16930_vm13 = vcmask 1042433  }
 0x5c7   :  { %v4335_v15 = vsel %vm16890_vm11, %v4334_v16, %v4333_v13  ;;  %vm16926_vm7 = vmmov %vm16890_vm11  ;;  %vm16931_vm15 = vcmask 1043458   ;;  %vm16932_vm8 = vcmask 1044483   ;;  %vm16934_vm11 = vcmask 1045508  }
 0x5c8   :  { %v4337_v53 = vsel %vm16891_vm6, %v4336_v19, %v4335_v15  ;;  %vm16928_vm14 = vmmov %vm16889_vm5 }
 0x5c9   :  { %v4338_v38 = vpack.c.b16 %v4337_v53, %v4337_v53  ;;  %vm16933_vm5 = vmmov %vm16926_vm7 }
 0x5ca   :  { %vm16935_vm6 = vmmov %vm16927_vm12 }
 0x5cb   :  { %4348 = vmatmul.bf16.vlgmr.msra.gmra.mxu0 %v4338_v38  ;;  %4361 = vmatmul.bf16.vlgmr.msra.gmra.mxu1 %v4338_v38 }
 0x5cc   :  { %4374 = vmatmul.bf16.vlgmr.msra.gmra.mxu2 %v4338_v38  ;;  %4387 = vmatmul.bf16.vlgmr.msra.gmra.mxu3 %v4338_v38 }
 0x5cd   :  { %5800 = vmatpush.bf16.msra.mxu0 %v16892_v54  ;;  %5813 = vmatpush.bf16.msra.mxu1 %v16893_v27 }
 0x5ce   :  { %5826 = vmatpush.bf16.msra.mxu2 %v16894_v48  ;;  %5839 = vmatpush.bf16.msra.mxu3 %v16895_v20 }
 0x5d1   :  { %5801 = vmatpush.bf16.msra.mxu0 %v16896_v18  ;;  %5814 = vmatpush.bf16.msra.mxu1 %v16897_v39 }
 0x5d2   :  { %5827 = vmatpush.bf16.msra.mxu2 %v16898_v46  ;;  %5840 = vmatpush.bf16.msra.mxu3 %v16899_v12 }
 0x5d5   :  { %5802 = vmatpush.bf16.msra.mxu0 %v16900_v42  ;;  %5815 = vmatpush.bf16.msra.mxu1 %v16901_v45  ;;  %v4285_v45 = vld [vmem:[#allocation2 + $0x5] ss:$8 sm:$0xf] }
 0x5d6   :  { %5828 = vmatpush.bf16.msra.mxu2 %v16902_v58  ;;  %5841 = vmatpush.bf16.msra.mxu3 %v16903_v40  ;;  %v4287_v58 = vld [vmem:[#allocation2 + $0x25] ss:$8 sm:$0xf] }
 0x5d9   :  { %5803 = vmatpush.bf16.msra.mxu0 %v16904_v35  ;;  %5816 = vmatpush.bf16.msra.mxu1 %v16905_v23 }
 0x5da   :  { %5829 = vmatpush.bf16.msra.mxu2 %v16906_v56  ;;  %5842 = vmatpush.bf16.msra.mxu3 %v16907_v21  ;;  %v4289_v56 = vld [vmem:[#allocation2 + $0x45] ss:$8 sm:$0xf] }
 0x5db   :  { %v4291_v21 = vld [vmem:[#allocation2 + $0x65] ss:$8 sm:$0xf] }
 0x5dd   :  { %5804 = vmatpush.bf16.msra.mxu0 %v16908_v43  ;;  %5817 = vmatpush.bf16.msra.mxu1 %v16909_v34 }
 0x5de   :  { %5830 = vmatpush.bf16.msra.mxu2 %v16910_v17  ;;  %5843 = vmatpush.bf16.msra.mxu3 %v16911_v55 }
 0x5e1   :  { %5805 = vmatpush.bf16.msra.mxu0 %v16912_v50  ;;  %5818 = vmatpush.bf16.msra.mxu1 %v16913_v3 }
 0x5e2   :  { %5831 = vmatpush.bf16.msra.mxu2 %v16914_v5  ;;  %5844 = vmatpush.bf16.msra.mxu3 %v16915_v11 }
 0x5e5   :  { %5806 = vmatpush.bf16.msra.mxu0 %v16916_v29  ;;  %5819 = vmatpush.bf16.msra.mxu1 %v16917_v10 }
 0x5e6   :  { %5832 = vmatpush.bf16.msra.mxu2 %v16918_v31  ;;  %5845 = vmatpush.bf16.msra.mxu3 %v16919_v14  ;;  %v4293_v14 = vld [vmem:[#allocation2 + $0x85] ss:$8 sm:$0xf] }
 0x5e9   :  { %5807 = vmatpush.bf16.msra.mxu0 %v16920_v52  ;;  %5820 = vmatpush.bf16.msra.mxu1 %v16921_v37 }
 0x5ea   :  { %5833 = vmatpush.bf16.msra.mxu2 %v16922_v32  ;;  %5846 = vmatpush.bf16.msra.mxu3 %v16923_v0 }
 0x648   :  { %v4349_v25 = vpop.f32.mrf.mxu0  ;;  %v4362_v57 = vpop.f32.mrf.mxu1 }
 0x649   :  { %v4396_v47 = vrot.slane %v4362_v57, 7 }
 0x64b   :  { %v4399_v51 = vsel %vm16924_vm0, %v4349_v25, %v4396_v47  ;;  %v4402_v30 = vsel %vm723_vm2, %v4349_v25, %v4396_v47  ;;  %v4406_v26 = vsel %vm719_vm1, %v4349_v25, %v4396_v47  ;;  %v4410_v62 = vsel %vm725_vm3, %v4349_v25, %v4396_v47 }
 0x64c   :  { %v4414_v36 = vsel %vm731_vm4, %v4349_v25, %v4396_v47  ;;  %v4418_v60 = vsel %vm16925_vm10, %v4349_v25, %v4396_v47  ;;  %v4422_v49 = vsel %vm16926_vm7, %v4349_v25, %v4396_v47  ;;  %v4426_v63 = vsel %vm16927_vm12, %v4396_v47, %v4349_v25  ;;  %v4295_v25 = vld [vmem:[#allocation2 + $0xa5] ss:$8 sm:$0xf] }
 0x64d   :  { %vm16936_vm10 = vcmask 1046533   ;;  %vm16937_vm7 = vcmask 1045504   ;;  %vm16938_vm12 = vcmask 1046529  }
 0x64f   :  { %v4375_v44 = vpop.f32.mrf.mxu2  ;;  %v4388_v1 = vpop.f32.mrf.mxu3 }
 0x650   :  { %v4397_v9 = vrot.slane %v4375_v44, 6  ;;  %v4398_v33 = vrot.slane %v4388_v1, 5  ;;  %v4351_v22 = vpop.f32.mrf.mxu0  ;;  %v4364_v8 = vpop.f32.mrf.mxu1 }
 0x652   :  { %v4400_v4 = vsel %vm719_vm1, %v4397_v9, %v4398_v33  ;;  %v4403_v16 = vsel %vm725_vm3, %v4397_v9, %v4398_v33  ;;  %v4407_v13 = vsel %vm731_vm4, %v4397_v9, %v4398_v33  ;;  %v4411_v19 = vsel %vm16928_vm14, %v4397_v9, %v4398_v33 }
 0x653   :  { %v4401_v15 = vsel %vm16929_vm9, %v4399_v51, %v4400_v4  ;;  %v4404_v53 = vsel %vm16930_vm13, %v4402_v30, %v4403_v16  ;;  %v4408_v38 = vsel %vm16931_vm15, %v4406_v26, %v4407_v13  ;;  %v4412_v54 = vsel %vm16932_vm8, %v4410_v62, %v4411_v19  ;;  %v4299_v13 = vld [vmem:[#allocation2 + $0xe5] ss:$8 sm:$0xf] }
 0x654   :  { %v4405_v27 = vrot.slane %v4404_v53, 1  ;;  %v4409_v48 = vrot.slane %v4408_v38, 2  ;;  %v4413_v20 = vrot.slane %v4412_v54, 3  ;;  %v4415_v18 = vsel %vm16933_vm5, %v4397_v9, %v4398_v33 }
 0x655   :  { %v4416_v39 = vsel %vm16934_vm11, %v4414_v36, %v4415_v18  ;;  %v4419_v46 = vsel %vm16935_vm6, %v4398_v33, %v4397_v9  ;;  %v4423_v12 = vsel %vm16924_vm0, %v4397_v9, %v4398_v33  ;;  %v4427_v42 = vsel %vm723_vm2, %v4397_v9, %v4398_v33 }
 0x656   :  { %v4420_v40 = vsel %vm16936_vm10, %v4418_v60, %v4419_v46  ;;  %v4424_v35 = vsel %vm16937_vm7, %v4423_v12, %v4422_v49  ;;  %v4428_v23 = vsel %vm16938_vm12, %v4427_v42, %v4426_v63  ;;  %v13267_v43 = vadd.f32 %v4401_v15, %v4285_v45  ;;  %v4297_v63 = vld [vmem:[#allocation2 + $0xc5] ss:$8 sm:$0xf] }
 0x657   :  { %v4377_v34 = vpop.f32.mrf.mxu2  ;;  %v4390_v17 = vpop.f32.mrf.mxu3  ;;  %v13269_v55 = vadd.f32 %v4405_v27, %v4287_v58  ;;  %v13271_v50 = vadd.f32 %v4409_v48, %v4289_v56  ;;  %v13273_v3 = vadd.f32 %v4413_v20, %v4291_v21  ;;  %v4417_v11 = vrot.slane %v4416_v39, 4 }
 0x658   :  { %v6956_v5 = vmul.f32 -1.442695, %v13267_v43  ;;  %v4421_v37 = vrot.slane %v4420_v40, 5  ;;  %v4425_v51 = vrot.slane %v4424_v35, 6  ;;  %v4606_v36 = vrot.slane %v13267_v43, 1 }
 0x659   :  { %v6957_v29 = vmul.f32 -1.442695, %v13269_v55  ;;  %v6958_v10 = vmul.f32 -1.442695, %v13271_v50  ;;  %v6959_v31 = vmul.f32 -1.442695, %v13273_v3  ;;  %v13279_v52 = vadd.f32 %v4417_v11, %v4293_v14 }
 0x65a   :  { %7763 = vpow2.f32 %v6956_v5  ;;  %v13282_v30 = vadd.f32 %v4421_v37, %v4295_v25  ;;  %v4607_v44 = vrot.slane %v13269_v55, 1  ;;  %v13292_v1 = vadd.f32 %v4425_v51, %v4297_v63 }
 0x65b   :  { %7765 = vpow2.f32 %v6957_v29  ;;  %v6960_v57 = vmul.f32 -1.442695, %v13279_v52  ;;  %v4429_v33 = vrot.slane %v4428_v23, 7  ;;  %v6964_v22 = vmul.f32 -1.442695, %v4606_v36 }
 0x65c   :  { %7767 = vpow2.f32 %v6958_v10  ;;  %v6961_v9 = vmul.f32 -1.442695, %v13282_v30  ;;  %v4608_v4 = vrot.slane %v13271_v50, 1  ;;  %v6965_v16 = vmul.f32 -1.442695, %v4607_v44 }
 0x65d   :  { %7769 = vpow2.f32 %v6959_v31  ;;  %v6962_v19 = vmul.f32 -1.442695, %v13292_v1  ;;  %v4609_v15 = vrot.slane %v13273_v3, 1  ;;  %v13303_v38 = vadd.f32 %v4429_v33, %v4299_v13 }
 0x65e   :  { %7771 = vpow2.f32 %v6960_v57  ;;  %v4610_v27 = vrot.slane %v13279_v52, 1  ;;  %v4611_v48 = vrot.slane %v13282_v30, 1  ;;  %v4612_v18 = vrot.slane %v13292_v1, 1 }
 0x65f   :  { %v6966_v39 = vmul.f32 -1.442695, %v4608_v4  ;;  %v6967_v12 = vmul.f32 -1.442695, %v4609_v15  ;;  %v4613_v45 = vrot.slane %v13303_v38, 1  ;;  %v4798_v58 = vrot.slane %v13267_v43, 3 }
 0x660   :  { %v7764_v32 = vpop.eup %7763  ;;  %v4799_v40 = vrot.slane %v13269_v55, 3  ;;  %v6968_v23 = vmul.f32 -1.442695, %v4610_v27  ;;  %v6969_v56 = vmul.f32 -1.442695, %v4611_v48  ;;  %v4774_v11 = vrot.slane %v13267_v43, 2 }
 0x661   :  { %v7766_v0 = vpop.eup %7765  ;;  %v13284_v26 = vadd.f32 1.0, %v7764_v32  ;;  %v6970_v5 = vmul.f32 -1.442695, %v4612_v18  ;;  %v4775_v31 = vrot.slane %v13269_v55, 2  ;;  %v6963_v37 = vmul.f32 -1.442695, %v13303_v38 }
 0x662   :  { %v7768_v47 = vpop.eup %7767  ;;  %v13286_v62 = vadd.f32 1.0, %v7766_v0  ;;  %v13333_v0 = vmul.f32 -1.442695, %v4798_v58  ;;  %v13335_v25 = vmul.f32 -1.442695, %v4799_v40 }
 0x663   :  { %v13289_v60 = vadd.f32 1.0, %v7768_v47  ;;  %v7770_v49 = vpop.eup %7769  ;;  %7773 = vrcp.f32 %v13284_v26  ;;  %v4489_v43 = vand.u32 2147483648, %v13284_v26  ;;  %vm4483_vm14 = vweird.f32 %v13284_v26 }
 0x664   :  { %7775 = vrcp.f32 %v13286_v62  ;;  %v13297_v8 = vadd.f32 1.0, %v7770_v49  ;;  %v7772_v53 = vpop.eup %7771  ;;  %vm4498_vm9 = vweird.f32 %v13286_v62 }
 0x665   :  { %7777 = vrcp.f32 %v13289_v60  ;;  %v13315_v42 = vadd.f32 1.0, %v7772_v53  ;;  %v13351_v4 = vor.u32 1.1754944e-38, %v4489_v43  ;;  %v4504_v53 = vand.u32 2147483648, %v13286_v62 }
 0x666   :  { %7779 = vpow2.f32 %v6961_v9  ;;  %v4487_v9 = vand.u32 2147483647, %v13284_v26  ;;  %v4517_v18 = vand.u32 2147483647, %v13289_v60  ;;  %vm4513_vm0 = vweird.f32 %v13289_v60 }
 0x667   :  { %7781 = vpow2.f32 %v6964_v22 }
 0x668   :  { %7783 = vrcp.f32 %v13297_v8  ;;  %vm13367_vm15 = vcmp.eq.f32.partialorder %v4487_v9, 8.507059e+37  ;;  %vm13418_vm7 = vcmp.eq.f32.partialorder %v4517_v18, 8.507059e+37 }
 0x669   :  { %v13305_v54 = vpop.eup %7773  ;;  %7785 = vpow2.f32 %v6965_v16  ;;  %v4502_v16 = vand.u32 2147483647, %v13286_v62 }
 0x66a   :  { %v13310_v20 = vpop.eup %7775  ;;  %7787 = vpow2.f32 %v6962_v19  ;;  %v4479_v21 = vmul.f32 %v13305_v54, %v13284_v26  ;;  %vm4484_vm13 = vweird.f32 %v13305_v54 }
 0x66b   :  { %v13313_v46 = vpop.eup %7777  ;;  %v4494_v34 = vmul.f32 %v13310_v20, %v13286_v62  ;;  %7789 = vpow2.f32 %v6966_v39  ;;  %vm4499_vm8 = vweird.f32 %v13310_v20  ;;  %vm13398_vm11 = vmor %vm4483_vm14, %vm4484_vm13  ;;  %vm13402_vm6 = vcmp.eq.f32.partialorder %v4502_v16, 8.507059e+37 }
 0x66c   :  { %v7780_v35 = vpop.eup %7779  ;;  %v4509_v29 = vmul.f32 %v13313_v46, %v13289_v60  ;;  %7791 = vpow2.f32 %v6967_v12  ;;  %v4480_v51 = vsub.f32 1.0, %v4479_v21  ;;  %vm4514_vm5 = vweird.f32 %v13313_v46  ;;  %vm13414_vm10 = vmor %vm4498_vm9, %vm4499_vm8 }
 0x66d   :  { %v7782_v17 = vpop.eup %7781  ;;  %7793 = vrcp.f32 %v13315_v42  ;;  %v4495_v36 = vsub.f32 1.0, %v4494_v34  ;;  %v13340_v55 = vadd.f32 1.0, %v7780_v35  ;;  %v4519_v35 = vand.u32 2147483648, %v13289_v60  ;;  %vm13432_vm12 = vmor %vm4513_vm0, %vm4514_vm5 }
 0x66e   :  { %v13327_v10 = vpop.eup %7783  ;;  %7795 = vpow2.f32 %v6968_v23  ;;  %v13338_v47 = vadd.f32 1.0, %v7782_v17  ;;  %v4510_v49 = vsub.f32 1.0, %v4509_v29  ;;  %v4481_v19 = vmul.f32 %v13305_v54, %v4480_v51 }
 0x66f   :  { %v7786_v32 = vpop.eup %7785  ;;  %7797 = vpow2.f32 %v6969_v56  ;;  %v4524_v63 = vmul.f32 %v13327_v10, %v13297_v8  ;;  %v4496_v15 = vmul.f32 %v13310_v20, %v4495_v36  ;;  %v4520_v9 = vor.u32 1.1754944e-38, %v4519_v35 }
 0x670   :  { %v7788_v57 = vpop.eup %7787  ;;  %v13345_v44 = vadd.f32 1.0, %v7786_v32  ;;  %7799 = vpow2.f32 %v6963_v37  ;;  %v4511_v48 = vmul.f32 %v13313_v46, %v4510_v49  ;;  %v4482_v34 = vadd.f32 %v13305_v54, %v4481_v19 }
 0x671   :  { %v7790_v33 = vpop.eup %7789  ;;  %7801 = vpow2.f32 %v6970_v5  ;;  %v13349_v22 = vadd.f32 1.0, %v7788_v57  ;;  %v4525_v39 = vsub.f32 1.0, %v4524_v63  ;;  %v4497_v17 = vadd.f32 %v13310_v20, %v4496_v15 }
 0x672   :  { %v7792_v13 = vpop.eup %7791  ;;  %7803 = vrcp.f32 %v13338_v47  ;;  %v13363_v58 = vadd.f32 1.0, %v7790_v33  ;;  %v4512_v32 = vadd.f32 %v13313_v46, %v4511_v48  ;;  %v4505_v49 = vor.u32 1.1754944e-38, %v4504_v53 }
 0x673   :  { %v13358_v27 = vpop.eup %7793  ;;  %7805 = vrcp.f32 %v13340_v55  ;;  %v13374_v56 = vadd.f32 1.0, %v7792_v13  ;;  %v4486_v60 = vsel %vm13398_vm11, %v13305_v54, %v4482_v34  ;;  %v4501_v62 = vsel %vm13414_vm10, %v13310_v20, %v4497_v17 }
 0x674   :  { %v7796_v12 = vpop.eup %7795  ;;  %7807 = vrcp.f32 %v13345_v44  ;;  %v4539_v5 = vmul.f32 %v13358_v27, %v13315_v42  ;;  %v4532_v13 = vand.u32 2147483647, %v13297_v8  ;;  %v4516_v53 = vsel %vm13432_vm12, %v13313_v46, %v4512_v32 }
 0x675   :  { %v13372_v23 = vpop.eup %7797  ;;  %7809 = vtanh.f32 %v4774_v11  ;;  %v4526_v11 = vmul.f32 %v13327_v10, %v4525_v39  ;;  %vm4529_vm14 = vweird.f32 %v13327_v10  ;;  %v4534_v48 = vand.u32 2147483648, %v13297_v8 }
 0x676   :  { %v7800_v21 = vpop.eup %7799  ;;  %7811 = vtanh.f32 %v4775_v31  ;;  %v13391_v31 = vadd.f32 1.0, %v7796_v12  ;;  %v4540_v19 = vsub.f32 1.0, %v4539_v5  ;;  %v13459_v46 = vsel %vm13367_vm15, %v13351_v4, %v4486_v60 }
 0x677   :  { %v13382_v29 = vpop.eup %7801  ;;  %v13384_v37 = vadd.f32 1.0, %v7800_v21  ;;  %7813 = vrcp.f32 %v13349_v22  ;;  %v4527_v54 = vadd.f32 %v13327_v10, %v4526_v11  ;;  %v13463_v35 = vsel %vm13402_vm6, %v4505_v49, %v4501_v62 }
 0x678   :  { %v13389_v43 = vpop.eup %7803  ;;  %7815 = vrcp.f32 %v13363_v58  ;;  %vm4528_vm9 = vweird.f32 %v13297_v8  ;;  %v13471_v34 = vsel %vm13418_vm7, %v4520_v9, %v4516_v53  ;;  %vm13479_vm15 = vcmp.eq.f32.partialorder %v4532_v13, 8.507059e+37 }
 0x679   :  { %v13407_v36 = vpop.eup %7805  ;;  %7817 = vrcp.f32 %v13374_v56  ;;  %v4655_v39 = vmul.f32 %v13389_v43, %v13338_v47  ;;  %vm13475_vm13 = vmor %vm4528_vm9, %vm4529_vm14  ;;  %v4541_v8 = vmul.f32 %v13358_v27, %v4540_v19  ;;  %v4547_v17 = vand.u32 2147483647, %v13315_v42 }
 0x67a   :  { %v13422_v33 = vpop.eup %7807  ;;  %7819 = vrcp.f32 %v13384_v37  ;;  %v4554_v18 = vmul.f32 %v13407_v36, %v13340_v55  ;;  %v4549_v5 = vand.u32 2147483648, %v13315_v42  ;;  %v4564_v32 = vand.u32 2147483648, %v13340_v55 }
 0x67b   :  { %v13437_v15 = vpop.eup %7809  ;;  %7821 = vrcp.f32 %v13391_v31  ;;  %v4535_v11 = vor.u32 1.1754944e-38, %v4534_v48  ;;  %v4656_v26 = vsub.f32 1.0, %v4655_v39  ;;  %vm4543_vm8 = vweird.f32 %v13315_v42 }
 0x67c   :  { %v13445_v20 = vpop.eup %7811  ;;  %7823 = vpow2.f32 %v13333_v0  ;;  %v4555_v57 = vsub.f32 1.0, %v4554_v18  ;;  %vm4544_vm5 = vweird.f32 %v13358_v27  ;;  %v4670_v63 = vmul.f32 %v13422_v33, %v13345_v44 }
 0x67d   :  { %v13453_v12 = vpop.eup %7813  ;;  %7825 = vpow2.f32 %v13335_v25  ;;  %v4531_v25 = vsel %vm13475_vm13, %v13327_v10, %v4527_v54  ;;  %v6971_v10 = vmul.f32 -1.442695, %v4613_v45  ;;  %v4542_v62 = vadd.f32 %v13358_v27, %v4541_v8  ;;  %vm13528_vm0 = vmor %vm4543_vm8, %vm4544_vm5 }
 0x67e   :  { %v13466_v21 = vpop.eup %7815  ;;  %v4569_v51 = vmul.f32 %v13453_v12, %v13349_v22  ;;  %v13506_v60 = vsel %vm13479_vm15, %v4535_v11, %v4531_v25  ;;  %vm4558_vm11 = vweird.f32 %v13340_v55  ;;  %v4562_v16 = vand.u32 2147483647, %v13340_v55 }
 0x67f   :  { %v13484_v40 = vpop.eup %7817  ;;  %vm13513_vm6 = vcmp.eq.f32.partialorder %v4547_v17, 8.507059e+37  ;;  %v4550_v45 = vor.u32 1.1754944e-38, %v4549_v5  ;;  %v4565_v53 = vor.u32 1.1754944e-38, %v4564_v32  ;;  %v4577_v54 = vand.u32 2147483647, %v13349_v22 }
 0x680   :  { %v13494_v49 = vpop.eup %7819  ;;  %v4556_v18 = vmul.f32 %v13407_v36, %v4555_v57  ;;  %v4570_v39 = vsub.f32 1.0, %v4569_v51  ;;  %v4657_v4 = vmul.f32 %v13389_v43, %v4656_v26  ;;  %v4579_v25 = vand.u32 2147483648, %v13349_v22 }
 0x681   :  { %v13502_v9 = vpop.eup %7821  ;;  %v4584_v0 = vmul.f32 %v13494_v49, %v13384_v37  ;;  %7827 = vpow2.f32 %v6971_v10  ;;  %v13534_v17 = vadd.f32 1.0, %v13372_v23  ;;  %v4671_v5 = vsub.f32 1.0, %v4670_v63 }
 0x682   :  { %v13511_v13 = vpop.eup %7823  ;;  %v4546_v32 = vsel %vm13528_vm0, %v13358_v27, %v4542_v62  ;;  %vm13539_vm10 = vcmp.eq.f32.partialorder %v4562_v16, 8.507059e+37  ;;  %vm4573_vm7 = vweird.f32 %v13349_v22  ;;  %v13545_v42 = vadd.f32 1.0, %v13382_v29 }
 0x683   :  { %v13518_v48 = vpop.eup %7825  ;;  %vm4659_vm12 = vweird.f32 %v13338_v47  ;;  %v4685_v23 = vmul.f32 %v13466_v21, %v13363_v58  ;;  %vm4559_vm14 = vweird.f32 %v13407_v36  ;;  %v4594_v57 = vand.u32 2147483648, %v13384_v37 }
 0x684   :  { %vm4660_vm9 = vweird.f32 %v13389_v43  ;;  %v4663_v27 = vand.u32 2147483647, %v13338_v47  ;;  %v4557_v51 = vadd.f32 %v13407_v36, %v4556_v18  ;;  %v4571_v26 = vmul.f32 %v13453_v12, %v4570_v39  ;;  %vm13565_vm13 = vmor %vm4558_vm11, %vm4559_vm14 }
 0x685   :  { %v4585_v10 = vsub.f32 1.0, %v4584_v0  ;;  %v4658_v29 = vadd.f32 %v13389_v43, %v4657_v4  ;;  %v13559_v63 = vsel %vm13513_vm6, %v4550_v45, %v4546_v32  ;;  %v4580_v62 = vor.u32 1.1754944e-38, %v4579_v25  ;;  %vm13582_vm11 = vmor %vm4659_vm12, %vm4660_vm9 }
 0x686   :  { %v4665_v16 = vand.u32 2147483648, %v13338_v47  ;;  %v4672_v8 = vmul.f32 %v13422_v33, %v4671_v5  ;;  %vm13569_vm15 = vcmp.eq.f32.partialorder %v4577_v54, 8.507059e+37  ;;  %vm4588_vm8 = vweird.f32 %v13384_v37 }
 0x687   :  { %v4592_v19 = vand.u32 2147483647, %v13384_v37  ;;  %v4686_v45 = vsub.f32 1.0, %v4685_v23  ;;  %v4700_v39 = vmul.f32 %v13484_v40, %v13374_v56  ;;  %v7828_v0 = vpop.eup %7827  ;;  %vm4574_vm5 = vweird.f32 %v13453_v12 }
 0x688   :  { %v4595_v55 = vor.u32 1.1754944e-38, %v4594_v57  ;;  %vm13586_vm6 = vcmp.eq.f32.partialorder %v4663_v27, 8.507059e+37  ;;  %v4678_v25 = vand.u32 2147483647, %v13345_v44  ;;  %v4561_v5 = vsel %vm13565_vm13, %v13407_v36, %v4557_v51  ;;  %vm13618_vm9 = vmor %vm4573_vm7, %vm4574_vm5 }
 0x689   :  { %v4572_v32 = vadd.f32 %v13453_v12, %v4571_v26  ;;  %v4586_v23 = vmul.f32 %v13494_v49, %v4585_v10  ;;  %v4662_v47 = vsel %vm13582_vm11, %v13389_v43, %v4658_v29  ;;  %v4666_v57 = vor.u32 1.1754944e-38, %v4665_v16 }
 0x68a   :  { %v4673_v27 = vadd.f32 %v13422_v33, %v4672_v8  ;;  %vm4674_vm0 = vweird.f32 %v13345_v44  ;;  %vm4675_vm12 = vweird.f32 %v13422_v33  ;;  %vm13602_vm14 = vcmp.eq.f32.partialorder %v4592_v19, 8.507059e+37 }
 0x68b   :  { %v13606_v14 = vadd.f32 1.0, %v7828_v0  ;;  %v4680_v36 = vand.u32 2147483648, %v13345_v44  ;;  %v4687_v51 = vmul.f32 %v13466_v21, %v4686_v45  ;;  %v4701_v26 = vsub.f32 1.0, %v4700_v39 }
 0x68c   :  { %v13612_v43 = vsel %vm13539_vm10, %v4565_v53, %v4561_v5  ;;  %vm4589_vm13 = vweird.f32 %v13494_v49  ;;  %v13625_v44 = vsel %vm13586_vm6, %v4666_v57, %v4662_v47  ;;  %vm13627_vm11 = vcmp.eq.f32.partialorder %v4678_v25, 8.507059e+37  ;;  %vm13635_vm10 = vmor %vm4674_vm0, %vm4675_vm12 }
 0x68d   :  { %v4576_v53 = vsel %vm13618_vm9, %v13453_v12, %v4572_v32  ;;  %v4587_v22 = vadd.f32 %v13494_v49, %v4586_v23  ;;  %v4693_v16 = vand.u32 2147483647, %v13363_v58  ;;  %7829 = vrcp.f32 %v13534_v17  ;;  %vm13659_vm5 = vmor %vm4588_vm8, %vm4589_vm13 }
 0x68e   :  { %v4677_v8 = vsel %vm13635_vm10, %v13422_v33, %v4673_v27  ;;  %v4695_v19 = vand.u32 2147483648, %v13363_v58  ;;  %v4715_v45 = vmul.f32 %v13502_v9, %v13391_v31  ;;  %7831 = vrcp.f32 %v13545_v42 }
 0x68f   :  { %v4681_v12 = vor.u32 1.1754944e-38, %v4680_v36  ;;  %v4688_v39 = vadd.f32 %v13466_v21, %v4687_v51  ;;  %vm4690_vm7 = vweird.f32 %v13466_v21  ;;  %v4702_v0 = vmul.f32 %v13484_v40, %v4701_v26 }
 0x690   :  { %v13653_v54 = vsel %vm13569_vm15, %v4580_v62, %v4576_v53  ;;  %vm4689_vm6 = vweird.f32 %v13363_v58  ;;  %v4708_v4 = vand.u32 2147483647, %v13374_v56  ;;  %v4710_v25 = vand.u32 2147483648, %v13374_v56 }
 0x691   :  { %v4591_v18 = vsel %vm13659_vm5, %v13494_v49, %v4587_v22  ;;  %v13671_v62 = vsel %vm13627_vm11, %v4681_v12, %v4677_v8  ;;  %vm4704_vm15 = vweird.f32 %v13374_v56  ;;  %v4801_v37 = vrot.slane %v13273_v3, 3  ;;  %vm13675_vm8 = vmor %vm4689_vm6, %vm4690_vm7 }
 0x692   :  { %vm13679_vm0 = vcmp.eq.f32.partialorder %v4693_v16, 8.507059e+37  ;;  %v4696_v32 = vor.u32 1.1754944e-38, %v4695_v19  ;;  %v4716_v23 = vsub.f32 1.0, %v4715_v45  ;;  %7833 = vrcp.f32 %v13606_v14 }
 0x693   :  { %v13684_v49 = vpop.eup %7829  ;;  %v4692_v47 = vsel %vm13675_vm8, %v13466_v21, %v4688_v39  ;;  %v4703_v57 = vadd.f32 %v13484_v40, %v4702_v0  ;;  %vm4705_vm12 = vweird.f32 %v13484_v40  ;;  %v4802_v27 = vrot.slane %v13279_v52, 3 }
 0x694   :  { %v13692_v36 = vpop.eup %7831  ;;  %v13696_v51 = vsel %vm13602_vm14, %v4595_v55, %v4591_v18  ;;  %vm13698_vm9 = vcmp.eq.f32.partialorder %v4708_v4, 8.507059e+37  ;;  %v4711_v10 = vor.u32 1.1754944e-38, %v4710_v25  ;;  %vm4720_vm13 = vweird.f32 %v13502_v9  ;;  %vm13713_vm14 = vmor %vm4704_vm15, %vm4705_vm12 }
 0x695   :  { %16983 = vst [vmem:[#allocation42_spill] sm:$0xff] %v13696_v51  ;;  %v4725_v21 = vand.u32 2147483648, %v13391_v31  ;;  %v4803_v29 = vrot.slane %v13282_v30, 3  ;;  %v16986_v53 = vrot.slane %v13271_v50, 3  ;;  %v6975_v11 = vmul.f32 -1.442695, %v4801_v37 }
 0x696   :  { %v13709_v24 = vsel %vm13679_vm0, %v4696_v32, %v4692_v47  ;;  %v4717_v16 = vmul.f32 %v13502_v9, %v4716_v23  ;;  %vm4719_vm11 = vweird.f32 %v13391_v31  ;;  %v4723_v8 = vand.u32 2147483647, %v13391_v31 }
 0x697   :  { %v6974_v22 = vmul.f32 -1.442695, %v16986_v53  ;;  %v4730_v19 = vmul.f32 %v13684_v49, %v13534_v17  ;;  %v4707_v45 = vsel %vm13713_vm14, %v13484_v40, %v4703_v57  ;;  %v4745_v56 = vmul.f32 %v13692_v36, %v13545_v42  ;;  %vm13765_vm6 = vmor %vm4719_vm11, %vm4720_vm13 }
 0x698   :  { %v4776_v12 = vrot.slane %v13271_v50, 2  ;;  %v6976_v39 = vmul.f32 -1.442695, %v4802_v27  ;;  %v13728_v0 = vpop.eup %7833  ;;  %v4738_v33 = vand.u32 2147483647, %v13534_v17  ;;  %v4777_v4 = vrot.slane %v13273_v3, 2 }
 0x699   :  { %v4804_v25 = vrot.slane %v13292_v1, 3  ;;  %7835 = vpow2.f32 %v6974_v22  ;;  %v4726_v18 = vor.u32 1.1754944e-38, %v4725_v21  ;;  %v4740_v37 = vand.u32 2147483648, %v13534_v17 }
 0x69a   :  { %7837 = vpow2.f32 %v6975_v11  ;;  %v6977_v40 = vmul.f32 -1.442695, %v4803_v29  ;;  %v13736_v5 = vsel %vm13698_vm9, %v4711_v10, %v4707_v45  ;;  %v4731_v50 = vsub.f32 1.0, %v4730_v19 }
 0x69b   :  { %7839 = vpow2.f32 %v6976_v39  ;;  %v13739_v58 = vadd.f32 1.0, %v13511_v13  ;;  %vm13741_vm10 = vcmp.eq.f32.partialorder %v4723_v8, 8.507059e+37  ;;  %v4746_v3 = vsub.f32 1.0, %v4745_v56 }
 0x69c   :  { %v4760_v23 = vmul.f32 %v13728_v0, %v13606_v14  ;;  %7841 = vtanh.f32 %v4776_v12  ;;  %v13748_v47 = vadd.f32 1.0, %v13518_v48  ;;  %v4718_v57 = vadd.f32 %v13502_v9, %v4717_v16 }
 0x69d   :  { %vm4734_vm7 = vweird.f32 %v13534_v17  ;;  %7843 = vtanh.f32 %v4777_v4  ;;  %v4805_v13 = vrot.slane %v13303_v38, 3  ;;  %v6978_v27 = vmul.f32 -1.442695, %v4804_v25 }
 0x69e   :  { %v13753_v26 = vor.u32 1.1754944e-38, %v4740_v37  ;;  %vm4749_vm5 = vweird.f32 %v13545_v42  ;;  %v4753_v10 = vand.u32 2147483647, %v13545_v42  ;;  %7845 = vpow2.f32 %v6977_v40 }
 0x69f   :  { %v7836_v21 = vpop.eup %7835  ;;  %v4732_v29 = vmul.f32 %v13684_v49, %v4731_v50  ;;  %v4755_v48 = vand.u32 2147483648, %v13545_v42  ;;  %v4778_v53 = vrot.slane %v13279_v52, 2  ;;  %7847 = vrcp.f32 %v13739_v58 }
 0x6a0   :  { %v7838_v22 = vpop.eup %7837  ;;  %v4747_v55 = vmul.f32 %v13692_v36, %v4746_v3  ;;  %v4761_v16 = vsub.f32 1.0, %v4760_v23  ;;  %v13770_v8 = vadd.f32 1.0, %v7836_v21  ;;  %7849 = vrcp.f32 %v13748_v47 }
 0x6a1   :  { %v7840_v19 = vpop.eup %7839  ;;  %v4722_v52 = vsel %vm13765_vm6, %v13502_v9, %v4718_v57  ;;  %7851 = vpow2.f32 %v6978_v27  ;;  %v6979_v45 = vmul.f32 -1.442695, %v4805_v13  ;;  %v13776_v56 = vadd.f32 1.0, %v7838_v22 }
 0x6a2   :  { %v13778_v31 = vpop.eup %7841  ;;  %vm13780_vm15 = vcmp.eq.f32.partialorder %v4738_v33, 8.507059e+37  ;;  %vm4764_vm8 = vweird.f32 %v13606_v14  ;;  %v4768_v39 = vand.u32 2147483647, %v13606_v14  ;;  %v4779_v4 = vrot.slane %v13282_v30, 2 }
 0x6a3   :  { %7853 = vrcp.f32 %v13770_v8  ;;  %v13788_v25 = vpop.eup %7843  ;;  %vm4735_vm0 = vweird.f32 %v13684_v49  ;;  %vm4750_vm12 = vweird.f32 %v13692_v36  ;;  %v13792_v9 = vadd.f32 1.0, %v7840_v19 }
 0x6a4   :  { %7855 = vrcp.f32 %v13776_v56  ;;  %v7846_v33 = vpop.eup %7845  ;;  %v4733_v37 = vadd.f32 %v13684_v49, %v4732_v29  ;;  %v4748_v40 = vadd.f32 %v13692_v36, %v4747_v55  ;;  %v4762_v50 = vmul.f32 %v13728_v0, %v4761_v16  ;;  %vm13815_vm13 = vmor %vm4734_vm7, %vm4735_vm0 }
 0x6a5   :  { %7857 = vtanh.f32 %v4778_v53  ;;  %v13798_v30 = vpop.eup %7847  ;;  %v13802_v3 = vsel %vm13741_vm10, %v4726_v18, %v4722_v52  ;;  %vm13804_vm9 = vcmp.eq.f32.partialorder %v4753_v10, 8.507059e+37  ;;  %v4780_v57 = vrot.slane %v13292_v1, 2  ;;  %vm13827_vm14 = vmor %vm4749_vm5, %vm4750_vm12 }
 0x6a6   :  { %7859 = vpow2.f32 %v6979_v45  ;;  %v13809_v13 = vpop.eup %7849  ;;  %v4770_v18 = vand.u32 2147483648, %v13606_v14  ;;  %v4781_v32 = vrot.slane %v13303_v38, 2  ;;  %v4847_v10 = vmul.f32 %v13798_v30, %v13739_v58 }
 0x6a7   :  { %7861 = vtanh.f32 %v4779_v4  ;;  %v7852_v1 = vpop.eup %7851  ;;  %v4756_v17 = vor.u32 1.1754944e-38, %v4755_v48  ;;  %vm4765_vm11 = vweird.f32 %v13728_v0  ;;  %v4862_v29 = vmul.f32 %v13809_v13, %v13748_v47 }
 0x6a8   :  { %7863 = vrcp.f32 %v13792_v9  ;;  %v4737_v53 = vsel %vm13815_vm13, %v13684_v49, %v4733_v37  ;;  %v4752_v42 = vsel %vm13827_vm14, %v13692_v36, %v4748_v40  ;;  %v4763_v22 = vadd.f32 %v13728_v0, %v4762_v50  ;;  %vm13871_vm7 = vmor %vm4764_vm8, %vm4765_vm11 }
 0x6a9   :  { %v13835_v38 = vpop.eup %7853  ;;  %v4848_v48 = vsub.f32 1.0, %v4847_v10  ;;  %7865 = vtanh.f32 %v4780_v57  ;;  %v13846_v55 = vadd.f32 1.0, %v7846_v33  ;;  %v4863_v16 = vsub.f32 1.0, %v4862_v29 }
 0x6aa   :  { %v13844_v11 = vpop.eup %7855  ;;  %v4877_v19 = vmul.f32 %v13835_v38, %v13770_v8  ;;  %vm13852_vm10 = vcmp.eq.f32.partialorder %v4768_v39, 8.507059e+37  ;;  %v4771_v45 = vor.u32 1.1754944e-38, %v4770_v18  ;;  %7867 = vtanh.f32 %v4781_v32 }
 0x6ab   :  { %v13850_v52 = vpop.eup %7857  ;;  %v13856_v36 = vadd.f32 1.0, %v7852_v1  ;;  %v13861_v33 = vsel %vm13780_vm15, %v13753_v26, %v4737_v53  ;;  %v13865_v37 = vsel %vm13804_vm9, %v4756_v17, %v4752_v42  ;;  %v4855_v40 = vand.u32 2147483647, %v13739_v58 }
 0x6ac   :  { %v7860_v4 = vpop.eup %7859  ;;  %v4857_v50 = vand.u32 2147483648, %v13739_v58  ;;  %v4767_v26 = vsel %vm13871_vm7, %v13728_v0, %v4763_v22  ;;  %v4849_v12 = vmul.f32 %v13798_v30, %v4848_v48  ;;  %vm4851_vm5 = vweird.f32 %v13739_v58 }
 0x6ad   :  { %v13877_v57 = vpop.eup %7861  ;;  %v4892_v14 = vmul.f32 %v13844_v11, %v13776_v56  ;;  %v4864_v27 = vmul.f32 %v13809_v13, %v4863_v16  ;;  %vm4866_vm6 = vweird.f32 %v13748_v47  ;;  %v4878_v18 = vsub.f32 1.0, %v4877_v19 }
 0x6ae   :  { %v13886_v23 = vpop.eup %7863  ;;  %7869 = vrcp.f32 %v13846_v55  ;;  %v13891_v32 = vadd.f32 1.0, %v7860_v4  ;;  %v4870_v0 = vand.u32 2147483647, %v13748_v47  ;;  %v4872_v10 = vand.u32 2147483648, %v13748_v47 }
 0x6af   :  { %7871 = vrcp.f32 %v13856_v36  ;;  %v13896_v1 = vpop.eup %7865  ;;  %v13900_v21 = vsel %vm13852_vm10, %v4771_v45, %v4767_v26  ;;  %vm13902_vm15 = vcmp.eq.f32.partialorder %v4855_v40, 8.507059e+37  ;;  %v4858_v29 = vor.u32 1.1754944e-38, %v4857_v50 }
 0x6b0   :  { %17005 = vst [vmem:[#allocation44_spill] sm:$0xff] %v13896_v1  ;;  %v4887_v53 = vand.u32 2147483648, %v13770_v8  ;;  %v13907_v42 = vpop.eup %7867  ;;  %v4850_v22 = vadd.f32 %v13798_v30, %v4849_v12  ;;  %vm4852_vm8 = vweird.f32 %v13798_v30  ;;  %v4893_v48 = vsub.f32 1.0, %v4892_v14 }
 0x6b1   :  { %17008 = vst [vmem:[#allocation45_spill] sm:$0xff] %v13907_v42  ;;  %v4907_v16 = vmul.f32 %v13886_v23, %v13792_v9  ;;  %v4865_v19 = vadd.f32 %v13809_v13, %v4864_v27  ;;  %vm4867_vm0 = vweird.f32 %v13809_v13  ;;  %v4879_v49 = vmul.f32 %v13835_v38, %v4878_v18  ;;  %vm13927_vm13 = vmor %vm4851_vm5, %vm4852_vm8 }
 0x6b2   :  { %v4902_v45 = vand.u32 2147483648, %v13776_v56  ;;  %vm13917_vm12 = vcmp.eq.f32.partialorder %v4870_v0, 8.507059e+37  ;;  %v4873_v39 = vor.u32 1.1754944e-38, %v4872_v10  ;;  %vm4881_vm9 = vweird.f32 %v13770_v8  ;;  %vm13944_vm14 = vmor %vm4866_vm6, %vm4867_vm0 }
 0x6b3   :  { %7873 = vrcp.f32 %v13891_v32  ;;  %v4885_v26 = vand.u32 2147483647, %v13770_v8  ;;  %v4900_v12 = vand.u32 2147483647, %v13776_v56  ;;  %v4917_v14 = vand.u32 2147483648, %v13792_v9 }
 0x6b4   :  { %v13923_v40 = vpop.eup %7869  ;;  %v4932_v27 = vand.u32 2147483648, %v13846_v55  ;;  %v4854_v0 = vsel %vm13927_vm13, %v13798_v30, %v4850_v22  ;;  %v13948_v10 = vor.u32 1.1754944e-38, %v4887_v53  ;;  %v4894_v42 = vmul.f32 %v13844_v11, %v4893_v48 }
 0x6b5   :  { %v13935_v18 = vpop.eup %7871  ;;  %v4908_v51 = vsub.f32 1.0, %v4907_v16  ;;  %v4869_v1 = vsel %vm13944_vm14, %v13809_v13, %v4865_v19  ;;  %v13955_v50 = vadd.f32 %v13835_v38, %v4879_v49  ;;  %vm4882_vm11 = vweird.f32 %v13835_v38 }
 0x6b6   :  { %v13958_v30 = vor.u32 1.1754944e-38, %v4902_v45  ;;  %vm4897_vm10 = vweird.f32 %v13844_v11  ;;  %v4915_v47 = vand.u32 2147483647, %v13792_v9  ;;  %v4922_v53 = vmul.f32 %v13923_v40, %v13846_v55  ;;  %vm13984_vm5 = vmor %vm4881_vm9, %vm4882_vm11 }
 0x6b7   :  { %v4930_v22 = vand.u32 2147483647, %v13846_v55  ;;  %v13967_v48 = vsel %vm13902_vm15, %v4858_v29, %v4854_v0  ;;  %vm4896_vm7 = vweird.f32 %v13776_v56  ;;  %v13970_v13 = vor.u32 1.1754944e-38, %v4917_v14 }
 0x6b8   :  { %v13972_v16 = vor.u32 1.1754944e-38, %v4932_v27  ;;  %v4937_v19 = vmul.f32 %v13935_v18, %v13856_v36  ;;  %v13980_v45 = vsel %vm13917_vm12, %v4873_v39, %v4869_v1  ;;  %v4895_v29 = vadd.f32 %v13844_v11, %v4894_v42  ;;  %vm14061_vm11 = vmor %vm4896_vm7, %vm4897_vm10 }
 0x6b9   :  { %v13976_v49 = vpop.eup %7873  ;;  %v4909_v14 = vmul.f32 %v13886_v23, %v4908_v51  ;;  %v4966_v27 = vmul.f32 %v13625_v44, %v13075_v7  ;;  %v4884_v4 = vsel %vm13984_vm5, %v13835_v38, %v13955_v50  ;;  %vm13996_vm6 = vcmp.eq.f32.partialorder %v4885_v26, 8.507059e+37 }
 0x6ba   :  { %vm4912_vm15 = vweird.f32 %v13886_v23  ;;  %v4952_v8 = vmul.f32 %v13976_v49, %v13891_v32  ;;  %v4967_v51 = vmul.f32 %v13671_v62, %v13082_v28  ;;  %v4968_v7 = vmul.f32 %v13709_v24, %v13084_v59 }
 0x6bb   :  { %v4923_v44 = vsub.f32 1.0, %v4922_v53  ;;  %vm4927_vm8 = vweird.f32 %v13923_v40  ;;  %v4945_v38 = vand.u32 2147483647, %v13856_v36  ;;  %v4969_v42 = vmul.f32 %v13736_v5, %v13091_v61 }
 0x6bc   :  { %v4974_v39 = vmul.f32 %v13437_v15, %v13459_v46  ;;  %vm14013_vm0 = vcmp.eq.f32.partialorder %v4900_v12, 8.507059e+37  ;;  %vm4911_vm12 = vweird.f32 %v13792_v9  ;;  %v4938_v28 = vsub.f32 1.0, %v4937_v19  ;;  %v17028_v12 = vld [vmem:[#allocation45_spill] sm:$0xff] }
 0x6bd   :  { %v4970_v59 = vmul.f32 %v13802_v3, %v13100_v41  ;;  %v4975_v62 = vmul.f32 %v13445_v20, %v13463_v35  ;;  %v4976_v24 = vmul.f32 %v13778_v31, %v13471_v34  ;;  %vm4926_vm9 = vweird.f32 %v13846_v55  ;;  %vm14100_vm7 = vmor %vm4911_vm12, %vm4912_vm15 }
 0x6be   :  { %v4953_v61 = vsub.f32 1.0, %v4952_v8  ;;  %v4971_v15 = vmul.f32 %v13861_v33, %v13114_v6  ;;  %v4977_v46 = vmul.f32 %v13788_v25, %v13506_v60  ;;  %v14029_v5 = vadd.f32 %v4974_v39, %v4966_v27  ;;  %v17021_v6 = vld [vmem:[#allocation43_spill] sm:$0xff] }
 0x6bf   :  { %vm4941_vm13 = vweird.f32 %v13856_v36  ;;  %v4972_v41 = vmul.f32 %v13865_v37, %v13125_v2  ;;  %v4978_v20 = vmul.f32 %v13850_v52, %v13559_v63  ;;  %v14036_v35 = vadd.f32 %v4975_v62, %v4967_v51  ;;  %v17024_v63 = vld [vmem:[#allocation44_spill] sm:$0xff] }
 0x6c0   :  { %v14038_v34 = vadd.f32 %v4976_v24, %v4968_v7  ;;  %v4924_v31 = vmul.f32 %v13923_v40, %v4923_v44  ;;  %v4973_v3 = vmul.f32 %v13900_v21, %v17021_v6  ;;  %v4979_v60 = vmul.f32 %v13877_v57, %v13612_v43  ;;  %v17027_v21 = vld [vmem:[#allocation42_spill] sm:$0xff] }
 0x6c1   :  { %v14045_v25 = vadd.f32 %v4977_v46, %v4969_v42  ;;  %vm14047_vm14 = vcmp.eq.f32.partialorder %v4915_v47, 8.507059e+37  ;;  %v4939_v2 = vmul.f32 %v13935_v18, %v4938_v28  ;;  %v4980_v52 = vmul.f32 %v17024_v63, %v13653_v54 }
 0x6c2   :  { %v14054_v37 = vadd.f32 %v4978_v20, %v4970_v59  ;;  %7875 = vtanh.f32 %v14029_v5  ;;  %v4954_v57 = vmul.f32 %v13976_v49, %v4953_v61  ;;  %v4981_v0 = vmul.f32 %v17028_v12, %v17027_v21 }
 0x6c3   :  { %v14068_v58 = vadd.f32 %v4979_v60, %v4971_v15  ;;  %7877 = vtanh.f32 %v14036_v35  ;;  %v4899_v54 = vsel %vm14061_vm11, %v13844_v11, %v4895_v29  ;;  %v4910_v50 = vadd.f32 %v13886_v23, %v4909_v14 }
 0x6c4   :  { %vm14075_vm5 = vcmp.eq.f32.partialorder %v4930_v22, 8.507059e+37  ;;  %v14079_v47 = vadd.f32 %v4980_v52, %v4972_v41  ;;  %7879 = vtanh.f32 %v14038_v34  ;;  %v4889_v53 = vsel %vm13996_vm6, %v13948_v10, %v4884_v4 }
 0x6c5   :  { %v4947_v19 = vand.u32 2147483648, %v13856_v36  ;;  %v14086_v17 = vadd.f32 %v4981_v0, %v4973_v3  ;;  %7881 = vtanh.f32 %v14045_v25  ;;  %v4925_v11 = vadd.f32 %v13923_v40, %v4924_v31 }
 0x6c6   :  { %v4940_v22 = vadd.f32 %v13935_v18, %v4939_v2  ;;  %vm4942_vm10 = vweird.f32 %v13935_v18  ;;  %7883 = vtanh.f32 %v14054_v37  ;;  %v4904_v29 = vsel %vm14013_vm0, %v13958_v30, %v4899_v54  ;;  %vm14114_vm0 = vmor %vm4926_vm9, %vm4927_vm8 }
 0x6c7   :  { %17031 = vst [vmem:[#allocation13_spill] sm:$0xff] %v14086_v17  ;;  %v4955_v14 = vadd.f32 %v13976_v49, %v4954_v57  ;;  %vm4957_vm6 = vweird.f32 %v13976_v49  ;;  %7885 = vtanh.f32 %v14068_v58  ;;  %v4914_v4 = vsel %vm14100_vm7, %v13886_v23, %v4910_v50  ;;  %vm14123_vm15 = vmor %vm4941_vm13, %vm4942_vm10 }
 0x6c8   :  { %v7876_v27 = vpop.eup %7875  ;;  %v4960_v30 = vand.u32 2147483647, %v13891_v32  ;;  %v4962_v1 = vand.u32 2147483648, %v13891_v32  ;;  %7887 = vtanh.f32 %v14079_v47  ;;  %vm14127_vm12 = vcmp.eq.f32.partialorder %v4945_v38, 8.507059e+37 }
 0x6c9   :  { %v7878_v8 = vpop.eup %7877  ;;  %vm4956_vm8 = vweird.f32 %v13891_v32  ;;  %7889 = vtanh.f32 %v14086_v17  ;;  %v4998_v55 = vmul.f32 %v7876_v27, %v13967_v48  ;;  %v4929_v44 = vsel %vm14114_vm0, %v13923_v40, %v4925_v11 }
 0x6ca   :  { %v7880_v7 = vpop.eup %7879  ;;  %v4944_v36 = vsel %vm14123_vm15, %v13935_v18, %v4940_v22  ;;  %v4948_v42 = vor.u32 1.1754944e-38, %v4947_v19  ;;  %vm14142_vm9 = vmor %vm4956_vm8, %vm4957_vm6  ;;  %v4999_v32 = vmul.f32 %v7878_v8, %v13980_v45  ;;  %v4919_v48 = vsel %vm14047_vm14, %v13970_v13, %v4914_v4 }
 0x6cb   :  { %v7882_v39 = vpop.eup %7881  ;;  %v4959_v40 = vsel %vm14142_vm9, %v13976_v49, %v4955_v14  ;;  %v5000_v26 = vmul.f32 %v7880_v7, %v4889_v53  ;;  %5006 = vst [vmem:[#allocation3 + $0x5] sm:$0x1] %v4998_v55  ;;  %v5030_v18 = vpack.c.bf16 %v4998_v55, %v4998_v55  ;;  %vm4961_vm13 = vcmp.eq.f32.partialorder %v4960_v30, 8.507059e+37 }
 0x6cc   :  { %v7884_v28 = vpop.eup %7883  ;;  %v4963_v59 = vor.u32 1.1754944e-38, %v4962_v1  ;;  %v5001_v62 = vmul.f32 %v7882_v39, %v4904_v29  ;;  %5007 = vst [vmem:[#allocation3 + $0xd] sm:$0x1] %v4999_v32  ;;  %v5031_v24 = vpack.c.bf16 %v4999_v32, %v4999_v32  ;;  %v4934_v45 = vsel %vm14075_vm5, %v13972_v16, %v4929_v44 }
 0x6cd   :  { %v7886_v61 = vpop.eup %7885  ;;  %v4949_v13 = vsel %vm14127_vm12, %v4948_v42, %v4944_v36  ;;  %v5002_v15 = vmul.f32 %v7884_v28, %v4919_v48  ;;  %5008 = vst [vmem:[#allocation3 + $0x15] sm:$0x1] %v5000_v26  ;;  %v5032_v49 = vpack.c.bf16 %v5000_v26, %v5000_v26  ;;  %v5046_v2 = vunpack.c.l.b16 %v5030_v18 }
 0x6ce   :  { %v7888_v46 = vpop.eup %7887  ;;  %v4964_v41 = vsel %vm4961_vm13, %v4963_v59, %v4959_v40  ;;  %v5003_v20 = vmul.f32 %v7886_v61, %v4934_v45  ;;  %5009 = vst [vmem:[#allocation3 + $0x1d] sm:$0x1] %v5001_v62  ;;  %v5033_v31 = vpack.c.bf16 %v5001_v62, %v5001_v62  ;;  %v5047_v6 = vunpack.c.l.b16 %v5031_v24 }
 0x6cf   :  { %v7890_v3 = vpop.eup %7889  ;;  %v5004_v60 = vmul.f32 %v7888_v46, %v4949_v13  ;;  %5010 = vst [vmem:[#allocation3 + $0x25] sm:$0x1] %v5002_v15  ;;  %v5034_v33 = vpack.c.bf16 %v5002_v15, %v5002_v15  ;;  %v5048_v63 = vunpack.c.l.b16 %v5032_v49  ;;  %vm17042_vm14 = vcmask 1045509  }
 0x6d0   :  { %v5005_v52 = vmul.f32 %v7890_v3, %v4964_v41  ;;  %5011 = vst [vmem:[#allocation3 + $0x2d] sm:$0x1] %v5003_v20  ;;  %v5035_v16 = vpack.c.bf16 %v5003_v20, %v5003_v20  ;;  %v5049_v43 = vunpack.c.l.b16 %v5033_v31  ;;  %v5054_v57 = vrot.slane %v5047_v6, 7  ;;  %vm17046_vm7 = vmmov %vm17042_vm14 }
 0x6d1   :  { %5012 = vst [vmem:[#allocation3 + $0x35] sm:$0x1] %v5004_v60  ;;  %v5036_v21 = vpack.c.bf16 %v5004_v60, %v5004_v60  ;;  %v5050_v12 = vunpack.c.l.b16 %v5034_v33  ;;  %v5056_v0 = vrot.slane %v5048_v63, 6  ;;  %vm17043_vm11 = vcmask 1046534   ;;  %vm17049_vm15 = vmmov %vm17046_vm7 }
 0x6d2   :  { %5013 = vst [vmem:[#allocation3 + $0x3d] sm:$0x1] %v5005_v52  ;;  %v5037_v54 = vpack.c.bf16 %v5005_v52, %v5005_v52  ;;  %v5051_v50 = vunpack.c.l.b16 %v5035_v16  ;;  %v5055_v56 = vsel %vm723_vm2, %v5054_v57, %v5046_v2  ;;  %v5058_v53 = vrot.slane %v5049_v43, 5  ;;  %vm17047_vm6 = vmmov %vm17043_vm11  ;;  %v5015_v16 = vld [vmem:[#allocation2 + $0x6] ss:$8 sm:$0xf] }
 0x6d3   :  { %v5052_v19 = vunpack.c.l.b16 %v5036_v21  ;;  %v5057_v11 = vsel %vm719_vm1, %v5056_v0, %v5055_v56  ;;  %v5060_v22 = vrot.slane %v5050_v12, 4  ;;  %vm17044_vm5 = vcmask 1047559   ;;  %v5017_v43 = vld [vmem:[#allocation2 + $0x26] ss:$8 sm:$0xf] }
 0x6d4   :  { %v5053_v29 = vunpack.c.l.b16 %v5037_v54  ;;  %v5059_v10 = vsel %vm725_vm3, %v5058_v53, %v5057_v11  ;;  %v5062_v14 = vrot.slane %v5051_v50, 3  ;;  %vm17045_vm10 = vcmask 1040384   ;;  %v5019_v0 = vld [vmem:[#allocation2 + $0x46] ss:$8 sm:$0xf] }
 0x6d5   :  { %v5061_v27 = vsel %vm731_vm4, %v5060_v22, %v5059_v10  ;;  %v5064_v4 = vrot.slane %v5052_v19, 2  ;;  %vm17048_vm0 = vcmask 1046528   ;;  %vm17050_vm12 = vcmask 1041408   ;;  %v5021_v54 = vld [vmem:[#allocation2 + $0x66] ss:$8 sm:$0xf] }
 0x6d6   :  { %v5063_v9 = vsel %vm17042_vm14, %v5062_v14, %v5061_v27  ;;  %v5066_v30 = vrot.slane %v5053_v29, 1  ;;  %vm17051_vm8 = vcmask 1042433   ;;  %vm17052_vm9 = vcmask 1043458   ;;  %vm17054_vm14 = vmmov %vm17047_vm6 }
 0x6d7   :  { %v5065_v1 = vsel %vm17043_vm11, %v5064_v4, %v5063_v9  ;;  %vm17053_vm13 = vcmask 1044483   ;;  %vm17055_vm11 = vcmask 1045508   ;;  %v5023_v9 = vld [vmem:[#allocation2 + $0x86] ss:$8 sm:$0xf] }
 0x6d8   :  { %v5067_v8 = vsel %vm17044_vm5, %v5066_v30, %v5065_v1  ;;  %vm17056_vm5 = vmmov %vm17048_vm0 }
 0x6d9   :  { %v5068_v51 = vpack.c.b16 %v5067_v8, %v5067_v8 }
 0x6db   :  { %5078 = vmatmul.bf16.vlgmr.msrb.gmra.mxu0 %v5068_v51  ;;  %5091 = vmatmul.bf16.vlgmr.msrb.gmra.mxu1 %v5068_v51 }
 0x6dc   :  { %5104 = vmatmul.bf16.vlgmr.msrb.gmra.mxu2 %v5068_v51  ;;  %5117 = vmatmul.bf16.vlgmr.msrb.gmra.mxu3 %v5068_v51 }
 0x758   :  { %v5079_v23 = vpop.f32.mrf.mxu0  ;;  %v5092_v55 = vpop.f32.mrf.mxu1 }
 0x759   :  { %v5126_v7 = vrot.slane %v5092_v55, 7 }
 0x75b   :  { %v5129_v44 = vsel %vm17045_vm10, %v5079_v23, %v5126_v7  ;;  %v5132_v36 = vsel %vm723_vm2, %v5079_v23, %v5126_v7  ;;  %v5136_v42 = vsel %vm719_vm1, %v5079_v23, %v5126_v7  ;;  %v5140_v38 = vsel %vm725_vm3, %v5079_v23, %v5126_v7 }
 0x75c   :  { %v5144_v32 = vsel %vm731_vm4, %v5079_v23, %v5126_v7  ;;  %v5148_v39 = vsel %vm17046_vm7, %v5079_v23, %v5126_v7  ;;  %v5152_v48 = vsel %vm17047_vm6, %v5079_v23, %v5126_v7  ;;  %v5156_v40 = vsel %vm17048_vm0, %v5126_v7, %v5079_v23  ;;  %v5025_v23 = vld [vmem:[#allocation2 + $0xa6] ss:$8 sm:$0xf] }
 0x75d   :  { %vm17057_vm7 = vcmask 1046533   ;;  %vm17058_vm6 = vcmask 1045504   ;;  %vm17059_vm0 = vcmask 1046529  }
 0x75f   :  { %v5105_v26 = vpop.f32.mrf.mxu2  ;;  %v5118_v18 = vpop.f32.mrf.mxu3 }
 0x760   :  { %v5127_v28 = vrot.slane %v5105_v26, 6  ;;  %v5128_v59 = vrot.slane %v5118_v18, 5  ;;  %v5081_v62 = vpop.f32.mrf.mxu0  ;;  %v5094_v24 = vpop.f32.mrf.mxu1 }
 0x762   :  { %v5130_v61 = vsel %vm719_vm1, %v5127_v28, %v5128_v59  ;;  %v5133_v45 = vsel %vm725_vm3, %v5127_v28, %v5128_v59  ;;  %v5137_v13 = vsel %vm731_vm4, %v5127_v28, %v5128_v59  ;;  %v5141_v15 = vsel %vm17049_vm15, %v5127_v28, %v5128_v59 }
 0x763   :  { %v5131_v49 = vsel %vm17050_vm12, %v5129_v44, %v5130_v61  ;;  %v5134_v46 = vsel %vm17051_vm8, %v5132_v36, %v5133_v45  ;;  %v5138_v41 = vsel %vm17052_vm9, %v5136_v42, %v5137_v13  ;;  %v5142_v20 = vsel %vm17053_vm13, %v5140_v38, %v5141_v15  ;;  %v5029_v13 = vld [vmem:[#allocation2 + $0xe6] ss:$8 sm:$0xf] }
 0x764   :  { %v5135_v31 = vrot.slane %v5134_v46, 1  ;;  %v5139_v6 = vrot.slane %v5138_v41, 2  ;;  %v5143_v3 = vrot.slane %v5142_v20, 3  ;;  %v5145_v60 = vsel %vm17054_vm14, %v5127_v28, %v5128_v59 }
 0x765   :  { %v5146_v33 = vsel %vm17055_vm11, %v5144_v32, %v5145_v60  ;;  %v5149_v2 = vsel %vm17056_vm5, %v5128_v59, %v5127_v28  ;;  %v5153_v63 = vsel %vm17045_vm10, %v5127_v28, %v5128_v59  ;;  %v5157_v52 = vsel %vm723_vm2, %v5127_v28, %v5128_v59 }
 0x766   :  { %v5150_v57 = vsel %vm17057_vm7, %v5148_v39, %v5149_v2  ;;  %v5154_v21 = vsel %vm17058_vm6, %v5153_v63, %v5152_v48  ;;  %v5158_v12 = vsel %vm17059_vm0, %v5157_v52, %v5156_v40  ;;  %v14189_v50 = vadd.f32 %v5131_v49, %v5015_v16  ;;  %v5027_v40 = vld [vmem:[#allocation2 + $0xc6] ss:$8 sm:$0xf] }
 0x767   :  { %v5107_v56 = vpop.f32.mrf.mxu2  ;;  %v5120_v53 = vpop.f32.mrf.mxu3  ;;  %v14191_v19 = vadd.f32 %v5135_v31, %v5017_v43  ;;  %v14193_v11 = vadd.f32 %v5139_v6, %v5019_v0  ;;  %v14195_v22 = vadd.f32 %v5143_v3, %v5021_v54  ;;  %v5147_v10 = vrot.slane %v5146_v33, 4 }
 0x768   :  { %v6980_v29 = vmul.f32 -1.442695, %v14189_v50  ;;  %v5151_v1 = vrot.slane %v5150_v57, 5  ;;  %v5155_v44 = vrot.slane %v5154_v21, 6  ;;  %v5336_v32 = vrot.slane %v14189_v50, 1 }
 0x769   :  { %v6981_v14 = vmul.f32 -1.442695, %v14191_v19  ;;  %v6982_v27 = vmul.f32 -1.442695, %v14193_v11  ;;  %v6983_v4 = vmul.f32 -1.442695, %v14195_v22  ;;  %v14201_v30 = vadd.f32 %v5147_v10, %v5023_v9 }
 0x76a   :  { %7891 = vpow2.f32 %v6980_v29  ;;  %v14204_v36 = vadd.f32 %v5151_v1, %v5025_v23  ;;  %v5337_v26 = vrot.slane %v14191_v19, 1  ;;  %v14214_v18 = vadd.f32 %v5155_v44, %v5027_v40 }
 0x76b   :  { %7893 = vpow2.f32 %v6981_v14  ;;  %v6984_v55 = vmul.f32 -1.442695, %v14201_v30  ;;  %v5159_v59 = vrot.slane %v5158_v12, 7  ;;  %v6988_v62 = vmul.f32 -1.442695, %v5336_v32 }
 0x76c   :  { %7895 = vpow2.f32 %v6982_v27  ;;  %v6985_v28 = vmul.f32 -1.442695, %v14204_v36  ;;  %v5338_v61 = vrot.slane %v14193_v11, 1  ;;  %v6989_v45 = vmul.f32 -1.442695, %v5337_v26 }
 0x76d   :  { %7897 = vpow2.f32 %v6983_v4  ;;  %v6986_v15 = vmul.f32 -1.442695, %v14214_v18  ;;  %v5339_v49 = vrot.slane %v14195_v22, 1  ;;  %v14225_v41 = vadd.f32 %v5159_v59, %v5029_v13 }
 0x76e   :  { %7899 = vpow2.f32 %v6984_v55  ;;  %v5340_v31 = vrot.slane %v14201_v30, 1  ;;  %v5341_v6 = vrot.slane %v14204_v36, 1  ;;  %v5342_v60 = vrot.slane %v14214_v18, 1 }
 0x76f   :  { %v6990_v33 = vmul.f32 -1.442695, %v5338_v61  ;;  %v6991_v63 = vmul.f32 -1.442695, %v5339_v49  ;;  %v5343_v16 = vrot.slane %v14225_v41, 1  ;;  %v5528_v43 = vrot.slane %v14189_v50, 3 }
 0x770   :  { %v7892_v8 = vpop.eup %7891  ;;  %v5529_v57 = vrot.slane %v14191_v19, 3  ;;  %v6992_v12 = vmul.f32 -1.442695, %v5340_v31  ;;  %v6993_v0 = vmul.f32 -1.442695, %v5341_v6  ;;  %v5504_v10 = vrot.slane %v14189_v50, 2 }
 0x771   :  { %v7894_v51 = vpop.eup %7893  ;;  %v14206_v42 = vadd.f32 1.0, %v7892_v8  ;;  %v6994_v29 = vmul.f32 -1.442695, %v5342_v60  ;;  %v5505_v4 = vrot.slane %v14191_v19, 2  ;;  %v6987_v1 = vmul.f32 -1.442695, %v14225_v41 }
 0x772   :  { %v7896_v7 = vpop.eup %7895  ;;  %v14208_v38 = vadd.f32 1.0, %v7894_v51  ;;  %v14255_v51 = vmul.f32 -1.442695, %v5528_v43  ;;  %v14257_v23 = vmul.f32 -1.442695, %v5529_v57 }
 0x773   :  { %v14211_v39 = vadd.f32 1.0, %v7896_v7  ;;  %v7898_v48 = vpop.eup %7897  ;;  %7901 = vrcp.f32 %v14206_v42  ;;  %v5219_v50 = vand.u32 2147483648, %v14206_v42  ;;  %vm5213_vm15 = vweird.f32 %v14206_v42 }
 0x774   :  { %7903 = vrcp.f32 %v14208_v38  ;;  %v14219_v24 = vadd.f32 1.0, %v7898_v48  ;;  %v7900_v46 = vpop.eup %7899  ;;  %vm5228_vm12 = vweird.f32 %v14208_v38 }
 0x775   :  { %7905 = vrcp.f32 %v14211_v39  ;;  %v14237_v52 = vadd.f32 1.0, %v7900_v46  ;;  %v14273_v61 = vor.u32 1.1754944e-38, %v5219_v50  ;;  %v5234_v46 = vand.u32 2147483648, %v14208_v38 }
 0x776   :  { %7907 = vpow2.f32 %v6985_v28  ;;  %v5217_v28 = vand.u32 2147483647, %v14206_v42  ;;  %v5247_v60 = vand.u32 2147483647, %v14211_v39  ;;  %vm5243_vm10 = vweird.f32 %v14211_v39 }
 0x777   :  { %7909 = vpow2.f32 %v6988_v62 }
 0x778   :  { %7911 = vrcp.f32 %v14219_v24  ;;  %vm14289_vm9 = vcmp.eq.f32.partialorder %v5217_v28, 8.507059e+37  ;;  %vm14340_vm6 = vcmp.eq.f32.partialorder %v5247_v60, 8.507059e+37 }
 0x779   :  { %v14227_v20 = vpop.eup %7901  ;;  %7913 = vpow2.f32 %v6989_v45  ;;  %v5232_v45 = vand.u32 2147483647, %v14208_v38 }
 0x77a   :  { %v14232_v3 = vpop.eup %7903  ;;  %7915 = vpow2.f32 %v6986_v15  ;;  %v5209_v54 = vmul.f32 %v14227_v20, %v14206_v42  ;;  %vm5214_vm8 = vweird.f32 %v14227_v20 }
 0x77b   :  { %v14235_v2 = vpop.eup %7905  ;;  %v5224_v56 = vmul.f32 %v14232_v3, %v14208_v38  ;;  %7917 = vpow2.f32 %v6990_v33  ;;  %vm5229_vm13 = vweird.f32 %v14232_v3  ;;  %vm14320_vm11 = vmor %vm5213_vm15, %vm5214_vm8  ;;  %vm14324_vm5 = vcmp.eq.f32.partialorder %v5232_v45, 8.507059e+37 }
 0x77c   :  { %v7908_v21 = vpop.eup %7907  ;;  %v5239_v14 = vmul.f32 %v14235_v2, %v14211_v39  ;;  %7919 = vpow2.f32 %v6991_v63  ;;  %v5210_v44 = vsub.f32 1.0, %v5209_v54  ;;  %vm5244_vm14 = vweird.f32 %v14235_v2  ;;  %vm14336_vm7 = vmor %vm5228_vm12, %vm5229_vm13 }
 0x77d   :  { %v7910_v53 = vpop.eup %7909  ;;  %7921 = vrcp.f32 %v14237_v52  ;;  %v5225_v32 = vsub.f32 1.0, %v5224_v56  ;;  %v14262_v19 = vadd.f32 1.0, %v7908_v21  ;;  %v5249_v21 = vand.u32 2147483648, %v14211_v39  ;;  %vm14354_vm0 = vmor %vm5243_vm10, %vm5244_vm14 }
 0x77e   :  { %v14249_v27 = vpop.eup %7911  ;;  %7923 = vpow2.f32 %v6992_v12  ;;  %v14260_v7 = vadd.f32 1.0, %v7910_v53  ;;  %v5240_v48 = vsub.f32 1.0, %v5239_v14  ;;  %v5211_v15 = vmul.f32 %v14227_v20, %v5210_v44 }
 0x77f   :  { %v7914_v8 = vpop.eup %7913  ;;  %7925 = vpow2.f32 %v6993_v0  ;;  %v5254_v40 = vmul.f32 %v14249_v27, %v14219_v24  ;;  %v5226_v49 = vmul.f32 %v14232_v3, %v5225_v32  ;;  %v5250_v28 = vor.u32 1.1754944e-38, %v5249_v21 }
 0x780   :  { %v7916_v55 = vpop.eup %7915  ;;  %v14267_v26 = vadd.f32 1.0, %v7914_v8  ;;  %7927 = vpow2.f32 %v6987_v1  ;;  %v5241_v6 = vmul.f32 %v14235_v2, %v5240_v48  ;;  %v5212_v56 = vadd.f32 %v14227_v20, %v5211_v15 }
 0x781   :  { %v7918_v59 = vpop.eup %7917  ;;  %7929 = vpow2.f32 %v6994_v29  ;;  %v14271_v62 = vadd.f32 1.0, %v7916_v55  ;;  %v5255_v33 = vsub.f32 1.0, %v5254_v40  ;;  %v5227_v53 = vadd.f32 %v14232_v3, %v5226_v49 }
 0x782   :  { %v7920_v13 = vpop.eup %7919  ;;  %7931 = vrcp.f32 %v14260_v7  ;;  %v14285_v43 = vadd.f32 1.0, %v7918_v59  ;;  %v5242_v8 = vadd.f32 %v14235_v2, %v5241_v6  ;;  %v5235_v48 = vor.u32 1.1754944e-38, %v5234_v46 }
 0x783   :  { %v14280_v31 = vpop.eup %7921  ;;  %7933 = vrcp.f32 %v14262_v19  ;;  %v14296_v0 = vadd.f32 1.0, %v7920_v13  ;;  %v5216_v39 = vsel %vm14320_vm11, %v14227_v20, %v5212_v56  ;;  %v5231_v38 = vsel %vm14336_vm7, %v14232_v3, %v5227_v53 }
 0x784   :  { %v7924_v63 = vpop.eup %7923  ;;  %7935 = vrcp.f32 %v14267_v26  ;;  %v5269_v29 = vmul.f32 %v14280_v31, %v14237_v52  ;;  %v5262_v13 = vand.u32 2147483647, %v14219_v24  ;;  %v5246_v46 = vsel %vm14354_vm0, %v14235_v2, %v5242_v8 }
 0x785   :  { %v14294_v12 = vpop.eup %7925  ;;  %7937 = vtanh.f32 %v5504_v10  ;;  %v5256_v10 = vmul.f32 %v14249_v27, %v5255_v33  ;;  %vm5259_vm15 = vweird.f32 %v14249_v27  ;;  %v5264_v6 = vand.u32 2147483648, %v14219_v24 }
 0x786   :  { %v7928_v54 = vpop.eup %7927  ;;  %7939 = vtanh.f32 %v5505_v4  ;;  %v14313_v4 = vadd.f32 1.0, %v7924_v63  ;;  %v5270_v15 = vsub.f32 1.0, %v5269_v29  ;;  %v14381_v2 = vsel %vm14289_vm9, %v14273_v61, %v5216_v39 }
 0x787   :  { %v14304_v14 = vpop.eup %7929  ;;  %v14306_v1 = vadd.f32 1.0, %v7928_v54  ;;  %7941 = vrcp.f32 %v14271_v62  ;;  %v5257_v20 = vadd.f32 %v14249_v27, %v5256_v10  ;;  %v14385_v21 = vsel %vm14324_vm5, %v5235_v48, %v5231_v38 }
 0x788   :  { %v14311_v50 = vpop.eup %7931  ;;  %7943 = vrcp.f32 %v14285_v43  ;;  %vm5258_vm12 = vweird.f32 %v14219_v24  ;;  %v14393_v56 = vsel %vm14340_vm6, %v5250_v28, %v5246_v46  ;;  %vm14401_vm9 = vcmp.eq.f32.partialorder %v5262_v13, 8.507059e+37 }
 0x789   :  { %v14329_v32 = vpop.eup %7933  ;;  %7945 = vrcp.f32 %v14296_v0  ;;  %v5385_v33 = vmul.f32 %v14311_v50, %v14260_v7  ;;  %vm14397_vm8 = vmor %vm5258_vm12, %vm5259_vm15  ;;  %v5271_v24 = vmul.f32 %v14280_v31, %v5270_v15  ;;  %v5277_v53 = vand.u32 2147483647, %v14237_v52 }
 0x78a   :  { %v14344_v59 = vpop.eup %7935  ;;  %7947 = vrcp.f32 %v14306_v1  ;;  %v5284_v60 = vmul.f32 %v14329_v32, %v14262_v19  ;;  %v5279_v29 = vand.u32 2147483648, %v14237_v52  ;;  %v5294_v8 = vand.u32 2147483648, %v14262_v19 }
 0x78b   :  { %v14359_v49 = vpop.eup %7937  ;;  %7949 = vrcp.f32 %v14313_v4  ;;  %v5265_v10 = vor.u32 1.1754944e-38, %v5264_v6  ;;  %v5386_v42 = vsub.f32 1.0, %v5385_v33  ;;  %vm5273_vm13 = vweird.f32 %v14237_v52 }
 0x78c   :  { %v14367_v3 = vpop.eup %7939  ;;  %7951 = vpow2.f32 %v14255_v51  ;;  %v5285_v55 = vsub.f32 1.0, %v5284_v60  ;;  %vm5274_vm14 = vweird.f32 %v14280_v31  ;;  %v5400_v40 = vmul.f32 %v14344_v59, %v14267_v26 }
 0x78d   :  { %v14375_v63 = vpop.eup %7941  ;;  %7953 = vpow2.f32 %v14257_v23  ;;  %v5261_v23 = vsel %vm14397_vm8, %v14249_v27, %v5257_v20  ;;  %v6995_v27 = vmul.f32 -1.442695, %v5343_v16  ;;  %v5272_v38 = vadd.f32 %v14280_v31, %v5271_v24  ;;  %vm14450_vm10 = vmor %vm5273_vm13, %vm5274_vm14 }
 0x78e   :  { %v14388_v54 = vpop.eup %7943  ;;  %v5299_v44 = vmul.f32 %v14375_v63, %v14271_v62  ;;  %v14428_v39 = vsel %vm14401_vm9, %v5265_v10, %v5261_v23  ;;  %vm5288_vm11 = vweird.f32 %v14262_v19  ;;  %v5292_v45 = vand.u32 2147483647, %v14262_v19 }
 0x78f   :  { %v14406_v57 = vpop.eup %7945  ;;  %vm14435_vm5 = vcmp.eq.f32.partialorder %v5277_v53, 8.507059e+37  ;;  %v5280_v16 = vor.u32 1.1754944e-38, %v5279_v29  ;;  %v5295_v46 = vor.u32 1.1754944e-38, %v5294_v8  ;;  %v5307_v20 = vand.u32 2147483647, %v14271_v62 }
 0x790   :  { %v14416_v48 = vpop.eup %7947  ;;  %v5286_v60 = vmul.f32 %v14329_v32, %v5285_v55  ;;  %v5300_v33 = vsub.f32 1.0, %v5299_v44  ;;  %v5387_v61 = vmul.f32 %v14311_v50, %v5386_v42  ;;  %v5309_v23 = vand.u32 2147483648, %v14271_v62 }
 0x791   :  { %v14424_v28 = vpop.eup %7949  ;;  %v5314_v51 = vmul.f32 %v14416_v48, %v14306_v1  ;;  %7955 = vpow2.f32 %v6995_v27  ;;  %v14456_v53 = vadd.f32 1.0, %v14294_v12  ;;  %v5401_v29 = vsub.f32 1.0, %v5400_v40 }
 0x792   :  { %v14433_v13 = vpop.eup %7951  ;;  %v5276_v8 = vsel %vm14450_vm10, %v14280_v31, %v5272_v38  ;;  %vm14461_vm7 = vcmp.eq.f32.partialorder %v5292_v45, 8.507059e+37  ;;  %vm5303_vm6 = vweird.f32 %v14271_v62  ;;  %v14467_v52 = vadd.f32 1.0, %v14304_v14 }
 0x793   :  { %v14440_v6 = vpop.eup %7953  ;;  %vm5389_vm0 = vweird.f32 %v14260_v7  ;;  %v5415_v12 = vmul.f32 %v14388_v54, %v14285_v43  ;;  %vm5289_vm15 = vweird.f32 %v14329_v32  ;;  %v5324_v55 = vand.u32 2147483648, %v14306_v1 }
 0x794   :  { %vm5390_vm12 = vweird.f32 %v14311_v50  ;;  %v5393_v31 = vand.u32 2147483647, %v14260_v7  ;;  %v5287_v44 = vadd.f32 %v14329_v32, %v5286_v60  ;;  %v5301_v42 = vmul.f32 %v14375_v63, %v5300_v33  ;;  %vm14487_vm8 = vmor %vm5288_vm11, %vm5289_vm15 }
 0x795   :  { %v5315_v27 = vsub.f32 1.0, %v5314_v51  ;;  %v5388_v14 = vadd.f32 %v14311_v50, %v5387_v61  ;;  %v14481_v40 = vsel %vm14435_vm5, %v5280_v16, %v5276_v8  ;;  %v5310_v38 = vor.u32 1.1754944e-38, %v5309_v23  ;;  %vm14504_vm11 = vmor %vm5389_vm0, %vm5390_vm12 }
 0x796   :  { %v5395_v45 = vand.u32 2147483648, %v14260_v7  ;;  %v5402_v24 = vmul.f32 %v14344_v59, %v5401_v29  ;;  %vm14491_vm9 = vcmp.eq.f32.partialorder %v5307_v20, 8.507059e+37  ;;  %vm5318_vm13 = vweird.f32 %v14306_v1 }
 0x797   :  { %v5322_v15 = vand.u32 2147483647, %v14306_v1  ;;  %v5416_v16 = vsub.f32 1.0, %v5415_v12  ;;  %v5430_v33 = vmul.f32 %v14406_v57, %v14296_v0  ;;  %v7956_v51 = vpop.eup %7955  ;;  %vm5304_vm14 = vweird.f32 %v14375_v63 }
 0x798   :  { %v5325_v19 = vor.u32 1.1754944e-38, %v5324_v55  ;;  %vm14508_vm5 = vcmp.eq.f32.partialorder %v5393_v31, 8.507059e+37  ;;  %v5408_v23 = vand.u32 2147483647, %v14267_v26  ;;  %v5291_v29 = vsel %vm14487_vm8, %v14329_v32, %v5287_v44  ;;  %vm14540_vm12 = vmor %vm5303_vm6, %vm5304_vm14 }
 0x799   :  { %v5302_v8 = vadd.f32 %v14375_v63, %v5301_v42  ;;  %v5316_v12 = vmul.f32 %v14416_v48, %v5315_v27  ;;  %v5392_v7 = vsel %vm14504_vm11, %v14311_v50, %v5388_v14  ;;  %v5396_v55 = vor.u32 1.1754944e-38, %v5395_v45 }
 0x79a   :  { %v5403_v31 = vadd.f32 %v14344_v59, %v5402_v24  ;;  %vm5404_vm10 = vweird.f32 %v14267_v26  ;;  %vm5405_vm0 = vweird.f32 %v14344_v59  ;;  %vm14524_vm15 = vcmp.eq.f32.partialorder %v5322_v15, 8.507059e+37 }
 0x79b   :  { %v14528_v9 = vadd.f32 1.0, %v7956_v51  ;;  %v5410_v32 = vand.u32 2147483648, %v14267_v26  ;;  %v5417_v44 = vmul.f32 %v14388_v54, %v5416_v16  ;;  %v5431_v42 = vsub.f32 1.0, %v5430_v33 }
 0x79c   :  { %v14534_v50 = vsel %vm14461_vm7, %v5295_v46, %v5291_v29  ;;  %vm5319_vm8 = vweird.f32 %v14416_v48  ;;  %v14547_v26 = vsel %vm14508_vm5, %v5396_v55, %v5392_v7  ;;  %vm14549_vm11 = vcmp.eq.f32.partialorder %v5408_v23, 8.507059e+37  ;;  %vm14557_vm7 = vmor %vm5404_vm10, %vm5405_vm0 }
 0x79d   :  { %v5306_v46 = vsel %vm14540_vm12, %v14375_v63, %v5302_v8  ;;  %v5317_v62 = vadd.f32 %v14416_v48, %v5316_v12  ;;  %v5423_v45 = vand.u32 2147483647, %v14285_v43  ;;  %7957 = vrcp.f32 %v14456_v53  ;;  %vm14581_vm14 = vmor %vm5318_vm13, %vm5319_vm8 }
 0x79e   :  { %v5407_v24 = vsel %vm14557_vm7, %v14344_v59, %v5403_v31  ;;  %v5425_v15 = vand.u32 2147483648, %v14285_v43  ;;  %v5445_v16 = vmul.f32 %v14424_v28, %v14313_v4  ;;  %7959 = vrcp.f32 %v14467_v52 }
 0x79f   :  { %v5411_v63 = vor.u32 1.1754944e-38, %v5410_v32  ;;  %v5418_v33 = vadd.f32 %v14388_v54, %v5417_v44  ;;  %vm5420_vm6 = vweird.f32 %v14388_v54  ;;  %v5432_v51 = vmul.f32 %v14406_v57, %v5431_v42 }
 0x7a0   :  { %v14575_v20 = vsel %vm14491_vm9, %v5310_v38, %v5306_v46  ;;  %vm5419_vm5 = vweird.f32 %v14285_v43  ;;  %v5438_v61 = vand.u32 2147483647, %v14296_v0  ;;  %v5440_v23 = vand.u32 2147483648, %v14296_v0 }
 0x7a1   :  { %v5321_v60 = vsel %vm14581_vm14, %v14416_v48, %v5317_v62  ;;  %v14593_v38 = vsel %vm14549_vm11, %v5411_v63, %v5407_v24  ;;  %vm5434_vm9 = vweird.f32 %v14296_v0  ;;  %v5531_v1 = vrot.slane %v14195_v22, 3  ;;  %vm14597_vm13 = vmor %vm5419_vm5, %vm5420_vm6 }
 0x7a2   :  { %vm14601_vm10 = vcmp.eq.f32.partialorder %v5423_v45, 8.507059e+37  ;;  %v5426_v8 = vor.u32 1.1754944e-38, %v5425_v15  ;;  %v5446_v12 = vsub.f32 1.0, %v5445_v16  ;;  %7961 = vrcp.f32 %v14528_v9 }
 0x7a3   :  { %v14606_v48 = vpop.eup %7957  ;;  %v5422_v7 = vsel %vm14597_vm13, %v14388_v54, %v5418_v33  ;;  %v5433_v55 = vadd.f32 %v14406_v57, %v5432_v51  ;;  %vm5435_vm0 = vweird.f32 %v14406_v57  ;;  %v5532_v31 = vrot.slane %v14201_v30, 3 }
 0x7a4   :  { %v14614_v32 = vpop.eup %7959  ;;  %v14618_v44 = vsel %vm14524_vm15, %v5325_v19, %v5321_v60  ;;  %vm14620_vm12 = vcmp.eq.f32.partialorder %v5438_v61, 8.507059e+37  ;;  %v5441_v27 = vor.u32 1.1754944e-38, %v5440_v23  ;;  %vm5450_vm8 = vweird.f32 %v14424_v28  ;;  %vm14635_vm15 = vmor %vm5434_vm9, %vm5435_vm0 }
 0x7a5   :  { %17104 = vst [vmem:[#allocation12_spill] sm:$0xff] %v14618_v44  ;;  %v5455_v54 = vand.u32 2147483648, %v14313_v4  ;;  %v5533_v14 = vrot.slane %v14204_v36, 3  ;;  %v17107_v46 = vrot.slane %v14193_v11, 3  ;;  %v6999_v10 = vmul.f32 -1.442695, %v5531_v1 }
 0x7a6   :  { %v14631_v17 = vsel %vm14601_vm10, %v5426_v8, %v5422_v7  ;;  %v5447_v45 = vmul.f32 %v14424_v28, %v5446_v12  ;;  %vm5449_vm11 = vweird.f32 %v14313_v4  ;;  %v5453_v24 = vand.u32 2147483647, %v14313_v4 }
 0x7a7   :  { %v6998_v62 = vmul.f32 -1.442695, %v17107_v46  ;;  %v5460_v15 = vmul.f32 %v14606_v48, %v14456_v53  ;;  %v5437_v16 = vsel %vm14635_vm15, %v14406_v57, %v5433_v55  ;;  %v5475_v0 = vmul.f32 %v14614_v32, %v14467_v52  ;;  %vm14687_vm5 = vmor %vm5449_vm11, %vm5450_vm8 }
 0x7a8   :  { %v5506_v63 = vrot.slane %v14193_v11, 2  ;;  %v7000_v33 = vmul.f32 -1.442695, %v5532_v31  ;;  %v14650_v51 = vpop.eup %7961  ;;  %v5468_v59 = vand.u32 2147483647, %v14456_v53  ;;  %v5507_v61 = vrot.slane %v14195_v22, 2 }
 0x7a9   :  { %v5534_v23 = vrot.slane %v14214_v18, 3  ;;  %7963 = vpow2.f32 %v6998_v62  ;;  %v5456_v60 = vor.u32 1.1754944e-38, %v5455_v54  ;;  %v5470_v1 = vand.u32 2147483648, %v14456_v53 }
 0x7aa   :  { %7965 = vpow2.f32 %v6999_v10  ;;  %v7001_v57 = vmul.f32 -1.442695, %v5533_v14  ;;  %v14658_v29 = vsel %vm14620_vm12, %v5441_v27, %v5437_v16  ;;  %v5461_v11 = vsub.f32 1.0, %v5460_v15 }
 0x7ab   :  { %7967 = vpow2.f32 %v7000_v33  ;;  %v14661_v43 = vadd.f32 1.0, %v14433_v13  ;;  %vm14663_vm7 = vcmp.eq.f32.partialorder %v5453_v24, 8.507059e+37  ;;  %v5476_v22 = vsub.f32 1.0, %v5475_v0 }
 0x7ac   :  { %v5490_v12 = vmul.f32 %v14650_v51, %v14528_v9  ;;  %7969 = vtanh.f32 %v5506_v63  ;;  %v14670_v7 = vadd.f32 1.0, %v14440_v6  ;;  %v5448_v55 = vadd.f32 %v14424_v28, %v5447_v45 }
 0x7ad   :  { %vm5464_vm6 = vweird.f32 %v14456_v53  ;;  %7971 = vtanh.f32 %v5507_v61  ;;  %v5535_v13 = vrot.slane %v14225_v41, 3  ;;  %v7002_v31 = vmul.f32 -1.442695, %v5534_v23 }
 0x7ae   :  { %v14675_v42 = vor.u32 1.1754944e-38, %v5470_v1  ;;  %vm5479_vm14 = vweird.f32 %v14467_v52  ;;  %v5483_v27 = vand.u32 2147483647, %v14467_v52  ;;  %7973 = vpow2.f32 %v7001_v57 }
 0x7af   :  { %v7964_v54 = vpop.eup %7963  ;;  %v5462_v14 = vmul.f32 %v14606_v48, %v5461_v11  ;;  %v5485_v6 = vand.u32 2147483648, %v14467_v52  ;;  %v5508_v46 = vrot.slane %v14201_v30, 2  ;;  %7975 = vrcp.f32 %v14661_v43 }
 0x7b0   :  { %v7966_v62 = vpop.eup %7965  ;;  %v5477_v19 = vmul.f32 %v14614_v32, %v5476_v22  ;;  %v5491_v45 = vsub.f32 1.0, %v5490_v12  ;;  %v14692_v24 = vadd.f32 1.0, %v7964_v54  ;;  %7977 = vrcp.f32 %v14670_v7 }
 0x7b1   :  { %v7968_v15 = vpop.eup %7967  ;;  %v5452_v30 = vsel %vm14687_vm5, %v14424_v28, %v5448_v55  ;;  %7979 = vpow2.f32 %v7002_v31  ;;  %v7003_v16 = vmul.f32 -1.442695, %v5535_v13  ;;  %v14698_v0 = vadd.f32 1.0, %v7966_v62 }
 0x7b2   :  { %v14700_v4 = vpop.eup %7969  ;;  %vm14702_vm9 = vcmp.eq.f32.partialorder %v5468_v59, 8.507059e+37  ;;  %vm5494_vm13 = vweird.f32 %v14528_v9  ;;  %v5498_v33 = vand.u32 2147483647, %v14528_v9  ;;  %v5509_v61 = vrot.slane %v14204_v36, 2 }
 0x7b3   :  { %7981 = vrcp.f32 %v14692_v24  ;;  %v14710_v23 = vpop.eup %7971  ;;  %vm5465_vm10 = vweird.f32 %v14606_v48  ;;  %vm5480_vm0 = vweird.f32 %v14614_v32  ;;  %v14714_v28 = vadd.f32 1.0, %v7968_v15 }
 0x7b4   :  { %7983 = vrcp.f32 %v14698_v0  ;;  %v7974_v59 = vpop.eup %7973  ;;  %v5463_v1 = vadd.f32 %v14606_v48, %v5462_v14  ;;  %v5478_v57 = vadd.f32 %v14614_v32, %v5477_v19  ;;  %v5492_v11 = vmul.f32 %v14650_v51, %v5491_v45  ;;  %vm14737_vm8 = vmor %vm5464_vm6, %vm5465_vm10 }
 0x7b5   :  { %7985 = vtanh.f32 %v5508_v46  ;;  %v14720_v36 = vpop.eup %7975  ;;  %v14724_v22 = vsel %vm14663_vm7, %v5456_v60, %v5452_v30  ;;  %vm14726_vm12 = vcmp.eq.f32.partialorder %v5483_v27, 8.507059e+37  ;;  %v5510_v55 = vrot.slane %v14214_v18, 2  ;;  %vm14749_vm15 = vmor %vm5479_vm14, %vm5480_vm0 }
 0x7b6   :  { %7987 = vpow2.f32 %v7003_v16  ;;  %v14731_v13 = vpop.eup %7977  ;;  %v5500_v60 = vand.u32 2147483648, %v14528_v9  ;;  %v5511_v8 = vrot.slane %v14225_v41, 2  ;;  %v5577_v27 = vmul.f32 %v14720_v36, %v14661_v43 }
 0x7b7   :  { %7989 = vtanh.f32 %v5509_v61  ;;  %v7980_v18 = vpop.eup %7979  ;;  %v5486_v53 = vor.u32 1.1754944e-38, %v5485_v6  ;;  %vm5495_vm11 = vweird.f32 %v14650_v51  ;;  %v5592_v14 = vmul.f32 %v14731_v13, %v14670_v7 }
 0x7b8   :  { %7991 = vrcp.f32 %v14714_v28  ;;  %v5467_v46 = vsel %vm14737_vm8, %v14606_v48, %v5463_v1  ;;  %v5482_v52 = vsel %vm14749_vm15, %v14614_v32, %v5478_v57  ;;  %v5493_v62 = vadd.f32 %v14650_v51, %v5492_v11  ;;  %vm14793_vm6 = vmor %vm5494_vm13, %vm5495_vm11 }
 0x7b9   :  { %v14757_v41 = vpop.eup %7981  ;;  %v5578_v6 = vsub.f32 1.0, %v5577_v27  ;;  %7993 = vtanh.f32 %v5510_v55  ;;  %v14768_v19 = vadd.f32 1.0, %v7974_v59  ;;  %v5593_v45 = vsub.f32 1.0, %v5592_v14 }
 0x7ba   :  { %v14766_v10 = vpop.eup %7983  ;;  %v5607_v15 = vmul.f32 %v14757_v41, %v14692_v24  ;;  %vm14774_vm7 = vcmp.eq.f32.partialorder %v5498_v33, 8.507059e+37  ;;  %v5501_v16 = vor.u32 1.1754944e-38, %v5500_v60  ;;  %7995 = vtanh.f32 %v5511_v8 }
 0x7bb   :  { %v14772_v30 = vpop.eup %7985  ;;  %v14778_v32 = vadd.f32 1.0, %v7980_v18  ;;  %v14783_v59 = vsel %vm14702_vm9, %v14675_v42, %v5467_v46  ;;  %v14787_v1 = vsel %vm14726_vm12, %v5486_v53, %v5482_v52  ;;  %v5585_v57 = vand.u32 2147483647, %v14661_v43 }
 0x7bc   :  { %v7988_v61 = vpop.eup %7987  ;;  %v5587_v11 = vand.u32 2147483648, %v14661_v43  ;;  %v5497_v42 = vsel %vm14793_vm6, %v14650_v51, %v5493_v62  ;;  %v5579_v63 = vmul.f32 %v14720_v36, %v5578_v6  ;;  %vm5581_vm14 = vweird.f32 %v14661_v43 }
 0x7bd   :  { %v14799_v55 = vpop.eup %7989  ;;  %v5622_v9 = vmul.f32 %v14766_v10, %v14698_v0  ;;  %v5594_v31 = vmul.f32 %v14731_v13, %v5593_v45  ;;  %vm5596_vm5 = vweird.f32 %v14670_v7  ;;  %v5608_v60 = vsub.f32 1.0, %v5607_v15 }
 0x7be   :  { %v14808_v12 = vpop.eup %7991  ;;  %7997 = vrcp.f32 %v14768_v19  ;;  %v14813_v8 = vadd.f32 1.0, %v7988_v61  ;;  %v5600_v51 = vand.u32 2147483647, %v14670_v7  ;;  %v5602_v27 = vand.u32 2147483648, %v14670_v7 }
 0x7bf   :  { %7999 = vrcp.f32 %v14778_v32  ;;  %v14818_v18 = vpop.eup %7993  ;;  %v14822_v54 = vsel %vm14774_vm7, %v5501_v16, %v5497_v42  ;;  %vm14824_vm9 = vcmp.eq.f32.partialorder %v5585_v57, 8.507059e+37  ;;  %v5588_v14 = vor.u32 1.1754944e-38, %v5587_v11 }
 0x7c0   :  { %17126 = vst [vmem:[#allocation10_spill] sm:$0xff] %v14818_v18  ;;  %v5617_v46 = vand.u32 2147483648, %v14692_v24  ;;  %v14829_v52 = vpop.eup %7995  ;;  %v5580_v62 = vadd.f32 %v14720_v36, %v5579_v63  ;;  %vm5582_vm13 = vweird.f32 %v14720_v36  ;;  %v5623_v6 = vsub.f32 1.0, %v5622_v9 }
 0x7c1   :  { %17129 = vst [vmem:[#allocation11_spill] sm:$0xff] %v14829_v52  ;;  %v5637_v45 = vmul.f32 %v14808_v12, %v14714_v28  ;;  %v5595_v15 = vadd.f32 %v14731_v13, %v5594_v31  ;;  %vm5597_vm10 = vweird.f32 %v14731_v13  ;;  %v5609_v48 = vmul.f32 %v14757_v41, %v5608_v60  ;;  %vm14849_vm8 = vmor %vm5581_vm14, %vm5582_vm13 }
 0x7c2   :  { %v5632_v16 = vand.u32 2147483648, %v14698_v0  ;;  %vm14839_vm0 = vcmp.eq.f32.partialorder %v5600_v51, 8.507059e+37  ;;  %v5603_v33 = vor.u32 1.1754944e-38, %v5602_v27  ;;  %vm5611_vm12 = vweird.f32 %v14692_v24  ;;  %vm14866_vm15 = vmor %vm5596_vm5, %vm5597_vm10 }
 0x7c3   :  { %8001 = vrcp.f32 %v14813_v8  ;;  %v5615_v42 = vand.u32 2147483647, %v14692_v24  ;;  %v5630_v63 = vand.u32 2147483647, %v14698_v0  ;;  %v5647_v9 = vand.u32 2147483648, %v14714_v28 }
 0x7c4   :  { %v14845_v57 = vpop.eup %7997  ;;  %v5662_v31 = vand.u32 2147483648, %v14768_v19  ;;  %v5584_v51 = vsel %vm14849_vm8, %v14720_v36, %v5580_v62  ;;  %v14870_v27 = vor.u32 1.1754944e-38, %v5617_v46  ;;  %v5624_v52 = vmul.f32 %v14766_v10, %v5623_v6 }
 0x7c5   :  { %v14857_v60 = vpop.eup %7999  ;;  %v5638_v44 = vsub.f32 1.0, %v5637_v45  ;;  %v5599_v18 = vsel %vm14866_vm15, %v14731_v13, %v5595_v15  ;;  %v14877_v11 = vadd.f32 %v14757_v41, %v5609_v48  ;;  %vm5612_vm11 = vweird.f32 %v14757_v41 }
 0x7c6   :  { %v14880_v36 = vor.u32 1.1754944e-38, %v5632_v16  ;;  %vm5627_vm7 = vweird.f32 %v14766_v10  ;;  %v5645_v7 = vand.u32 2147483647, %v14714_v28  ;;  %v5652_v46 = vmul.f32 %v14845_v57, %v14768_v19  ;;  %vm14906_vm14 = vmor %vm5611_vm12, %vm5612_vm11 }
 0x7c7   :  { %v5660_v62 = vand.u32 2147483647, %v14768_v19  ;;  %v14889_v6 = vsel %vm14824_vm9, %v5588_v14, %v5584_v51  ;;  %vm5626_vm6 = vweird.f32 %v14698_v0  ;;  %v14892_v13 = vor.u32 1.1754944e-38, %v5647_v9 }
 0x7c8   :  { %v14894_v45 = vor.u32 1.1754944e-38, %v5662_v31  ;;  %v5667_v15 = vmul.f32 %v14857_v60, %v14778_v32  ;;  %v14902_v16 = vsel %vm14839_vm0, %v5603_v33, %v5599_v18  ;;  %v5625_v14 = vadd.f32 %v14766_v10, %v5624_v52  ;;  %vm14983_vm11 = vmor %vm5626_vm6, %vm5627_vm7 }
 0x7c9   :  { %v14898_v48 = vpop.eup %8001  ;;  %v5639_v9 = vmul.f32 %v14808_v12, %v5638_v44  ;;  %v5696_v31 = vmul.f32 %v14547_v26, %v14029_v5  ;;  %v5614_v61 = vsel %vm14906_vm14, %v14757_v41, %v14877_v11  ;;  %vm14918_vm5 = vcmp.eq.f32.partialorder %v5615_v42, 8.507059e+37 }
 0x7ca   :  { %vm5642_vm9 = vweird.f32 %v14808_v12  ;;  %v5682_v24 = vmul.f32 %v14898_v48, %v14813_v8  ;;  %v5697_v44 = vmul.f32 %v14593_v38, %v14036_v35  ;;  %v5698_v5 = vmul.f32 %v14631_v17, %v14038_v34 }
 0x7cb   :  { %v5653_v26 = vsub.f32 1.0, %v5652_v46  ;;  %vm5657_vm13 = vweird.f32 %v14845_v57  ;;  %v5675_v41 = vand.u32 2147483647, %v14778_v32  ;;  %v5699_v52 = vmul.f32 %v14658_v29, %v14045_v25 }
 0x7cc   :  { %v5704_v33 = vmul.f32 %v14359_v49, %v14381_v2  ;;  %vm14935_vm10 = vcmp.eq.f32.partialorder %v5630_v63, 8.507059e+37  ;;  %vm5641_vm0 = vweird.f32 %v14714_v28  ;;  %v5668_v35 = vsub.f32 1.0, %v5667_v15  ;;  %v17149_v63 = vld [vmem:[#allocation11_spill] sm:$0xff] }
 0x7cd   :  { %v5700_v34 = vmul.f32 %v14724_v22, %v14054_v37  ;;  %v5705_v38 = vmul.f32 %v14367_v3, %v14385_v21  ;;  %v5706_v17 = vmul.f32 %v14700_v4, %v14393_v56  ;;  %vm5656_vm12 = vweird.f32 %v14768_v19  ;;  %vm15022_vm6 = vmor %vm5641_vm0, %vm5642_vm9 }
 0x7ce   :  { %v5683_v25 = vsub.f32 1.0, %v5682_v24  ;;  %v5701_v49 = vmul.f32 %v14783_v59, %v14068_v58  ;;  %v5707_v2 = vmul.f32 %v14710_v23, %v14428_v39  ;;  %v14951_v29 = vadd.f32 %v5704_v33, %v5696_v31  ;;  %v17142_v58 = vld [vmem:[#allocation13_spill] sm:$0xff] }
 0x7cf   :  { %vm5671_vm8 = vweird.f32 %v14778_v32  ;;  %v5702_v37 = vmul.f32 %v14787_v1, %v14079_v47  ;;  %v5708_v3 = vmul.f32 %v14772_v30, %v14481_v40  ;;  %v14958_v21 = vadd.f32 %v5705_v38, %v5697_v44  ;;  %v17145_v40 = vld [vmem:[#allocation10_spill] sm:$0xff] }
 0x7d0   :  { %v14960_v56 = vadd.f32 %v5706_v17, %v5698_v5  ;;  %v5654_v4 = vmul.f32 %v14845_v57, %v5653_v26  ;;  %v5703_v22 = vmul.f32 %v14822_v54, %v17142_v58  ;;  %v5709_v39 = vmul.f32 %v14799_v55, %v14534_v50  ;;  %v17148_v54 = vld [vmem:[#allocation12_spill] sm:$0xff] }
 0x7d1   :  { %v14967_v23 = vadd.f32 %v5707_v2, %v5699_v52  ;;  %vm14969_vm15 = vcmp.eq.f32.partialorder %v5645_v7, 8.507059e+37  ;;  %v5669_v47 = vmul.f32 %v14857_v60, %v5668_v35  ;;  %v5710_v30 = vmul.f32 %v17145_v40, %v14575_v20 }
 0x7d2   :  { %v14976_v1 = vadd.f32 %v5708_v3, %v5700_v34  ;;  %8003 = vtanh.f32 %v14951_v29  ;;  %v5684_v55 = vmul.f32 %v14898_v48, %v5683_v25  ;;  %v5711_v51 = vmul.f32 %v17149_v63, %v17148_v54 }
 0x7d3   :  { %v14990_v43 = vadd.f32 %v5709_v39, %v5701_v49  ;;  %8005 = vtanh.f32 %v14958_v21  ;;  %v5629_v20 = vsel %vm14983_vm11, %v14766_v10, %v5625_v14  ;;  %v5640_v11 = vadd.f32 %v14808_v12, %v5639_v9 }
 0x7d4   :  { %vm14997_vm14 = vcmp.eq.f32.partialorder %v5660_v62, 8.507059e+37  ;;  %v15001_v7 = vadd.f32 %v5710_v30, %v5702_v37  ;;  %8007 = vtanh.f32 %v14960_v56  ;;  %v5619_v46 = vsel %vm14918_vm5, %v14870_v27, %v5614_v61 }
 0x7d5   :  { %v5677_v15 = vand.u32 2147483648, %v14778_v32  ;;  %v15008_v53 = vadd.f32 %v5711_v51, %v5703_v22  ;;  %8009 = vtanh.f32 %v14967_v23  ;;  %v5655_v10 = vadd.f32 %v14845_v57, %v5654_v4 }
 0x7d6   :  { %v5670_v62 = vadd.f32 %v14857_v60, %v5669_v47  ;;  %vm5672_vm7 = vweird.f32 %v14857_v60  ;;  %8011 = vtanh.f32 %v14976_v1  ;;  %v5634_v14 = vsel %vm14935_vm10, %v14880_v36, %v5629_v20  ;;  %vm15036_vm10 = vmor %vm5656_vm12, %vm5657_vm13 }
 0x7d7   :  { %v5685_v9 = vadd.f32 %v14898_v48, %v5684_v55  ;;  %vm5687_vm5 = vweird.f32 %v14898_v48  ;;  %8013 = vtanh.f32 %v14990_v43  ;;  %v5644_v61 = vsel %vm15022_vm6, %v14808_v12, %v5640_v11  ;;  %vm15045_vm9 = vmor %vm5671_vm8, %vm5672_vm7 }
 0x7d8   :  { %v8004_v31 = vpop.eup %8003  ;;  %v5690_v36 = vand.u32 2147483647, %v14813_v8  ;;  %v5692_v18 = vand.u32 2147483648, %v14813_v8  ;;  %8015 = vtanh.f32 %v15001_v7  ;;  %vm15049_vm0 = vcmp.eq.f32.partialorder %v5675_v41, 8.507059e+37 }
 0x7d9   :  { %v8006_v24 = vpop.eup %8005  ;;  %vm5686_vm13 = vweird.f32 %v14813_v8  ;;  %8017 = vtanh.f32 %v15008_v53  ;;  %v5728_v19 = vmul.f32 %v8004_v31, %v14889_v6  ;;  %v5659_v26 = vsel %vm15036_vm10, %v14845_v57, %v5655_v10 }
 0x7da   :  { %v8008_v5 = vpop.eup %8007  ;;  %v5674_v32 = vsel %vm15045_vm9, %v14857_v60, %v5670_v62  ;;  %v5678_v52 = vor.u32 1.1754944e-38, %v5677_v15  ;;  %vm15064_vm12 = vmor %vm5686_vm13, %vm5687_vm5  ;;  %v5729_v8 = vmul.f32 %v8006_v24, %v14902_v16  ;;  %v5649_v6 = vsel %vm14969_vm15, %v14892_v13, %v5644_v61 }
 0x7db   :  { %v8010_v33 = vpop.eup %8009  ;;  %v5689_v57 = vsel %vm15064_vm12, %v14898_v48, %v5685_v9  ;;  %v5730_v42 = vmul.f32 %v8008_v5, %v5619_v46  ;;  %5736 = vst [vmem:[#allocation3 + $0x6] sm:$0x1] %v5728_v19  ;;  %v5760_v60 = vpack.c.bf16 %v5728_v19, %v5728_v19  ;;  %vm5691_vm8 = vcmp.eq.f32.partialorder %v5690_v36, 8.507059e+37 }
 0x7dc   :  { %v8012_v35 = vpop.eup %8011  ;;  %v5693_v34 = vor.u32 1.1754944e-38, %v5692_v18  ;;  %v5731_v38 = vmul.f32 %v8010_v33, %v5634_v14  ;;  %5737 = vst [vmem:[#allocation3 + $0xe] sm:$0x1] %v5729_v8  ;;  %v5761_v17 = vpack.c.bf16 %v5729_v8, %v5729_v8  ;;  %v5664_v16 = vsel %vm14997_vm14, %v14894_v45, %v5659_v26 }
 0x7dd   :  { %v8014_v25 = vpop.eup %8013  ;;  %v5679_v13 = vsel %vm15049_vm0, %v5678_v52, %v5674_v32  ;;  %v5732_v49 = vmul.f32 %v8012_v35, %v5649_v6  ;;  %5738 = vst [vmem:[#allocation3 + $0x16] sm:$0x1] %v5730_v42  ;;  %v5762_v48 = vpack.c.bf16 %v5730_v42, %v5730_v42  ;;  %v5776_v47 = vunpack.c.l.b16 %v5760_v60 }
 0x7de   :  { %v8016_v2 = vpop.eup %8015  ;;  %v5694_v37 = vsel %vm5691_vm8, %v5693_v34, %v5689_v57  ;;  %v5733_v3 = vmul.f32 %v8014_v25, %v5664_v16  ;;  %5739 = vst [vmem:[#allocation3 + $0x1e] sm:$0x1] %v5731_v38  ;;  %v5763_v4 = vpack.c.bf16 %v5731_v38, %v5731_v38  ;;  %v5777_v58 = vunpack.c.l.b16 %v5761_v17 }
 0x7df   :  { %v8018_v22 = vpop.eup %8017  ;;  %v5734_v39 = vmul.f32 %v8016_v2, %v5679_v13  ;;  %5740 = vst [vmem:[#allocation3 + $0x26] sm:$0x1] %v5732_v49  ;;  %v5764_v59 = vpack.c.bf16 %v5732_v49, %v5732_v49  ;;  %v5778_v40 = vunpack.c.l.b16 %v5762_v48  ;;  %vm17162_vm15 = vcmask 1045509  }
 0x7e0   :  { %v5735_v30 = vmul.f32 %v8018_v22, %v5694_v37  ;;  %5741 = vst [vmem:[#allocation3 + $0x2e] sm:$0x1] %v5733_v3  ;;  %v5765_v45 = vpack.c.bf16 %v5733_v3, %v5733_v3  ;;  %v5779_v50 = vunpack.c.l.b16 %v5763_v4  ;;  %v5784_v55 = vrot.slane %v5777_v58, 7  ;;  %vm17166_vm6 = vmmov %vm17162_vm15 }
 0x7e1   :  { %5742 = vst [vmem:[#allocation3 + $0x36] sm:$0x1] %v5734_v39  ;;  %v5766_v54 = vpack.c.bf16 %v5734_v39, %v5734_v39  ;;  %v5780_v63 = vunpack.c.l.b16 %v5764_v59  ;;  %v5786_v51 = vrot.slane %v5778_v40, 6  ;;  %vm17163_vm11 = vcmask 1046534   ;;  %vm17169_vm9 = vmmov %vm17166_vm6 }
 0x7e2   :  { %5743 = vst [vmem:[#allocation3 + $0x3e] sm:$0x1] %v5735_v30  ;;  %v5767_v20 = vpack.c.bf16 %v5735_v30, %v5735_v30  ;;  %v5781_v11 = vunpack.c.l.b16 %v5765_v45  ;;  %v5785_v0 = vsel %vm723_vm2, %v5784_v55, %v5776_v47  ;;  %v5788_v46 = vrot.slane %v5779_v50, 5  ;;  %vm17167_vm5 = vmmov %vm17163_vm11 }
 0x7e3   :  { %v5782_v15 = vunpack.c.l.b16 %v5766_v54  ;;  %v5787_v10 = vsel %vm719_vm1, %v5786_v51, %v5785_v0  ;;  %v5790_v62 = vrot.slane %v5780_v63, 4  ;;  %vm17164_vm14 = vcmask 1047559   ;;  %v5745_v54 = vld [vmem:[#allocation2 + $0x7] ss:$8 sm:$0xf] }
 0x7e4   :  { %v5783_v14 = vunpack.c.l.b16 %v5767_v20  ;;  %v5789_v27 = vsel %vm725_vm3, %v5788_v46, %v5787_v10  ;;  %v5792_v9 = vrot.slane %v5781_v11, 3  ;;  %vm17165_vm7 = vcmask 1040384   ;;  %v5747_v63 = vld [vmem:[#allocation2 + $0x27] ss:$8 sm:$0xf] }
 0x7e5   :  { %v5791_v31 = vsel %vm731_vm4, %v5790_v62, %v5789_v27  ;;  %v5794_v61 = vrot.slane %v5782_v15, 2  ;;  %vm17168_vm10 = vcmask 1046528   ;;  %vm17170_vm0 = vcmask 1041408   ;;  %v5749_v0 = vld [vmem:[#allocation2 + $0x47] ss:$8 sm:$0xf] }
 0x7e6   :  { %v5793_v28 = vsel %vm17162_vm15, %v5792_v9, %v5791_v31  ;;  %v5796_v36 = vrot.slane %v5783_v14, 1  ;;  %vm17171_vm13 = vcmask 1042433   ;;  %vm17172_vm12 = vcmask 1043458   ;;  %vm17174_vm15 = vmmov %vm17167_vm5  ;;  %v5751_v27 = vld [vmem:[#allocation2 + $0x67] ss:$8 sm:$0xf] }
 0x7e7   :  { %v5795_v18 = vsel %vm17163_vm11, %v5794_v61, %v5793_v28  ;;  %vm17173_vm8 = vcmask 1044483   ;;  %vm17175_vm11 = vcmask 1045508   ;;  %v5753_v61 = vld [vmem:[#allocation2 + $0x87] ss:$8 sm:$0xf] }
 0x7e8   :  { %v5797_v24 = vsel %vm17164_vm14, %v5796_v36, %v5795_v18  ;;  %vm17176_vm14 = vmmov %vm17168_vm10 }
 0x7e9   :  { %v5798_v44 = vpack.c.b16 %v5797_v24, %v5797_v24  ;;  %v5755_v24 = vld [vmem:[#allocation2 + $0xa7] ss:$8 sm:$0xf] }
 0x7eb   :  { %5808 = vmatmul.bf16.vlgmr.msra.gmra.mxu0 %v5798_v44  ;;  %5821 = vmatmul.bf16.vlgmr.msra.gmra.mxu1 %v5798_v44 }
 0x7ec   :  { %5834 = vmatmul.bf16.vlgmr.msra.gmra.mxu2 %v5798_v44  ;;  %5847 = vmatmul.bf16.vlgmr.msra.gmra.mxu3 %v5798_v44  ;;  %v5757_v44 = vld [vmem:[#allocation2 + $0xc7] ss:$8 sm:$0xf] }
 0x868   :  { %v5809_v12 = vpop.f32.mrf.mxu0  ;;  %v5822_v19 = vpop.f32.mrf.mxu1 }
 0x869   :  { %v5856_v5 = vrot.slane %v5822_v19, 7 }
 0x86b   :  { %v5859_v26 = vsel %vm17165_vm7, %v5809_v12, %v5856_v5  ;;  %v5862_v32 = vsel %vm723_vm2, %v5809_v12, %v5856_v5  ;;  %v5866_v52 = vsel %vm719_vm1, %v5809_v12, %v5856_v5  ;;  %v5870_v41 = vsel %vm725_vm3, %v5809_v12, %v5856_v5 }
 0x86c   :  { %v5874_v8 = vsel %vm731_vm4, %v5809_v12, %v5856_v5  ;;  %v5878_v33 = vsel %vm17166_vm6, %v5809_v12, %v5856_v5  ;;  %v5882_v6 = vsel %vm17167_vm5, %v5809_v12, %v5856_v5  ;;  %v5886_v57 = vsel %vm17168_vm10, %v5856_v5, %v5809_v12 }
 0x86f   :  { %v5835_v42 = vpop.f32.mrf.mxu2  ;;  %v5848_v60 = vpop.f32.mrf.mxu3 }
 0x870   :  { %v5857_v35 = vrot.slane %v5835_v42, 6  ;;  %v5858_v34 = vrot.slane %v5848_v60, 5  ;;  %v5811_v38 = vpop.f32.mrf.mxu0  ;;  %v5824_v17 = vpop.f32.mrf.mxu1 }
 0x872   :  { %v5860_v25 = vsel %vm719_vm1, %v5857_v35, %v5858_v34  ;;  %v5863_v16 = vsel %vm725_vm3, %v5857_v35, %v5858_v34  ;;  %v5867_v13 = vsel %vm731_vm4, %v5857_v35, %v5858_v34  ;;  %v5871_v49 = vsel %vm17169_vm9, %v5857_v35, %v5858_v34  ;;  %vm17177_vm1 = vmmov %vm17165_vm7 }
 0x873   :  { %v5861_v48 = vsel %vm17170_vm0, %v5859_v26, %v5860_v25  ;;  %v5864_v2 = vsel %vm17171_vm13, %v5862_v32, %v5863_v16  ;;  %v5868_v37 = vsel %vm17172_vm12, %v5866_v52, %v5867_v13  ;;  %v5872_v3 = vsel %vm17173_vm8, %v5870_v41, %v5871_v49 }
 0x874   :  { %v5875_v4 = vsel %vm17174_vm15, %v5857_v35, %v5858_v34  ;;  %v5879_v22 = vsel %vm17176_vm14, %v5858_v34, %v5857_v35  ;;  %v5883_v39 = vsel %vm17177_vm1, %v5857_v35, %v5858_v34  ;;  %v5887_v59 = vsel %vm723_vm2, %v5857_v35, %v5858_v34 }
 0x875   :  { %v5876_v58 = vsel %vm17175_vm11, %v5874_v8, %v5875_v4  ;;  %v5865_v47 = vrot.slane %v5864_v2, 1  ;;  %vm17178_vm3 = vcmask 1046533   ;;  %vm17179_vm4 = vcmask 1045504   ;;  %v5759_v8 = vld [vmem:[#allocation2 + $0xe7] ss:$8 sm:$0xf] }
 0x876   :  { %v5880_v40 = vsel %vm17178_vm3, %v5878_v33, %v5879_v22  ;;  %v5884_v30 = vsel %vm17179_vm4, %v5883_v39, %v5882_v6  ;;  %vm17180_vm7 = vcmask 1046529   ;;  %v5869_v51 = vrot.slane %v5868_v37, 2 }
 0x877   :  { %v5888_v45 = vsel %vm17180_vm7, %v5887_v59, %v5886_v57  ;;  %v5837_v50 = vpop.f32.mrf.mxu2  ;;  %v5850_v55 = vpop.f32.mrf.mxu3  ;;  %v15111_v20 = vadd.f32 %v5861_v48, %v5745_v54  ;;  %v15113_v11 = vadd.f32 %v5865_v47, %v5747_v63  ;;  %v5873_v46 = vrot.slane %v5872_v3, 3 }
 0x878   :  { %v15115_v15 = vadd.f32 %v5869_v51, %v5749_v0  ;;  %v5877_v62 = vrot.slane %v5876_v58, 4  ;;  %v5881_v9 = vrot.slane %v5880_v40, 5  ;;  %v5885_v28 = vrot.slane %v5884_v30, 6 }
 0x879   :  { %v7004_v10 = vmul.f32 -1.442695, %v15111_v20  ;;  %v7005_v14 = vmul.f32 -1.442695, %v15113_v11  ;;  %v15119_v31 = vadd.f32 %v5873_v46, %v5751_v27  ;;  %v5889_v5 = vrot.slane %v5888_v45, 7 }
 0x87a   :  { %v7006_v36 = vmul.f32 -1.442695, %v15115_v15  ;;  %v15122_v18 = vadd.f32 %v5877_v62, %v5753_v61  ;;  %v15124_v12 = vadd.f32 %v5881_v9, %v5755_v24  ;;  %v15127_v26 = vadd.f32 %v5885_v28, %v5757_v44 }
 0x87b   :  { %8019 = vpow2.f32 %v7004_v10  ;;  %v7007_v19 = vmul.f32 -1.442695, %v15119_v31  ;;  %v15131_v6 = vadd.f32 %v5889_v5, %v5759_v8  ;;  %v6066_v4 = vrot.slane %v15111_v20, 1 }
 0x87c   :  { %8021 = vpow2.f32 %v7005_v14  ;;  %v7008_v32 = vmul.f32 -1.442695, %v15122_v18  ;;  %v7009_v33 = vmul.f32 -1.442695, %v15124_v12  ;;  %v7010_v57 = vmul.f32 -1.442695, %v15127_v26 }
 0x87d   :  { %8023 = vpow2.f32 %v7006_v36  ;;  %v7011_v34 = vmul.f32 -1.442695, %v15131_v6  ;;  %v6067_v58 = vrot.slane %v15113_v11, 1  ;;  %v6068_v22 = vrot.slane %v15115_v15, 1 }
 0x87e   :  { %8025 = vpow2.f32 %v7007_v19  ;;  %v6069_v39 = vrot.slane %v15119_v31, 1  ;;  %v6070_v40 = vrot.slane %v15122_v18, 1  ;;  %v6071_v55 = vrot.slane %v15124_v12, 1 }
 0x87f   :  { %8027 = vpow2.f32 %v7008_v32  ;;  %v6072_v54 = vrot.slane %v15127_v26, 1  ;;  %v6073_v63 = vrot.slane %v15131_v6, 1  ;;  %v7012_v51 = vmul.f32 -1.442695, %v6066_v4 }
 0x880   :  { %8029 = vpow2.f32 %v7009_v33  ;;  %v7013_v0 = vmul.f32 -1.442695, %v6067_v58  ;;  %v7014_v46 = vmul.f32 -1.442695, %v6068_v22  ;;  %v15173_v10 = vmul.f32 -1.442695, %v6069_v39 }
 0x881   :  { %v8020_v52 = vpop.eup %8019  ;;  %8031 = vpow2.f32 %v7010_v57  ;;  %v15181_v61 = vmul.f32 -1.442695, %v6070_v40  ;;  %v15185_v24 = vmul.f32 -1.442695, %v6071_v55  ;;  %v15190_v5 = vmul.f32 -1.442695, %v6072_v54 }
 0x882   :  { %v8022_v41 = vpop.eup %8021  ;;  %v15134_v42 = vadd.f32 1.0, %v8020_v52  ;;  %v15192_v32 = vmul.f32 -1.442695, %v6073_v63 }
 0x883   :  { %v8024_v60 = vpop.eup %8023  ;;  %v15136_v35 = vadd.f32 1.0, %v8022_v41 }
 0x884   :  { %v8026_v38 = vpop.eup %8025  ;;  %v15139_v17 = vadd.f32 1.0, %v8024_v60  ;;  %8033 = vrcp.f32 %v15134_v42  ;;  %v5949_v28 = vand.u32 2147483648, %v15134_v42  ;;  %v5947_v19 = vand.u32 2147483647, %v15134_v42 }
 0x885   :  { %8035 = vrcp.f32 %v15136_v35  ;;  %v8028_v25 = vpop.eup %8027  ;;  %v15143_v16 = vadd.f32 1.0, %v8026_v38  ;;  %vm5943_vm2 = vweird.f32 %v15134_v42  ;;  %v5962_v52 = vand.u32 2147483647, %v15136_v35 }
 0x886   :  { %8037 = vpow2.f32 %v7011_v34  ;;  %v8030_v13 = vpop.eup %8029  ;;  %v15146_v48 = vadd.f32 1.0, %v8028_v25  ;;  %v5964_v41 = vand.u32 2147483648, %v15136_v35  ;;  %vm5958_vm6 = vweird.f32 %v15136_v35 }
 0x887   :  { %8039 = vrcp.f32 %v15139_v17  ;;  %v8032_v49 = vpop.eup %8031  ;;  %v15152_v3 = vadd.f32 1.0, %v8030_v13  ;;  %v5950_v34 = vor.u32 1.1754944e-38, %v5949_v28  ;;  %vm15207_vm5 = vcmp.eq.f32.partialorder %v5947_v19, 8.507059e+37 }
 0x888   :  { %8041 = vrcp.f32 %v15143_v16  ;;  %v15165_v45 = vadd.f32 1.0, %v8032_v49  ;;  %vm5973_vm10 = vweird.f32 %v15139_v17  ;;  %v5977_v49 = vand.u32 2147483647, %v15139_v17 }
 0x889   :  { %8043 = vrcp.f32 %v15146_v48  ;;  %v5979_v4 = vand.u32 2147483648, %v15139_v17  ;;  %v5994_v58 = vand.u32 2147483648, %v15143_v16  ;;  %vm15217_vm9 = vcmp.eq.f32.partialorder %v5962_v52, 8.507059e+37 }
 0x88a   :  { %v15148_v2 = vpop.eup %8033  ;;  %8045 = vrcp.f32 %v15152_v3  ;;  %v6009_v40 = vand.u32 2147483648, %v15146_v48  ;;  %vm5988_vm12 = vweird.f32 %v15143_v16  ;;  %vm15233_vm8 = vcmp.eq.f32.partialorder %v5977_v49, 8.507059e+37 }
 0x88b   :  { %v15150_v37 = vpop.eup %8035  ;;  %v5939_v47 = vmul.f32 %v15148_v2, %v15134_v42  ;;  %8047 = vrcp.f32 %v15165_v45  ;;  %vm5944_vm0 = vweird.f32 %v15148_v2  ;;  %v15237_v19 = vor.u32 1.1754944e-38, %v5994_v58 }
 0x88c   :  { %v8038_v59 = vpop.eup %8037  ;;  %v5954_v50 = vmul.f32 %v15150_v37, %v15136_v35  ;;  %8049 = vpow2.f32 %v7012_v51  ;;  %vm5959_vm13 = vweird.f32 %v15150_v37  ;;  %vm15246_vm15 = vmor %vm5943_vm2, %vm5944_vm0  ;;  %vm6003_vm14 = vweird.f32 %v15146_v48 }
 0x88d   :  { %v15163_v30 = vpop.eup %8039  ;;  %v15177_v14 = vadd.f32 1.0, %v8038_v59  ;;  %v5940_v27 = vsub.f32 1.0, %v5939_v47  ;;  %v5965_v59 = vor.u32 1.1754944e-38, %v5964_v41  ;;  %vm15262_vm1 = vmor %vm5958_vm6, %vm5959_vm13  ;;  %vm6018_vm3 = vweird.f32 %v15152_v3 }
 0x88e   :  { %v15175_v62 = vpop.eup %8041  ;;  %v5969_v9 = vmul.f32 %v15163_v30, %v15139_v17  ;;  %v5955_v36 = vsub.f32 1.0, %v5954_v50  ;;  %vm5974_vm11 = vweird.f32 %v15163_v30  ;;  %v6022_v35 = vand.u32 2147483647, %v15152_v3 }
 0x88f   :  { %v15187_v44 = vpop.eup %8043  ;;  %v5984_v8 = vmul.f32 %v15175_v62, %v15143_v16  ;;  %v5941_v57 = vmul.f32 %v15148_v2, %v5940_v27  ;;  %8051 = vrcp.f32 %v15177_v14  ;;  %vm5989_vm4 = vweird.f32 %v15175_v62  ;;  %vm15294_vm2 = vmor %vm5973_vm10, %vm5974_vm11 }
 0x890   :  { %v15199_v33 = vpop.eup %8045  ;;  %v5970_v60 = vsub.f32 1.0, %v5969_v9  ;;  %v5956_v38 = vmul.f32 %v15150_v37, %v5955_v36  ;;  %v5999_v25 = vmul.f32 %v15187_v44, %v15146_v48  ;;  %8053 = vpow2.f32 %v7013_v0 }
 0x891   :  { %v15215_v22 = vpop.eup %8047  ;;  %v5985_v47 = vsub.f32 1.0, %v5984_v8  ;;  %v6014_v50 = vmul.f32 %v15199_v33, %v15152_v3  ;;  %v5942_v54 = vadd.f32 %v15148_v2, %v5941_v57  ;;  %8055 = vpow2.f32 %v7014_v46 }
 0x892   :  { %v8050_v55 = vpop.eup %8049  ;;  %v5971_v63 = vmul.f32 %v15163_v30, %v5970_v60  ;;  %v5957_v51 = vadd.f32 %v15150_v37, %v5956_v38  ;;  %v5992_v0 = vand.u32 2147483647, %v15143_v16  ;;  %v6000_v27 = vsub.f32 1.0, %v5999_v25 }
 0x893   :  { %v5980_v36 = vor.u32 1.1754944e-38, %v5979_v4  ;;  %v6007_v46 = vand.u32 2147483647, %v15146_v48  ;;  %v6029_v52 = vmul.f32 %v15215_v22, %v15165_v45  ;;  %v5986_v57 = vmul.f32 %v15175_v62, %v5985_v47 }
 0x894   :  { %v15253_v60 = vor.u32 1.1754944e-38, %v6009_v40  ;;  %v6015_v38 = vsub.f32 1.0, %v6014_v50  ;;  %v5946_v25 = vsel %vm15246_vm15, %v15148_v2, %v5942_v54  ;;  %v5972_v49 = vadd.f32 %v15163_v30, %v5971_v63 }
 0x895   :  { %v15231_v9 = vpop.eup %8051  ;;  %8057 = vpow2.f32 %v15173_v10  ;;  %v15268_v4 = vadd.f32 1.0, %v8050_v55  ;;  %v5961_v58 = vsel %vm15262_vm1, %v15150_v37, %v5957_v51  ;;  %v6001_v2 = vmul.f32 %v15187_v44, %v6000_v27 }
 0x896   :  { %v8054_v41 = vpop.eup %8053  ;;  %v6044_v47 = vmul.f32 %v15231_v9, %v15177_v14  ;;  %vm15279_vm7 = vcmp.eq.f32.partialorder %v5992_v0, 8.507059e+37  ;;  %v6024_v50 = vand.u32 2147483648, %v15152_v3  ;;  %v6030_v55 = vsub.f32 1.0, %v6029_v52 }
 0x897   :  { %v8056_v40 = vpop.eup %8055  ;;  %v15284_v37 = vadd.f32 1.0, %v8054_v41  ;;  %v15288_v54 = vsel %vm15207_vm5, %v5950_v34, %v5946_v25  ;;  %v5987_v51 = vadd.f32 %v15175_v62, %v5986_v57  ;;  %vm6004_vm6 = vweird.f32 %v15187_v44 }
 0x898   :  { %vm15300_vm0 = vcmp.eq.f32.partialorder %v6007_v46, 8.507059e+37  ;;  %v6016_v13 = vmul.f32 %v15199_v33, %v6015_v38  ;;  %v15307_v34 = vsel %vm15217_vm9, %v5965_v59, %v5961_v58  ;;  %v5976_v17 = vsel %vm15294_vm2, %v15163_v30, %v5972_v49  ;;  %vm15327_vm9 = vmor %vm5988_vm12, %vm5989_vm4 }
 0x899   :  { %vm6033_vm5 = vweird.f32 %v15165_v45  ;;  %v6037_v27 = vand.u32 2147483647, %v15165_v45  ;;  %8059 = vrcp.f32 %v15268_v4  ;;  %v6002_v46 = vadd.f32 %v15187_v44, %v6001_v2  ;;  %vm15347_vm12 = vmor %vm6003_vm14, %vm6004_vm6 }
 0x89a   :  { %vm15316_vm10 = vcmp.eq.f32.partialorder %v6022_v35, 8.507059e+37  ;;  %v6045_v41 = vsub.f32 1.0, %v6044_v47  ;;  %8061 = vpow2.f32 %v15181_v61  ;;  %v15321_v39 = vadd.f32 1.0, %v8056_v40 }
 0x89b   :  { %v8058_v59 = vpop.eup %8057  ;;  %vm6019_vm13 = vweird.f32 %v15199_v33  ;;  %v6025_v8 = vor.u32 1.1754944e-38, %v6024_v50  ;;  %v6031_v57 = vmul.f32 %v15215_v22, %v6030_v55  ;;  %8063 = vrcp.f32 %v15284_v37 }
 0x89c   :  { %v15336_v61 = vsel %vm15233_vm8, %v5980_v36, %v5976_v17  ;;  %v5991_v38 = vsel %vm15327_vm9, %v15175_v62, %v5987_v51  ;;  %v6017_v16 = vadd.f32 %v15199_v33, %v6016_v13  ;;  %v6039_v25 = vand.u32 2147483648, %v15165_v45  ;;  %vm15371_vm11 = vmor %vm6018_vm3, %vm6019_vm13 }
 0x89d   :  { %vm15351_vm15 = vcmp.eq.f32.partialorder %v6037_v27, 8.507059e+37  ;;  %vm6048_vm8 = vweird.f32 %v15177_v14  ;;  %v6052_v62 = vand.u32 2147483647, %v15177_v14  ;;  %8065 = vpow2.f32 %v15185_v24 }
 0x89e   :  { %v6006_v36 = vsel %vm15347_vm12, %v15187_v44, %v6002_v46  ;;  %v6046_v48 = vmul.f32 %v15231_v9, %v6045_v41  ;;  %v15362_v49 = vadd.f32 1.0, %v8058_v59  ;;  %8067 = vrcp.f32 %v15321_v39 }
 0x89f   :  { %v15365_v58 = vpop.eup %8059  ;;  %v6032_v24 = vadd.f32 %v15215_v22, %v6031_v57  ;;  %vm6034_vm14 = vweird.f32 %v15215_v22  ;;  %v6054_v44 = vand.u32 2147483648, %v15177_v14  ;;  %8069 = vpow2.f32 %v15190_v5 }
 0x8a0   :  { %v8062_v35 = vpop.eup %8061  ;;  %v15382_v47 = vsel %vm15279_vm7, %v15237_v19, %v5991_v38  ;;  %v6021_v3 = vsel %vm15371_vm11, %v15199_v33, %v6017_v16  ;;  %v6040_v40 = vor.u32 1.1754944e-38, %v6039_v25  ;;  %8071 = vpow2.f32 %v15192_v32  ;;  %vm15403_vm3 = vmor %vm6033_vm5, %vm6034_vm14 }
 0x8a1   :  { %v15388_v50 = vpop.eup %8063  ;;  %v15393_v55 = vsel %vm15300_vm0, %v15253_v60, %v6006_v36  ;;  %vm15395_vm1 = vcmp.eq.f32.partialorder %v6052_v62, 8.507059e+37  ;;  %v6125_v19 = vand.u32 2147483648, %v15268_v4  ;;  %v6047_v32 = vadd.f32 %v15231_v9, %v6046_v48 }
 0x8a2   :  { %vm6049_vm4 = vweird.f32 %v15231_v9  ;;  %v6115_v60 = vmul.f32 %v15365_v58, %v15268_v4  ;;  %8073 = vrcp.f32 %v15362_v49  ;;  %v15414_v51 = vsel %vm15316_vm10, %v6025_v8, %v6021_v3 }
 0x8a3   :  { %v8066_v63 = vpop.eup %8065  ;;  %v6036_v45 = vsel %vm15403_vm3, %v15215_v22, %v6032_v24  ;;  %v6055_v0 = vor.u32 1.1754944e-38, %v6054_v44  ;;  %v15419_v13 = vadd.f32 1.0, %v8062_v35  ;;  %v6123_v27 = vand.u32 2147483647, %v15268_v4  ;;  %vm15430_vm7 = vmor %vm6048_vm8, %vm6049_vm4 }
 0x8a4   :  { %v15421_v17 = vpop.eup %8067  ;;  %v6130_v46 = vmul.f32 %v15388_v50, %v15284_v37  ;;  %v6140_v41 = vand.u32 2147483648, %v15284_v37  ;;  %v15434_v22 = vor.u32 1.1754944e-38, %v6125_v19  ;;  %v6155_v8 = vand.u32 2147483648, %v15321_v39 }
 0x8a5   :  { %v8070_v59 = vpop.eup %8069  ;;  %v15441_v25 = vsel %vm15351_vm15, %v6040_v40, %v6036_v45  ;;  %v6051_v14 = vsel %vm15430_vm7, %v15231_v9, %v6047_v32  ;;  %v15446_v42 = vadd.f32 1.0, %v8066_v63  ;;  %v6116_v62 = vsub.f32 1.0, %v6115_v60 }
 0x8a6   :  { %v8072_v16 = vpop.eup %8071  ;;  %17213 = vst [vmem:[#allocation17_spill] sm:$0xff] %v15441_v25  ;;  %v6138_v36 = vand.u32 2147483647, %v15284_v37  ;;  %v6145_v48 = vmul.f32 %v15421_v17, %v15321_v39  ;;  %8075 = vrcp.f32 %v15419_v13  ;;  %v15455_v28 = vadd.f32 1.0, %v8070_v59 }
 0x8a7   :  { %vm6119_vm2 = vweird.f32 %v15268_v4  ;;  %v6131_v44 = vsub.f32 1.0, %v6130_v46  ;;  %v15458_v9 = vor.u32 1.1754944e-38, %v6140_v41  ;;  %v6153_v35 = vand.u32 2147483647, %v15321_v39 }
 0x8a8   :  { %v15453_v24 = vpop.eup %8073  ;;  %v15463_v3 = vsel %vm15395_vm1, %v6055_v0, %v6051_v14  ;;  %v15465_v40 = vadd.f32 1.0, %v8072_v16  ;;  %vm6120_vm6 = vweird.f32 %v15365_v58  ;;  %v15468_v19 = vor.u32 1.1754944e-38, %v6155_v8 }
 0x8a9   :  { %17214 = vst [vmem:[#allocation16_spill] sm:$0xff] %v15463_v3  ;;  %v6117_v33 = vmul.f32 %v15365_v58, %v6116_v62  ;;  %vm6134_vm0 = vweird.f32 %v15284_v37  ;;  %v6168_v32 = vand.u32 2147483647, %v15362_v49  ;;  %v6170_v60 = vand.u32 2147483648, %v15362_v49  ;;  %vm15514_vm15 = vmor %vm6119_vm2, %vm6120_vm6 }
 0x8aa   :  { %8077 = vrcp.f32 %v15446_v42  ;;  %vm6135_vm5 = vweird.f32 %v15388_v50  ;;  %v6146_v5 = vsub.f32 1.0, %v6145_v48  ;;  %v6160_v63 = vmul.f32 %v15453_v24, %v15362_v49 }
 0x8ab   :  { %v6258_v45 = vrot.slane %v15111_v20, 3  ;;  %vm15479_vm10 = vcmp.eq.f32.partialorder %v6123_v27, 8.507059e+37  ;;  %v6132_v46 = vmul.f32 %v15388_v50, %v6131_v44  ;;  %8079 = vrcp.f32 %v15455_v28  ;;  %vm15537_vm1 = vmor %vm6134_vm0, %vm6135_vm5 }
 0x8ac   :  { %v6259_v41 = vrot.slane %v15113_v11, 3  ;;  %v6260_v59 = vrot.slane %v15115_v15, 3  ;;  %v15487_v30 = vpop.eup %8075  ;;  %vm6149_vm9 = vweird.f32 %v15321_v39  ;;  %vm6150_vm13 = vweird.f32 %v15421_v17 }
 0x8ad   :  { %8081 = vrcp.f32 %v15465_v40  ;;  %v6261_v27 = vrot.slane %v15119_v31, 3  ;;  %v6118_v16 = vadd.f32 %v15365_v58, %v6117_v33  ;;  %vm15495_vm12 = vcmp.eq.f32.partialorder %v6138_v36, 8.507059e+37  ;;  %vm15566_vm4 = vmor %vm6149_vm9, %vm6150_vm13 }
 0x8ae   :  { %v15499_v62 = vor.u32 1.1754944e-38, %v6170_v60  ;;  %v6185_v48 = vand.u32 2147483648, %v15419_v13  ;;  %v6262_v44 = vrot.slane %v15122_v18, 3  ;;  %v6147_v2 = vmul.f32 %v15421_v17, %v6146_v5 }
 0x8af   :  { %v6161_v38 = vsub.f32 1.0, %v6160_v63  ;;  %v7020_v52 = vmul.f32 -1.442695, %v6258_v45  ;;  %v6133_v33 = vadd.f32 %v15388_v50, %v6132_v46  ;;  %v6175_v36 = vmul.f32 %v15487_v30, %v15419_v13 }
 0x8b0   :  { %v15505_v8 = vpop.eup %8077  ;;  %v7021_v10 = vmul.f32 -1.442695, %v6259_v41  ;;  %v7022_v60 = vmul.f32 -1.442695, %v6260_v59  ;;  %vm6164_vm8 = vweird.f32 %v15362_v49  ;;  %vm6165_vm11 = vweird.f32 %v15453_v24 }
 0x8b1   :  { %v6263_v5 = vrot.slane %v15124_v12, 3  ;;  %8083 = vpow2.f32 %v7020_v52  ;;  %v7023_v63 = vmul.f32 -1.442695, %v6261_v27  ;;  %v15521_v45 = vpop.eup %8079  ;;  %v6122_v46 = vsel %vm15514_vm15, %v15365_v58, %v6118_v16  ;;  %vm15598_vm0 = vmor %vm6164_vm8, %vm6165_vm11 }
 0x8b2   :  { %vm15526_vm14 = vcmp.eq.f32.partialorder %v6153_v35, 8.507059e+37  ;;  %v6200_v41 = vand.u32 2147483648, %v15446_v42  ;;  %8085 = vpow2.f32 %v7021_v10  ;;  %v7024_v59 = vmul.f32 -1.442695, %v6262_v44 }
 0x8b3   :  { %v15531_v57 = vpop.eup %8081  ;;  %v6148_v58 = vadd.f32 %v15421_v17, %v6147_v2  ;;  %v6162_v35 = vmul.f32 %v15453_v24, %v6161_v38  ;;  %v6190_v3 = vmul.f32 %v15505_v8, %v15446_v42  ;;  %8087 = vpow2.f32 %v7022_v60 }
 0x8b4   :  { %v6137_v10 = vsel %vm15537_vm1, %v15388_v50, %v6133_v33  ;;  %v6176_v27 = vsub.f32 1.0, %v6175_v36  ;;  %v15548_v16 = vor.u32 1.1754944e-38, %v6185_v48  ;;  %v6264_v37 = vrot.slane %v15127_v26, 3 }
 0x8b5   :  { %v15554_v44 = vsel %vm15479_vm10, %v15434_v22, %v6122_v46  ;;  %vm15556_vm3 = vcmp.eq.f32.partialorder %v6168_v32, 8.507059e+37  ;;  %v6205_v2 = vmul.f32 %v15521_v45, %v15455_v28  ;;  %8089 = vpow2.f32 %v7023_v63 }
 0x8b6   :  { %v7025_v60 = vmul.f32 -1.442695, %v6263_v5  ;;  %vm6180_vm7 = vweird.f32 %v15487_v30  ;;  %v15571_v22 = vor.u32 1.1754944e-38, %v6200_v41  ;;  %v6220_v32 = vmul.f32 %v15531_v57, %v15465_v40 }
 0x8b7   :  { %8091 = vpow2.f32 %v7024_v59  ;;  %v8084_v0 = vpop.eup %8083  ;;  %v15578_v48 = vsel %vm15495_vm12, %v15458_v9, %v6137_v10  ;;  %v6152_v39 = vsel %vm15566_vm4, %v15421_v17, %v6148_v58  ;;  %v6163_v33 = vadd.f32 %v15453_v24, %v6162_v35 }
 0x8b8   :  { %v6191_v36 = vsub.f32 1.0, %v6190_v3  ;;  %v8086_v5 = vpop.eup %8085  ;;  %v6177_v63 = vmul.f32 %v15487_v30, %v6176_v27  ;;  %vm6179_vm2 = vweird.f32 %v15419_v13  ;;  %v17229_v46 = vrot.slane %v15111_v20, 2 }
 0x8b9   :  { %v7026_v41 = vmul.f32 -1.442695, %v6264_v37  ;;  %v15588_v59 = vadd.f32 1.0, %v8084_v0  ;;  %v8088_v9 = vpop.eup %8087  ;;  %vm6194_vm6 = vweird.f32 %v15446_v42  ;;  %v6206_v14 = vsub.f32 1.0, %v6205_v2  ;;  %vm15670_vm8 = vmor %vm6179_vm2, %vm6180_vm7 }
 0x8ba   :  { %8093 = vtanh.f32 %v17229_v46  ;;  %v6265_v17 = vrot.slane %v15131_v6, 3  ;;  %v15592_v52 = vadd.f32 1.0, %v8086_v5  ;;  %v6213_v20 = vand.u32 2147483647, %v15455_v28 }
 0x8bb   :  { %8095 = vpow2.f32 %v7025_v60  ;;  %v6221_v35 = vsub.f32 1.0, %v6220_v32  ;;  %v15603_v3 = vadd.f32 1.0, %v8088_v9  ;;  %v8090_v10 = vpop.eup %8089  ;;  %v15609_v27 = vsel %vm15526_vm14, %v15468_v19, %v6152_v39 }
 0x8bc   :  { %8097 = vrcp.f32 %v15588_v59  ;;  %v6167_v49 = vsel %vm15598_vm0, %v15453_v24, %v6163_v33  ;;  %v6192_v37 = vmul.f32 %v15505_v8, %v6191_v36  ;;  %vm6209_vm5 = vweird.f32 %v15455_v28 }
 0x8bd   :  { %8099 = vrcp.f32 %v15592_v52  ;;  %v8092_v2 = vpop.eup %8091  ;;  %v6178_v60 = vadd.f32 %v15487_v30, %v6177_v63  ;;  %vm6195_vm10 = vweird.f32 %v15505_v8  ;;  %v6215_v50 = vand.u32 2147483648, %v15455_v28 }
 0x8be   :  { %8101 = vpow2.f32 %v7026_v41  ;;  %v17232_v19 = vand.u32 2147483647, %v15419_v13  ;;  %v6207_v24 = vmul.f32 %v15521_v45, %v6206_v14  ;;  %vm6224_vm13 = vweird.f32 %v15465_v40  ;;  %vm15682_vm14 = vmor %vm6194_vm6, %vm6195_vm10 }
 0x8bf   :  { %v17235_v32 = vrot.slane %v15113_v11, 2  ;;  %v7027_v0 = vmul.f32 -1.442695, %v6265_v17  ;;  %v15635_v33 = vsel %vm15556_vm3, %v15499_v62, %v6167_v49  ;;  %v17236_v36 = vand.u32 2147483647, %v15446_v42 }
 0x8c0   :  { %vm15622_vm9 = vcmp.eq.f32.partialorder %v17232_v19, 8.507059e+37  ;;  %v15630_v39 = vpop.eup %8093  ;;  %v6222_v63 = vmul.f32 %v15531_v57, %v6221_v35  ;;  %v15644_v46 = vadd.f32 1.0, %v8090_v10  ;;  %v6193_v41 = vadd.f32 %v15505_v8, %v6192_v37 }
 0x8c1   :  { %8103 = vtanh.f32 %v17235_v32  ;;  %vm15639_vm12 = vcmp.eq.f32.partialorder %v17236_v36, 8.507059e+37  ;;  %v8096_v11 = vpop.eup %8095  ;;  %vm15648_vm15 = vcmp.eq.f32.partialorder %v6213_v20, 8.507059e+37  ;;  %v6228_v62 = vand.u32 2147483647, %v15465_v40 }
 0x8c2   :  { %8105 = vrcp.f32 %v15603_v3  ;;  %v17241_v38 = vrot.slane %v15115_v15, 2  ;;  %v15655_v14 = vadd.f32 1.0, %v8092_v2  ;;  %v15657_v17 = vpop.eup %8097  ;;  %v6230_v58 = vand.u32 2147483648, %v15465_v40 }
 0x8c3   :  { %v6239_v35 = vrot.slane %v15124_v12, 2  ;;  %v6240_v10 = vrot.slane %v15127_v26, 2  ;;  %v17242_v20 = vrot.slane %v15119_v31, 2  ;;  %v15664_v49 = vpop.eup %8099  ;;  %v6208_v37 = vadd.f32 %v15521_v45, %v6207_v24 }
 0x8c4   :  { %8107 = vtanh.f32 %v17241_v38  ;;  %vm6210_vm11 = vweird.f32 %v15521_v45  ;;  %v6307_v12 = vmul.f32 %v15657_v17, %v15588_v59  ;;  %v8102_v31 = vpop.eup %8101  ;;  %v6223_v13 = vadd.f32 %v15531_v57, %v6222_v63 }
 0x8c5   :  { %8109 = vtanh.f32 %v17242_v20  ;;  %vm6225_vm1 = vweird.f32 %v15531_v57  ;;  %v6322_v2 = vmul.f32 %v15664_v49, %v15592_v52  ;;  %v6182_v24 = vsel %vm15670_vm8, %v15487_v30, %v6178_v60  ;;  %vm15707_vm3 = vmor %vm6209_vm5, %vm6210_vm11 }
 0x8c6   :  { %8111 = vpow2.f32 %v7027_v0  ;;  %v6197_v42 = vsel %vm15682_vm14, %v15505_v8, %v6193_v41  ;;  %v6241_v32 = vrot.slane %v15131_v6, 2  ;;  %v17249_v30 = vrot.slane %v15122_v18, 2  ;;  %vm15724_vm4 = vmor %vm6224_vm13, %vm6225_vm1 }
 0x8c7   :  { %8113 = vrcp.f32 %v15644_v46  ;;  %v15691_v19 = vpop.eup %8103  ;;  %v15713_v60 = vadd.f32 1.0, %v8096_v11  ;;  %v6308_v8 = vsub.f32 1.0, %v6307_v12  ;;  %v6323_v63 = vsub.f32 1.0, %v6322_v2 }
 0x8c8   :  { %8115 = vrcp.f32 %v15655_v14  ;;  %v15701_v0 = vpop.eup %8105  ;;  %v6212_v41 = vsel %vm15707_vm3, %v15521_v45, %v6208_v37  ;;  %v6216_v38 = vor.u32 1.1754944e-38, %v6215_v50  ;;  %v15728_v18 = vadd.f32 1.0, %v8102_v31 }
 0x8c9   :  { %8117 = vtanh.f32 %v17249_v30  ;;  %v15735_v20 = vsel %vm15622_vm9, %v15548_v16, %v6182_v24  ;;  %v6227_v45 = vsel %vm15724_vm4, %v15531_v57, %v6223_v13  ;;  %vm6229_vm7 = vcmp.eq.f32.partialorder %v6228_v62, 8.507059e+37 }
 0x8ca   :  { %v15715_v6 = vpop.eup %8107  ;;  %8119 = vtanh.f32 %v6239_v35  ;;  %v15743_v50 = vsel %vm15639_vm12, %v15571_v22, %v6197_v42  ;;  %v6231_v35 = vor.u32 1.1754944e-38, %v6230_v58  ;;  %v6337_v15 = vmul.f32 %v15701_v0, %v15603_v3 }
 0x8cb   :  { %v15730_v11 = vpop.eup %8109  ;;  %8121 = vtanh.f32 %v6240_v10  ;;  %v15751_v16 = vsel %vm15648_vm15, %v6216_v38, %v6212_v41  ;;  %v6309_v57 = vmul.f32 %v15657_v17, %v6308_v8  ;;  %v6324_v62 = vmul.f32 %v15664_v49, %v6323_v63 }
 0x8cc   :  { %v8112_v40 = vpop.eup %8111  ;;  %8123 = vtanh.f32 %v6241_v32  ;;  %v15758_v22 = vsel %vm6229_vm7, %v6231_v35, %v6227_v45  ;;  %v6315_v58 = vand.u32 2147483647, %v15588_v59  ;;  %v6317_v10 = vand.u32 2147483648, %v15588_v59 }
 0x8cd   :  { %v15747_v4 = vpop.eup %8113  ;;  %8125 = vrcp.f32 %v15713_v60  ;;  %v15765_v9 = vadd.f32 1.0, %v8112_v40  ;;  %vm6311_vm2 = vweird.f32 %v15588_v59  ;;  %v6330_v12 = vand.u32 2147483647, %v15592_v52 }
 0x8ce   :  { %v15756_v5 = vpop.eup %8115  ;;  %8127 = vrcp.f32 %v15728_v18  ;;  %v6332_v31 = vand.u32 2147483648, %v15592_v52  ;;  %vm6312_vm6 = vweird.f32 %v15657_v17  ;;  %v6338_v13 = vsub.f32 1.0, %v6337_v15 }
 0x8cf   :  { %v15763_v37 = vpop.eup %8117  ;;  %v6347_v2 = vand.u32 2147483648, %v15603_v3  ;;  %v6352_v24 = vmul.f32 %v15747_v4, %v15644_v46  ;;  %v6310_v32 = vadd.f32 %v15657_v17, %v6309_v57  ;;  %v6325_v36 = vadd.f32 %v15664_v49, %v6324_v62  ;;  %vm15797_vm9 = vmor %vm6311_vm2, %vm6312_vm6 }
 0x8d0   :  { %v15770_v26 = vpop.eup %8119  ;;  %vm6327_vm0 = vweird.f32 %v15664_v49  ;;  %v6367_v30 = vmul.f32 %v15756_v5, %v15655_v14  ;;  %vm15785_vm5 = vcmp.eq.f32.partialorder %v6315_v58, 8.507059e+37  ;;  %v6318_v41 = vor.u32 1.1754944e-38, %v6317_v10 }
 0x8d1   :  { %17252 = vst [vmem:[#allocation14_spill] sm:$0xff] %v15770_v26  ;;  %v15776_v42 = vpop.eup %8121  ;;  %vm6326_vm10 = vweird.f32 %v15592_v52  ;;  %v6362_v38 = vand.u32 2147483648, %v15644_v46  ;;  %vm15801_vm13 = vcmp.eq.f32.partialorder %v6330_v12, 8.507059e+37  ;;  %v6333_v35 = vor.u32 1.1754944e-38, %v6332_v31 }
 0x8d2   :  { %17253 = vst [vmem:[#allocation15_spill] sm:$0xff] %v15776_v42  ;;  %v15783_v8 = vpop.eup %8123  ;;  %v6377_v15 = vand.u32 2147483648, %v15655_v14  ;;  %8129 = vrcp.f32 %v15765_v9  ;;  %vm15809_vm12 = vmor %vm6326_vm10, %vm6327_vm0  ;;  %v6339_v59 = vmul.f32 %v15701_v0, %v6338_v13  ;;  %vm6341_vm15 = vweird.f32 %v15603_v3 }
 0x8d3   :  { %17254 = vst [vmem:[#allocation21_spill] sm:$0xff] %v15783_v8  ;;  %v15791_v28 = vpop.eup %8125  ;;  %v6345_v62 = vand.u32 2147483647, %v15603_v3  ;;  %v6353_v58 = vsub.f32 1.0, %v6352_v24  ;;  %v6360_v10 = vand.u32 2147483647, %v15644_v46  ;;  %v6314_v12 = vsel %vm15797_vm9, %v15657_v17, %v6310_v32 }
 0x8d4   :  { %v15807_v52 = vpop.eup %8127  ;;  %v6329_v31 = vsel %vm15809_vm12, %v15664_v49, %v6325_v36  ;;  %v15823_v8 = vor.u32 1.1754944e-38, %v6347_v2  ;;  %v6368_v42 = vsub.f32 1.0, %v6367_v30  ;;  %v15825_v25 = vor.u32 1.1754944e-38, %v6362_v38 }
 0x8d5   :  { %v6375_v13 = vand.u32 2147483647, %v15655_v14  ;;  %v6382_v24 = vmul.f32 %v15791_v28, %v15713_v60  ;;  %v6397_v26 = vmul.f32 %v15807_v52, %v15728_v18  ;;  %vm6342_vm8 = vweird.f32 %v15701_v0 }
 0x8d6   :  { %v15833_v17 = vor.u32 1.1754944e-38, %v6377_v15  ;;  %v6390_v32 = vand.u32 2147483647, %v15713_v60  ;;  %v6392_v49 = vand.u32 2147483648, %v15713_v60  ;;  %v15839_v2 = vsel %vm15785_vm5, %v6318_v41, %v6314_v12  ;;  %vm15888_vm7 = vmor %vm6341_vm15, %vm6342_vm8 }
 0x8d7   :  { %v15843_v36 = vsel %vm15801_vm13, %v6333_v35, %v6329_v31  ;;  %v6340_v30 = vadd.f32 %v15701_v0, %v6339_v59  ;;  %v6354_v38 = vmul.f32 %v15747_v4, %v6353_v58  ;;  %vm6357_vm11 = vweird.f32 %v15747_v4 }
 0x8d8   :  { %v15847_v45 = vpop.eup %8129  ;;  %v6369_v15 = vmul.f32 %v15756_v5, %v6368_v42  ;;  %v6426_v57 = vmul.f32 %v15554_v44, %v14951_v29  ;;  %v6427_v63 = vmul.f32 %v15578_v48, %v14958_v21  ;;  %v6428_v41 = vmul.f32 %v15609_v27, %v14960_v56  ;;  %v17267_v3 = vld [vmem:[#allocation14_spill] sm:$0xff] }
 0x8d9   :  { %vm15857_vm14 = vcmp.eq.f32.partialorder %v6345_v62, 8.507059e+37  ;;  %vm6372_vm1 = vweird.f32 %v15756_v5  ;;  %v6383_v35 = vsub.f32 1.0, %v6382_v24  ;;  %v6398_v59 = vsub.f32 1.0, %v6397_v26 }
 0x8da   :  { %v6412_v42 = vmul.f32 %v15847_v45, %v15765_v9  ;;  %v6429_v29 = vmul.f32 %v15635_v33, %v14967_v23  ;;  %vm6356_vm3 = vweird.f32 %v15644_v46  ;;  %v6430_v21 = vmul.f32 %v15735_v20, %v14976_v1  ;;  %v17270_v20 = vld [vmem:[#allocation17_spill] sm:$0xff] }
 0x8db   :  { %v6434_v56 = vmul.f32 %v15630_v39, %v15288_v54  ;;  %v6435_v44 = vmul.f32 %v15691_v19, %v15307_v34  ;;  %v6436_v48 = vmul.f32 %v15715_v6, %v15336_v61  ;;  %vm6371_vm4 = vweird.f32 %v15655_v14  ;;  %vm15953_vm13 = vmor %vm6356_vm3, %vm6357_vm11 }
 0x8dc   :  { %v6431_v27 = vmul.f32 %v15743_v50, %v14990_v43  ;;  %v6432_v23 = vmul.f32 %v15751_v16, %v15001_v7  ;;  %v6437_v1 = vmul.f32 %v15730_v11, %v15382_v47  ;;  %v6438_v54 = vmul.f32 %v15763_v37, %v15393_v55  ;;  %v17271_v50 = vld [vmem:[#allocation15_spill] sm:$0xff]  ;;  %v17275_v37 = vld [vmem:[#allocation21_spill] sm:$0xff]  ;;  %vm15968_vm15 = vmor %vm6371_vm4, %vm6372_vm1 }
 0x8dd   :  { %vm6386_vm2 = vweird.f32 %v15713_v60  ;;  %v6413_v43 = vsub.f32 1.0, %v6412_v42  ;;  %v15893_v61 = vadd.f32 %v6434_v56, %v6426_v57  ;;  %v15895_v7 = vadd.f32 %v6435_v44, %v6427_v63 }
 0x8de   :  { %v15897_v39 = vadd.f32 %v6436_v48, %v6428_v41  ;;  %v6344_v47 = vsel %vm15888_vm7, %v15701_v0, %v6340_v30  ;;  %vm6401_vm6 = vweird.f32 %v15728_v18  ;;  %v6433_v55 = vmul.f32 %v15758_v22, %v15008_v53  ;;  %v17274_v22 = vld [vmem:[#allocation16_spill] sm:$0xff] }
 0x8df   :  { %v6439_v33 = vmul.f32 %v17267_v3, %v15414_v51  ;;  %v15907_v19 = vadd.f32 %v6437_v1, %v6429_v29  ;;  %vm15909_vm0 = vcmp.eq.f32.partialorder %v6360_v10, 8.507059e+37  ;;  %v6384_v11 = vmul.f32 %v15791_v28, %v6383_v35 }
 0x8e0   :  { %v6440_v16 = vmul.f32 %v17271_v50, %v17270_v20  ;;  %v15916_v0 = vadd.f32 %v6438_v54, %v6430_v21  ;;  %8131 = vtanh.f32 %v15893_v61  ;;  %vm15919_vm5 = vcmp.eq.f32.partialorder %v6375_v13, 8.507059e+37 }
 0x8e1   :  { %v6399_v51 = vmul.f32 %v15807_v52, %v6398_v59  ;;  %v6441_v26 = vmul.f32 %v17275_v37, %v17274_v22  ;;  %v15926_v62 = vadd.f32 %v6439_v33, %v6431_v27  ;;  %8133 = vtanh.f32 %v15895_v7 }
 0x8e2   :  { %v6355_v58 = vadd.f32 %v15747_v4, %v6354_v38  ;;  %vm15930_vm10 = vcmp.eq.f32.partialorder %v6390_v32, 8.507059e+37  ;;  %v6414_v12 = vmul.f32 %v15847_v45, %v6413_v43  ;;  %v15935_v31 = vadd.f32 %v6440_v16, %v6432_v23 }
 0x8e3   :  { %8135 = vtanh.f32 %v15897_v39  ;;  %v6370_v13 = vadd.f32 %v15756_v5, %v6369_v15  ;;  %vm6387_vm9 = vweird.f32 %v15791_v28  ;;  %v15940_v24 = vadd.f32 %v6441_v26, %v6433_v55 }
 0x8e4   :  { %8137 = vtanh.f32 %v15907_v19  ;;  %v6349_v32 = vsel %vm15857_vm14, %v15823_v8, %v6344_v47  ;;  %v6385_v30 = vadd.f32 %v15791_v28, %v6384_v11  ;;  %v6405_v38 = vand.u32 2147483647, %v15728_v18  ;;  %vm15982_vm11 = vmor %vm6386_vm2, %vm6387_vm9 }
 0x8e5   :  { %8139 = vtanh.f32 %v15916_v0  ;;  %v6400_v57 = vadd.f32 %v15807_v52, %v6399_v51  ;;  %vm6402_vm12 = vweird.f32 %v15807_v52  ;;  %v6407_v8 = vand.u32 2147483648, %v15728_v18 }
 0x8e6   :  { %8141 = vtanh.f32 %v15926_v62  ;;  %v8132_v63 = vpop.eup %8131  ;;  %v6359_v41 = vsel %vm15953_vm13, %v15747_v4, %v6355_v58  ;;  %v6415_v40 = vadd.f32 %v15847_v45, %v6414_v12  ;;  %vm6417_vm8 = vweird.f32 %v15847_v45  ;;  %vm15996_vm14 = vmor %vm6401_vm6, %vm6402_vm12 }
 0x8e7   :  { %8143 = vtanh.f32 %v15935_v31  ;;  %v8134_v35 = vpop.eup %8133  ;;  %v6374_v59 = vsel %vm15968_vm15, %v15756_v5, %v6370_v13  ;;  %v6422_v4 = vand.u32 2147483648, %v15765_v9  ;;  %v6458_v42 = vmul.f32 %v8132_v63, %v15839_v2 }
 0x8e8   :  { %8145 = vtanh.f32 %v15940_v24  ;;  %v6389_v21 = vsel %vm15982_vm11, %v15791_v28, %v6385_v30  ;;  %vm6416_vm1 = vweird.f32 %v15765_v9  ;;  %v6420_v56 = vand.u32 2147483647, %v15765_v9 }
 0x8e9   :  { %v8136_v29 = vpop.eup %8135  ;;  %v6459_v44 = vmul.f32 %v8134_v35, %v15843_v36  ;;  %v6364_v48 = vsel %vm15909_vm0, %v15825_v25, %v6359_v41  ;;  %v6393_v28 = vor.u32 1.1754944e-38, %v6392_v49  ;;  %v6404_v18 = vsel %vm15996_vm14, %v15807_v52, %v6400_v57  ;;  %vm16013_vm3 = vmor %vm6416_vm1, %vm6417_vm8  ;;  %6466 = vst [vmem:[#allocation3 + $0x7] sm:$0x1] %v6458_v42 }
 0x8ea   :  { %v8138_v2 = vpop.eup %8137  ;;  %v6460_v9 = vmul.f32 %v8136_v29, %v6349_v32  ;;  %v6379_v25 = vsel %vm15919_vm5, %v15833_v17, %v6374_v59  ;;  %v6408_v23 = vor.u32 1.1754944e-38, %v6407_v8  ;;  %v6419_v60 = vsel %vm16013_vm3, %v15847_v45, %v6415_v40  ;;  %6506 = vst [vmem:[#allocation1] ss:$9 sm:$0xff] %v6458_v42 }
 0x8eb   :  { %v8140_v36 = vpop.eup %8139  ;;  %v6461_v49 = vmul.f32 %v8138_v2, %v6364_v48  ;;  %6467 = vst [vmem:[#allocation3 + $0xf] sm:$0x1] %v6459_v44  ;;  %v6394_v1 = vsel %vm15930_vm10, %v6393_v28, %v6389_v21  ;;  %vm6406_vm4 = vcmp.eq.f32.partialorder %v6405_v38, 8.507059e+37  ;;  %v6423_v54 = vor.u32 1.1754944e-38, %v6422_v4 }
 0x8ec   :  { %v8142_v52 = vpop.eup %8141  ;;  %v6462_v34 = vmul.f32 %v8140_v36, %v6379_v25  ;;  %6468 = vst [vmem:[#allocation3 + $0x17] sm:$0x1] %v6460_v9  ;;  %v6409_v47 = vsel %vm6406_vm4, %v6408_v23, %v6404_v18  ;;  %vm6421_vm7 = vcmp.eq.f32.partialorder %v6420_v56, 8.507059e+37 }
 0x8ed   :  { %v8144_v43 = vpop.eup %8143  ;;  %v6463_v55 = vmul.f32 %v8142_v52, %v6394_v1  ;;  %6469 = vst [vmem:[#allocation3 + $0x1f] sm:$0x1] %v6461_v49  ;;  %v6424_v3 = vsel %vm6421_vm7, %v6423_v54, %v6419_v60 }
 0x8ee   :  { %v8146_v17 = vpop.eup %8145  ;;  %v6464_v33 = vmul.f32 %v8144_v43, %v6409_v47  ;;  %6470 = vst [vmem:[#allocation3 + $0x27] sm:$0x1] %v6462_v34 }
 0x8ef   :  { %v6465_v45 = vmul.f32 %v8146_v17, %v6424_v3  ;;  %6471 = vst [vmem:[#allocation3 + $0x2f] sm:$0x1] %v6463_v55 }
 0x8f0   :  { %6472 = vst [vmem:[#allocation3 + $0x37] sm:$0x1] %v6464_v33  ;;  %v6474_v6 = vld [vmem:[#allocation3] sm:$0xff] }
 0x8f1   :  { %6473 = vst [vmem:[#allocation3 + $0x3f] sm:$0x1] %v6465_v45 }
 0x8f2   :  { %v6475_v11 = vld [vmem:[#allocation3 + $0x8] sm:$0xff]  ;;  %6508 = vst [vmem:[#allocation1 + $0x1] ss:$9 sm:$0xff] %v6459_v44 }
 0x8f3   :  { %v6476_v20 = vld [vmem:[#allocation3 + $0x10] sm:$0xff]  ;;  %v7099_v50 = vpack.c.bf16 %v6475_v11, %v6474_v6  ;;  %6510 = vst [vmem:[#allocation1 + $0x2] ss:$9 sm:$0xff] %v6460_v9 }
 0x8f4   :  { %v6477_v16 = vld [vmem:[#allocation3 + $0x18] sm:$0xff]  ;;  %6512 = vst [vmem:[#allocation1 + $0x3] ss:$9 sm:$0xff] %v6461_v49 }
 0x8f5   :  { %v6478_v53 = vld [vmem:[#allocation3 + $0x20] sm:$0xff]  ;;  %7100 = vst [vmem:[%s16057_s6] sm:$0xff] %v7099_v50   ;;  %v7104_v51 = vpack.c.bf16 %v6477_v16, %v6476_v20 }
 0x8f6   :  { %v6479_v22 = vld [vmem:[#allocation3 + $0x28] sm:$0xff]  ;;  %6514 = vst [vmem:[#allocation1 + $0x4] ss:$9 sm:$0xff] %v6462_v34 }
 0x8f7   :  { %v6480_v37 = vld [vmem:[#allocation3 + $0x30] sm:$0xff]  ;;  %7116 = vst [vmem:[%s16057_s6 + $0x8] sm:$0xff] %v7104_v51   ;;  %v7109_v26 = vpack.c.bf16 %v6479_v22, %v6478_v53 }
 0x8f8   :  { %v6481_v58 = vld [vmem:[#allocation3 + $0x38] sm:$0xff]  ;;  %6516 = vst [vmem:[#allocation1 + $0x5] ss:$9 sm:$0xff] %v6463_v55 }
 0x8f9   :  { %7117 = vst [vmem:[%s16057_s6 + $0x10] sm:$0xff] %v7109_v26   ;;  %v7114_v10 = vpack.c.bf16 %v6481_v58, %v6480_v37 }
 0x8fa   :  { %6518 = vst [vmem:[#allocation1 + $0x6] ss:$9 sm:$0xff] %v6464_v33 }
 0x8fb   :  { %7118 = vst [vmem:[%s16057_s6 + $0x18] sm:$0xff] %v7114_v10  }
 0x8fc   :  { %6520 = vst [vmem:[#allocation1 + $0x7] ss:$9 sm:$0xff] %v6465_v45 }
 0x903   :  { %v6521_v12 = vld [vmem:[#allocation1] sm:$0xff] }
 0x904   :  { %6523 = vst [vmem:[%s16058_s7] sm:$0xff] %v6521_v12 }
 0x905   :  { %6532 = vst [vmem:[#allocation1] ss:$9 sm:$0xff] %v15893_v61 }
 0x906   :  { %6534 = vst [vmem:[#allocation1 + $0x1] ss:$9 sm:$0xff] %v15895_v7 }
 0x907   :  { %6536 = vst [vmem:[#allocation1 + $0x2] ss:$9 sm:$0xff] %v15897_v39 }
 0x908   :  { %6538 = vst [vmem:[#allocation1 + $0x3] ss:$9 sm:$0xff] %v15907_v19 }
 0x909   :  { %6540 = vst [vmem:[#allocation1 + $0x4] ss:$9 sm:$0xff] %v15916_v0 }
 0x90a   :  { %6542 = vst [vmem:[#allocation1 + $0x5] ss:$9 sm:$0xff] %v15926_v62 }
 0x90b   :  { %6544 = vst [vmem:[#allocation1 + $0x6] ss:$9 sm:$0xff] %v15935_v31 }
 0x90c   :  { %6546 = vst [vmem:[#allocation1 + $0x7] ss:$9 sm:$0xff] %v15940_v24 }
 0x913   :  { %v6547_v13 = vld [vmem:[#allocation1] sm:$0xff] }
 0x914   :  { %6549 = vst [vmem:[%s16059_s8] sm:$0xff] %v6547_v13 }
 0x915   :  { %6562 = vsyncpa [#allocation5], 1 }
 0x916   :  { %6563 = vsyncpa [#allocation7], 1 }

</bundles_post_ra>
